<compile_context>
chip_gen: v7x
topology: tpu7x:2x2x1
jax: 0.10.0
libtpu: 0.0.40
codegen_flags: <defaults>
</compile_context>

<pallas_src>
import jax
import jax.numpy as jnp
from jax.experimental import pallas as pl
from jax.experimental.pallas import tpu as pltpu


def _make_basic_block_kernel(H, W, Cin, Cout, has_downsample, compute_dtype):
    """Builds the fused kernel for one image: conv-bn-relu-conv-bn-(+res)-relu."""
    HW = H * W

    def kernel(x_ref, w1_ref, b1_ref, w2_ref, b2_ref, *rest):
        if has_downsample:
            wd_ref, bd_ref, out_ref, xpad_ref, hpad_ref = rest
        else:
            out_ref, xpad_ref, hpad_ref = rest

        def zero_halo(pad_ref, c):
            # Zero only the 1-px border strips (perimeter), never the full buffer.
            pad_ref[:, 0:1, :, :] = jnp.zeros((1, 1, W + 2, c), compute_dtype)
            pad_ref[:, H + 1:H + 2, :, :] = jnp.zeros((1, 1, W + 2, c), compute_dtype)
            pad_ref[:, :, 0:1, :] = jnp.zeros((1, H + 2, 1, c), compute_dtype)
            pad_ref[:, :, W + 1:W + 2, :] = jnp.zeros((1, H + 2, 1, c), compute_dtype)

        def conv3x3(pad_ref, w_ref, cin):
            # 3x3 stride-1 conv as 9 shifted (HW, cin) x (cin, Cout) MXU matmuls,
            # bf16 operands, f32 accumulation.
            acc = jnp.zeros((HW, Cout), jnp.float32)
            for dy in range(3):
                for dx in range(3):
                    patch = pad_ref[:, dy:dy + H, dx:dx + W, :]
                    acc = acc + jnp.dot(patch.reshape(HW, cin),
                                        w_ref[dy, dx],
                                        preferred_element_type=jnp.float32)
            return acc

        x = x_ref[...]                                    # (1, H, W, Cin) f32

        # ---- conv1 (BN scale pre-folded into w1) + bias + ReLU ----
        zero_halo(xpad_ref, Cin)
        xpad_ref[:, 1:H + 1, 1:W + 1, :] = x.astype(compute_dtype)
        h = conv3x3(xpad_ref, w1_ref, Cin) + b1_ref[...]  # (HW, Cout) f32
        h = jnp.maximum(h, 0.0)

        # ---- conv2 (BN scale pre-folded into w2) + bias ----
        zero_halo(hpad_ref, Cout)
        hpad_ref[:, 1:H + 1, 1:W + 1, :] = h.reshape(1, H, W, Cout).astype(compute_dtype)
        h2 = conv3x3(hpad_ref, w2_ref, Cout) + b2_ref[...]

        # ---- residual branch ----
        if has_downsample:
            # 1x1 conv (BN scale folded into wd) + bias.
            ident = jnp.dot(x.reshape(HW, Cin).astype(compute_dtype), wd_ref[...],
                            preferred_element_type=jnp.float32) + bd_ref[...]
        else:
            # nn.Identity(): no matmul at all, residual stays f32.
            ident = x.reshape(HW, Cout)

        out = jnp.maximum(h2 + ident, 0.0)
        out_ref[...] = out.reshape(1, H, W, Cout).astype(out_ref.dtype)

    return kernel


def _nbytes(shape, dtype):
    n = 1
    for s in shape:
        n *= int(s)
    return n * jnp.dtype(dtype).itemsize


def basic_block_forward(x_nchw, params, *, compute_dtype=jnp.bfloat16):
    """x_nchw: [N, C_in, H, W] (PyTorch convention). Returns [N, C_out, H, W]."""
    x = jnp.transpose(x_nchw, (0, 2, 3, 1)).astype(jnp.float32)   # -> NHWC
    N, H, W, Cin = x.shape
    Cout = params["w1"].shape[-1]
    has_downsample = "wd" in params

    # --- host-side BN fold: scale into weights, bias stays as a per-channel add ---
    w1 = (params["w1"] * params["s1"].reshape(1, 1, 1, Cout)).astype(compute_dtype)
    w2 = (params["w2"] * params["s2"].reshape(1, 1, 1, Cout)).astype(compute_dtype)
    b1 = params["b1"].reshape(1, Cout).astype(jnp.float32)
    b2 = params["b2"].reshape(1, Cout).astype(jnp.float32)

    ins = [x, w1, b1, w2, b2]
    in_specs = [
        pl.BlockSpec((1, H, W, Cin), lambda n: (n, 0, 0, 0)),       # per-image tile
        pl.BlockSpec((3, 3, Cin, Cout), lambda n: (0, 0, 0, 0)),    # weights: constant block
        pl.BlockSpec((1, Cout), lambda n: (0, 0)),
        pl.BlockSpec((3, 3, Cout, Cout), lambda n: (0, 0, 0, 0)),
        pl.BlockSpec((1, Cout), lambda n: (0, 0)),
    ]
    if has_downsample:
        wd = (params["wd"] * params["sd"].reshape(1, Cout)).astype(compute_dtype)
        bd = params["bd"].reshape(1, Cout).astype(jnp.float32)
        ins += [wd, bd]
        in_specs += [pl.BlockSpec((Cin, Cout), lambda n: (0, 0)),
                     pl.BlockSpec((1, Cout), lambda n: (0, 0))]

    scratch_shapes = [
        pltpu.VMEM((1, H + 2, W + 2, Cin), compute_dtype),    # padded input (bf16)
        pltpu.VMEM((1, H + 2, W + 2, Cout), compute_dtype),   # padded conv1 output (bf16)
    ]

    # Explicit VMEM budget: double-buffered per-image blocks + weights + scratches,
    # capped at 64 MiB (v7x physical VMEM per TensorCore).
    est = (2 * (_nbytes((1, H, W, Cin), jnp.float32)
                + _nbytes((1, H, W, Cout), jnp.float32))
           + _nbytes((3, 3, Cin, Cout), compute_dtype)
           + _nbytes((3, 3, Cout, Cout), compute_dtype)
           + _nbytes((Cin, Cout), compute_dtype)
           + 3 * _nbytes((1, Cout), jnp.float32)
           + _nbytes((1, H + 2, W + 2, Cin), compute_dtype)
           + _nbytes((1, H + 2, W + 2, Cout), compute_dtype))
    vmem_limit = int(min(max(2 * est, 32 * 1024 * 1024), 64 * 1024 * 1024))

    kernel = _make_basic_block_kernel(H, W, Cin, Cout, has_downsample, compute_dtype)

    out_nhwc = pl.pallas_call(
        kernel,
        out_shape=jax.ShapeDtypeStruct((N, H, W, Cout), jnp.float32),
        grid_spec=pltpu.PrefetchScalarGridSpec(
            num_scalar_prefetch=0,
            grid=(N,),
            in_specs=in_specs,
            out_specs=pl.BlockSpec((1, H, W, Cout), lambda n: (n, 0, 0, 0)),
            scratch_shapes=scratch_shapes),
        compiler_params=pltpu.CompilerParams(
            dimension_semantics=("parallel",),
            vmem_limit_bytes=vmem_limit),
    )(*ins)
    return jnp.transpose(out_nhwc, (0, 3, 1, 2))                   # -> NCHW


def make_params(key, cin, cout, dtype=jnp.float32, eps=1e-5):
    """Deterministic synthetic parameters (BN as per-channel scale/bias)."""
    ks = jax.random.split(key, 6)

    def bn(k, c):
        kg, kb, km, kv = jax.random.split(k, 4)
        gamma = jax.random.uniform(kg, (c,), dtype, 0.5, 1.5)
        beta = 0.1 * jax.random.normal(kb, (c,), dtype)
        mean = 0.1 * jax.random.normal(km, (c,), dtype)
        var = jax.random.uniform(kv, (c,), dtype, 0.5, 1.5)
        scale = gamma / jnp.sqrt(var + eps)
        bias = beta - mean * scale
        return scale.reshape(1, c), bias.reshape(1, c)

    w1 = 0.1 * jax.random.normal(ks[0], (3, 3, cin, cout), dtype)
    s1, b1 = bn(ks[1], cout)
    w2 = 0.1 * jax.random.normal(ks[2], (3, 3, cout, cout), dtype)
    s2, b2 = bn(ks[3], cout)
    p = dict(w1=w1, s1=s1, b1=b1, w2=w2, s2=s2, b2=b2)
    if cin != cout:  # downsample = conv1x1 + BN; otherwise nn.Identity() (no params)
        p["wd"] = 0.1 * jax.random.normal(ks[4], (cin, cout), dtype)
        p["sd"], p["bd"] = bn(ks[5], cout)
    return p


def reference_forward(x_nchw, params):
    """Pure-JAX f32 reference (same math) used only to sanity-check the kernel."""
    x = jnp.transpose(x_nchw, (0, 2, 3, 1)).astype(jnp.float32)

    def conv3(h, w):
        return jax.lax.conv_general_dilated(
            h, w, window_strides=(1, 1), padding=((1, 1), (1, 1)),
            dimension_numbers=("NHWC", "HWIO", "NHWC"))

    h = conv3(x, params["w1"]) * params["s1"] + params["b1"]
    h = jnp.maximum(h, 0.0)
    h = conv3(h, params["w2"]) * params["s2"] + params["b2"]
    if "wd" in params:
        ident = jnp.einsum("nhwc,co->nhwo", x, params["wd"]) * params["sd"] + params["bd"]
    else:
        ident = x
    out = jnp.maximum(h + ident, 0.0)
    return jnp.transpose(out, (0, 3, 1, 2))


if __name__ == "__main__":
    key = jax.random.PRNGKey(0)
    kx1, kp1, kx2, kp2 = jax.random.split(key, 4)

    N, H, W = 2, 16, 16

    # Case 1: Cin != Cout -> real downsample (conv1x1 + BN) residual branch.
    Cin, Cout = 4, 8
    x1 = jax.random.normal(kx1, (N, Cin, H, W), jnp.float32)
    p1 = make_params(kp1, Cin, Cout)
    out1 = jax.block_until_ready(basic_block_forward(x1, p1))
    assert out1.shape == (N, Cout, H, W), out1.shape
    ref1 = reference_forward(x1, p1)
    err1 = float(jnp.max(jnp.abs(out1 - ref1)))
    # bf16 MXU operands (f32 accumulation) vs pure-f32 reference -> loose tolerance.
    assert err1 < 5e-2, f"downsample-branch mismatch vs reference: {err1}"

    # Case 2: Cin == Cout -> nn.Identity() residual (no 1x1 matmul in-kernel).
    C = 8
    x2 = jax.random.normal(kx2, (N, C, H, W), jnp.float32)
    p2 = make_params(kp2, C, C)
    out2 = jax.block_until_ready(basic_block_forward(x2, p2))
    assert out2.shape == (N, C, H, W), out2.shape
    ref2 = reference_forward(x2, p2)
    err2 = float(jnp.max(jnp.abs(out2 - ref2)))
    assert err2 < 5e-2, f"identity-branch mismatch vs reference: {err2}"

    print("KERNEL_OK")
</pallas_src>

<mosaic_0001>
module attributes {stable_mosaic.version = 11 : i64} {
  func.func @kernel(%arg0: i32, %arg1: memref<1x16x16x4xf32, #tpu.memory_space<vmem>>, %arg2: memref<3x3x4x8xbf16, #tpu.memory_space<vmem>>, %arg3: memref<1x8xf32, #tpu.memory_space<vmem>>, %arg4: memref<3x3x8x8xbf16, #tpu.memory_space<vmem>>, %arg5: memref<1x8xf32, #tpu.memory_space<vmem>>, %arg6: memref<4x8xbf16, #tpu.memory_space<vmem>>, %arg7: memref<1x8xf32, #tpu.memory_space<vmem>>, %arg8: memref<1x16x16x8xf32, #tpu.memory_space<vmem>>, %arg9: memref<1x18x18x4xbf16, #tpu.memory_space<vmem>>, %arg10: memref<1x18x18x8xbf16, #tpu.memory_space<vmem>>) attributes {dimension_semantics = [#tpu.dimension_semantics<parallel>], iteration_bounds = array<i64: 2>, scalar_prefetch = 0 : i64, scratch_operands = 2 : i64, tpu.core_type = #tpu.core_type<tc>, window_params = [{transform_indices = @transform_0, window_bounds = array<i64: 1, 16, 16, 4>}, {pipeline_mode = #tpu.pipeline_mode<synchronous>, transform_indices = @transform_1, window_bounds = array<i64: 3, 3, 4, 8>}, {pipeline_mode = #tpu.pipeline_mode<synchronous>, transform_indices = @transform_2, window_bounds = array<i64: 1, 8>}, {pipeline_mode = #tpu.pipeline_mode<synchronous>, transform_indices = @transform_3, window_bounds = array<i64: 3, 3, 8, 8>}, {pipeline_mode = #tpu.pipeline_mode<synchronous>, transform_indices = @transform_4, window_bounds = array<i64: 1, 8>}, {pipeline_mode = #tpu.pipeline_mode<synchronous>, transform_indices = @transform_5, window_bounds = array<i64: 4, 8>}, {pipeline_mode = #tpu.pipeline_mode<synchronous>, transform_indices = @transform_6, window_bounds = array<i64: 1, 8>}, {transform_indices = @transform_7, window_bounds = array<i64: 1, 16, 16, 8>}]} {
    %c0 = arith.constant 0 : index
    %c0_0 = arith.constant 0 : index
    %c0_1 = arith.constant 0 : index
    %c0_2 = arith.constant 0 : index
    %0 = vector.load %arg1[%c0, %c0_0, %c0_1, %c0_2] : memref<1x16x16x4xf32, #tpu.memory_space<vmem>>, vector<1x16x16x4xf32>
    %cst = arith.constant 0.000000e+00 : bf16
    %1 = vector.broadcast %cst : bf16 to vector<1x1x18x4xbf16>
    %c0_3 = arith.constant 0 : index
    %c0_4 = arith.constant 0 : index
    %c0_5 = arith.constant 0 : index
    %c0_6 = arith.constant 0 : index
    %2 = vector.load %arg9[%c0_3, %c0_4, %c0_5, %c0_6] : memref<1x18x18x4xbf16, #tpu.memory_space<vmem>>, vector<1x1x18x4xbf16>
    tpu.vector_store %arg9[%c0_3, %c0_4, %c0_5, %c0_6], %1 {strides = array<i32>} : memref<1x18x18x4xbf16, #tpu.memory_space<vmem>>, vector<1x1x18x4xbf16>,
    %cst_7 = arith.constant 0.000000e+00 : bf16
    %3 = vector.broadcast %cst_7 : bf16 to vector<1x1x18x4xbf16>
    %c0_8 = arith.constant 0 : index
    %c17 = arith.constant 17 : index
    %c0_9 = arith.constant 0 : index
    %c0_10 = arith.constant 0 : index
    %4 = vector.load %arg9[%c0_8, %c17, %c0_9, %c0_10] : memref<1x18x18x4xbf16, #tpu.memory_space<vmem>>, vector<1x1x18x4xbf16>
    tpu.vector_store %arg9[%c0_8, %c17, %c0_9, %c0_10], %3 {strides = array<i32>} : memref<1x18x18x4xbf16, #tpu.memory_space<vmem>>, vector<1x1x18x4xbf16>,
    %cst_11 = arith.constant 0.000000e+00 : bf16
    %5 = vector.broadcast %cst_11 : bf16 to vector<1x18x1x4xbf16>
    %c0_12 = arith.constant 0 : index
    %c0_13 = arith.constant 0 : index
    %c0_14 = arith.constant 0 : index
    %c0_15 = arith.constant 0 : index
    %6 = vector.load %arg9[%c0_12, %c0_13, %c0_14, %c0_15] : memref<1x18x18x4xbf16, #tpu.memory_space<vmem>>, vector<1x18x1x4xbf16>
    tpu.vector_store %arg9[%c0_12, %c0_13, %c0_14, %c0_15], %5 {strides = array<i32>} : memref<1x18x18x4xbf16, #tpu.memory_space<vmem>>, vector<1x18x1x4xbf16>,
    %cst_16 = arith.constant 0.000000e+00 : bf16
    %7 = vector.broadcast %cst_16 : bf16 to vector<1x18x1x4xbf16>
    %c0_17 = arith.constant 0 : index
    %c0_18 = arith.constant 0 : index
    %c17_19 = arith.constant 17 : index
    %c0_20 = arith.constant 0 : index
    %8 = vector.load %arg9[%c0_17, %c0_18, %c17_19, %c0_20] : memref<1x18x18x4xbf16, #tpu.memory_space<vmem>>, vector<1x18x1x4xbf16>
    tpu.vector_store %arg9[%c0_17, %c0_18, %c17_19, %c0_20], %7 {strides = array<i32>} : memref<1x18x18x4xbf16, #tpu.memory_space<vmem>>, vector<1x18x1x4xbf16>,
    %9 = arith.truncf %0 : vector<1x16x16x4xf32> to vector<1x16x16x4xbf16>
    %c0_21 = arith.constant 0 : index
    %c1 = arith.constant 1 : index
    %c1_22 = arith.constant 1 : index
    %c0_23 = arith.constant 0 : index
    %10 = vector.load %arg9[%c0_21, %c1, %c1_22, %c0_23] : memref<1x18x18x4xbf16, #tpu.memory_space<vmem>>, vector<1x16x16x4xbf16>
    tpu.vector_store %arg9[%c0_21, %c1, %c1_22, %c0_23], %9 {strides = array<i32>} : memref<1x18x18x4xbf16, #tpu.memory_space<vmem>>, vector<1x16x16x4xbf16>,
    %cst_24 = arith.constant 0.000000e+00 : f32
    %11 = vector.broadcast %cst_24 : f32 to vector<256x8xf32>
    %c0_25 = arith.constant 0 : index
    %c0_26 = arith.constant 0 : index
    %c0_27 = arith.constant 0 : index
    %c0_28 = arith.constant 0 : index
    %12 = vector.load %arg9[%c0_25, %c0_26, %c0_27, %c0_28] : memref<1x18x18x4xbf16, #tpu.memory_space<vmem>>, vector<1x16x16x4xbf16>
    %13 = vector.shape_cast %12 : vector<1x16x16x4xbf16> to vector<256x4xbf16>
    %c0_29 = arith.constant 0 : index
    %c0_30 = arith.constant 0 : index
    %c0_31 = arith.constant 0 : index
    %c0_32 = arith.constant 0 : index
    %14 = vector.load %arg2[%c0_29, %c0_30, %c0_31, %c0_32] : memref<3x3x4x8xbf16, #tpu.memory_space<vmem>>, vector<1x1x4x8xbf16>
    %15 = vector.shape_cast %14 : vector<1x1x4x8xbf16> to vector<4x8xbf16>
    %cst_33 = arith.constant dense<0.000000e+00> : vector<256x8xf32>
    %16 = tpu.matmul %13, %15, %cst_33 {dimension_numbers = #tpu.dot_dimension_numbers<[1], [0], [0], [1], [0, 0, 1, 1], [], []>} : vector<256x4xbf16>, vector<4x8xbf16>, vector<256x8xf32> -> vector<256x8xf32>
    %17 = arith.addf %11, %16 : vector<256x8xf32>
    %c0_34 = arith.constant 0 : index
    %c0_35 = arith.constant 0 : index
    %c1_36 = arith.constant 1 : index
    %c0_37 = arith.constant 0 : index
    %18 = vector.load %arg9[%c0_34, %c0_35, %c1_36, %c0_37] : memref<1x18x18x4xbf16, #tpu.memory_space<vmem>>, vector<1x16x16x4xbf16>
    %19 = vector.shape_cast %18 : vector<1x16x16x4xbf16> to vector<256x4xbf16>
    %c0_38 = arith.constant 0 : index
    %c1_39 = arith.constant 1 : index
    %c0_40 = arith.constant 0 : index
    %c0_41 = arith.constant 0 : index
    %20 = vector.load %arg2[%c0_38, %c1_39, %c0_40, %c0_41] : memref<3x3x4x8xbf16, #tpu.memory_space<vmem>>, vector<1x1x4x8xbf16>
    %21 = vector.shape_cast %20 : vector<1x1x4x8xbf16> to vector<4x8xbf16>
    %cst_42 = arith.constant dense<0.000000e+00> : vector<256x8xf32>
    %22 = tpu.matmul %19, %21, %cst_42 {dimension_numbers = #tpu.dot_dimension_numbers<[1], [0], [0], [1], [0, 0, 1, 1], [], []>} : vector<256x4xbf16>, vector<4x8xbf16>, vector<256x8xf32> -> vector<256x8xf32>
    %23 = arith.addf %17, %22 : vector<256x8xf32>
    %c0_43 = arith.constant 0 : index
    %c0_44 = arith.constant 0 : index
    %c2 = arith.constant 2 : index
    %c0_45 = arith.constant 0 : index
    %24 = vector.load %arg9[%c0_43, %c0_44, %c2, %c0_45] : memref<1x18x18x4xbf16, #tpu.memory_space<vmem>>, vector<1x16x16x4xbf16>
    %25 = vector.shape_cast %24 : vector<1x16x16x4xbf16> to vector<256x4xbf16>
    %c0_46 = arith.constant 0 : index
    %c2_47 = arith.constant 2 : index
    %c0_48 = arith.constant 0 : index
    %c0_49 = arith.constant 0 : index
    %26 = vector.load %arg2[%c0_46, %c2_47, %c0_48, %c0_49] : memref<3x3x4x8xbf16, #tpu.memory_space<vmem>>, vector<1x1x4x8xbf16>
    %27 = vector.shape_cast %26 : vector<1x1x4x8xbf16> to vector<4x8xbf16>
    %cst_50 = arith.constant dense<0.000000e+00> : vector<256x8xf32>
    %28 = tpu.matmul %25, %27, %cst_50 {dimension_numbers = #tpu.dot_dimension_numbers<[1], [0], [0], [1], [0, 0, 1, 1], [], []>} : vector<256x4xbf16>, vector<4x8xbf16>, vector<256x8xf32> -> vector<256x8xf32>
    %29 = arith.addf %23, %28 : vector<256x8xf32>
    %c0_51 = arith.constant 0 : index
    %c1_52 = arith.constant 1 : index
    %c0_53 = arith.constant 0 : index
    %c0_54 = arith.constant 0 : index
    %30 = vector.load %arg9[%c0_51, %c1_52, %c0_53, %c0_54] : memref<1x18x18x4xbf16, #tpu.memory_space<vmem>>, vector<1x16x16x4xbf16>
    %31 = vector.shape_cast %30 : vector<1x16x16x4xbf16> to vector<256x4xbf16>
    %c1_55 = arith.constant 1 : index
    %c0_56 = arith.constant 0 : index
    %c0_57 = arith.constant 0 : index
    %c0_58 = arith.constant 0 : index
    %32 = vector.load %arg2[%c1_55, %c0_56, %c0_57, %c0_58] : memref<3x3x4x8xbf16, #tpu.memory_space<vmem>>, vector<1x1x4x8xbf16>
    %33 = vector.shape_cast %32 : vector<1x1x4x8xbf16> to vector<4x8xbf16>
    %cst_59 = arith.constant dense<0.000000e+00> : vector<256x8xf32>
    %34 = tpu.matmul %31, %33, %cst_59 {dimension_numbers = #tpu.dot_dimension_numbers<[1], [0], [0], [1], [0, 0, 1, 1], [], []>} : vector<256x4xbf16>, vector<4x8xbf16>, vector<256x8xf32> -> vector<256x8xf32>
    %35 = arith.addf %29, %34 : vector<256x8xf32>
    %c0_60 = arith.constant 0 : index
    %c1_61 = arith.constant 1 : index
    %c1_62 = arith.constant 1 : index
    %c0_63 = arith.constant 0 : index
    %36 = vector.load %arg9[%c0_60, %c1_61, %c1_62, %c0_63] : memref<1x18x18x4xbf16, #tpu.memory_space<vmem>>, vector<1x16x16x4xbf16>
    %37 = vector.shape_cast %36 : vector<1x16x16x4xbf16> to vector<256x4xbf16>
    %c1_64 = arith.constant 1 : index
    %c1_65 = arith.constant 1 : index
    %c0_66 = arith.constant 0 : index
    %c0_67 = arith.constant 0 : index
    %38 = vector.load %arg2[%c1_64, %c1_65, %c0_66, %c0_67] : memref<3x3x4x8xbf16, #tpu.memory_space<vmem>>, vector<1x1x4x8xbf16>
    %39 = vector.shape_cast %38 : vector<1x1x4x8xbf16> to vector<4x8xbf16>
    %cst_68 = arith.constant dense<0.000000e+00> : vector<256x8xf32>
    %40 = tpu.matmul %37, %39, %cst_68 {dimension_numbers = #tpu.dot_dimension_numbers<[1], [0], [0], [1], [0, 0, 1, 1], [], []>} : vector<256x4xbf16>, vector<4x8xbf16>, vector<256x8xf32> -> vector<256x8xf32>
    %41 = arith.addf %35, %40 : vector<256x8xf32>
    %c0_69 = arith.constant 0 : index
    %c1_70 = arith.constant 1 : index
    %c2_71 = arith.constant 2 : index
    %c0_72 = arith.constant 0 : index
    %42 = vector.load %arg9[%c0_69, %c1_70, %c2_71, %c0_72] : memref<1x18x18x4xbf16, #tpu.memory_space<vmem>>, vector<1x16x16x4xbf16>
    %43 = vector.shape_cast %42 : vector<1x16x16x4xbf16> to vector<256x4xbf16>
    %c1_73 = arith.constant 1 : index
    %c2_74 = arith.constant 2 : index
    %c0_75 = arith.constant 0 : index
    %c0_76 = arith.constant 0 : index
    %44 = vector.load %arg2[%c1_73, %c2_74, %c0_75, %c0_76] : memref<3x3x4x8xbf16, #tpu.memory_space<vmem>>, vector<1x1x4x8xbf16>
    %45 = vector.shape_cast %44 : vector<1x1x4x8xbf16> to vector<4x8xbf16>
    %cst_77 = arith.constant dense<0.000000e+00> : vector<256x8xf32>
    %46 = tpu.matmul %43, %45, %cst_77 {dimension_numbers = #tpu.dot_dimension_numbers<[1], [0], [0], [1], [0, 0, 1, 1], [], []>} : vector<256x4xbf16>, vector<4x8xbf16>, vector<256x8xf32> -> vector<256x8xf32>
    %47 = arith.addf %41, %46 : vector<256x8xf32>
    %c0_78 = arith.constant 0 : index
    %c2_79 = arith.constant 2 : index
    %c0_80 = arith.constant 0 : index
    %c0_81 = arith.constant 0 : index
    %48 = vector.load %arg9[%c0_78, %c2_79, %c0_80, %c0_81] : memref<1x18x18x4xbf16, #tpu.memory_space<vmem>>, vector<1x16x16x4xbf16>
    %49 = vector.shape_cast %48 : vector<1x16x16x4xbf16> to vector<256x4xbf16>
    %c2_82 = arith.constant 2 : index
    %c0_83 = arith.constant 0 : index
    %c0_84 = arith.constant 0 : index
    %c0_85 = arith.constant 0 : index
    %50 = vector.load %arg2[%c2_82, %c0_83, %c0_84, %c0_85] : memref<3x3x4x8xbf16, #tpu.memory_space<vmem>>, vector<1x1x4x8xbf16>
    %51 = vector.shape_cast %50 : vector<1x1x4x8xbf16> to vector<4x8xbf16>
    %cst_86 = arith.constant dense<0.000000e+00> : vector<256x8xf32>
    %52 = tpu.matmul %49, %51, %cst_86 {dimension_numbers = #tpu.dot_dimension_numbers<[1], [0], [0], [1], [0, 0, 1, 1], [], []>} : vector<256x4xbf16>, vector<4x8xbf16>, vector<256x8xf32> -> vector<256x8xf32>
    %53 = arith.addf %47, %52 : vector<256x8xf32>
    %c0_87 = arith.constant 0 : index
    %c2_88 = arith.constant 2 : index
    %c1_89 = arith.constant 1 : index
    %c0_90 = arith.constant 0 : index
    %54 = vector.load %arg9[%c0_87, %c2_88, %c1_89, %c0_90] : memref<1x18x18x4xbf16, #tpu.memory_space<vmem>>, vector<1x16x16x4xbf16>
    %55 = vector.shape_cast %54 : vector<1x16x16x4xbf16> to vector<256x4xbf16>
    %c2_91 = arith.constant 2 : index
    %c1_92 = arith.constant 1 : index
    %c0_93 = arith.constant 0 : index
    %c0_94 = arith.constant 0 : index
    %56 = vector.load %arg2[%c2_91, %c1_92, %c0_93, %c0_94] : memref<3x3x4x8xbf16, #tpu.memory_space<vmem>>, vector<1x1x4x8xbf16>
    %57 = vector.shape_cast %56 : vector<1x1x4x8xbf16> to vector<4x8xbf16>
    %cst_95 = arith.constant dense<0.000000e+00> : vector<256x8xf32>
    %58 = tpu.matmul %55, %57, %cst_95 {dimension_numbers = #tpu.dot_dimension_numbers<[1], [0], [0], [1], [0, 0, 1, 1], [], []>} : vector<256x4xbf16>, vector<4x8xbf16>, vector<256x8xf32> -> vector<256x8xf32>
    %59 = arith.addf %53, %58 : vector<256x8xf32>
    %c0_96 = arith.constant 0 : index
    %c2_97 = arith.constant 2 : index
    %c2_98 = arith.constant 2 : index
    %c0_99 = arith.constant 0 : index
    %60 = vector.load %arg9[%c0_96, %c2_97, %c2_98, %c0_99] : memref<1x18x18x4xbf16, #tpu.memory_space<vmem>>, vector<1x16x16x4xbf16>
    %61 = vector.shape_cast %60 : vector<1x16x16x4xbf16> to vector<256x4xbf16>
    %c2_100 = arith.constant 2 : index
    %c2_101 = arith.constant 2 : index
    %c0_102 = arith.constant 0 : index
    %c0_103 = arith.constant 0 : index
    %62 = vector.load %arg2[%c2_100, %c2_101, %c0_102, %c0_103] : memref<3x3x4x8xbf16, #tpu.memory_space<vmem>>, vector<1x1x4x8xbf16>
    %63 = vector.shape_cast %62 : vector<1x1x4x8xbf16> to vector<4x8xbf16>
    %cst_104 = arith.constant dense<0.000000e+00> : vector<256x8xf32>
    %64 = tpu.matmul %61, %63, %cst_104 {dimension_numbers = #tpu.dot_dimension_numbers<[1], [0], [0], [1], [0, 0, 1, 1], [], []>} : vector<256x4xbf16>, vector<4x8xbf16>, vector<256x8xf32> -> vector<256x8xf32>
    %65 = arith.addf %59, %64 : vector<256x8xf32>
    %c0_105 = arith.constant 0 : index
    %c0_106 = arith.constant 0 : index
    %66 = vector.load %arg3[%c0_105, %c0_106] : memref<1x8xf32, #tpu.memory_space<vmem>>, vector<1x8xf32>
    %67 = vector.broadcast %66 : vector<1x8xf32> to vector<256x8xf32>
    %68 = arith.addf %65, %67 : vector<256x8xf32>
    %cst_107 = arith.constant 0.000000e+00 : f32
    %69 = vector.broadcast %cst_107 : f32 to vector<256x8xf32>
    %70 = arith.maximumf %68, %69 : vector<256x8xf32>
    %cst_108 = arith.constant 0.000000e+00 : bf16
    %71 = vector.broadcast %cst_108 : bf16 to vector<1x1x18x8xbf16>
    %c0_109 = arith.constant 0 : index
    %c0_110 = arith.constant 0 : index
    %c0_111 = arith.constant 0 : index
    %c0_112 = arith.constant 0 : index
    %72 = vector.load %arg10[%c0_109, %c0_110, %c0_111, %c0_112] : memref<1x18x18x8xbf16, #tpu.memory_space<vmem>>, vector<1x1x18x8xbf16>
    tpu.vector_store %arg10[%c0_109, %c0_110, %c0_111, %c0_112], %71 {strides = array<i32>} : memref<1x18x18x8xbf16, #tpu.memory_space<vmem>>, vector<1x1x18x8xbf16>,
    %cst_113 = arith.constant 0.000000e+00 : bf16
    %73 = vector.broadcast %cst_113 : bf16 to vector<1x1x18x8xbf16>
    %c0_114 = arith.constant 0 : index
    %c17_115 = arith.constant 17 : index
    %c0_116 = arith.constant 0 : index
    %c0_117 = arith.constant 0 : index
    %74 = vector.load %arg10[%c0_114, %c17_115, %c0_116, %c0_117] : memref<1x18x18x8xbf16, #tpu.memory_space<vmem>>, vector<1x1x18x8xbf16>
    tpu.vector_store %arg10[%c0_114, %c17_115, %c0_116, %c0_117], %73 {strides = array<i32>} : memref<1x18x18x8xbf16, #tpu.memory_space<vmem>>, vector<1x1x18x8xbf16>,
    %cst_118 = arith.constant 0.000000e+00 : bf16
    %75 = vector.broadcast %cst_118 : bf16 to vector<1x18x1x8xbf16>
    %c0_119 = arith.constant 0 : index
    %c0_120 = arith.constant 0 : index
    %c0_121 = arith.constant 0 : index
    %c0_122 = arith.constant 0 : index
    %76 = vector.load %arg10[%c0_119, %c0_120, %c0_121, %c0_122] : memref<1x18x18x8xbf16, #tpu.memory_space<vmem>>, vector<1x18x1x8xbf16>
    tpu.vector_store %arg10[%c0_119, %c0_120, %c0_121, %c0_122], %75 {strides = array<i32>} : memref<1x18x18x8xbf16, #tpu.memory_space<vmem>>, vector<1x18x1x8xbf16>,
    %cst_123 = arith.constant 0.000000e+00 : bf16
    %77 = vector.broadcast %cst_123 : bf16 to vector<1x18x1x8xbf16>
    %c0_124 = arith.constant 0 : index
    %c0_125 = arith.constant 0 : index
    %c17_126 = arith.constant 17 : index
    %c0_127 = arith.constant 0 : index
    %78 = vector.load %arg10[%c0_124, %c0_125, %c17_126, %c0_127] : memref<1x18x18x8xbf16, #tpu.memory_space<vmem>>, vector<1x18x1x8xbf16>
    tpu.vector_store %arg10[%c0_124, %c0_125, %c17_126, %c0_127], %77 {strides = array<i32>} : memref<1x18x18x8xbf16, #tpu.memory_space<vmem>>, vector<1x18x1x8xbf16>,
    %79 = vector.shape_cast %70 : vector<256x8xf32> to vector<1x16x16x8xf32>
    %80 = arith.truncf %79 : vector<1x16x16x8xf32> to vector<1x16x16x8xbf16>
    %c0_128 = arith.constant 0 : index
    %c1_129 = arith.constant 1 : index
    %c1_130 = arith.constant 1 : index
    %c0_131 = arith.constant 0 : index
    %81 = vector.load %arg10[%c0_128, %c1_129, %c1_130, %c0_131] : memref<1x18x18x8xbf16, #tpu.memory_space<vmem>>, vector<1x16x16x8xbf16>
    tpu.vector_store %arg10[%c0_128, %c1_129, %c1_130, %c0_131], %80 {strides = array<i32>} : memref<1x18x18x8xbf16, #tpu.memory_space<vmem>>, vector<1x16x16x8xbf16>,
    %cst_132 = arith.constant 0.000000e+00 : f32
    %82 = vector.broadcast %cst_132 : f32 to vector<256x8xf32>
    %c0_133 = arith.constant 0 : index
    %c0_134 = arith.constant 0 : index
    %c0_135 = arith.constant 0 : index
    %c0_136 = arith.constant 0 : index
    %83 = vector.load %arg10[%c0_133, %c0_134, %c0_135, %c0_136] : memref<1x18x18x8xbf16, #tpu.memory_space<vmem>>, vector<1x16x16x8xbf16>
    %84 = vector.shape_cast %83 : vector<1x16x16x8xbf16> to vector<256x8xbf16>
    %c0_137 = arith.constant 0 : index
    %c0_138 = arith.constant 0 : index
    %c0_139 = arith.constant 0 : index
    %c0_140 = arith.constant 0 : index
    %85 = vector.load %arg4[%c0_137, %c0_138, %c0_139, %c0_140] : memref<3x3x8x8xbf16, #tpu.memory_space<vmem>>, vector<1x1x8x8xbf16>
    %86 = vector.shape_cast %85 : vector<1x1x8x8xbf16> to vector<8x8xbf16>
    %cst_141 = arith.constant dense<0.000000e+00> : vector<256x8xf32>
    %87 = tpu.matmul %84, %86, %cst_141 {dimension_numbers = #tpu.dot_dimension_numbers<[1], [0], [0], [1], [0, 0, 1, 1], [], []>} : vector<256x8xbf16>, vector<8x8xbf16>, vector<256x8xf32> -> vector<256x8xf32>
    %88 = arith.addf %82, %87 : vector<256x8xf32>
    %c0_142 = arith.constant 0 : index
    %c0_143 = arith.constant 0 : index
    %c1_144 = arith.constant 1 : index
    %c0_145 = arith.constant 0 : index
    %89 = vector.load %arg10[%c0_142, %c0_143, %c1_144, %c0_145] : memref<1x18x18x8xbf16, #tpu.memory_space<vmem>>, vector<1x16x16x8xbf16>
    %90 = vector.shape_cast %89 : vector<1x16x16x8xbf16> to vector<256x8xbf16>
    %c0_146 = arith.constant 0 : index
    %c1_147 = arith.constant 1 : index
    %c0_148 = arith.constant 0 : index
    %c0_149 = arith.constant 0 : index
    %91 = vector.load %arg4[%c0_146, %c1_147, %c0_148, %c0_149] : memref<3x3x8x8xbf16, #tpu.memory_space<vmem>>, vector<1x1x8x8xbf16>
    %92 = vector.shape_cast %91 : vector<1x1x8x8xbf16> to vector<8x8xbf16>
    %cst_150 = arith.constant dense<0.000000e+00> : vector<256x8xf32>
    %93 = tpu.matmul %90, %92, %cst_150 {dimension_numbers = #tpu.dot_dimension_numbers<[1], [0], [0], [1], [0, 0, 1, 1], [], []>} : vector<256x8xbf16>, vector<8x8xbf16>, vector<256x8xf32> -> vector<256x8xf32>
    %94 = arith.addf %88, %93 : vector<256x8xf32>
    %c0_151 = arith.constant 0 : index
    %c0_152 = arith.constant 0 : index
    %c2_153 = arith.constant 2 : index
    %c0_154 = arith.constant 0 : index
    %95 = vector.load %arg10[%c0_151, %c0_152, %c2_153, %c0_154] : memref<1x18x18x8xbf16, #tpu.memory_space<vmem>>, vector<1x16x16x8xbf16>
    %96 = vector.shape_cast %95 : vector<1x16x16x8xbf16> to vector<256x8xbf16>
    %c0_155 = arith.constant 0 : index
    %c2_156 = arith.constant 2 : index
    %c0_157 = arith.constant 0 : index
    %c0_158 = arith.constant 0 : index
    %97 = vector.load %arg4[%c0_155, %c2_156, %c0_157, %c0_158] : memref<3x3x8x8xbf16, #tpu.memory_space<vmem>>, vector<1x1x8x8xbf16>
    %98 = vector.shape_cast %97 : vector<1x1x8x8xbf16> to vector<8x8xbf16>
    %cst_159 = arith.constant dense<0.000000e+00> : vector<256x8xf32>
    %99 = tpu.matmul %96, %98, %cst_159 {dimension_numbers = #tpu.dot_dimension_numbers<[1], [0], [0], [1], [0, 0, 1, 1], [], []>} : vector<256x8xbf16>, vector<8x8xbf16>, vector<256x8xf32> -> vector<256x8xf32>
    %100 = arith.addf %94, %99 : vector<256x8xf32>
    %c0_160 = arith.constant 0 : index
    %c1_161 = arith.constant 1 : index
    %c0_162 = arith.constant 0 : index
    %c0_163 = arith.constant 0 : index
    %101 = vector.load %arg10[%c0_160, %c1_161, %c0_162, %c0_163] : memref<1x18x18x8xbf16, #tpu.memory_space<vmem>>, vector<1x16x16x8xbf16>
    %102 = vector.shape_cast %101 : vector<1x16x16x8xbf16> to vector<256x8xbf16>
    %c1_164 = arith.constant 1 : index
    %c0_165 = arith.constant 0 : index
    %c0_166 = arith.constant 0 : index
    %c0_167 = arith.constant 0 : index
    %103 = vector.load %arg4[%c1_164, %c0_165, %c0_166, %c0_167] : memref<3x3x8x8xbf16, #tpu.memory_space<vmem>>, vector<1x1x8x8xbf16>
    %104 = vector.shape_cast %103 : vector<1x1x8x8xbf16> to vector<8x8xbf16>
    %cst_168 = arith.constant dense<0.000000e+00> : vector<256x8xf32>
    %105 = tpu.matmul %102, %104, %cst_168 {dimension_numbers = #tpu.dot_dimension_numbers<[1], [0], [0], [1], [0, 0, 1, 1], [], []>} : vector<256x8xbf16>, vector<8x8xbf16>, vector<256x8xf32> -> vector<256x8xf32>
    %106 = arith.addf %100, %105 : vector<256x8xf32>
    %c0_169 = arith.constant 0 : index
    %c1_170 = arith.constant 1 : index
    %c1_171 = arith.constant 1 : index
    %c0_172 = arith.constant 0 : index
    %107 = vector.load %arg10[%c0_169, %c1_170, %c1_171, %c0_172] : memref<1x18x18x8xbf16, #tpu.memory_space<vmem>>, vector<1x16x16x8xbf16>
    %108 = vector.shape_cast %107 : vector<1x16x16x8xbf16> to vector<256x8xbf16>
    %c1_173 = arith.constant 1 : index
    %c1_174 = arith.constant 1 : index
    %c0_175 = arith.constant 0 : index
    %c0_176 = arith.constant 0 : index
    %109 = vector.load %arg4[%c1_173, %c1_174, %c0_175, %c0_176] : memref<3x3x8x8xbf16, #tpu.memory_space<vmem>>, vector<1x1x8x8xbf16>
    %110 = vector.shape_cast %109 : vector<1x1x8x8xbf16> to vector<8x8xbf16>
    %cst_177 = arith.constant dense<0.000000e+00> : vector<256x8xf32>
    %111 = tpu.matmul %108, %110, %cst_177 {dimension_numbers = #tpu.dot_dimension_numbers<[1], [0], [0], [1], [0, 0, 1, 1], [], []>} : vector<256x8xbf16>, vector<8x8xbf16>, vector<256x8xf32> -> vector<256x8xf32>
    %112 = arith.addf %106, %111 : vector<256x8xf32>
    %c0_178 = arith.constant 0 : index
    %c1_179 = arith.constant 1 : index
    %c2_180 = arith.constant 2 : index
    %c0_181 = arith.constant 0 : index
    %113 = vector.load %arg10[%c0_178, %c1_179, %c2_180, %c0_181] : memref<1x18x18x8xbf16, #tpu.memory_space<vmem>>, vector<1x16x16x8xbf16>
    %114 = vector.shape_cast %113 : vector<1x16x16x8xbf16> to vector<256x8xbf16>
    %c1_182 = arith.constant 1 : index
    %c2_183 = arith.constant 2 : index
    %c0_184 = arith.constant 0 : index
    %c0_185 = arith.constant 0 : index
    %115 = vector.load %arg4[%c1_182, %c2_183, %c0_184, %c0_185] : memref<3x3x8x8xbf16, #tpu.memory_space<vmem>>, vector<1x1x8x8xbf16>
    %116 = vector.shape_cast %115 : vector<1x1x8x8xbf16> to vector<8x8xbf16>
    %cst_186 = arith.constant dense<0.000000e+00> : vector<256x8xf32>
    %117 = tpu.matmul %114, %116, %cst_186 {dimension_numbers = #tpu.dot_dimension_numbers<[1], [0], [0], [1], [0, 0, 1, 1], [], []>} : vector<256x8xbf16>, vector<8x8xbf16>, vector<256x8xf32> -> vector<256x8xf32>
    %118 = arith.addf %112, %117 : vector<256x8xf32>
    %c0_187 = arith.constant 0 : index
    %c2_188 = arith.constant 2 : index
    %c0_189 = arith.constant 0 : index
    %c0_190 = arith.constant 0 : index
    %119 = vector.load %arg10[%c0_187, %c2_188, %c0_189, %c0_190] : memref<1x18x18x8xbf16, #tpu.memory_space<vmem>>, vector<1x16x16x8xbf16>
    %120 = vector.shape_cast %119 : vector<1x16x16x8xbf16> to vector<256x8xbf16>
    %c2_191 = arith.constant 2 : index
    %c0_192 = arith.constant 0 : index
    %c0_193 = arith.constant 0 : index
    %c0_194 = arith.constant 0 : index
    %121 = vector.load %arg4[%c2_191, %c0_192, %c0_193, %c0_194] : memref<3x3x8x8xbf16, #tpu.memory_space<vmem>>, vector<1x1x8x8xbf16>
    %122 = vector.shape_cast %121 : vector<1x1x8x8xbf16> to vector<8x8xbf16>
    %cst_195 = arith.constant dense<0.000000e+00> : vector<256x8xf32>
    %123 = tpu.matmul %120, %122, %cst_195 {dimension_numbers = #tpu.dot_dimension_numbers<[1], [0], [0], [1], [0, 0, 1, 1], [], []>} : vector<256x8xbf16>, vector<8x8xbf16>, vector<256x8xf32> -> vector<256x8xf32>
    %124 = arith.addf %118, %123 : vector<256x8xf32>
    %c0_196 = arith.constant 0 : index
    %c2_197 = arith.constant 2 : index
    %c1_198 = arith.constant 1 : index
    %c0_199 = arith.constant 0 : index
    %125 = vector.load %arg10[%c0_196, %c2_197, %c1_198, %c0_199] : memref<1x18x18x8xbf16, #tpu.memory_space<vmem>>, vector<1x16x16x8xbf16>
    %126 = vector.shape_cast %125 : vector<1x16x16x8xbf16> to vector<256x8xbf16>
    %c2_200 = arith.constant 2 : index
    %c1_201 = arith.constant 1 : index
    %c0_202 = arith.constant 0 : index
    %c0_203 = arith.constant 0 : index
    %127 = vector.load %arg4[%c2_200, %c1_201, %c0_202, %c0_203] : memref<3x3x8x8xbf16, #tpu.memory_space<vmem>>, vector<1x1x8x8xbf16>
    %128 = vector.shape_cast %127 : vector<1x1x8x8xbf16> to vector<8x8xbf16>
    %cst_204 = arith.constant dense<0.000000e+00> : vector<256x8xf32>
    %129 = tpu.matmul %126, %128, %cst_204 {dimension_numbers = #tpu.dot_dimension_numbers<[1], [0], [0], [1], [0, 0, 1, 1], [], []>} : vector<256x8xbf16>, vector<8x8xbf16>, vector<256x8xf32> -> vector<256x8xf32>
    %130 = arith.addf %124, %129 : vector<256x8xf32>
    %c0_205 = arith.constant 0 : index
    %c2_206 = arith.constant 2 : index
    %c2_207 = arith.constant 2 : index
    %c0_208 = arith.constant 0 : index
    %131 = vector.load %arg10[%c0_205, %c2_206, %c2_207, %c0_208] : memref<1x18x18x8xbf16, #tpu.memory_space<vmem>>, vector<1x16x16x8xbf16>
    %132 = vector.shape_cast %131 : vector<1x16x16x8xbf16> to vector<256x8xbf16>
    %c2_209 = arith.constant 2 : index
    %c2_210 = arith.constant 2 : index
    %c0_211 = arith.constant 0 : index
    %c0_212 = arith.constant 0 : index
    %133 = vector.load %arg4[%c2_209, %c2_210, %c0_211, %c0_212] : memref<3x3x8x8xbf16, #tpu.memory_space<vmem>>, vector<1x1x8x8xbf16>
    %134 = vector.shape_cast %133 : vector<1x1x8x8xbf16> to vector<8x8xbf16>
    %cst_213 = arith.constant dense<0.000000e+00> : vector<256x8xf32>
    %135 = tpu.matmul %132, %134, %cst_213 {dimension_numbers = #tpu.dot_dimension_numbers<[1], [0], [0], [1], [0, 0, 1, 1], [], []>} : vector<256x8xbf16>, vector<8x8xbf16>, vector<256x8xf32> -> vector<256x8xf32>
    %136 = arith.addf %130, %135 : vector<256x8xf32>
    %c0_214 = arith.constant 0 : index
    %c0_215 = arith.constant 0 : index
    %137 = vector.load %arg5[%c0_214, %c0_215] : memref<1x8xf32, #tpu.memory_space<vmem>>, vector<1x8xf32>
    %138 = vector.broadcast %137 : vector<1x8xf32> to vector<256x8xf32>
    %139 = arith.addf %136, %138 : vector<256x8xf32>
    %140 = vector.shape_cast %0 : vector<1x16x16x4xf32> to vector<256x4xf32>
    %141 = arith.truncf %140 : vector<256x4xf32> to vector<256x4xbf16>
    %c0_216 = arith.constant 0 : index
    %c0_217 = arith.constant 0 : index
    %142 = vector.load %arg6[%c0_216, %c0_217] : memref<4x8xbf16, #tpu.memory_space<vmem>>, vector<4x8xbf16>
    %cst_218 = arith.constant dense<0.000000e+00> : vector<256x8xf32>
    %143 = tpu.matmul %141, %142, %cst_218 {dimension_numbers = #tpu.dot_dimension_numbers<[1], [0], [0], [1], [0, 0, 1, 1], [], []>} : vector<256x4xbf16>, vector<4x8xbf16>, vector<256x8xf32> -> vector<256x8xf32>
    %c0_219 = arith.constant 0 : index
    %c0_220 = arith.constant 0 : index
    %144 = vector.load %arg7[%c0_219, %c0_220] : memref<1x8xf32, #tpu.memory_space<vmem>>, vector<1x8xf32>
    %145 = vector.broadcast %144 : vector<1x8xf32> to vector<256x8xf32>
    %146 = arith.addf %143, %145 : vector<256x8xf32>
    %147 = arith.addf %139, %146 : vector<256x8xf32>
    %cst_221 = arith.constant 0.000000e+00 : f32
    %148 = vector.broadcast %cst_221 : f32 to vector<256x8xf32>
    %149 = arith.maximumf %147, %148 : vector<256x8xf32>
    %150 = vector.shape_cast %149 : vector<256x8xf32> to vector<1x16x16x8xf32>
    %c0_222 = arith.constant 0 : index
    %c0_223 = arith.constant 0 : index
    %c0_224 = arith.constant 0 : index
    %c0_225 = arith.constant 0 : index
    %151 = vector.load %arg8[%c0_222, %c0_223, %c0_224, %c0_225] : memref<1x16x16x8xf32, #tpu.memory_space<vmem>>, vector<1x16x16x8xf32>
    tpu.vector_store %arg8[%c0_222, %c0_223, %c0_224, %c0_225], %150 {strides = array<i32>} : memref<1x16x16x8xf32, #tpu.memory_space<vmem>>, vector<1x16x16x8xf32>,
    return
  }
  func.func @transform_0(%arg0: i32) -> (i32, i32, i32, i32) {
    %c0_i32 = arith.constant 0 : i32
    %c0_i32_0 = arith.constant 0 : i32
    %c0_i32_1 = arith.constant 0 : i32
    %c0_i32_2 = arith.constant 0 : i32
    return %arg0, %c0_i32, %c0_i32_0, %c0_i32_1 : i32, i32, i32, i32
  }
  func.func @transform_1(%arg0: i32) -> (i32, i32, i32, i32) {
    %c0_i32 = arith.constant 0 : i32
    %c0_i32_0 = arith.constant 0 : i32
    %c0_i32_1 = arith.constant 0 : i32
    %c0_i32_2 = arith.constant 0 : i32
    %c0_i32_3 = arith.constant 0 : i32
    return %c0_i32, %c0_i32_0, %c0_i32_1, %c0_i32_2 : i32, i32, i32, i32
  }
  func.func @transform_2(%arg0: i32) -> (i32, i32) {
    %c0_i32 = arith.constant 0 : i32
    %c0_i32_0 = arith.constant 0 : i32
    %c0_i32_1 = arith.constant 0 : i32
    return %c0_i32, %c0_i32_0 : i32, i32
  }
  func.func @transform_3(%arg0: i32) -> (i32, i32, i32, i32) {
    %c0_i32 = arith.constant 0 : i32
    %c0_i32_0 = arith.constant 0 : i32
    %c0_i32_1 = arith.constant 0 : i32
    %c0_i32_2 = arith.constant 0 : i32
    %c0_i32_3 = arith.constant 0 : i32
    return %c0_i32, %c0_i32_0, %c0_i32_1, %c0_i32_2 : i32, i32, i32, i32
  }
  func.func @transform_4(%arg0: i32) -> (i32, i32) {
    %c0_i32 = arith.constant 0 : i32
    %c0_i32_0 = arith.constant 0 : i32
    %c0_i32_1 = arith.constant 0 : i32
    return %c0_i32, %c0_i32_0 : i32, i32
  }
  func.func @transform_5(%arg0: i32) -> (i32, i32) {
    %c0_i32 = arith.constant 0 : i32
    %c0_i32_0 = arith.constant 0 : i32
    %c0_i32_1 = arith.constant 0 : i32
    return %c0_i32, %c0_i32_0 : i32, i32
  }
  func.func @transform_6(%arg0: i32) -> (i32, i32) {
    %c0_i32 = arith.constant 0 : i32
    %c0_i32_0 = arith.constant 0 : i32
    %c0_i32_1 = arith.constant 0 : i32
    return %c0_i32, %c0_i32_0 : i32, i32
  }
  func.func @transform_7(%arg0: i32) -> (i32, i32, i32, i32) {
    %c0_i32 = arith.constant 0 : i32
    %c0_i32_0 = arith.constant 0 : i32
    %c0_i32_1 = arith.constant 0 : i32
    %c0_i32_2 = arith.constant 0 : i32
    return %arg0, %c0_i32, %c0_i32_0, %c0_i32_1 : i32, i32, i32, i32
  }
}

</mosaic_0001>

<bundles_post_ra>
// kernel: tpu_custom_call.1
= control target key start
LH: loop header
LB: loop body
LE: loop exit
PB: predicated region body
PF: predicated region fallthrough
CT: control target
= control target key end

     0   :  { %s13864_s24 = smov 0   ;;  %s17736_s0 = inlined_call_operand.vmem [shape: f32[2,16,16,4], index: 0, kind: input, shape index: {}]   ;;  %s17737_s1 = inlined_call_operand.vmem [shape: bf16[3,3,4,8], index: 1, kind: input, shape index: {}]   ;;  %s17738_s2 = inlined_call_operand.vmem [shape: f32[1,8], index: 2, kind: input, shape index: {}]   ;;  %s17739_s3 = inlined_call_operand.vmem [shape: bf16[3,3,8,8], index: 3, kind: input, shape index: {}]   ;;  %s17740_s4 = inlined_call_operand.vmem [shape: f32[1,8], index: 4, kind: input, shape index: {}]   ;;  %s17741_s5 = inlined_call_operand.vmem [shape: bf16[4,8], index: 5, kind: input, shape index: {}]   ;;  %s17742_s6 = inlined_call_operand.vmem [shape: f32[1,8], index: 6, kind: input, shape index: {}]   ;;  %s17743_s7 = inlined_call_operand.vmem [shape: f32[2,16,16,8], index: 7, kind: output, shape index: {}]  }
   0x1 LB: > { %s11209_s25 = sadd.s32 4294967295, %s13821_s24   ;;  %p11213_p0 = scmp.ge.s32.totalorder %s13821_s24, 1  ;;  %s13821_s24 = sphi %s13864_s24, %s17_s24  }
   0x2   : > { %p237_p1 = scmp.lt.s32.totalorder %s13821_s24, 3 }
   0x4   : > { %p238_p2 = pnand %p11213_p0, %p237_p1 }
   0x6   : > { %241 = sbr.rel (%p238_p2) target bundleno = 1792 (0x700), region = 48 }
   0xd   : > { %v11250_v0 = vld [vmem:[%s17737_s1 + $0x2] sm:$0x3]  ;;  %vm1502_vm0 = vcmask 1041408   ;;  %vm312_vm1 = vcmask 27648   ;;  %vm315_vm2 = vcmask 24576   ;;  %v17744_v2 = vmov 0  }
   0xe   : > { %13636 = vmatprep.subr.msk.bf16.mxu0 %vm1502_vm0, %v11250_v0  ;;  %v1504_v1 = vsel %vm1502_vm0, %v11250_v0, 0  ;;  %313 = vst.msk [vmem:[#allocation2] sm:$0xf] %vm312_vm1, %v17744_v2  ;;  %314 = vst.msk [vmem:[#allocation2 + $0x4] sm:$0xf] %vm312_vm1, %v17744_v2  ;;  %vm5596_vm6 = vcmask 60416  }
   0xf   : > { %316 = vst.msk [vmem:[#allocation2 + $0x8] sm:$0x1] %vm315_vm2, %v17744_v2  ;;  %vm322_vm3 = vsmask.f32 256  ;;  %vm378_vm4 = vsmask.f32 7938  ;;  %12381 = vmatpush3.bf16.msra.mxu0 %v1504_v1 }
  0x10   : > { %318 = vst.msk [vmem:[#allocation2 + $0xcc] sm:$0xf] %vm312_vm1, %v17744_v2  ;;  %319 = vst.msk [vmem:[#allocation2 + $0xd0] sm:$0xf] %vm312_vm1, %v17744_v2  ;;  %p269_p3 = scmp.lt.s32.totalorder %s11209_s25, 1  ;;  %v17852_v4 = vmov 0 }
  0x11   : > { %320 = vst.msk [vmem:[#allocation2 + $0xd4] sm:$0x1] %vm315_vm2, %v17744_v2  ;;  %vm13891_vm5 = vmand %vm315_vm2, %vm322_vm3  ;;  %v13914_v5 = vld [vmem:[%s17737_s1] sm:$0x3]  ;;  %v327_v6 = vld [vmem:[#allocation2 + $0xc] sm:$0x1] }
  0x12   : > { %vm13899_vm7 = vmand %vm315_vm2, %vm378_vm4  ;;  %5597 = vst.msk [vmem:[#allocation3] sm:$0xf] %vm5596_vm6, %v17744_v2  ;;  %13637 = vmatprep.subr.msk.bf16.mxu0 %vm1502_vm0, %v13914_v5  ;;  %s18149_s25 = smov (!%p269_p3, %s11209_s25), 1  ;;  %v328_v7 = vsel %vm13891_vm5, 0, %v327_v6  ;;  %v383_v8 = vld [vmem:[#allocation2 + $0x14] sm:$0x1] }
  0x13   : > { %v17853_v4 = vsel %vm13899_vm7, 4294967295, %v17852_v4  ;;  %5598 = vst.msk [vmem:[#allocation3 + $0x4] sm:$0xf] %vm5596_vm6, %v17744_v2  ;;  %5602 = vst.msk [vmem:[#allocation3 + $0xcc] sm:$0xf] %vm5596_vm6, %v17744_v2  ;;  %v384_v9 = vsel %vm13899_vm7, 0, %v383_v8 }
  0x14   : > { %17854 = vst [vmem:[#allocation4_spill] sm:$0xff] %v17853_v4  ;;  %5603 = vst.msk [vmem:[#allocation3 + $0xd0] sm:$0xf] %vm5596_vm6, %v17744_v2  ;;  %v330_v10 = vld [vmem:[#allocation2 + $0x18] sm:$0x1]  ;;  %s11991_s30 = sshll.u32 %s18149_s25, 8 }
  0x15   : > { %329 = vst [vmem:[#allocation2 + $0xc] sm:$0x1] %v328_v7  ;;  %v386_v11 = vld [vmem:[#allocation2 + $0x20] sm:$0x1]  ;;  %385 = vst [vmem:[#allocation2 + $0x14] sm:$0x1] %v384_v9  ;;  %s13936_s10 = scalar_lea.vmem %s17736_s0, %s11991_s30  ;;  %s17632_s20 = scalar_lea.vmem %s17743_s7, %s11991_s30 }
  0x16   : > { %v331_v12 = vsel %vm13891_vm5, 0, %v330_v10  ;;  %v387_v13 = vsel %vm13899_vm7, 0, %v386_v11  ;;  %v333_v14 = vld [vmem:[#allocation2 + $0x24] sm:$0x1]  ;;  %v389_v16 = vld [vmem:[#allocation2 + $0x2c] sm:$0x1]  ;;  %vm13959_vm11 = vmand %vm312_vm1, %vm378_vm4 }
  0x17   : > { %332 = vst [vmem:[#allocation2 + $0x18] sm:$0x1] %v331_v12  ;;  %388 = vst [vmem:[#allocation2 + $0x20] sm:$0x1] %v387_v13  ;;  %v334_v15 = vsel %vm13891_vm5, 0, %v333_v14  ;;  %v280_v25 = vld [vmem:[%s13936_s10] sm:$0xff] }
  0x18   : > { %v336_v17 = vld [vmem:[#allocation2 + $0x30] sm:$0x1]  ;;  %v324_v18 = vld [vmem:[#allocation2] sm:$0x1]  ;;  %v380_v19 = vld [vmem:[#allocation2 + $0x8] sm:$0x1]  ;;  %v11993_v27 = vpack.c.bf16 %v280_v25, %v280_v25 }
  0x19   : > { %v968_v20 = vld [vmem:[#allocation2 + $0x4] sm:$0xf]  ;;  %335 = vst [vmem:[#allocation2 + $0x24] sm:$0x1] %v334_v15  ;;  %v325_v21 = vsel %vm13891_vm5, 0, %v324_v18  ;;  %v381_v22 = vsel %vm13899_vm7, 0, %v380_v19 }
  0x1a   : > { %vm1016_vm8 = vsmask.f32 3328  ;;  %vm1017_vm9 = vsmask.f32 7440  ;;  %v1029_v23 = vshll.u32 %v968_v20, 16  ;;  %v1033_v24 = vshrl.u32 %v968_v20, 16 }
  0x1b   : > { %v281_v26 = vld [vmem:[%s13936_s10 + $0x8] sm:$0xff]  ;;  %326 = vst [vmem:[#allocation2] sm:$0x1] %v325_v21  ;;  %382 = vst [vmem:[#allocation2 + $0x8] sm:$0x1] %v381_v22  ;;  %v282_v29 = vld [vmem:[%s13936_s10 + $0x10] sm:$0xff] }
  0x1c   : > { %v11994_v28 = vpack.c.bf16 %v281_v26, %v281_v26  ;;  %v283_v30 = vld [vmem:[%s13936_s10 + $0x18] sm:$0xff]  ;;  %v390_v31 = vsel %vm13899_vm7, 0, %v389_v16  ;;  %v337_v32 = vsel %vm13891_vm5, 0, %v336_v17  ;;  %v13952_v33 = vrot.slane %v1029_v23, 5  ;;  %v284_v41 = vld [vmem:[%s13936_s10 + $0x20] sm:$0xff]  ;;  %v285_v42 = vld [vmem:[%s13936_s10 + $0x28] sm:$0xff] }
  0x1d   : > { %v1035_v34 = vrot.slane %v1033_v24, 4  ;;  %v11995_v35 = vpack.c.bf16 %v282_v29, %v282_v29  ;;  %v11996_v36 = vpack.c.bf16 %v283_v30, %v283_v30  ;;  %391 = vst [vmem:[#allocation2 + $0x2c] sm:$0x1] %v390_v31  ;;  %338 = vst [vmem:[#allocation2 + $0x30] sm:$0x1] %v337_v32  ;;  %v533_v37 = vshrl.u32 %v11993_v27, 16 }
  0x1e   : > { %v536_v38 = vshll.u32 %v11993_v27, 16  ;;  %v541_v39 = vshrl.u32 %v11994_v28, 16  ;;  %v544_v40 = vshll.u32 %v11994_v28, 16  ;;  %vm530_vm10 = vsmask.f32 4368  ;;  %vm13978_vm13 = vmor %vm1016_vm8, %vm1017_vm9  ;;  %v286_v24 = vld [vmem:[%s13936_s10 + $0x30] sm:$0xff] }
  0x1f   : > { %v550_v43 = vshrl.u32 %v11995_v35, 16  ;;  %v553_v44 = vshll.u32 %v11995_v35, 16  ;;  %v558_v45 = vshrl.u32 %v11996_v36, 16  ;;  %v1036_v46 = vor.u32 %v1035_v34, %v13952_v33  ;;  %v855_v51 = vld [vmem:[#allocation2 + $0xc] sm:$0xf]  ;;  %vm13964_vm12 = vmor %vm322_vm3, %vm530_vm10  ;;  %v287_v30 = vld [vmem:[%s13936_s10 + $0x38] sm:$0xff] }
  0x20   : > { %v535_v47 = vrot.slane %v533_v37, 7  ;;  %v543_v48 = vrot.slane %v541_v39, 7  ;;  %v561_v49 = vshll.u32 %v11996_v36, 16  ;;  %v11997_v54 = vpack.c.bf16 %v284_v41, %v284_v41  ;;  %v859_v61 = vld [vmem:[#allocation2 + $0x14] sm:$0x1]  ;;  %v288_v41 = vld [vmem:[%s13936_s10 + $0x40] sm:$0xff]  ;;  %vm15722_vm10 = vmand %vm5596_vm6, %vm378_vm4 }
  0x21   : > { %v552_v52 = vrot.slane %v550_v43, 7  ;;  %v560_v53 = vrot.slane %v558_v45, 7  ;;  %v11998_v55 = vpack.c.bf16 %v285_v42, %v285_v42  ;;  %v17857_v56 = vmov 0  ;;  %v862_v62 = vld [vmem:[#allocation2 + $0x18] sm:$0xf] }
  0x22   : > { %v17858_v56 = vsel %vm13964_vm12, 4294967295, %v17857_v56  ;;  %v538_v57 = vor.u32 %v536_v38, %v535_v47  ;;  %v539_v58 = vrot.slane %v535_v47, 4  ;;  %v546_v59 = vor.u32 %v544_v40, %v543_v48  ;;  %v967_v63 = vld [vmem:[#allocation2] sm:$0xf]  ;;  %v1000_v0 = vld [vmem:[#allocation2 + $0x8] sm:$0x1] }
  0x23   : > { %17859 = vst [vmem:[#allocation5_spill] sm:$0xff] %v17858_v56  ;;  %v548_v60 = vrot.slane %v543_v48, 4  ;;  %v555_v1 = vor.u32 %v553_v44, %v552_v52  ;;  %v556_v6 = vrot.slane %v552_v52, 4  ;;  %v563_v7 = vor.u32 %v561_v49, %v560_v53  ;;  %v866_v13 = vld [vmem:[#allocation2 + $0x20] sm:$0x1] }
  0x24   : > { %v565_v8 = vrot.slane %v560_v53, 4  ;;  %v1020_v9 = vshrl.u32 %v967_v63, 16  ;;  %v1023_v10 = vshll.u32 %v967_v63, 16  ;;  %v1037_v11 = vrot.slane %v1036_v46, 4  ;;  %v392_v18 = vld [vmem:[#allocation2 + $0x38] sm:$0x1] }
  0x25   : > { %v1039_v12 = vshll.u32 %v1000_v0, 16  ;;  %v547_v14 = vsel %vm13964_vm12, %v539_v58, %v546_v59  ;;  %v856_v15 = vsel %vm13959_vm11, %v538_v57, %v855_v51  ;;  %v860_v16 = vsel %vm13891_vm5, %v548_v60, %v859_v61  ;;  %v339_v25 = vld [vmem:[#allocation2 + $0x3c] sm:$0x1]  ;;  %v395_v31 = vld [vmem:[#allocation2 + $0x44] sm:$0x1] }
  0x26   : > { %v564_v17 = vsel %vm13964_vm12, %v556_v6, %v563_v7  ;;  %v1022_v20 = vrot.slane %v1020_v9, 4  ;;  %v1025_v21 = vrot.slane %v1023_v10, 5  ;;  %857 = vst [vmem:[#allocation2 + $0xc] sm:$0xf] %v856_v15  ;;  %858 = vst.msk [vmem:[#allocation2 + $0x10] sm:$0xf] %vm312_vm1, %v547_v14  ;;  %v863_v23 = vsel %vm13959_vm11, %v555_v1, %v862_v62 }
  0x27   : > { %v1041_v22 = vrot.slane %v1039_v12, 5  ;;  %861 = vst [vmem:[#allocation2 + $0x14] sm:$0x1] %v860_v16  ;;  %865 = vst.msk [vmem:[#allocation2 + $0x1c] sm:$0xf] %vm312_vm1, %v564_v17  ;;  %v867_v26 = vsel %vm13891_vm5, %v565_v8, %v866_v13  ;;  %v567_v27 = vshrl.u32 %v11997_v54, 16  ;;  %v13994_v40 = vpack.c.bf16 %v286_v24, %v286_v24 }
  0x28   : > { %864 = vst [vmem:[#allocation2 + $0x18] sm:$0xf] %v863_v23  ;;  %v570_v28 = vshll.u32 %v11997_v54, 16  ;;  %v575_v29 = vshrl.u32 %v11998_v55, 16  ;;  %v1026_v32 = vor.u32 %v1025_v21, %v1022_v20  ;;  %vm1453_vm14 = vcmask 31744  }
  0x29   : > { %868 = vst [vmem:[#allocation2 + $0x20] sm:$0x1] %v867_v26  ;;  %v578_v34 = vshll.u32 %v11998_v55, 16  ;;  %v393_v35 = vsel %vm13899_vm7, 0, %v392_v18  ;;  %v1042_v36 = vsel %vm13978_vm13, %v1037_v11, %v1041_v22  ;;  %v569_v37 = vrot.slane %v567_v27, 7  ;;  %v289_v26 = vld [vmem:[%s13936_s10 + $0x48] sm:$0xff] }
  0x2a   : > { %v577_v38 = vrot.slane %v575_v29, 7  ;;  %v869_v39 = vld [vmem:[#allocation2 + $0x24] sm:$0xf]  ;;  %394 = vst [vmem:[#allocation2 + $0x38] sm:$0x1] %v393_v35  ;;  %v1027_v42 = vrot.slane %v1026_v32, 4  ;;  %v13997_v44 = vpack.c.bf16 %v287_v30, %v287_v30  ;;  %v14011_v55 = vpack.c.bf16 %v288_v41, %v288_v41 }
  0x2b   : > { %v873_v43 = vld [vmem:[#allocation2 + $0x2c] sm:$0x1]  ;;  %v340_v45 = vsel %vm13891_vm5, 0, %v339_v25  ;;  %v396_v46 = vsel %vm13899_vm7, 0, %v395_v31  ;;  %v572_v47 = vor.u32 %v570_v28, %v569_v37  ;;  %v573_v48 = vrot.slane %v569_v37, 4  ;;  %v290_v27 = vld [vmem:[%s13936_s10 + $0x50] sm:$0xff] }
  0x2c   : > { %v580_v49 = vor.u32 %v578_v34, %v577_v38  ;;  %v582_v51 = vrot.slane %v577_v38, 4  ;;  %341 = vst [vmem:[#allocation2 + $0x3c] sm:$0x1] %v340_v45  ;;  %397 = vst [vmem:[#allocation2 + $0x44] sm:$0x1] %v396_v46  ;;  %v1032_v52 = vsel %vm13978_vm13, %v1027_v42, %v13952_v33  ;;  %v14008_v53 = vsel %vm1502_vm0, %v13914_v5, 0 }
  0x2d   : > { %v584_v54 = vshrl.u32 %v13994_v40, 16  ;;  %v11251_v57 = vcombine.low %v1032_v52, %v1042_v36  ;;  %v969_v58 = vld [vmem:[#allocation2 + $0xc] sm:$0xf]  ;;  %v970_v59 = vld [vmem:[#allocation2 + $0x10] sm:$0xf]  ;;  %v870_v62 = vsel %vm13959_vm11, %v572_v47, %v869_v39  ;;  %v587_v10 = vshll.u32 %v13994_v40, 16 }
  0x2e   : > { %v1001_v60 = vld [vmem:[#allocation2 + $0x14] sm:$0x1]  ;;  %v581_v61 = vsel %vm13964_vm12, %v573_v48, %v580_v49  ;;  %v874_v33 = vsel %vm13891_vm5, %v582_v51, %v873_v43  ;;  %v1044_v63 = vshrl.u32 %v969_v58, 16  ;;  %v1047_v5 = vshll.u32 %v969_v58, 16  ;;  %871 = vst [vmem:[#allocation2 + $0x24] sm:$0xf] %v870_v62 }
  0x2f   : > { %v1053_v0 = vshll.u32 %v970_v59, 16  ;;  %v1057_v1 = vshrl.u32 %v970_v59, 16  ;;  %v971_v6 = vld [vmem:[#allocation2 + $0x18] sm:$0xf]  ;;  %872 = vst.msk [vmem:[#allocation2 + $0x28] sm:$0xf] %vm312_vm1, %v581_v61  ;;  %12382 = vmatprep.mubr.msk.bf16.mxu0 %vm1453_vm14, %v11251_v57  ;;  %v14025_v42 = vpack.c.bf16 %v289_v26, %v289_v26  ;;  %v14027_v43 = vpack.c.bf16 %v290_v27, %v290_v27 }
  0x30   : > { %875 = vst [vmem:[#allocation2 + $0x2c] sm:$0x1] %v874_v33  ;;  %v1063_v7 = vshll.u32 %v1001_v60, 16  ;;  %v972_v8 = vld [vmem:[#allocation2 + $0x1c] sm:$0xf]  ;;  %v1068_v9 = vshrl.u32 %v971_v6, 16 }
  0x31   : > { %v592_v11 = vshrl.u32 %v13997_v44, 16  ;;  %v1046_v12 = vrot.slane %v1044_v63, 4  ;;  %v1049_v13 = vrot.slane %v1047_v5, 5  ;;  %v1055_v14 = vrot.slane %v1053_v0, 5  ;;  %v1002_v16 = vld [vmem:[#allocation2 + $0x20] sm:$0x1] }
  0x32   : > { %v1059_v15 = vrot.slane %v1057_v1, 4  ;;  %v1065_v17 = vrot.slane %v1063_v7, 5  ;;  %v1070_v18 = vrot.slane %v1068_v9, 4  ;;  %v1071_v20 = vshll.u32 %v971_v6, 16  ;;  %v876_v61 = vld [vmem:[#allocation2 + $0x30] sm:$0xf] }
  0x33   : > { %v1077_v21 = vshll.u32 %v972_v8, 16  ;;  %v1050_v22 = vor.u32 %v1049_v13, %v1046_v12  ;;  %v1081_v24 = vshrl.u32 %v972_v8, 16  ;;  %v1087_v25 = vshll.u32 %v1002_v16, 16  ;;  %v880_v8 = vld [vmem:[#allocation2 + $0x38] sm:$0x1] }
  0x34   : > { %v1060_v23 = vor.u32 %v1059_v15, %v1055_v14  ;;  %v1073_v28 = vrot.slane %v1071_v20, 5  ;;  %v586_v30 = vrot.slane %v584_v54, 7  ;;  %v594_v31 = vrot.slane %v592_v11, 7  ;;  %v342_v13 = vld [vmem:[#allocation2 + $0x48] sm:$0x1] }
  0x35   : > { %v1079_v29 = vrot.slane %v1077_v21, 5  ;;  %v1051_v32 = vrot.slane %v1050_v22, 4  ;;  %v1083_v35 = vrot.slane %v1081_v24, 4  ;;  %v1089_v36 = vrot.slane %v1087_v25, 5  ;;  %v973_v38 = vld [vmem:[#allocation2 + $0x24] sm:$0xf] }
  0x36   : > { %v1061_v34 = vrot.slane %v1060_v23, 4  ;;  %v1074_v37 = vor.u32 %v1073_v28, %v1070_v18  ;;  %v974_v39 = vld [vmem:[#allocation2 + $0x28] sm:$0xf]  ;;  %v589_v41 = vor.u32 %v587_v10, %v586_v30  ;;  %v1092_v48 = vshrl.u32 %v973_v38, 16  ;;  %v398_v18 = vld [vmem:[#allocation2 + $0x50] sm:$0x1] }
  0x37   : > { %v1003_v40 = vld [vmem:[#allocation2 + $0x2c] sm:$0x1]  ;;  %v1056_v45 = vsel %vm13978_vm13, %v1051_v32, %v1055_v14  ;;  %v1084_v47 = vor.u32 %v1083_v35, %v1079_v29  ;;  %v1095_v52 = vshll.u32 %v973_v38, 16  ;;  %v1101_v54 = vshll.u32 %v974_v39, 16  ;;  %v883_v26 = vld [vmem:[#allocation2 + $0x3c] sm:$0xf] }
  0x38   : > { %v1066_v46 = vsel %vm13978_vm13, %v1061_v34, %v1065_v17  ;;  %v1075_v51 = vrot.slane %v1074_v37, 4  ;;  %v1094_v58 = vrot.slane %v1092_v48, 4  ;;  %v1105_v59 = vshrl.u32 %v974_v39, 16  ;;  %v291_v17 = vld [vmem:[%s13936_s10 + $0x58] sm:$0xff]  ;;  %v345_v27 = vld [vmem:[#allocation2 + $0x54] sm:$0x1] }
  0x39   : > { %v11252_v49 = vcombine.low %v1056_v45, %v1066_v46  ;;  %v1085_v57 = vrot.slane %v1084_v47, 4  ;;  %v1111_v60 = vshll.u32 %v1003_v40, 16  ;;  %v1097_v33 = vrot.slane %v1095_v52, 5  ;;  %v401_v28 = vld [vmem:[#allocation2 + $0x5c] sm:$0x1]  ;;  %v292_v40 = vld [vmem:[%s13936_s10 + $0x60] sm:$0xff] }
  0x3a   : > { %v1080_v62 = vsel %vm13978_vm13, %v1075_v51, %v1079_v29  ;;  %v1103_v63 = vrot.slane %v1101_v54, 5  ;;  %v590_v5 = vrot.slane %v586_v30, 4  ;;  %v1107_v1 = vrot.slane %v1105_v59, 4  ;;  %v11331_v35 = vld [vmem:[%s17737_s1 + $0x4] sm:$0x3] }
  0x3b   : > { %12383 = vmatmul.mubr.msk.bf16.vlgmr.msra.gmra.mrb[0].mxu0 %vm1453_vm14, %v11252_v49  ;;  %v1090_v0 = vsel %vm13978_vm13, %v1085_v57, %v1089_v36  ;;  %v1113_v6 = vrot.slane %v1111_v60, 5  ;;  %v595_v7 = vshll.u32 %v13997_v44, 16  ;;  %v1098_v10 = vor.u32 %v1097_v33, %v1094_v58  ;;  %v404_v48 = vld [vmem:[#allocation2 + $0x68] sm:$0x1] }
  0x3c   : > { %12415 = vmatpush3.bf16.msra.mxu0 %v14008_v53  ;;  %v11253_v9 = vcombine.low %v1080_v62, %v1090_v0  ;;  %v599_v11 = vrot.slane %v594_v31, 4  ;;  %v877_v12 = vsel %vm13959_vm11, %v589_v41, %v876_v61  ;;  %v1108_v14 = vor.u32 %v1107_v1, %v1103_v63  ;;  %v348_v41 = vld [vmem:[#allocation2 + $0x60] sm:$0x1]  ;;  %v293_v57 = vld [vmem:[%s13936_s10 + $0x68] sm:$0xff] }
  0x3d   : > { %v597_v15 = vor.u32 %v595_v7, %v594_v31  ;;  %878 = vst [vmem:[#allocation2 + $0x30] sm:$0xf] %v877_v12  ;;  %v601_v53 = vshrl.u32 %v14011_v55, 16  ;;  %v604_v16 = vshll.u32 %v14011_v55, 16  ;;  %v1099_v44 = vrot.slane %v1098_v10, 4  ;;  %13638 = vmatprep.subr.msk.bf16.mxu0 %vm1502_vm0, %v11331_v35 }
  0x3e   : > { %12386 = vmatprep.mubr.msk.bf16.mxu0 %vm1453_vm14, %v11253_v9  ;;  %v881_v20 = vsel %vm13891_vm5, %v599_v11, %v880_v8  ;;  %v609_v21 = vshrl.u32 %v14025_v42, 16  ;;  %v612_v22 = vshll.u32 %v14025_v42, 16  ;;  %v1109_v23 = vrot.slane %v1108_v14, 4  ;;  %v887_v31 = vld [vmem:[#allocation2 + $0x44] sm:$0x1] }
  0x3f   : > { %v598_v24 = vsel %vm13964_vm12, %v590_v5, %v597_v15  ;;  %882 = vst [vmem:[#allocation2 + $0x38] sm:$0x1] %v881_v20  ;;  %v603_v25 = vrot.slane %v601_v53, 7  ;;  %v343_v55 = vsel %vm13891_vm5, 0, %v342_v13  ;;  %v1104_v29 = vsel %vm13978_vm13, %v1099_v44, %v1103_v63 }
  0x40   : > { %879 = vst.msk [vmem:[#allocation2 + $0x34] sm:$0xf] %vm312_vm1, %v598_v24  ;;  %v611_v30 = vrot.slane %v609_v21, 7  ;;  %344 = vst [vmem:[#allocation2 + $0x48] sm:$0x1] %v343_v55  ;;  %v399_v32 = vsel %vm13899_vm7, 0, %v398_v18  ;;  %v12004_v34 = vpack.c.bf16 %v291_v17, %v291_v17  ;;  %v1114_v36 = vsel %vm13978_vm13, %v1109_v23, %v1113_v6 }
  0x41   : > { %v606_v37 = vor.u32 %v604_v16, %v603_v25  ;;  %v607_v38 = vrot.slane %v603_v25, 4  ;;  %400 = vst [vmem:[#allocation2 + $0x50] sm:$0x1] %v399_v32  ;;  %v618_v39 = vshrl.u32 %v14027_v43, 16  ;;  %v11254_v42 = vcombine.low %v1104_v29, %v1114_v36  ;;  %v294_v18 = vld [vmem:[%s13936_s10 + $0x70] sm:$0xff] }
  0x42   : > { %v614_v45 = vor.u32 %v612_v22, %v611_v30  ;;  %v616_v46 = vrot.slane %v611_v30, 4  ;;  %v621_v47 = vshll.u32 %v14027_v43, 16  ;;  %v626_v52 = vshrl.u32 %v12004_v34, 16 }
  0x43   : > { %v884_v49 = vsel %vm13959_vm11, %v606_v37, %v883_v26  ;;  %v620_v51 = vrot.slane %v618_v39, 7  ;;  %v629_v54 = vshll.u32 %v12004_v34, 16  ;;  %12387 = vmatmul.mubr.msk.bf16.gmra.mrb[4].mxu0 %vm1453_vm14, %v11254_v42  ;;  %v346_v43 = vsel %vm13891_vm5, 0, %v345_v27 }
  0x44   : > { %v975_v58 = vld [vmem:[#allocation2 + $0x30] sm:$0xf]  ;;  %v615_v59 = vsel %vm13964_vm12, %v607_v38, %v614_v45  ;;  %885 = vst [vmem:[#allocation2 + $0x3c] sm:$0xf] %v884_v49  ;;  %v888_v60 = vsel %vm13891_vm5, %v616_v46, %v887_v31  ;;  %v402_v61 = vsel %vm13899_vm7, 0, %v401_v28  ;;  %v628_v1 = vrot.slane %v626_v52, 7 }
  0x45   : > { %v1116_v62 = vshrl.u32 %v975_v58, 16  ;;  %v1119_v33 = vshll.u32 %v975_v58, 16  ;;  %886 = vst.msk [vmem:[#allocation2 + $0x40] sm:$0xf] %vm312_vm1, %v615_v59  ;;  %889 = vst [vmem:[#allocation2 + $0x44] sm:$0x1] %v888_v60  ;;  %v623_v63 = vor.u32 %v621_v47, %v620_v51  ;;  %v12005_v6 = vpack.c.bf16 %v292_v40, %v292_v40 }
  0x46   : > { %v624_v5 = vrot.slane %v620_v51, 4  ;;  %347 = vst [vmem:[#allocation2 + $0x54] sm:$0x1] %v346_v43  ;;  %403 = vst [vmem:[#allocation2 + $0x5c] sm:$0x1] %v402_v61  ;;  %v14081_v7 = vpack.c.bf16 %v293_v57, %v293_v57  ;;  %v349_v8 = vsel %vm13891_vm5, 0, %v348_v41  ;;  %v631_v53 = vor.u32 %v629_v54, %v628_v1 }
  0x47   : > { %v1004_v0 = vld [vmem:[#allocation2 + $0x38] sm:$0x1]  ;;  %v976_v9 = vld [vmem:[#allocation2 + $0x34] sm:$0xf]  ;;  %v1118_v10 = vrot.slane %v1116_v62, 4  ;;  %v1121_v11 = vrot.slane %v1119_v33, 5  ;;  %v14096_v38 = vpack.c.bf16 %v294_v18, %v294_v18 }
  0x48   : > { %v1135_v12 = vshll.u32 %v1004_v0, 16  ;;  %350 = vst [vmem:[#allocation2 + $0x60] sm:$0x1] %v349_v8  ;;  %v405_v13 = vsel %vm13899_vm7, 0, %v404_v48  ;;  %v1125_v14 = vshll.u32 %v976_v9, 16  ;;  %v1129_v15 = vshrl.u32 %v976_v9, 16 }
  0x49   : > { %v633_v16 = vrot.slane %v628_v1, 4  ;;  %v890_v17 = vld [vmem:[#allocation2 + $0x48] sm:$0xf]  ;;  %406 = vst [vmem:[#allocation2 + $0x68] sm:$0x1] %v405_v13  ;;  %v1122_v44 = vor.u32 %v1121_v11, %v1118_v10  ;;  %v635_v23 = vshrl.u32 %v12005_v6, 16  ;;  %v632_v26 = vsel %vm13964_vm12, %v624_v5, %v631_v53 }
  0x4a   : > { %v1137_v20 = vrot.slane %v1135_v12, 5  ;;  %v891_v21 = vsel %vm13959_vm11, %v623_v63, %v890_v17  ;;  %v894_v22 = vld [vmem:[#allocation2 + $0x50] sm:$0x1]  ;;  %v1127_v24 = vrot.slane %v1125_v14, 5  ;;  %v1131_v25 = vrot.slane %v1129_v15, 4  ;;  %v295_v51 = vld [vmem:[%s13936_s10 + $0x78] sm:$0xff] }
  0x4b   : > { %892 = vst [vmem:[#allocation2 + $0x48] sm:$0xf] %v891_v21  ;;  %v895_v55 = vsel %vm13891_vm5, %v633_v16, %v894_v22  ;;  %v1123_v27 = vrot.slane %v1122_v44, 4  ;;  %v977_v28 = vld [vmem:[#allocation2 + $0x3c] sm:$0xf]  ;;  %v637_v29 = vrot.slane %v635_v23, 7  ;;  %v12008_v1 = vpack.c.bf16 %v295_v51, %v295_v51 }
  0x4c   : > { %893 = vst.msk [vmem:[#allocation2 + $0x4c] sm:$0xf] %vm312_vm1, %v632_v26  ;;  %896 = vst [vmem:[#allocation2 + $0x50] sm:$0x1] %v895_v55  ;;  %v638_v30 = vshll.u32 %v12005_v6, 16  ;;  %v643_v31 = vshrl.u32 %v14081_v7, 16  ;;  %v1132_v32 = vor.u32 %v1131_v25, %v1127_v24 }
  0x4d   : > { %v978_v34 = vld [vmem:[#allocation2 + $0x40] sm:$0xf]  ;;  %v1005_v35 = vld [vmem:[#allocation2 + $0x44] sm:$0x1]  ;;  %v1140_v36 = vshrl.u32 %v977_v28, 16  ;;  %v1143_v37 = vshll.u32 %v977_v28, 16  ;;  %v1128_v39 = vsel %vm13978_vm13, %v1123_v27, %v1127_v24 }
  0x4e   : > { %v1149_v40 = vshll.u32 %v978_v34, 16  ;;  %v1153_v41 = vshrl.u32 %v978_v34, 16  ;;  %v1159_v42 = vshll.u32 %v1005_v35, 16  ;;  %v1133_v45 = vrot.slane %v1132_v32, 4  ;;  %v897_v49 = vld [vmem:[#allocation2 + $0x54] sm:$0xf] }
  0x4f   : > { %v1142_v46 = vrot.slane %v1140_v36, 4  ;;  %v1145_v47 = vrot.slane %v1143_v37, 5  ;;  %v640_v48 = vor.u32 %v638_v30, %v637_v29  ;;  %v641_v58 = vrot.slane %v637_v29, 4  ;;  %v296_v59 = vld [vmem:[%s13936_s10 + $0x80] sm:$0xff]  ;;  %v901_v53 = vld [vmem:[#allocation2 + $0x5c] sm:$0x1] }
  0x50   : > { %v1151_v52 = vrot.slane %v1149_v40, 5  ;;  %v1155_v54 = vrot.slane %v1153_v41, 4  ;;  %v1161_v57 = vrot.slane %v1159_v42, 5  ;;  %v1138_v60 = vsel %vm13978_vm13, %v1133_v45, %v1137_v20  ;;  %v351_v16 = vld [vmem:[#allocation2 + $0x6c] sm:$0x1] }
  0x51   : > { %v1146_v43 = vor.u32 %v1145_v47, %v1142_v46  ;;  %v645_v61 = vrot.slane %v643_v31, 7  ;;  %v646_v62 = vshll.u32 %v14081_v7, 16  ;;  %v11255_v33 = vcombine.low %v1128_v39, %v1138_v60  ;;  %v407_v21 = vld [vmem:[#allocation2 + $0x74] sm:$0x1]  ;;  %v904_v34 = vld [vmem:[#allocation2 + $0x60] sm:$0xf] }
  0x52   : > { %v1156_v63 = vor.u32 %v1155_v54, %v1151_v52  ;;  %v979_v5 = vld [vmem:[#allocation2 + $0x48] sm:$0xf]  ;;  %v898_v0 = vsel %vm13959_vm11, %v640_v48, %v897_v49  ;;  %v14107_v12 = vpack.c.bf16 %v296_v59, %v296_v59  ;;  %v652_v28 = vshrl.u32 %v14096_v38, 16  ;;  %v410_v54 = vld [vmem:[#allocation2 + $0x80] sm:$0x1] }
  0x53   : > { %v1147_v6 = vrot.slane %v1146_v43, 4  ;;  %v980_v8 = vld [vmem:[#allocation2 + $0x4c] sm:$0xf]  ;;  %v1006_v9 = vld [vmem:[#allocation2 + $0x50] sm:$0x1]  ;;  %v1164_v10 = vshrl.u32 %v979_v5, 16  ;;  %v648_v11 = vor.u32 %v646_v62, %v645_v61  ;;  %12390 = vmatprep.mubr.msk.bf16.mxu0 %vm1453_vm14, %v11255_v33 }
  0x54   : > { %899 = vst [vmem:[#allocation2 + $0x54] sm:$0xf] %v898_v0  ;;  %v1157_v13 = vrot.slane %v1156_v63, 4  ;;  %v1167_v14 = vshll.u32 %v979_v5, 16  ;;  %v1173_v7 = vshll.u32 %v980_v8, 16  ;;  %v1177_v15 = vshrl.u32 %v980_v8, 16 }
  0x55   : > { %v1152_v17 = vsel %vm13978_vm13, %v1147_v6, %v1151_v52  ;;  %v1166_v18 = vrot.slane %v1164_v10, 4  ;;  %v1183_v44 = vshll.u32 %v1006_v9, 16  ;;  %v649_v20 = vsel %vm13964_vm12, %v641_v58, %v648_v11  ;;  %v908_v39 = vld [vmem:[#allocation2 + $0x68] sm:$0x1]  ;;  %v354_v52 = vld [vmem:[#allocation2 + $0x78] sm:$0x1] }
  0x56   : > { %v1162_v22 = vsel %vm13978_vm13, %v1157_v13, %v1161_v57  ;;  %v1169_v23 = vrot.slane %v1167_v14, 5  ;;  %v1175_v24 = vrot.slane %v1173_v7, 5  ;;  %v1179_v25 = vrot.slane %v1177_v15, 4  ;;  %900 = vst.msk [vmem:[#allocation2 + $0x58] sm:$0xf] %vm312_vm1, %v649_v20  ;;  %v297_v43 = vld [vmem:[%s13936_s10 + $0x88] sm:$0xff] }
  0x57   : > { %v11256_v26 = vcombine.low %v1152_v17, %v1162_v22  ;;  %v1185_v55 = vrot.slane %v1183_v44, 5  ;;  %v650_v27 = vrot.slane %v645_v61, 4  ;;  %v655_v31 = vshll.u32 %v14096_v38, 16  ;;  %v298_v14 = vld [vmem:[%s13936_s10 + $0x90] sm:$0xff]  ;;  %v299_v7 = vld [vmem:[%s13936_s10 + $0x98] sm:$0xff] }
  0x58   : > { %v1170_v29 = vor.u32 %v1169_v23, %v1166_v18  ;;  %v1180_v30 = vor.u32 %v1179_v25, %v1175_v24  ;;  %v660_v32 = vshrl.u32 %v12008_v1, 16  ;;  %v654_v36 = vrot.slane %v652_v28, 7 }
  0x59   : > { %12391 = vmatmul.mubr.msk.bf16.gmra.mrb[8].mxu0 %vm1453_vm14, %v11256_v26  ;;  %v902_v35 = vsel %vm13891_vm5, %v650_v27, %v901_v53  ;;  %v663_v37 = vshll.u32 %v12008_v1, 16  ;;  %v352_v40 = vsel %vm13891_vm5, 0, %v351_v16  ;;  %v408_v46 = vsel %vm13899_vm7, 0, %v407_v21 }
  0x5a   : > { %v1171_v41 = vrot.slane %v1170_v29, 4  ;;  %v1181_v42 = vrot.slane %v1180_v30, 4  ;;  %903 = vst [vmem:[#allocation2 + $0x5c] sm:$0x1] %v902_v35  ;;  %v662_v38 = vrot.slane %v660_v32, 7  ;;  %v657_v49 = vor.u32 %v655_v31, %v654_v36  ;;  %v300_v30 = vld [vmem:[%s13936_s10 + $0xa0] sm:$0xff] }
  0x5b   : > { %v14124_v45 = vld [vmem:[#allocation2 + $0x54] sm:$0xf]  ;;  %353 = vst [vmem:[#allocation2 + $0x6c] sm:$0x1] %v352_v40  ;;  %v658_v51 = vrot.slane %v654_v36, 4  ;;  %v12010_v10 = vpack.c.bf16 %v297_v43, %v297_v43  ;;  %v669_v11 = vshrl.u32 %v14107_v12, 16  ;;  %v12011_v25 = vpack.c.bf16 %v298_v14, %v298_v14 }
  0x5c   : > { %v1188_v47 = vshrl.u32 %v14124_v45, 16  ;;  %v1191_v48 = vshll.u32 %v14124_v45, 16  ;;  %409 = vst [vmem:[#allocation2 + $0x74] sm:$0x1] %v408_v46  ;;  %v1176_v57 = vsel %vm13978_vm13, %v1171_v41, %v1175_v24  ;;  %v1186_v58 = vsel %vm13978_vm13, %v1181_v42, %v1185_v55 }
  0x5d   : > { %v665_v59 = vor.u32 %v663_v37, %v662_v38  ;;  %v667_v60 = vrot.slane %v662_v38, 4  ;;  %v11257_v61 = vcombine.low %v1176_v57, %v1186_v58  ;;  %v14135_v62 = vld [vmem:[#allocation2 + $0x58] sm:$0xf]  ;;  %v905_v5 = vsel %vm13959_vm11, %v657_v49, %v904_v34  ;;  %v357_v38 = vld [vmem:[#allocation2 + $0x84] sm:$0x1] }
  0x5e   : > { %v1190_v33 = vrot.slane %v1188_v47, 4  ;;  %v1193_v63 = vrot.slane %v1191_v48, 5  ;;  %v1197_v0 = vshll.u32 %v14135_v62, 16  ;;  %v1201_v1 = vshrl.u32 %v14135_v62, 16  ;;  %906 = vst [vmem:[#allocation2 + $0x60] sm:$0xf] %v905_v5 }
  0x5f   : > { %v666_v6 = vsel %vm13964_vm12, %v658_v51, %v665_v59  ;;  %v909_v8 = vsel %vm13891_vm5, %v667_v60, %v908_v39  ;;  %12394 = vmatprep.mubr.msk.bf16.mxu0 %vm1453_vm14, %v11257_v61  ;;  %v672_v13 = vshll.u32 %v14107_v12, 16  ;;  %v355_v16 = vsel %vm13891_vm5, 0, %v354_v52  ;;  %v301_v60 = vld [vmem:[%s13936_s10 + $0xa8] sm:$0xff] }
  0x60   : > { %v1194_v9 = vor.u32 %v1193_v63, %v1190_v33  ;;  %907 = vst.msk [vmem:[#allocation2 + $0x64] sm:$0xf] %vm312_vm1, %v666_v6  ;;  %910 = vst [vmem:[#allocation2 + $0x68] sm:$0x1] %v909_v8  ;;  %v1199_v15 = vrot.slane %v1197_v0, 5  ;;  %v1203_v53 = vrot.slane %v1201_v1, 4  ;;  %v12012_v26 = vpack.c.bf16 %v299_v7, %v299_v7 }
  0x61   : > { %v411_v17 = vsel %vm13899_vm7, 0, %v410_v54  ;;  %v1007_v18 = vld [vmem:[#allocation2 + $0x5c] sm:$0x1]  ;;  %v671_v20 = vrot.slane %v669_v11, 7  ;;  %v677_v21 = vshrl.u32 %v12010_v10, 16  ;;  %v680_v22 = vshll.u32 %v12010_v10, 16 }
  0x62   : > { %v1195_v44 = vrot.slane %v1194_v9, 4  ;;  %356 = vst [vmem:[#allocation2 + $0x78] sm:$0x1] %v355_v16  ;;  %412 = vst [vmem:[#allocation2 + $0x80] sm:$0x1] %v411_v17  ;;  %v1204_v23 = vor.u32 %v1203_v53, %v1199_v15  ;;  %v1207_v12 = vshll.u32 %v1007_v18, 16  ;;  %v12013_v52 = vpack.c.bf16 %v300_v30, %v300_v30 }
  0x63   : > { %v911_v24 = vld [vmem:[#allocation2 + $0x6c] sm:$0xf]  ;;  %v674_v27 = vor.u32 %v672_v13, %v671_v20  ;;  %v675_v28 = vrot.slane %v671_v20, 4  ;;  %v679_v29 = vrot.slane %v677_v21, 7  ;;  %v915_v34 = vld [vmem:[#allocation2 + $0x74] sm:$0x1]  ;;  %v12014_v21 = vpack.c.bf16 %v301_v60, %v301_v60 }
  0x64   : > { %v1200_v55 = vsel %vm13978_vm13, %v1195_v44, %v1199_v15  ;;  %v1205_v31 = vrot.slane %v1204_v23, 4  ;;  %v1209_v32 = vrot.slane %v1207_v12, 5  ;;  %v686_v35 = vshrl.u32 %v12011_v25, 16  ;;  %v413_v0 = vld [vmem:[#allocation2 + $0x8c] sm:$0x1] }
  0x65   : > { %v689_v36 = vshll.u32 %v12011_v25, 16  ;;  %v14158_v37 = vld [vmem:[#allocation2 + $0x60] sm:$0xf]  ;;  %v682_v39 = vor.u32 %v680_v22, %v679_v29  ;;  %v684_v40 = vrot.slane %v679_v29, 4  ;;  %v912_v41 = vsel %vm13959_vm11, %v674_v27, %v911_v24 }
  0x66   : > { %v694_v42 = vshrl.u32 %v12012_v26, 16  ;;  %v1210_v46 = vsel %vm13978_vm13, %v1205_v31, %v1209_v32  ;;  %v1212_v49 = vshrl.u32 %v14158_v37, 16  ;;  %v1215_v51 = vshll.u32 %v14158_v37, 16  ;;  %913 = vst [vmem:[#allocation2 + $0x6c] sm:$0xf] %v912_v41 }
  0x67   : > { %v14164_v47 = vld [vmem:[#allocation2 + $0x64] sm:$0xf]  ;;  %v1008_v48 = vld [vmem:[#allocation2 + $0x68] sm:$0x1]  ;;  %v11258_v54 = vcombine.low %v1200_v55, %v1210_v46  ;;  %v683_v33 = vsel %vm13964_vm12, %v675_v28, %v682_v39  ;;  %v916_v63 = vsel %vm13891_vm5, %v684_v40, %v915_v34  ;;  %v688_v9 = vrot.slane %v686_v35, 7 }
  0x68   : > { %v1221_v57 = vshll.u32 %v14164_v47, 16  ;;  %v1225_v58 = vshrl.u32 %v14164_v47, 16  ;;  %v1231_v59 = vshll.u32 %v1008_v48, 16  ;;  %v1214_v43 = vrot.slane %v1212_v49, 4  ;;  %914 = vst.msk [vmem:[#allocation2 + $0x70] sm:$0xf] %vm312_vm1, %v683_v33 }
  0x69   : > { %v1217_v61 = vrot.slane %v1215_v51, 5  ;;  %v918_v5 = vld [vmem:[#allocation2 + $0x78] sm:$0xf]  ;;  %12395 = vmatmul.mubr.msk.bf16.gmra.mrb[12].mxu0 %vm1453_vm14, %v11258_v54  ;;  %917 = vst [vmem:[#allocation2 + $0x74] sm:$0x1] %v916_v63  ;;  %v696_v11 = vrot.slane %v694_v42, 7  ;;  %v691_v15 = vor.u32 %v689_v36, %v688_v9 }
  0x6a   : > { %v1223_v1 = vrot.slane %v1221_v57, 5  ;;  %v1227_v6 = vrot.slane %v1225_v58, 4  ;;  %v1233_v8 = vrot.slane %v1231_v59, 5  ;;  %v697_v13 = vshll.u32 %v12012_v26, 16  ;;  %v922_v20 = vld [vmem:[#allocation2 + $0x80] sm:$0x1] }
  0x6b   : > { %v1218_v10 = vor.u32 %v1217_v61, %v1214_v43  ;;  %v358_v14 = vsel %vm13891_vm5, 0, %v357_v38  ;;  %v692_v53 = vrot.slane %v688_v9, 4  ;;  %v414_v16 = vsel %vm13899_vm7, 0, %v413_v0  ;;  %v302_v26 = vld [vmem:[%s13936_s10 + $0xb0] sm:$0xff]  ;;  %v303_v43 = vld [vmem:[%s13936_s10 + $0xb8] sm:$0xff] }
  0x6c   : > { %v1228_v7 = vor.u32 %v1227_v6, %v1223_v1  ;;  %359 = vst [vmem:[#allocation2 + $0x84] sm:$0x1] %v358_v14  ;;  %v699_v18 = vor.u32 %v697_v13, %v696_v11  ;;  %v701_v44 = vrot.slane %v696_v11, 4  ;;  %415 = vst [vmem:[#allocation2 + $0x8c] sm:$0x1] %v414_v16  ;;  %v919_v12 = vsel %vm13959_vm11, %v691_v15, %v918_v5 }
  0x6d   : > { %v1219_v17 = vrot.slane %v1218_v10, 4  ;;  %v14181_v23 = vld [vmem:[#allocation2 + $0x6c] sm:$0xf]  ;;  %v703_v24 = vshrl.u32 %v12013_v52, 16  ;;  %v706_v25 = vshll.u32 %v12013_v52, 16  ;;  %v711_v34 = vshrl.u32 %v12014_v21, 16 }
  0x6e   : > { %v1229_v22 = vrot.slane %v1228_v7, 4  ;;  %v1236_v27 = vshrl.u32 %v14181_v23, 16  ;;  %v1239_v28 = vshll.u32 %v14181_v23, 16  ;;  %v700_v29 = vsel %vm13964_vm12, %v692_v53, %v699_v18  ;;  %920 = vst [vmem:[#allocation2 + $0x78] sm:$0xf] %v919_v12 }
  0x6f   : > { %v1224_v55 = vsel %vm13978_vm13, %v1219_v17, %v1223_v1  ;;  %921 = vst.msk [vmem:[#allocation2 + $0x7c] sm:$0xf] %vm312_vm1, %v700_v29  ;;  %v923_v31 = vsel %vm13891_vm5, %v701_v44, %v922_v20  ;;  %v705_v32 = vrot.slane %v703_v24, 7  ;;  %v360_v35 = vld [vmem:[#allocation2 + $0x90] sm:$0x1]  ;;  %v12015_v38 = vpack.c.bf16 %v302_v26, %v302_v26 }
  0x70   : > { %v1234_v30 = vsel %vm13978_vm13, %v1229_v22, %v1233_v8  ;;  %v14197_v39 = vld [vmem:[#allocation2 + $0x70] sm:$0xf]  ;;  %v14199_v40 = vld [vmem:[#allocation2 + $0x74] sm:$0x1]  ;;  %v1238_v41 = vrot.slane %v1236_v27, 4  ;;  %v1241_v42 = vrot.slane %v1239_v28, 5  ;;  %v12016_v14 = vpack.c.bf16 %v303_v43, %v303_v43 }
  0x71   : > { %v11259_v36 = vcombine.low %v1224_v55, %v1234_v30  ;;  %924 = vst [vmem:[#allocation2 + $0x80] sm:$0x1] %v923_v31  ;;  %v1245_v46 = vshll.u32 %v14197_v39, 16  ;;  %v1249_v48 = vshrl.u32 %v14197_v39, 16  ;;  %v1255_v49 = vshll.u32 %v14199_v40, 16  ;;  %v304_v31 = vld [vmem:[%s13936_s10 + $0xc0] sm:$0xff] }
  0x72   : > { %v708_v51 = vor.u32 %v706_v25, %v705_v32  ;;  %v416_v52 = vld [vmem:[#allocation2 + $0x98] sm:$0x1]  ;;  %v1242_v54 = vor.u32 %v1241_v42, %v1238_v41  ;;  %v709_v57 = vrot.slane %v705_v32, 4  ;;  %v713_v58 = vrot.slane %v711_v34, 7  ;;  %v363_v32 = vld [vmem:[#allocation2 + $0x9c] sm:$0x1] }
  0x73   : > { %12398 = vmatprep.mubr.msk.bf16.mxu0 %vm1453_vm14, %v11259_v36  ;;  %v714_v59 = vshll.u32 %v12014_v21, 16  ;;  %v925_v60 = vld [vmem:[#allocation2 + $0x84] sm:$0xf]  ;;  %v1247_v61 = vrot.slane %v1245_v46, 5  ;;  %v1251_v33 = vrot.slane %v1249_v48, 4  ;;  %v1257_v63 = vrot.slane %v1255_v49, 5 }
  0x74   : > { %v926_v5 = vsel %vm13959_vm11, %v708_v51, %v925_v60  ;;  %v1243_v0 = vrot.slane %v1242_v54, 4  ;;  %v718_v6 = vrot.slane %v713_v58, 4  ;;  %v929_v8 = vld [vmem:[#allocation2 + $0x8c] sm:$0x1]  ;;  %v361_v9 = vsel %vm13891_vm5, 0, %v360_v35 }
  0x75   : > { %v716_v1 = vor.u32 %v714_v59, %v713_v58  ;;  %927 = vst [vmem:[#allocation2 + $0x84] sm:$0xf] %v926_v5  ;;  %v1252_v10 = vor.u32 %v1251_v33, %v1247_v61  ;;  %v14210_v11 = vld [vmem:[#allocation2 + $0x78] sm:$0xf]  ;;  %362 = vst [vmem:[#allocation2 + $0x90] sm:$0x1] %v361_v9  ;;  %v12017_v9 = vpack.c.bf16 %v304_v31, %v304_v31 }
  0x76   : > { %v417_v13 = vsel %vm13899_vm7, 0, %v416_v52  ;;  %v720_v7 = vshrl.u32 %v12015_v38, 16  ;;  %v1248_v15 = vsel %vm13978_vm13, %v1243_v0, %v1247_v61  ;;  %v14216_v53 = vld [vmem:[#allocation2 + $0x7c] sm:$0xf]  ;;  %v1260_v16 = vshrl.u32 %v14210_v11, 16 }
  0x77   : > { %v1263_v17 = vshll.u32 %v14210_v11, 16  ;;  %v717_v18 = vsel %vm13964_vm12, %v709_v57, %v716_v1  ;;  %418 = vst [vmem:[#allocation2 + $0x98] sm:$0x1] %v417_v13  ;;  %v1253_v44 = vrot.slane %v1252_v10, 4  ;;  %v1269_v21 = vshll.u32 %v14216_v53, 16  ;;  %v307_v31 = vld [vmem:[%s13936_s10 + $0xd8] sm:$0xff] }
  0x78   : > { %v14222_v20 = vld [vmem:[#allocation2 + $0x80] sm:$0x1]  ;;  %v1273_v22 = vshrl.u32 %v14216_v53, 16  ;;  %928 = vst.msk [vmem:[#allocation2 + $0x88] sm:$0xf] %vm312_vm1, %v717_v18  ;;  %v930_v12 = vsel %vm13891_vm5, %v718_v6, %v929_v8  ;;  %v1262_v24 = vrot.slane %v1260_v16, 4 }
  0x79   : > { %v1265_v25 = vrot.slane %v1263_v17, 5  ;;  %v1279_v26 = vshll.u32 %v14222_v20, 16  ;;  %931 = vst [vmem:[#allocation2 + $0x8c] sm:$0x1] %v930_v12  ;;  %v722_v55 = vrot.slane %v720_v7, 7  ;;  %v1258_v27 = vsel %vm13978_vm13, %v1253_v44, %v1257_v63  ;;  %v305_v63 = vld [vmem:[%s13936_s10 + $0xc8] sm:$0xff] }
  0x7a   : > { %v1271_v28 = vrot.slane %v1269_v21, 5  ;;  %v1275_v29 = vrot.slane %v1273_v22, 4  ;;  %v723_v30 = vshll.u32 %v12015_v38, 16  ;;  %v11260_v34 = vcombine.low %v1248_v15, %v1258_v27  ;;  %v419_v42 = vld [vmem:[#allocation2 + $0xa4] sm:$0x1]  ;;  %v306_v21 = vld [vmem:[%s13936_s10 + $0xd0] sm:$0xff] }
  0x7b   : > { %v1266_v35 = vor.u32 %v1265_v25, %v1262_v24  ;;  %v1281_v36 = vrot.slane %v1279_v26, 5  ;;  %v726_v41 = vrot.slane %v722_v55, 4  ;;  %v728_v51 = vshrl.u32 %v12016_v14, 16  ;;  %v366_v22 = vld [vmem:[#allocation2 + $0xa8] sm:$0x1] }
  0x7c   : > { %v1276_v46 = vor.u32 %v1275_v29, %v1271_v28  ;;  %v14233_v48 = vld [vmem:[#allocation2 + $0x84] sm:$0xf]  ;;  %v725_v49 = vor.u32 %v723_v30, %v722_v55  ;;  %v731_v52 = vshll.u32 %v12016_v14, 16  ;;  %12399 = vmatmul.mubr.msk.bf16.gmra.mrb[16].mxu0 %vm1453_vm14, %v11260_v34  ;;  %v932_v58 = vld [vmem:[#allocation2 + $0x90] sm:$0xf]  ;;  %v364_v59 = vsel %vm13891_vm5, 0, %v363_v32 }
  0x7d   : > { %v1267_v54 = vrot.slane %v1266_v35, 4  ;;  %v1284_v57 = vshrl.u32 %v14233_v48, 16  ;;  %v1287_v38 = vshll.u32 %v14233_v48, 16  ;;  %v730_v43 = vrot.slane %v728_v51, 7  ;;  %365 = vst [vmem:[#allocation2 + $0x9c] sm:$0x1] %v364_v59 }
  0x7e   : > { %v1277_v60 = vrot.slane %v1276_v46, 4  ;;  %v933_v61 = vsel %vm13959_vm11, %v725_v49, %v932_v58  ;;  %v936_v33 = vld [vmem:[#allocation2 + $0x98] sm:$0x1]  ;;  %v420_v5 = vsel %vm13899_vm7, 0, %v419_v42  ;;  %v12018_v26 = vpack.c.bf16 %v305_v63, %v305_v63  ;;  %v422_v55 = vld [vmem:[#allocation2 + $0xb0] sm:$0x1] }
  0x7f   : > { %v1272_v0 = vsel %vm13978_vm13, %v1267_v54, %v1271_v28  ;;  %v14247_v1 = vld [vmem:[#allocation2 + $0x88] sm:$0xf]  ;;  %v1286_v6 = vrot.slane %v1284_v57, 4  ;;  %v1289_v8 = vrot.slane %v1287_v38, 5  ;;  %934 = vst [vmem:[#allocation2 + $0x90] sm:$0xf] %v933_v61  ;;  %v733_v15 = vor.u32 %v731_v52, %v730_v43 }
  0x80   : > { %421 = vst [vmem:[#allocation2 + $0xa4] sm:$0x1] %v420_v5  ;;  %v1282_v10 = vsel %vm13978_vm13, %v1277_v60, %v1281_v36  ;;  %v14251_v13 = vld [vmem:[#allocation2 + $0x8c] sm:$0x1]  ;;  %v1293_v14 = vshll.u32 %v14247_v1, 16  ;;  %v1297_v7 = vshrl.u32 %v14247_v1, 16  ;;  %v12019_v58 = vpack.c.bf16 %v306_v21, %v306_v21 }
  0x81   : > { %v11261_v16 = vcombine.low %v1272_v0, %v1282_v10  ;;  %v1290_v17 = vor.u32 %v1289_v8, %v1286_v6  ;;  %v1303_v18 = vshll.u32 %v14251_v13, 16  ;;  %v735_v44 = vrot.slane %v730_v43, 4  ;;  %v425_v21 = vld [vmem:[#allocation2 + $0xbc] sm:$0x1] }
  0x82   : > { %v1295_v12 = vrot.slane %v1293_v14, 5  ;;  %v1299_v24 = vrot.slane %v1297_v7, 4  ;;  %v734_v25 = vsel %vm13964_vm12, %v726_v41, %v733_v15  ;;  %v737_v30 = vshrl.u32 %v12017_v9, 16  ;;  %v369_v7 = vld [vmem:[#allocation2 + $0xb4] sm:$0x1] }
  0x83   : > { %12402 = vmatprep.mubr.msk.bf16.mxu0 %vm1453_vm14, %v11261_v16  ;;  %v1291_v27 = vrot.slane %v1290_v17, 4  ;;  %v1305_v28 = vrot.slane %v1303_v18, 5  ;;  %935 = vst.msk [vmem:[#allocation2 + $0x94] sm:$0xf] %vm312_vm1, %v734_v25  ;;  %v937_v29 = vsel %vm13891_vm5, %v735_v44, %v936_v33  ;;  %v740_v34 = vshll.u32 %v12017_v9, 16 }
  0x84   : > { %v1300_v32 = vor.u32 %v1299_v24, %v1295_v12  ;;  %938 = vst [vmem:[#allocation2 + $0x98] sm:$0x1] %v937_v29  ;;  %v745_v35 = vshrl.u32 %v12018_v26, 16  ;;  %v748_v36 = vshll.u32 %v12018_v26, 16  ;;  %v739_v42 = vrot.slane %v737_v30, 7  ;;  %v308_v30 = vld [vmem:[%s13936_s10 + $0xe0] sm:$0xff] }
  0x85   : > { %v1296_v41 = vsel %vm13978_vm13, %v1291_v27, %v1295_v12  ;;  %v939_v46 = vld [vmem:[#allocation2 + $0x9c] sm:$0xf]  ;;  %v367_v49 = vsel %vm13891_vm5, 0, %v366_v22  ;;  %v423_v51 = vsel %vm13899_vm7, 0, %v422_v55  ;;  %v12020_v59 = vpack.c.bf16 %v307_v31, %v307_v31 }
  0x86   : > { %v1301_v52 = vrot.slane %v1300_v32, 4  ;;  %v14270_v54 = vld [vmem:[#allocation2 + $0x90] sm:$0xf]  ;;  %v747_v57 = vrot.slane %v745_v35, 7  ;;  %368 = vst [vmem:[#allocation2 + $0xa8] sm:$0x1] %v367_v49  ;;  %v742_v61 = vor.u32 %v740_v34, %v739_v42 }
  0x87   : > { %v943_v38 = vld [vmem:[#allocation2 + $0xa4] sm:$0x1]  ;;  %424 = vst [vmem:[#allocation2 + $0xb0] sm:$0x1] %v423_v51  ;;  %v1308_v60 = vshrl.u32 %v14270_v54, 16  ;;  %v1311_v43 = vshll.u32 %v14270_v54, 16 }
  0x88   : > { %v743_v33 = vrot.slane %v739_v42, 4  ;;  %v1306_v63 = vsel %vm13978_vm13, %v1301_v52, %v1305_v28  ;;  %v750_v5 = vor.u32 %v748_v36, %v747_v57  ;;  %v752_v0 = vrot.slane %v747_v57, 4 }
  0x89   : > { %v754_v6 = vshrl.u32 %v12019_v58, 16  ;;  %v11262_v8 = vcombine.low %v1296_v41, %v1306_v63  ;;  %v1310_v9 = vrot.slane %v1308_v60, 4  ;;  %v1313_v10 = vrot.slane %v1311_v43, 5 }
  0x8a   : > { %v940_v14 = vsel %vm13959_vm11, %v742_v61, %v939_v46  ;;  %v14278_v15 = vld [vmem:[#allocation2 + $0x94] sm:$0xf]  ;;  %v751_v16 = vsel %vm13964_vm12, %v743_v33, %v750_v5  ;;  %v944_v17 = vsel %vm13891_vm5, %v752_v0, %v943_v38  ;;  %v757_v44 = vshll.u32 %v12019_v58, 16  ;;  %v309_v58 = vld [vmem:[%s13936_s10 + $0xe8] sm:$0xff] }
  0x8b   : > { %941 = vst [vmem:[#allocation2 + $0x9c] sm:$0xf] %v940_v14  ;;  %v756_v18 = vrot.slane %v754_v6, 7  ;;  %12403 = vmatmul.mubr.msk.bf16.gmra.mrb[20].mxu0 %vm1453_vm14, %v11262_v8  ;;  %v14285_v22 = vld [vmem:[#allocation2 + $0x98] sm:$0x1]  ;;  %v1314_v12 = vor.u32 %v1313_v10, %v1310_v9  ;;  %v1317_v24 = vshll.u32 %v14278_v15, 16  ;;  %v12022_v9 = vpack.c.bf16 %v309_v58, %v309_v58 }
  0x8c   : > { %v1321_v25 = vshrl.u32 %v14278_v15, 16  ;;  %942 = vst.msk [vmem:[#allocation2 + $0xa0] sm:$0xf] %vm312_vm1, %v751_v16  ;;  %945 = vst [vmem:[#allocation2 + $0xa4] sm:$0x1] %v944_v17  ;;  %v762_v26 = vshrl.u32 %v12020_v59, 16 }
  0x8d   : > { %v1327_v55 = vshll.u32 %v14285_v22, 16  ;;  %v759_v27 = vor.u32 %v757_v44, %v756_v18  ;;  %v760_v28 = vrot.slane %v756_v18, 4  ;;  %v765_v29 = vshll.u32 %v12020_v59, 16  ;;  %v946_v36 = vld [vmem:[#allocation2 + $0xa8] sm:$0xf] }
  0x8e   : > { %v1315_v31 = vrot.slane %v1314_v12, 4  ;;  %v1319_v32 = vrot.slane %v1317_v24, 5  ;;  %v1323_v34 = vrot.slane %v1321_v25, 4  ;;  %v764_v35 = vrot.slane %v762_v26, 7  ;;  %v950_v42 = vld [vmem:[#allocation2 + $0xb0] sm:$0x1] }
  0x8f   : > { %v947_v41 = vsel %vm13959_vm11, %v759_v27, %v946_v36  ;;  %v370_v46 = vsel %vm13891_vm5, 0, %v369_v7  ;;  %v426_v49 = vsel %vm13899_vm7, 0, %v425_v21  ;;  %v1329_v52 = vrot.slane %v1327_v55, 5 }
  0x90   : > { %v1324_v51 = vor.u32 %v1323_v34, %v1319_v32  ;;  %v767_v57 = vor.u32 %v765_v29, %v764_v35  ;;  %v769_v38 = vrot.slane %v764_v35, 4  ;;  %948 = vst [vmem:[#allocation2 + $0xa8] sm:$0xf] %v947_v41  ;;  %371 = vst [vmem:[#allocation2 + $0xb4] sm:$0x1] %v370_v46  ;;  %v12021_v59 = vpack.c.bf16 %v308_v30, %v308_v30 }
  0x91   : > { %427 = vst [vmem:[#allocation2 + $0xbc] sm:$0x1] %v426_v49  ;;  %v1320_v60 = vsel %vm13978_vm13, %v1315_v31, %v1319_v32  ;;  %v779_v29 = vshrl.u32 %v12022_v9, 16  ;;  %v782_v34 = vshll.u32 %v12022_v9, 16  ;;  %vm2007_vm15 = vcmask 1042432  }
  0x92   : > { %v1325_v43 = vrot.slane %v1324_v51, 4  ;;  %v14301_v61 = vld [vmem:[#allocation2 + $0x9c] sm:$0xf]  ;;  %v768_v33 = vsel %vm13964_vm12, %v760_v28, %v767_v57  ;;  %v951_v63 = vsel %vm13891_vm5, %v769_v38, %v950_v42  ;;  %v771_v21 = vshrl.u32 %v12021_v59, 16 }
  0x93   : > { %v14307_v5 = vld [vmem:[#allocation2 + $0xa0] sm:$0xf]  ;;  %v14309_v0 = vld [vmem:[#allocation2 + $0xa4] sm:$0x1]  ;;  %v1332_v6 = vshrl.u32 %v14301_v61, 16  ;;  %v1335_v8 = vshll.u32 %v14301_v61, 16 }
  0x94   : > { %949 = vst.msk [vmem:[#allocation2 + $0xac] sm:$0xf] %vm312_vm1, %v768_v33  ;;  %952 = vst [vmem:[#allocation2 + $0xb0] sm:$0x1] %v951_v63  ;;  %v1330_v10 = vsel %vm13978_vm13, %v1325_v43, %v1329_v52  ;;  %v1341_v14 = vshll.u32 %v14307_v5, 16  ;;  %v1345_v7 = vshrl.u32 %v14307_v5, 16 }
  0x95   : > { %v1351_v16 = vshll.u32 %v14309_v0, 16  ;;  %v11263_v17 = vcombine.low %v1320_v60, %v1330_v10  ;;  %v1334_v18 = vrot.slane %v1332_v6, 4  ;;  %v1337_v44 = vrot.slane %v1335_v8, 5 }
  0x96   : > { %v1343_v12 = vrot.slane %v1341_v14, 5  ;;  %v1347_v24 = vrot.slane %v1345_v7, 4  ;;  %v774_v25 = vshll.u32 %v12021_v59, 16  ;;  %v773_v28 = vrot.slane %v771_v21, 7 }
  0x97   : > { %12406 = vmatprep.mubr.msk.bf16.mxu0 %vm1453_vm14, %v11263_v17  ;;  %v1338_v26 = vor.u32 %v1337_v44, %v1334_v18  ;;  %v1353_v55 = vrot.slane %v1351_v16, 5  ;;  %v14320_v27 = vld [vmem:[#allocation2 + $0xa8] sm:$0xf]  ;;  %v781_v41 = vrot.slane %v779_v29, 7  ;;  %v953_v42 = vld [vmem:[#allocation2 + $0xb4] sm:$0xf]  ;;  %v11296_v29 = vcombine.low %v14301_v61, %v14307_v5 }
  0x98   : > { %v1348_v30 = vor.u32 %v1347_v24, %v1343_v12  ;;  %v1356_v31 = vshrl.u32 %v14320_v27, 16  ;;  %v1359_v32 = vshll.u32 %v14320_v27, 16  ;;  %v777_v36 = vrot.slane %v773_v28, 4  ;;  %v957_v43 = vld [vmem:[#allocation2 + $0xbc] sm:$0x1] }
  0x99   : > { %v1339_v35 = vrot.slane %v1338_v26, 4  ;;  %v776_v57 = vor.u32 %v774_v25, %v773_v28  ;;  %v784_v6 = vor.u32 %v782_v34, %v781_v41  ;;  %v786_v8 = vrot.slane %v781_v41, 4  ;;  %v13755_v61 = vld [vmem:[#allocation2 + $0x14] sm:$0x1] }
  0x9a   : > { %v1349_v46 = vrot.slane %v1348_v30, 4  ;;  %v1358_v52 = vrot.slane %v1356_v31, 4  ;;  %v1361_v58 = vrot.slane %v1359_v32, 5  ;;  %v11293_v24 = vcombine.low %v14210_v11, %v14216_v53 }
  0x9b   : > { %v14324_v49 = vld [vmem:[#allocation2 + $0xac] sm:$0xf]  ;;  %v14326_v51 = vld [vmem:[#allocation2 + $0xb0] sm:$0x1]  ;;  %v1344_v38 = vsel %vm13978_vm13, %v1339_v35, %v1343_v12  ;;  %v785_v16 = vsel %vm13964_vm12, %v777_v36, %v784_v6  ;;  %v954_v17 = vsel %vm13959_vm11, %v776_v57, %v953_v42  ;;  %v958_v18 = vsel %vm13891_vm5, %v786_v8, %v957_v43 }
  0x9c   : > { %v1365_v59 = vshll.u32 %v14324_v49, 16  ;;  %v1369_v60 = vshrl.u32 %v14324_v49, 16  ;;  %v1354_v33 = vsel %vm13978_vm13, %v1349_v46, %v1353_v55  ;;  %v1375_v63 = vshll.u32 %v14326_v51, 16  ;;  %955 = vst [vmem:[#allocation2 + $0xb4] sm:$0xf] %v954_v17  ;;  %v13679_v4 = vld [vmem:[#allocation2 + $0xa8] sm:$0xff]  }
  0x9d   : > { %v11264_v9 = vcombine.low %v1344_v38, %v1354_v33  ;;  %v1362_v10 = vor.u32 %v1361_v58, %v1358_v52  ;;  %956 = vst.msk [vmem:[#allocation2 + $0xb8] sm:$0xf] %vm312_vm1, %v785_v16  ;;  %959 = vst [vmem:[#allocation2 + $0xbc] sm:$0x1] %v958_v18  ;;  %v11294_v25 = vcombine.low %v14233_v48, %v14247_v1  ;;  %v13740_v16 = vld [vmem:[#allocation2] sm:$0xf] }
  0x9e   : > { %v1367_v14 = vrot.slane %v1365_v59, 5  ;;  %v1371_v7 = vrot.slane %v1369_v60, 4  ;;  %v1377_v12 = vrot.slane %v1375_v63, 5  ;;  %v11295_v26 = vcombine.low %v14270_v54, %v14278_v15 }
  0x9f   : > { %12407 = vmatmul.mubr.msk.bf16.gmra.mrb[24].mxu0 %vm1453_vm14, %v11264_v9  ;;  %v1363_v44 = vrot.slane %v1362_v10, 4  ;;  %v11297_v30 = vcombine.low %v14320_v27, %v14324_v49  ;;  %vm2008_vm2 = vcmask 1046532   ;;  %v13756_v27 = vld [vmem:[#allocation2 + $0x20] sm:$0x1]  ;;  %vm6730_vm9 = vcmask 64512  }
  0xa0   : > { %v1372_v21 = vor.u32 %v1371_v7, %v1367_v14  ;;  %v14375_v7 = vld [vmem:[#allocation2 + $0x4] sm:$0xf]  ;;  %vm14396_vm8 = vmor %vm2007_vm15, %vm2008_vm2 }
  0xa1   : > { %v1368_v55 = vsel %vm13978_vm13, %v1363_v44, %v1367_v14  ;;  %v11283_v17 = vcombine.low %v13740_v16, %v14375_v7  ;;  %v1969_v44 = vld [vmem:[#allocation2 + $0x78] sm:$0xe]  ;;  %v2012_v11 = vrot.slane %v14375_v7, 5 }
  0xa2   : > { %v1373_v28 = vrot.slane %v1372_v21, 4  ;;  %v13741_v21 = vld [vmem:[#allocation2 + $0xc] sm:$0xf] }
  0xa3   : > { %v14358_v34 = vld [vmem:[#allocation2 + $0xb4] sm:$0xf] }
  0xa4   : > { %v1378_v31 = vsel %vm13978_vm13, %v1373_v28, %v1377_v12  ;;  %v14360_v35 = vld [vmem:[#allocation2 + $0xb8] sm:$0xf]  ;;  %v14362_v36 = vld [vmem:[#allocation2 + $0xbc] sm:$0x1]  ;;  %v1380_v41 = vshrl.u32 %v14358_v34, 16  ;;  %v1383_v42 = vshll.u32 %v14358_v34, 16 }
  0xa5   : > { %v11265_v32 = vcombine.low %v1368_v55, %v1378_v31  ;;  %v1389_v46 = vshll.u32 %v14360_v35, 16  ;;  %v1393_v52 = vshrl.u32 %v14360_v35, 16  ;;  %v1399_v57 = vshll.u32 %v14362_v36, 16  ;;  %v14380_v12 = vld [vmem:[#allocation2 + $0x10] sm:$0xf] }
  0xa6   : > { %v11298_v38 = vcombine.low %v14358_v34, %v14360_v35  ;;  %v1382_v58 = vrot.slane %v1380_v41, 4  ;;  %v1385_v59 = vrot.slane %v1383_v42, 5  ;;  %v11284_v55 = vcombine.low %v13741_v21, %v14380_v12  ;;  %v1970_v28 = vld [vmem:[#allocation2 + $0x84] sm:$0xe]  ;;  %v13743_v31 = vld [vmem:[#allocation2 + $0x18] sm:$0xf] }
  0xa7   : > { %12410 = vmatprep.mubr.msk.bf16.mxu0 %vm1453_vm14, %v11265_v32  ;;  %v1391_v60 = vrot.slane %v1389_v46, 5  ;;  %v1395_v43 = vrot.slane %v1393_v52, 4  ;;  %v1401_v6 = vrot.slane %v1399_v57, 5  ;;  %v14383_v32 = vld [vmem:[#allocation2 + $0x1c] sm:$0xf]  ;;  %v11325_v52 = vrot.slane %v1969_v44, 9 }
  0xa8   : > { %v1386_v33 = vor.u32 %v1385_v59, %v1382_v58  ;;  %v11285_v41 = vcombine.low %v13743_v31, %v14383_v32  ;;  %v13745_v42 = vld [vmem:[%s17737_s1 + $0x4] sm:$0x3]  ;;  %v2082_v57 = vrot.slane %v14216_v53, 5  ;;  %v2085_v58 = vrot.slane %v14222_v20, 5  ;;  %v1971_v59 = vld [vmem:[#allocation2 + $0x90] sm:$0xe] }
  0xa9   : > { %v1396_v63 = vor.u32 %v1395_v43, %v1391_v60  ;;  %v2221_v46 = vsel %vm1502_vm0, %v13745_v42, 0  ;;  %v14392_v43 = vld [vmem:[#allocation2 + $0x28] sm:$0xf]  ;;  %v1972_v20 = vld [vmem:[#allocation2 + $0x9c] sm:$0xe]  ;;  %v2092_v44 = vrot.slane %v14251_v13, 5 }
  0xaa   : > { %v1387_v8 = vrot.slane %v1386_v33, 4  ;;  %v2096_v31 = vrot.slane %v14278_v15, 5  ;;  %v2099_v13 = vrot.slane %v14285_v22, 5 }
  0xab   : > { %v1397_v9 = vrot.slane %v1396_v63, 4 }
  0xac   : > { %v1392_v10 = vsel %vm13978_vm13, %v1387_v8, %v1391_v60  ;;  %v13746_v60 = vld [vmem:[#allocation2 + $0x24] sm:$0xf]  ;;  %v11326_v8 = vrot.slane %v1970_v28, 9  ;;  %v11327_v28 = vrot.slane %v1971_v59, 9 }
  0xad   : > { %v1402_v14 = vsel %vm13978_vm13, %v1397_v9, %v1401_v6  ;;  %v11286_v33 = vcombine.low %v13746_v60, %v14392_v43  ;;  %v14403_v6 = vld [vmem:[%s17737_s1 + $0x6] sm:$0x3]  ;;  %v2089_v9 = vrot.slane %v14247_v1, 5  ;;  %v13754_v1 = vld [vmem:[#allocation2 + $0x8] sm:$0x1] }
  0xae   : > { %v11266_v18 = vcombine.low %v1392_v10, %v1402_v14  ;;  %v13748_v10 = vld [vmem:[#allocation2 + $0x30] sm:$0xf]  ;;  %v14407_v14 = vld [vmem:[#allocation2 + $0x34] sm:$0xf]  ;;  %v14437_v60 = vsel %vm14396_vm8, %v11327_v28, %v2096_v31  ;;  %v2113_v28 = vrot.slane %v14326_v51, 5  ;;  %v2120_v51 = vrot.slane %v14362_v36, 5 }
  0xaf   : > { %v11287_v16 = vcombine.low %v13748_v10, %v14407_v14  ;;  %v14418_v21 = vsel %vm14396_vm8, %v11326_v8, %v2089_v9  ;;  %v2098_v8 = vrot.slane %v2096_v31, 4  ;;  %v2106_v10 = vrot.slane %v14309_v0, 5 }
  0xb0   : > { %12411 = vmatmul.mubr.msk.bf16.gmra.mrb[28].mxu0 %vm1453_vm14, %v11266_v18  ;;  %v2084_v18 = vrot.slane %v2082_v57, 4  ;;  %v2040_v34 = vrot.slane %v14407_v14, 5 }
  0xb1   : > { %12416 = vmatprep.mubr.msk.bf16.mxu0 %vm1453_vm14, %v11283_v17  ;;  %v14412_v17 = vsel %vm14396_vm8, %v11325_v52, %v2082_v57  ;;  %v1973_v52 = vld [vmem:[#allocation2 + $0xa8] sm:$0xe] }
  0xb2   : > { %v14425_v42 = vsel %vm14396_vm8, %v2084_v18, %v2085_v58  ;;  %v1974_v58 = vld [vmem:[#allocation2 + $0xb4] sm:$0xe]  ;;  %v14448_v18 = vsel %vm14396_vm8, %v2098_v8, %v2099_v13 }
  0xb3   : > { %v11342_v57 = vcombine.low %v14412_v17, %v14425_v42  ;;  %v11344_v31 = vcombine.low %v14437_v60, %v14448_v18  ;;  %v13668_v60 = vld [vmem:[#allocation2 + $0x24] sm:$0xff]   ;;  %v14643_v18 = vld [vmem:[#allocation2 + $0x34] sm:$0xf] }
  0xb8   : > { %12417 = vmatmul.mubr.msk.bf16.vlgmr.msra.gmra.mrb[0].mxu0 %vm1453_vm14, %v11284_v55  ;;  %v2091_v55 = vrot.slane %v2089_v9, 4 }
  0xb9   : > { %12449 = vmatpush3.bf16.msra.mxu0 %v2221_v46  ;;  %12420 = vmatprep.mubr.msk.bf16.mxu0 %vm1453_vm14, %v11285_v41  ;;  %v11328_v46 = vrot.slane %v1972_v20, 9  ;;  %v2103_v41 = vrot.slane %v14307_v5, 5  ;;  %v2022_v5 = vrot.slane %v13755_v61, 5  ;;  %v1965_v61 = vld [vmem:[#allocation2 + $0x48] sm:$0xe] }
  0xba   : > { %13639 = vmatprep.subr.msk.bf16.mxu0 %vm1502_vm0, %v14403_v6  ;;  %v14433_v59 = vsel %vm14396_vm8, %v2091_v55, %v2092_v44  ;;  %v11329_v44 = vrot.slane %v1973_v52, 9  ;;  %v2110_v55 = vrot.slane %v14324_v49, 5  ;;  %v2029_v49 = vrot.slane %v13756_v27, 5 }
  0xbb   : > { %v11343_v22 = vcombine.low %v14418_v21, %v14433_v59  ;;  %v14443_v9 = vsel %vm14396_vm8, %v11328_v46, %v2103_v41  ;;  %v2105_v20 = vrot.slane %v2103_v41, 4  ;;  %v11330_v46 = vrot.slane %v1974_v58, 9  ;;  %v13666_v21 = vld [vmem:[#allocation2 + $0xc] sm:$0xff]  }
  0xbc   : > { %v2117_v41 = vrot.slane %v14360_v35, 5  ;;  %v14463_v13 = vsel %vm14396_vm8, %v11329_v44, %v2110_v55  ;;  %v2112_v52 = vrot.slane %v2110_v55, 4  ;;  %v14484_v55 = vld [vmem:[#allocation2 + $0x40] sm:$0xf]  ;;  %v1963_v35 = vld [vmem:[#allocation2 + $0x30] sm:$0xe] }
  0xbd   : > { %v14456_v2 = vsel %vm14396_vm8, %v2105_v20, %v2106_v10 }
  0xbe   : > { %v11345_v0 = vcombine.low %v14443_v9, %v14456_v2  ;;  %v14469_v8 = vsel %vm14396_vm8, %v11330_v46, %v2117_v41  ;;  %v2119_v20 = vrot.slane %v2117_v41, 4  ;;  %v14474_v58 = vsel %vm14396_vm8, %v2112_v52, %v2113_v28  ;;  %v13752_v46 = vld [vmem:[#allocation2 + $0x48] sm:$0xf]  ;;  %v14487_v28 = vld [vmem:[#allocation2 + $0x4c] sm:$0xf] }
  0xbf   : > { %v11346_v10 = vcombine.low %v14463_v13, %v14474_v58  ;;  %v11289_v41 = vcombine.low %v13752_v46, %v14487_v28  ;;  %v11290_v52 = vcombine.low %v14124_v45, %v14135_v62  ;;  %v311_v45 = vld [vmem:[%s13936_s10 + $0xf8] sm:$0xff]  ;;  %v14640_v9 = vld [vmem:[%s17737_s1 + $0xa] sm:$0x3]  ;;  %v3587_v13 = vrot.slane %v14643_v18, 5 }
  0xc0   : > { %12421 = vmatmul.mubr.msk.bf16.gmra.mrb[4].mxu0 %vm1453_vm14, %v11286_v33  ;;  %v14480_v44 = vsel %vm14396_vm8, %v2119_v20, %v2120_v51  ;;  %v13750_v33 = vld [vmem:[#allocation2 + $0x3c] sm:$0xf]  ;;  %v11291_v51 = vcombine.low %v14158_v37, %v14164_v47  ;;  %v11292_v20 = vcombine.low %v14181_v23, %v14197_v39  ;;  %v12024_v47 = vpack.c.bf16 %v311_v45, %v311_v45 }
  0xc1   : > { %12424 = vmatprep.mubr.msk.bf16.mxu0 %vm1453_vm14, %v11287_v16  ;;  %v11347_v36 = vcombine.low %v14469_v8, %v14480_v44  ;;  %v11288_v16 = vcombine.low %v13750_v33, %v14484_v55  ;;  %v372_v33 = vld [vmem:[#allocation2 + $0xc0] sm:$0x1]  ;;  %v13669_v44 = vld [vmem:[#allocation2 + $0x30] sm:$0xff]  }
  0xc2   : > { %v373_v62 = vsel %vm13891_vm5, 0, %v372_v33  ;;  %v796_v46 = vshrl.u32 %v12024_v47, 16 }
  0xc3   : > { %374 = vst [vmem:[#allocation2 + $0xc0] sm:$0x1] %v373_v62  ;;  %v2014_v62 = vrot.slane %v2012_v11, 4 }
  0xc8   : > { %12425 = vmatmul.mubr.msk.bf16.gmra.mrb[8].mxu0 %vm1453_vm14, %v11288_v16  ;;  %v310_v16 = vld [vmem:[%s13936_s10 + $0xf0] sm:$0xff] }
  0xc9   : > { %12428 = vmatprep.mubr.msk.bf16.mxu0 %vm1453_vm14, %v11289_v41  ;;  %v12023_v37 = vpack.c.bf16 %v310_v16, %v310_v16  ;;  %v14518_v41 = vrot.slane %v796_v46, 7 }
  0xca   : > { %v960_v16 = vld [vmem:[#allocation2 + $0xc0] sm:$0xf] }
  0xcb   : > { %v788_v23 = vshrl.u32 %v12023_v37, 16  ;;  %v803_v2 = vrot.slane %v14518_v41, 4 }
  0xcd   : > { %v790_v53 = vrot.slane %v788_v23, 7  ;;  %v2026_v23 = vrot.slane %v14383_v32, 5 }
  0xcf   : > { %v794_v33 = vrot.slane %v790_v53, 4 }
  0xd0   : > { %12429 = vmatmul.mubr.msk.bf16.gmra.mrb[12].mxu0 %vm1453_vm14, %v11290_v52  ;;  %v799_v52 = vshll.u32 %v12024_v47, 16  ;;  %v1961_v47 = vld [vmem:[#allocation2 + $0x18] sm:$0xe] }
  0xd1   : > { %12432 = vmatprep.mubr.msk.bf16.mxu0 %vm1453_vm14, %v11291_v51  ;;  %v1959_v51 = vld [vmem:[#allocation2] sm:$0xe] }
  0xd2   : > { %v801_v48 = vor.u32 %v799_v52, %v14518_v41  ;;  %v11315_v45 = vrot.slane %v1959_v51, 9  ;;  %v13670_v41 = vld [vmem:[#allocation2 + $0x3c] sm:$0xff]  }
  0xd4   : > { %v802_v54 = vsel %vm13964_vm12, %v794_v33, %v801_v48  ;;  %v2013_v7 = vsel %vm14396_vm8, %v11315_v45, %v2012_v11  ;;  %v2033_v11 = vrot.slane %v14392_v43, 5  ;;  %v2579_v45 = vsel %vm1502_vm0, %v14403_v6, 0 }
  0xd5   : > { %963 = vst.msk [vmem:[#allocation2 + $0xc4] sm:$0xf] %vm312_vm1, %v802_v54  ;;  %v11319_v43 = vrot.slane %v1963_v35, 9  ;;  %v13758_v54 = vld [vmem:[#allocation2 + $0x38] sm:$0x1]  ;;  %vm5599_vm1 = vcmask 57344  }
  0xd6   : > { %v13762_v35 = vld [vmem:[#allocation2 + $0x64] sm:$0xf] }
  0xd8   : > { %12433 = vmatmul.mubr.msk.bf16.gmra.mrb[16].mxu0 %vm1453_vm14, %v11292_v20 }
  0xd9   : > { %12436 = vmatprep.mubr.msk.bf16.mxu0 %vm1453_vm14, %v11293_v24  ;;  %v791_v24 = vshll.u32 %v12023_v37, 16  ;;  %v1960_v37 = vld [vmem:[#allocation2 + $0xc] sm:$0xe] }
  0xda   : > { %v11316_v46 = vrot.slane %v1960_v37, 9 }
  0xdb   : > { %v793_v20 = vor.u32 %v791_v24, %v790_v53  ;;  %v11317_v53 = vrot.slane %v1961_v47, 9  ;;  %v2028_v24 = vrot.slane %v2026_v23, 4  ;;  %v1964_v47 = vld [vmem:[#allocation2 + $0x3c] sm:$0xe] }
  0xdd   : > { %v961_v15 = vsel %vm13959_vm11, %v793_v20, %v960_v16  ;;  %v2027_v52 = vsel %vm14396_vm8, %v11317_v53, %v2026_v23  ;;  %v2030_v51 = vsel %vm14396_vm8, %v2028_v24, %v2029_v49  ;;  %v1962_v20 = vld [vmem:[#allocation2 + $0x24] sm:$0xe]  ;;  %v2054_v23 = vrot.slane %v14487_v28, 5  ;;  %v13759_v53 = vld [vmem:[#allocation2 + $0x44] sm:$0x1] }
  0xde   : > { %962 = vst [vmem:[#allocation2 + $0xc0] sm:$0xf] %v961_v15  ;;  %v11334_v33 = vcombine.low %v2027_v52, %v2030_v51  ;;  %v11318_v48 = vrot.slane %v1962_v20, 9  ;;  %v2043_v15 = vrot.slane %v13758_v54, 5  ;;  %v2050_v24 = vrot.slane %v13759_v53, 5 }
  0xdf   : > { %v2056_v27 = vrot.slane %v2054_v23, 4  ;;  %v13760_v49 = vld [vmem:[#allocation2 + $0x50] sm:$0x1] }
  0xe0   : > { %12437 = vmatmul.mubr.msk.bf16.gmra.mrb[20].mxu0 %vm1453_vm14, %v11294_v25  ;;  %v2015_v25 = vrot.slane %v13754_v1, 5  ;;  %v2035_v1 = vrot.slane %v2033_v11, 4  ;;  %v2034_v14 = vsel %vm14396_vm8, %v11318_v48, %v2033_v11  ;;  %v13761_v11 = vld [vmem:[#allocation2 + $0x58] sm:$0xf] }
  0xe1   : > { %12440 = vmatprep.mubr.msk.bf16.mxu0 %vm1453_vm14, %v11295_v26  ;;  %v2019_v26 = vrot.slane %v14380_v12, 5  ;;  %v2061_v52 = vrot.slane %v13761_v11, 5 }
  0xe2   : > { %v2016_v50 = vsel %vm14396_vm8, %v2014_v62, %v2015_v25  ;;  %v13757_v25 = vld [vmem:[#allocation2 + $0x2c] sm:$0x1]  ;;  %v2042_v62 = vrot.slane %v2040_v34, 4 }
  0xe3   : > { %v2021_v12 = vrot.slane %v2019_v26, 4  ;;  %v2036_v16 = vrot.slane %v13757_v25, 5 }
  0xe4   : > { %v2044_v37 = vsel %vm14396_vm8, %v2042_v62, %v2043_v15  ;;  %v13764_v15 = vld [vmem:[#allocation2 + $0x68] sm:$0x1] }
  0xe5   : > { %v2023_v32 = vsel %vm14396_vm8, %v2021_v12, %v2022_v5  ;;  %v2037_v6 = vsel %vm14396_vm8, %v2035_v1, %v2036_v16  ;;  %v2063_v16 = vrot.slane %v2061_v52, 4 }
  0xe6   : > { %v11335_v5 = vcombine.low %v2034_v14, %v2037_v6  ;;  %v2071_v14 = vrot.slane %v13764_v15, 5 }
  0xe8   : > { %12441 = vmatmul.mubr.msk.bf16.gmra.mrb[24].mxu0 %vm1453_vm14, %v11296_v29  ;;  %v11332_v29 = vcombine.low %v2013_v7, %v2016_v50  ;;  %v2047_v7 = vrot.slane %v14484_v55, 5  ;;  %v2041_v50 = vsel %vm14396_vm8, %v11319_v43, %v2040_v34  ;;  %v11321_v55 = vrot.slane %v1965_v61, 9  ;;  %v1966_v34 = vld [vmem:[#allocation2 + $0x54] sm:$0xe] }
  0xe9   : > { %12444 = vmatprep.mubr.msk.bf16.mxu0 %vm1453_vm14, %v11297_v30  ;;  %v2020_v30 = vsel %vm14396_vm8, %v11316_v46, %v2019_v26  ;;  %v14560_v26 = vld [vmem:[%s17737_s1 + $0x8] sm:$0x3]  ;;  %v11320_v46 = vrot.slane %v1964_v47, 9  ;;  %v11322_v25 = vrot.slane %v1966_v34, 9 }
  0xea   : > { %v2049_v12 = vrot.slane %v2047_v7, 4  ;;  %v2055_v51 = vsel %vm14396_vm8, %v11321_v55, %v2054_v23  ;;  %v1968_v23 = vld [vmem:[#allocation2 + $0x6c] sm:$0xe] }
  0xeb   : > { %v2048_v28 = vsel %vm14396_vm8, %v11320_v46, %v2047_v7  ;;  %v2062_v6 = vsel %vm14396_vm8, %v11322_v25, %v2061_v52 }
  0xf0   : > { %12445 = vmatmul.mubr.msk.bf16.gmra.mrb[28].mxu0 %vm1453_vm14, %v11298_v38  ;;  %v11333_v38 = vcombine.low %v2020_v30, %v2023_v32  ;;  %v2057_v30 = vrot.slane %v13760_v49, 5  ;;  %v2051_v32 = vsel %vm14396_vm8, %v2049_v12, %v2050_v24  ;;  %v2078_v12 = vrot.slane %v14199_v40, 5  ;;  %v428_v40 = vld [vmem:[#allocation2 + $0xc8] sm:$0x1]  ;;  %v14665_v49 = vld [vmem:[#allocation2 + $0x50] sm:$0x1] }
  0xf1   : > { %12450 = vmatprep.mubr.msk.bf16.mxu0 %vm1453_vm14, %v11332_v29  ;;  %v11336_v29 = vcombine.low %v2041_v50, %v2044_v37  ;;  %v11337_v48 = vcombine.low %v2048_v28, %v2051_v32  ;;  %v2075_v50 = vrot.slane %v14197_v39, 5  ;;  %v429_v17 = vsel %vm13899_vm7, 0, %v428_v40 }
  0xf2   : > { %v2058_v20 = vsel %vm14396_vm8, %v2056_v27, %v2057_v30  ;;  %430 = vst [vmem:[#allocation2 + $0xc8] sm:$0x1] %v429_v17  ;;  %v14663_v27 = vld [vmem:[#allocation2 + $0x4c] sm:$0xf]  ;;  %v3505_v30 = vld [vmem:[#allocation2 + $0x48] sm:$0xe] }
  0xf3   : > { %v11338_v1 = vcombine.low %v2055_v51, %v2058_v20  ;;  %v2077_v46 = vrot.slane %v2075_v50, 4  ;;  %v3601_v28 = vrot.slane %v14663_v27, 5  ;;  %v3604_v32 = vrot.slane %v14665_v49, 5  ;;  %v13671_v51 = vld [vmem:[#allocation2 + $0x48] sm:$0xff]  }
  0xf4   : > { %v11435_v11 = vrot.slane %v3505_v30, 9  ;;  %v2774_v20 = vld [vmem:[#allocation2 + $0xc] sm:$0xf]  ;;  %v14722_v30 = vld [vmem:[#allocation2 + $0x28] sm:$0xf] }
  0xf5   : > { %v2079_v53 = vsel %vm14396_vm8, %v2077_v46, %v2078_v12  ;;  %v3603_v52 = vrot.slane %v3601_v28, 4  ;;  %v2826_v25 = vshll.u32 %v2774_v20, 16 }
  0xf6   : > { %v14672_v34 = vsel %vm14396_vm8, %v11435_v11, %v3601_v28 }
  0xf7   : > { %17866 = vst [vmem:[#allocation8_spill] sm:$0xff] %v14672_v34 }
  0xf8   : > { %12451 = vmatmul.mubr.msk.bf16.vlgmr.msra.gmra.mrb[0].mxu0 %vm1453_vm14, %v11333_v38  ;;  %v2068_v38 = vrot.slane %v13762_v35, 5  ;;  %v13672_v35 = vld [vmem:[#allocation2 + $0x54] sm:$0xff]  }
  0xf9   : > { %12483 = vmatpush3.bf16.msra.mxu0 %v2579_v45  ;;  %12454 = vmatprep.mubr.msk.bf16.mxu0 %vm1453_vm14, %v11334_v33  ;;  %v1967_v33 = vld [vmem:[#allocation2 + $0x60] sm:$0xe]  ;;  %v13763_v45 = vld [vmem:[#allocation2 + $0x5c] sm:$0x1]  ;;  %v964_v42 = vld [vmem:[#allocation2 + $0xc8] sm:$0x1] }
  0xfa   : > { %13640 = vmatprep.subr.msk.bf16.mxu0 %vm1502_vm0, %v14560_v26  ;;  %v2064_v43 = vrot.slane %v13763_v45, 5  ;;  %v11323_v62 = vrot.slane %v1967_v33, 9  ;;  %v2070_v54 = vrot.slane %v2068_v38, 4  ;;  %v965_v59 = vsel %vm13891_vm5, %v803_v2, %v964_v42  ;;  %v14709_v2 = vld [vmem:[#allocation2 + $0x20] sm:$0x1] }
  0xfb   : > { %966 = vst [vmem:[#allocation2 + $0xc8] sm:$0x1] %v965_v59  ;;  %v14678_v33 = vsel %vm14396_vm8, %v3603_v52, %v3604_v32 }
  0xfc   : > { %v2065_v7 = vsel %vm14396_vm8, %v2063_v16, %v2064_v43  ;;  %v2069_v37 = vsel %vm14396_vm8, %v11323_v62, %v2068_v38  ;;  %v2072_v47 = vsel %vm14396_vm8, %v2070_v54, %v2071_v14  ;;  %v14674_v38 = vld [vmem:[#allocation2 + $0x10] sm:$0xf]  ;;  %17867 = vst [vmem:[#allocation9_spill] sm:$0xff] %v14678_v33  ;;  %v14685_v43 = vld [vmem:[#allocation2 + $0x64] sm:$0xf] }
  0xfd   : > { %v11339_v61 = vcombine.low %v2062_v6, %v2065_v7  ;;  %v2832_v16 = vshll.u32 %v14674_v38, 16  ;;  %v2836_v45 = vshrl.u32 %v14674_v38, 16  ;;  %v14687_v62 = vld [vmem:[#allocation2 + $0x68] sm:$0x1]  ;;  %v3507_v54 = vld [vmem:[#allocation2 + $0x60] sm:$0xe] }
  0xfe   : > { %v3615_v15 = vrot.slane %v14685_v43, 5  ;;  %v3618_v14 = vrot.slane %v14687_v62, 5  ;;  %v11437_v6 = vrot.slane %v3507_v54, 9 }
  0xff   : > { %v2838_v46 = vrot.slane %v2836_v45, 4 }
 0x100   : > { %12455 = vmatmul.mubr.msk.bf16.gmra.mrb[4].mxu0 %vm1453_vm14, %v11335_v5  ;;  %v11340_v5 = vcombine.low %v2069_v37, %v2072_v47  ;;  %v14692_v37 = vld [vmem:[#allocation2 + $0x1c] sm:$0xf]  ;;  %v3617_v47 = vrot.slane %v3615_v15, 4  ;;  %v14700_v12 = vsel %vm14396_vm8, %v11437_v6, %v3615_v15  ;;  %v13676_v15 = vld [vmem:[#allocation2 + $0x84] sm:$0xff]   ;;  %v2880_v6 = vshll.u32 %v14722_v30, 16 }
 0x101   : > { %12458 = vmatprep.mubr.msk.bf16.mxu0 %vm1453_vm14, %v11336_v29  ;;  %v11324_v29 = vrot.slane %v1968_v23, 9  ;;  %v13673_v23 = vld [vmem:[#allocation2 + $0x60] sm:$0xff]   ;;  %17868 = vst [vmem:[#allocation10_spill] sm:$0xff] %v14700_v12  ;;  %v2856_v42 = vshll.u32 %v14692_v37, 16 }
 0x103   : > { %v2076_v39 = vsel %vm14396_vm8, %v11324_v29, %v2075_v50  ;;  %v2777_v50 = vld [vmem:[#allocation2 + $0x18] sm:$0xf]  ;;  %v14696_v29 = vrot.slane %v2832_v16, 5  ;;  %v14726_v52 = vrot.slane %v2856_v42, 5 }
 0x104   : > { %v11341_v24 = vcombine.low %v2076_v39, %v2079_v53  ;;  %v13674_v39 = vld [vmem:[#allocation2 + $0x6c] sm:$0xff]   ;;  %v14704_v53 = vsel %vm14396_vm8, %v3617_v47, %v3618_v14  ;;  %v2850_v40 = vshll.u32 %v2777_v50, 16  ;;  %v14756_v42 = vld [vmem:[#allocation2 + $0x98] sm:$0x1] }
 0x105   : > { %17869 = vst [vmem:[#allocation11_spill] sm:$0xff] %v14704_v53  ;;  %v14848_v53 = vld [vmem:[#allocation2 + $0xb8] sm:$0xf] }
 0x108   : > { %12459 = vmatmul.mubr.msk.bf16.gmra.mrb[8].mxu0 %vm1453_vm14, %v11337_v48  ;;  %v2908_v48 = vshrl.u32 %v14643_v18, 16 }
 0x109   : > { %12462 = vmatprep.mubr.msk.bf16.mxu0 %vm1453_vm14, %v11338_v1  ;;  %v2823_v1 = vshrl.u32 %v2774_v20, 16  ;;  %v2783_v20 = vld [vmem:[#allocation2 + $0x30] sm:$0xf] }
 0x10b   : > { %v2825_v7 = vrot.slane %v2823_v1, 4  ;;  %v13675_v1 = vld [vmem:[#allocation2 + $0x78] sm:$0xff]  }
 0x110   : > { %12463 = vmatmul.mubr.msk.bf16.gmra.mrb[12].mxu0 %vm1453_vm14, %v11339_v61  ;;  %v14694_v61 = vld [vmem:[#allocation2 + $0x14] sm:$0x1] }
 0x111   : > { %12466 = vmatprep.mubr.msk.bf16.mxu0 %vm1453_vm14, %v11340_v5  ;;  %v2828_v5 = vrot.slane %v2826_v25, 5 }
 0x113   : > { %v2829_v59 = vor.u32 %v2828_v5, %v2825_v7  ;;  %v2884_v7 = vshrl.u32 %v14722_v30, 16  ;;  %v2898_v5 = vshll.u32 %v2783_v20, 16 }
 0x115   : > { %v14729_v25 = vrot.slane %v2829_v59, 4 }
 0x118   : > { %12467 = vmatmul.mubr.msk.bf16.gmra.mrb[16].mxu0 %vm1453_vm14, %v11341_v24  ;;  %v2847_v24 = vshrl.u32 %v2777_v50, 16 }
 0x119   : > { %12470 = vmatprep.mubr.msk.bf16.mxu0 %vm1453_vm14, %v11342_v57  ;;  %v13667_v57 = vld [vmem:[#allocation2 + $0x18] sm:$0xff]  }
 0x120   : > { %12471 = vmatmul.mubr.msk.bf16.gmra.mrb[20].mxu0 %vm1453_vm14, %v11343_v22  ;;  %v3305_v22 = vsel %vm1502_vm0, %v14560_v26, 0 }
 0x121   : > { %12474 = vmatprep.mubr.msk.bf16.mxu0 %vm1453_vm14, %v11344_v31  ;;  %v14646_v31 = vld [vmem:[#allocation2 + $0x38] sm:$0x1] }
 0x122   : > { %v3590_v58 = vrot.slane %v14646_v31, 5 }
 0x128   : > { %12475 = vmatmul.mubr.msk.bf16.gmra.mrb[24].mxu0 %vm1453_vm14, %v11345_v0  ;;  %v3503_v0 = vld [vmem:[#allocation2 + $0x30] sm:$0xe] }
 0x129   : > { %12478 = vmatprep.mubr.msk.bf16.mxu0 %vm1453_vm14, %v11346_v10  ;;  %v11433_v8 = vrot.slane %v3503_v0, 9  ;;  %v3589_v10 = vrot.slane %v3587_v13, 4  ;;  %v14715_v0 = vld [vmem:[#allocation2 + $0x7c] sm:$0xf] }
 0x12b   : > { %v14658_v26 = vsel %vm14396_vm8, %v3589_v10, %v3590_v58  ;;  %v3629_v58 = vrot.slane %v14715_v0, 5 }
 0x12c   : > { %17865 = vst [vmem:[#allocation7_spill] sm:$0xff] %v14658_v26  ;;  %v14867_v26 = vld [vmem:[#allocation2 + $0x58] sm:$0xf] }
 0x130   : > { %12479 = vmatmul.mubr.msk.bf16.gmra.mrb[28].mxu0 %vm1453_vm14, %v11347_v36  ;;  %v14654_v36 = vsel %vm14396_vm8, %v11433_v8, %v3587_v13  ;;  %v14717_v13 = vld [vmem:[#allocation2 + $0x80] sm:$0x1]  ;;  %v3509_v8 = vld [vmem:[#allocation2 + $0x78] sm:$0xe] }
 0x131   : > { %12484 = vmatprep.mubr.msk.bf16.mxu0 %vm1453_vm14, %v13666_v21  ;;  %17864 = vst [vmem:[#allocation6_spill] sm:$0xff] %v14654_v36  ;;  %v2842_v21 = vshll.u32 %v14694_v61, 16  ;;  %v3632_v10 = vrot.slane %v14717_v13, 5  ;;  %v11439_v32 = vrot.slane %v3509_v8, 9 }
 0x133   : > { %v14724_v11 = vrot.slane %v2842_v21, 5  ;;  %v14737_v54 = vsel %vm14396_vm8, %v11439_v32, %v3629_v58  ;;  %v14763_v32 = vrot.slane %v2880_v6, 5 }
 0x134   : > { %17870 = vst [vmem:[#allocation12_spill] sm:$0xff] %v14737_v54 }
 0x138   : > { %12485 = vmatmul.mubr.msk.bf16.vlgmr.msra.gmra.mrb[0].mxu0 %vm1453_vm14, %v13667_v57  ;;  %v2780_v57 = vld [vmem:[#allocation2 + $0x24] sm:$0xf] }
 0x139   : > { %12517 = vmatpush3.bf16.msra.mxu0 %v3305_v22  ;;  %12488 = vmatprep.mubr.msk.bf16.mxu0 %vm1453_vm14, %v13668_v60  ;;  %v2839_v60 = vor.u32 %v2838_v46, %v14696_v29  ;;  %v2860_v22 = vshrl.u32 %v14692_v37, 16  ;;  %v2871_v28 = vshrl.u32 %v2780_v57, 16  ;;  %v2874_v14 = vshll.u32 %v2780_v57, 16  ;;  %v3510_v57 = vld [vmem:[#allocation2 + $0x84] sm:$0xe] }
 0x13a   : > { %13641 = vmatprep.subr.msk.bf16.mxu0 %vm1502_vm0, %v14640_v9  ;;  %v11440_v8 = vrot.slane %v3510_v57, 9  ;;  %v2904_v57 = vshll.u32 %v14643_v18, 16  ;;  %v2835_v18 = vsel %vm13978_vm13, %v14729_v25, %v14696_v29 }
 0x13b   : > { %v14731_v16 = vrot.slane %v2839_v60, 4  ;;  %v14733_v45 = vrot.slane %v2860_v22, 4  ;;  %v14745_v47 = vrot.slane %v2871_v28, 4  ;;  %v2876_v22 = vrot.slane %v2874_v14, 5  ;;  %v14769_v14 = vld [vmem:[#allocation2 + $0x2c] sm:$0x1] }
 0x13c   : > { %v3646_v28 = vrot.slane %v14756_v42, 5 }
 0x13d   : > { %v2845_v29 = vsel %vm13978_vm13, %v14731_v16, %v14724_v11 }
 0x140   : > { %12489 = vmatmul.mubr.msk.bf16.gmra.mrb[4].mxu0 %vm1453_vm14, %v13669_v44  ;;  %v2849_v44 = vrot.slane %v2847_v24, 4  ;;  %v14751_v24 = vld [vmem:[#allocation2 + $0x8c] sm:$0x1] }
 0x141   : > { %12492 = vmatprep.mubr.msk.bf16.mxu0 %vm1453_vm14, %v13670_v41  ;;  %v2852_v41 = vrot.slane %v2850_v40, 5  ;;  %v14753_v40 = vld [vmem:[#allocation2 + $0x94] sm:$0xf]  ;;  %v3639_v60 = vrot.slane %v14751_v24, 5 }
 0x143   : > { %v2853_v21 = vor.u32 %v2852_v41, %v2849_v44 }
 0x148   : > { %12493 = vmatmul.mubr.msk.bf16.gmra.mrb[8].mxu0 %vm1453_vm14, %v13671_v51  ;;  %v2866_v51 = vshll.u32 %v14709_v2, 16 }
 0x149   : > { %12496 = vmatprep.mubr.msk.bf16.mxu0 %vm1453_vm14, %v13672_v35  ;;  %v3631_v35 = vrot.slane %v3629_v58, 4  ;;  %v3511_v58 = vld [vmem:[#allocation2 + $0x90] sm:$0xe] }
 0x14a   : > { %v11441_v41 = vrot.slane %v3511_v58, 9  ;;  %v2863_v58 = vor.u32 %v14733_v45, %v14726_v52  ;;  %v14810_v45 = vrot.slane %v2904_v57, 5 }
 0x14b   : > { %v14743_v50 = vsel %vm14396_vm8, %v3631_v35, %v3632_v10  ;;  %v3643_v10 = vrot.slane %v14753_v40, 5 }
 0x14c   : > { %17871 = vst [vmem:[#allocation13_spill] sm:$0xff] %v14743_v50  ;;  %v14819_v56 = vrot.slane %v2863_v58, 4 }
 0x14d   : > { %v3645_v17 = vrot.slane %v3643_v10, 4 }
 0x150   : > { %12497 = vmatmul.mubr.msk.bf16.gmra.mrb[12].mxu0 %vm1453_vm14, %v13673_v23  ;;  %v2895_v23 = vshrl.u32 %v2783_v20, 16  ;;  %v2886_v20 = vrot.slane %v2884_v7, 4  ;;  %v14779_v7 = vsel %vm14396_vm8, %v11441_v41, %v3643_v10  ;;  %v2786_v10 = vld [vmem:[#allocation2 + $0x3c] sm:$0xf] }
 0x151   : > { %12500 = vmatprep.mubr.msk.bf16.mxu0 %vm1453_vm14, %v13674_v39  ;;  %v14749_v39 = vld [vmem:[#allocation2 + $0x88] sm:$0xf]  ;;  %17874 = vst [vmem:[#allocation16_spill] sm:$0xff] %v14779_v7 }
 0x152   : > { %v3636_v59 = vrot.slane %v14749_v39, 5  ;;  %v2897_v35 = vrot.slane %v2895_v23, 4  ;;  %v13678_v23 = vld [vmem:[#allocation2 + $0x9c] sm:$0xff]   ;;  %v2887_v41 = vor.u32 %v2886_v20, %v14763_v32  ;;  %v2922_v20 = vshll.u32 %v2786_v10, 16 }
 0x154   : > { %v3638_v44 = vrot.slane %v3636_v59, 4  ;;  %v14767_v46 = vsel %vm14396_vm8, %v11440_v8, %v3636_v59  ;;  %v14787_v8 = vsel %vm14396_vm8, %v3645_v17, %v3646_v28  ;;  %v2890_v17 = vshll.u32 %v14769_v14, 16  ;;  %v14803_v59 = vld [vmem:[#allocation2 + $0x40] sm:$0xf] }
 0x155   : > { %17872 = vst [vmem:[#allocation14_spill] sm:$0xff] %v14767_v46  ;;  %17875 = vst [vmem:[#allocation17_spill] sm:$0xff] %v14787_v8  ;;  %v2914_v28 = vshll.u32 %v14646_v31, 16  ;;  %v2919_v31 = vshrl.u32 %v2786_v10, 16  ;;  %v2928_v11 = vshll.u32 %v14803_v59, 16  ;;  %v2932_v16 = vshrl.u32 %v14803_v59, 16 }
 0x156   : > { %v14775_v6 = vsel %vm14396_vm8, %v3638_v44, %v3639_v60  ;;  %v14793_v60 = vrot.slane %v2853_v21, 4  ;;  %v2877_v44 = vor.u32 %v2876_v22, %v14745_v47  ;;  %17876 = vst [vmem:[#allocation18_spill] sm:$0xff] %v14803_v59  ;;  %v2910_v21 = vrot.slane %v2908_v48, 4  ;;  %v14812_v47 = vld [vmem:[#allocation2 + $0xac] sm:$0xf]  ;;  %v13680_v46 = vld [vmem:[#allocation2 + $0xb4] sm:$0xff]  }
 0x157   : > { %17873 = vst [vmem:[#allocation15_spill] sm:$0xff] %v14775_v6  ;;  %v14814_v22 = vld [vmem:[#allocation2 + $0xb0] sm:$0x1]  ;;  %v2789_v48 = vld [vmem:[#allocation2 + $0x48] sm:$0xf]  ;;  %v14825_v57 = vrot.slane %v2887_v41, 4 }
 0x158   : > { %12501 = vmatmul.mubr.msk.bf16.gmra.mrb[16].mxu0 %vm1453_vm14, %v13675_v1  ;;  %v2900_v1 = vrot.slane %v2898_v5, 5  ;;  %v14781_v5 = vrot.slane %v2866_v51, 5  ;;  %v3513_v51 = vld [vmem:[#allocation2 + $0xa8] sm:$0xe]  ;;  %v3660_v55 = vrot.slane %v14814_v22, 5  ;;  %v2911_v7 = vor.u32 %v2910_v21, %v14810_v45 }
 0x159   : > { %12504 = vmatprep.mubr.msk.bf16.mxu0 %vm1453_vm14, %v13676_v15  ;;  %v13677_v15 = vld [vmem:[#allocation2 + $0x90] sm:$0xff]   ;;  %v14832_v58 = vrot.slane %v2914_v28, 5  ;;  %v2943_v50 = vshrl.u32 %v2789_v48, 16  ;;  %v2934_v54 = vrot.slane %v2932_v16, 4  ;;  %v2946_v21 = vshll.u32 %v2789_v48, 16 }
 0x15a   : > { %v2901_v25 = vor.u32 %v2900_v1, %v2897_v35  ;;  %v11443_v35 = vrot.slane %v3513_v51, 9  ;;  %v14823_v1 = vrot.slane %v2877_v44, 4  ;;  %v2921_v51 = vrot.slane %v2919_v31, 4  ;;  %v14852_v31 = vld [vmem:[#allocation2 + $0xc4] sm:$0xf] }
 0x15b   : > { %v2924_v44 = vrot.slane %v2922_v20, 5  ;;  %v11398_v20 = vcombine.low %v2835_v18, %v2845_v29  ;;  %v3514_v16 = vld [vmem:[#allocation2 + $0xb4] sm:$0xe]  ;;  %v3664_v48 = vrot.slane %v14848_v53, 5  ;;  %v2945_v33 = vrot.slane %v2943_v50, 4 }
 0x15c   : > { %v14829_v8 = vrot.slane %v2901_v25, 4  ;;  %v14844_v25 = vrot.slane %v2928_v11, 5  ;;  %v14859_v11 = vld [vmem:[#allocation2 + $0xc8] sm:$0x1]  ;;  %v11444_v28 = vrot.slane %v3514_v16, 9  ;;  %v2948_v34 = vrot.slane %v2946_v21, 5 }
 0x15d   : > { %v3674_v18 = vrot.slane %v14859_v11, 5  ;;  %v2925_v29 = vor.u32 %v2924_v44, %v2921_v51  ;;  %v13681_v16 = vld [vmem:[#allocation2 + $0xc0] sm:$0xff]   ;;  %v2952_v59 = vshll.u32 %v14663_v27, 16  ;;  %v2956_v44 = vshrl.u32 %v14663_v27, 16 }
 0x15e   : > { %v2935_v36 = vor.u32 %v2934_v54, %v14844_v25  ;;  %v2869_v27 = vsel %vm13978_vm13, %v14819_v56, %v14781_v5 }
 0x15f   : > { %v2926_v5 = vrot.slane %v2925_v29, 4 }
 0x160   : > { %12505 = vmatmul.mubr.msk.bf16.gmra.mrb[20].mxu0 %vm1453_vm14, %v13677_v15  ;;  %v3657_v15 = vrot.slane %v14812_v47, 5 }
 0x161   : > { %12508 = vmatprep.mubr.msk.bf16.mxu0 %vm1453_vm14, %v13678_v23  ;;  %v14827_v23 = vrot.slane %v2890_v17, 5  ;;  %v14842_v17 = vld [vmem:[#allocation2 + $0x44] sm:$0x1] }
 0x162   : > { %v3659_v10 = vrot.slane %v3657_v15, 4  ;;  %v14836_v6 = vsel %vm14396_vm8, %v11443_v35, %v3657_v15  ;;  %v14850_v15 = vld [vmem:[#allocation2 + $0xbc] sm:$0x1] }
 0x163   : > { %17877 = vst [vmem:[#allocation19_spill] sm:$0xff] %v14836_v6  ;;  %v3667_v35 = vrot.slane %v14850_v15, 5  ;;  %v2938_v6 = vshll.u32 %v14842_v17, 16 }
 0x164   : > { %v14840_v41 = vsel %vm14396_vm8, %v3659_v10, %v3660_v55  ;;  %v2859_v55 = vsel %vm13978_vm13, %v14793_v60, %v14726_v52  ;;  %v2912_v10 = vrot.slane %v2911_v7, 4  ;;  %v2792_v52 = vld [vmem:[#allocation2 + $0x54] sm:$0xf]  ;;  %v3666_v60 = vrot.slane %v3664_v48, 4 }
 0x165   : > { %17878 = vst [vmem:[#allocation20_spill] sm:$0xff] %v14840_v41  ;;  %v3515_v41 = vld [vmem:[#allocation2 + $0xc0] sm:$0xe]  ;;  %v2970_v54 = vshll.u32 %v2792_v52, 16 }
 0x166   : > { %v11445_v12 = vrot.slane %v3515_v41, 9  ;;  %v14877_v51 = vsel %vm14396_vm8, %v3666_v60, %v3667_v35  ;;  %v2967_v41 = vshrl.u32 %v2792_v52, 16  ;;  %v2980_v35 = vshrl.u32 %v14867_v26, 16 }
 0x167   : > { %v2917_v56 = vsel %vm13978_vm13, %v2912_v10, %v14832_v58  ;;  %v2940_v52 = vrot.slane %v2938_v6, 5  ;;  %v14915_v60 = vrot.slane %v2952_v59, 5  ;;  %v11399_v6 = vcombine.low %v2859_v55, %v2869_v27  ;;  %v2801_v27 = vld [vmem:[#allocation2 + $0x78] sm:$0xf] }
 0x168   : > { %12509 = vmatmul.mubr.msk.bf16.gmra.mrb[24].mxu0 %vm1453_vm14, %v13679_v4  ;;  %v3671_v4 = vrot.slane %v14852_v31, 5  ;;  %v2969_v21 = vrot.slane %v2967_v41, 4 }
 0x169   : > { %12512 = vmatprep.mubr.msk.bf16.mxu0 %vm1453_vm14, %v13680_v46  ;;  %v14871_v46 = vsel %vm14396_vm8, %v11444_v28, %v3664_v48  ;;  %v2976_v48 = vshll.u32 %v14867_v26, 16 }
 0x16a   : > { %v3673_v7 = vrot.slane %v3671_v4, 4  ;;  %v14881_v50 = vsel %vm14396_vm8, %v11445_v12, %v3671_v4  ;;  %v2883_v12 = vsel %vm13978_vm13, %v14823_v1, %v14763_v32  ;;  %v2893_v4 = vsel %vm13978_vm13, %v14825_v57, %v14827_v23  ;;  %v2795_v32 = vld [vmem:[#allocation2 + $0x60] sm:$0xf] }
 0x16b   : > { %v2936_v1 = vrot.slane %v2935_v36, 4  ;;  %v2958_v57 = vrot.slane %v2956_v44, 4  ;;  %v2962_v23 = vshll.u32 %v14665_v49, 16  ;;  %v2991_v58 = vshrl.u32 %v2795_v32, 16 }
 0x16c   : > { %v14888_v28 = vsel %vm14396_vm8, %v3673_v7, %v3674_v18  ;;  %v2907_v18 = vsel %vm13978_vm13, %v14829_v8, %v14810_v45  ;;  %v2949_v7 = vor.u32 %v2948_v34, %v2945_v33  ;;  %v2972_v8 = vrot.slane %v2970_v54, 5  ;;  %v2798_v54 = vld [vmem:[#allocation2 + $0x6c] sm:$0xf] }
 0x16d   : > { %17879 = vst [vmem:[#allocation21_spill] sm:$0xff] %v14888_v28  ;;  %v14918_v45 = vrot.slane %v2976_v48, 5  ;;  %v14920_v28 = vld [vmem:[#allocation2 + $0x5c] sm:$0x1]  ;;  %v2994_v10 = vshll.u32 %v2795_v32, 16  ;;  %v3000_v34 = vshll.u32 %v14685_v43, 16  ;;  %v11400_v59 = vcombine.low %v2883_v12, %v2893_v4 }
 0x16e   : > { %v3004_v33 = vshrl.u32 %v14685_v43, 16  ;;  %v3775_v36 = vsel %vm1502_vm0, %v14640_v9, 0  ;;  %v2931_v49 = vsel %vm13978_vm13, %v2926_v5, %v14844_v25  ;;  %v14929_v29 = vrot.slane %v2949_v7, 4  ;;  %v14934_v48 = vld [vmem:[#allocation2 + $0x70] sm:$0xf] }
 0x16f   : > { %v2959_v44 = vor.u32 %v2958_v57, %v14915_v60  ;;  %v14932_v41 = vrot.slane %v2962_v23, 5  ;;  %v2941_v43 = vsel %vm13978_vm13, %v2936_v1, %v2940_v52  ;;  %v2973_v55 = vor.u32 %v2972_v8, %v2969_v21 }
 0x170   : > { %12513 = vmatmul.mubr.msk.bf16.gmra.mrb[28].mxu0 %vm1453_vm14, %v13681_v16  ;;  %v2982_v16 = vrot.slane %v2980_v35, 4  ;;  %v2986_v35 = vshll.u32 %v14920_v28, 16  ;;  %v2993_v12 = vrot.slane %v2991_v58, 4  ;;  %v2996_v25 = vrot.slane %v2994_v10, 5 }
 0x171   : > { %12518 = vmatprep.mubr.msk.bf16.mxu0 %vm1453_vm14, %v11398_v20  ;;  %v11401_v20 = vcombine.low %v2907_v18, %v2917_v56  ;;  %v14940_v4 = vrot.slane %v3000_v34, 5  ;;  %v3006_v18 = vrot.slane %v3004_v33, 4  ;;  %v14945_v56 = vld [vmem:[%s17737_s1 + $0xc] sm:$0x3]  ;;  %v3015_v5 = vshrl.u32 %v2798_v54, 16 }
 0x172   : > { %v2983_v9 = vor.u32 %v2982_v16, %v14918_v45  ;;  %v3018_v52 = vshll.u32 %v2798_v54, 16  ;;  %v3024_v21 = vshll.u32 %v14934_v48, 16  ;;  %v3028_v7 = vshrl.u32 %v14934_v48, 16 }
 0x173   : > { %v11402_v32 = vcombine.low %v2931_v49, %v2941_v43  ;;  %v2960_v1 = vrot.slane %v2959_v44, 4  ;;  %v3039_v57 = vshrl.u32 %v2801_v27, 16  ;;  %v3042_v23 = vshll.u32 %v2801_v27, 16 }
 0x174   : > { %v2974_v8 = vrot.slane %v2973_v55, 4  ;;  %v2988_v16 = vrot.slane %v2986_v35, 5  ;;  %v3048_v58 = vshll.u32 %v14715_v0, 16  ;;  %v3052_v10 = vshrl.u32 %v14715_v0, 16 }
 0x175   : > { %v2984_v34 = vrot.slane %v2983_v9, 4  ;;  %v2997_v33 = vor.u32 %v2996_v25, %v2993_v12  ;;  %v3017_v49 = vrot.slane %v3015_v5, 4  ;;  %v3020_v44 = vrot.slane %v3018_v52, 5  ;;  %v14966_v9 = vld [vmem:[#allocation2 + $0x74] sm:$0x1] }
 0x176   : > { %v14957_v54 = vrot.slane %v3024_v21, 5  ;;  %v3030_v43 = vrot.slane %v3028_v7, 4  ;;  %v2955_v0 = vsel %vm13978_vm13, %v14929_v29, %v14915_v60  ;;  %v2965_v55 = vsel %vm13978_vm13, %v2960_v1, %v14932_v41 }
 0x177   : > { %v3041_v35 = vrot.slane %v3039_v57, 4  ;;  %v3044_v27 = vrot.slane %v3042_v23, 5  ;;  %v3054_v12 = vrot.slane %v3052_v10, 4  ;;  %v2979_v5 = vsel %vm13978_vm13, %v2974_v8, %v14918_v45 }
 0x178   : > { %12519 = vmatmul.mubr.msk.bf16.vlgmr.msra.gmra.mrb[0].mxu0 %vm1453_vm14, %v11399_v6  ;;  %v3007_v6 = vor.u32 %v3006_v18, %v14940_v4  ;;  %v2989_v60 = vsel %vm13978_vm13, %v2984_v34, %v2988_v16  ;;  %v2998_v29 = vrot.slane %v2997_v33, 4  ;;  %v3021_v21 = vor.u32 %v3020_v44, %v3017_v49  ;;  %v2810_v49 = vld [vmem:[#allocation2 + $0x9c] sm:$0xf] }
 0x179   : > { %12551 = vmatpush3.bf16.msra.mxu0 %v3775_v36  ;;  %12522 = vmatprep.mubr.msk.bf16.mxu0 %vm1453_vm14, %v11400_v59  ;;  %v3010_v36 = vshll.u32 %v14687_v62, 16  ;;  %v2804_v59 = vld [vmem:[#allocation2 + $0x84] sm:$0xf]  ;;  %v14968_v62 = vrot.slane %v3048_v58, 5  ;;  %v3031_v7 = vor.u32 %v3030_v43, %v14957_v54  ;;  %v3034_v1 = vshll.u32 %v14966_v9, 16 }
 0x17a   : > { %13642 = vmatprep.subr.msk.bf16.mxu0 %vm1502_vm0, %v14945_v56  ;;  %v3063_v25 = vshrl.u32 %v2804_v59, 16  ;;  %v3066_v18 = vshll.u32 %v2804_v59, 16  ;;  %v3008_v41 = vrot.slane %v3007_v6, 4  ;;  %v3058_v57 = vshll.u32 %v14717_v13, 16 }
 0x17b   : > { %v3012_v52 = vrot.slane %v3010_v36, 5  ;;  %v3072_v23 = vshll.u32 %v14749_v39, 16  ;;  %v3076_v45 = vshrl.u32 %v14749_v39, 16  ;;  %v3045_v8 = vor.u32 %v3044_v27, %v3041_v35  ;;  %v14990_v27 = vld [vmem:[#allocation2 + $0xa0] sm:$0xf] }
 0x17c   : > { %v3055_v16 = vor.u32 %v3054_v12, %v14968_v62  ;;  %v3065_v58 = vrot.slane %v3063_v25, 4  ;;  %v3068_v10 = vrot.slane %v3066_v18, 5  ;;  %v11403_v34 = vcombine.low %v2955_v0, %v2965_v55 }
 0x17d   : > { %v11404_v33 = vcombine.low %v2979_v5, %v2989_v60  ;;  %v3003_v6 = vsel %vm13978_vm13, %v2998_v29, %v14940_v4  ;;  %v3022_v13 = vrot.slane %v3021_v21, 4  ;;  %v3032_v36 = vrot.slane %v3031_v7, 4 }
 0x17e   : > { %v3036_v59 = vrot.slane %v3034_v1, 5  ;;  %v14988_v39 = vrot.slane %v3072_v23, 5  ;;  %v3078_v44 = vrot.slane %v3076_v45, 4  ;;  %v3046_v0 = vrot.slane %v3045_v8, 4 }
 0x17f   : > { %v3056_v55 = vrot.slane %v3055_v16, 4  ;;  %v3060_v12 = vrot.slane %v3058_v57, 5  ;;  %v3069_v25 = vor.u32 %v3068_v10, %v3065_v58  ;;  %v3096_v4 = vshll.u32 %v14753_v40, 16 }
 0x180   : > { %12523 = vmatmul.mubr.msk.bf16.gmra.mrb[4].mxu0 %vm1453_vm14, %v11401_v20  ;;  %v2807_v20 = vld [vmem:[#allocation2 + $0x90] sm:$0xf]  ;;  %v3100_v18 = vshrl.u32 %v14753_v40, 16  ;;  %v3111_v5 = vshrl.u32 %v2810_v49, 16  ;;  %v3114_v60 = vshll.u32 %v2810_v49, 16  ;;  %v3027_v29 = vsel %vm13978_vm13, %v3022_v13, %v14957_v54 }
 0x181   : > { %12526 = vmatprep.mubr.msk.bf16.mxu0 %vm1453_vm14, %v11402_v32  ;;  %v3013_v32 = vsel %vm13978_vm13, %v3008_v41, %v3012_v52  ;;  %v3087_v43 = vshrl.u32 %v2807_v20, 16  ;;  %v3090_v35 = vshll.u32 %v2807_v20, 16  ;;  %v3037_v52 = vsel %vm13978_vm13, %v3032_v36, %v3036_v59  ;;  %v2813_v36 = vld [vmem:[#allocation2 + $0xa8] sm:$0xf] }
 0x182   : > { %v3120_v41 = vshll.u32 %v14990_v27, 16  ;;  %v3124_v21 = vshrl.u32 %v14990_v27, 16  ;;  %v3079_v7 = vor.u32 %v3078_v44, %v14988_v39  ;;  %v3082_v40 = vshll.u32 %v14751_v24, 16 }
 0x183   : > { %v3089_v1 = vrot.slane %v3087_v43, 4  ;;  %v3092_v57 = vrot.slane %v3090_v35, 5  ;;  %v3051_v23 = vsel %vm13978_vm13, %v3046_v0, %v14968_v62  ;;  %v3061_v54 = vsel %vm13978_vm13, %v3056_v55, %v3060_v12 }
 0x184   : > { %v3070_v45 = vrot.slane %v3069_v25, 4  ;;  %v15010_v8 = vrot.slane %v3096_v4, 5  ;;  %v3102_v16 = vrot.slane %v3100_v18, 4  ;;  %v3113_v58 = vrot.slane %v3111_v5, 4  ;;  %v2816_v25 = vld [vmem:[#allocation2 + $0xb4] sm:$0xf] }
 0x185   : > { %v3116_v10 = vrot.slane %v3114_v60, 5  ;;  %v11405_v20 = vcombine.low %v3003_v6, %v3013_v32  ;;  %v3122_v24 = vrot.slane %v3120_v41, 5  ;;  %v3126_v13 = vrot.slane %v3124_v21, 4 }
 0x186   : > { %v3080_v59 = vrot.slane %v3079_v7, 4  ;;  %v3084_v49 = vrot.slane %v3082_v40, 5  ;;  %v3093_v44 = vor.u32 %v3092_v57, %v3089_v1  ;;  %v3106_v62 = vshll.u32 %v14756_v42, 16 }
 0x187   : > { %v11407_v43 = vcombine.low %v3051_v23, %v3061_v54  ;;  %v3103_v35 = vor.u32 %v3102_v16, %v15010_v8  ;;  %v3117_v0 = vor.u32 %v3116_v10, %v3113_v58  ;;  %v3135_v12 = vshrl.u32 %v2813_v36, 16 }
 0x188   : > { %12527 = vmatmul.mubr.msk.bf16.gmra.mrb[8].mxu0 %vm1453_vm14, %v11403_v34  ;;  %v11406_v34 = vcombine.low %v3027_v29, %v3037_v52  ;;  %v3127_v6 = vor.u32 %v3126_v13, %v3122_v24  ;;  %v3138_v32 = vshll.u32 %v2813_v36, 16  ;;  %v3144_v4 = vshll.u32 %v14812_v47, 16  ;;  %v2819_v13 = vld [vmem:[#allocation2 + $0xc0] sm:$0xf] }
 0x189   : > { %12530 = vmatprep.mubr.msk.bf16.mxu0 %vm1453_vm14, %v11404_v33  ;;  %v15012_v33 = vld [vmem:[#allocation2 + $0xa4] sm:$0x1]  ;;  %v3148_v18 = vshrl.u32 %v14812_v47, 16  ;;  %v3075_v42 = vsel %vm13978_vm13, %v3070_v45, %v14988_v39  ;;  %v3085_v5 = vsel %vm13978_vm13, %v3080_v59, %v3084_v49  ;;  %v3094_v60 = vrot.slane %v3093_v44, 4 }
 0x18a   : > { %v3130_v55 = vshll.u32 %v15012_v33, 16  ;;  %v3108_v29 = vrot.slane %v3106_v62, 5  ;;  %v3159_v52 = vshrl.u32 %v2816_v25, 16  ;;  %v3162_v41 = vshll.u32 %v2816_v25, 16 }
 0x18b   : > { %v3168_v21 = vshll.u32 %v14848_v53, 16  ;;  %v3172_v7 = vshrl.u32 %v14848_v53, 16  ;;  %v3104_v40 = vrot.slane %v3103_v35, 4  ;;  %v3118_v1 = vrot.slane %v3117_v0, 4 }
 0x18c   : > { %v3132_v47 = vrot.slane %v3130_v55, 5  ;;  %v3137_v57 = vrot.slane %v3135_v12, 4  ;;  %v3128_v23 = vrot.slane %v3127_v6, 4  ;;  %v3140_v54 = vrot.slane %v3138_v32, 5 }
 0x18d   : > { %v3146_v16 = vrot.slane %v3144_v4, 5  ;;  %v3150_v58 = vrot.slane %v3148_v18, 4  ;;  %v11408_v39 = vcombine.low %v3075_v42, %v3085_v5  ;;  %v3161_v45 = vrot.slane %v3159_v52, 4 }
 0x18e   : > { %v3164_v10 = vrot.slane %v3162_v41, 5  ;;  %v3099_v36 = vsel %vm13978_vm13, %v3094_v60, %v15010_v8  ;;  %v3109_v53 = vsel %vm13978_vm13, %v3104_v40, %v3108_v29  ;;  %v3154_v59 = vshll.u32 %v14814_v22, 16 }
 0x18f   : > { %v3123_v49 = vsel %vm13978_vm13, %v3118_v1, %v3122_v24  ;;  %v3133_v44 = vsel %vm13978_vm13, %v3128_v23, %v3132_v47  ;;  %v3141_v62 = vor.u32 %v3140_v54, %v3137_v57  ;;  %v3151_v35 = vor.u32 %v3150_v58, %v3146_v16  ;;  %v3500_v54 = vld [vmem:[#allocation2 + $0xc] sm:$0xe] }
 0x190   : > { %12531 = vmatmul.mubr.msk.bf16.gmra.mrb[12].mxu0 %vm1453_vm14, %v11405_v20  ;;  %v3170_v20 = vrot.slane %v3168_v21, 5  ;;  %v3183_v0 = vshrl.u32 %v2819_v13, 16  ;;  %v3186_v55 = vshll.u32 %v2819_v13, 16  ;;  %v3192_v8 = vshll.u32 %v14852_v31, 16 }
 0x191   : > { %12534 = vmatprep.mubr.msk.bf16.mxu0 %vm1453_vm14, %v11406_v34  ;;  %v3174_v34 = vrot.slane %v3172_v7, 4  ;;  %v3196_v12 = vshrl.u32 %v14852_v31, 16  ;;  %v3165_v25 = vor.u32 %v3164_v10, %v3161_v45  ;;  %v11409_v6 = vcombine.low %v3099_v36, %v3109_v53 }
 0x192   : > { %v11410_v32 = vcombine.low %v3123_v49, %v3133_v44  ;;  %v3142_v24 = vrot.slane %v3141_v62, 4  ;;  %v3152_v4 = vrot.slane %v3151_v35, 4  ;;  %v3156_v18 = vrot.slane %v3154_v59, 5  ;;  %v3502_v62 = vld [vmem:[#allocation2 + $0x24] sm:$0xe] }
 0x193   : > { %v3175_v22 = vor.u32 %v3174_v34, %v3170_v20  ;;  %v3185_v42 = vrot.slane %v3183_v0, 4  ;;  %v3188_v5 = vrot.slane %v3186_v55, 5  ;;  %v3194_v60 = vrot.slane %v3192_v8, 5  ;;  %v375_v34 = vld [vmem:[#allocation2 + $0xcc] sm:$0x1] }
 0x194   : > { %v3198_v29 = vrot.slane %v3196_v12, 4  ;;  %v3166_v52 = vrot.slane %v3165_v25, 4  ;;  %v3147_v31 = vsel %vm13978_vm13, %v3142_v24, %v3146_v16  ;;  %v3202_v1 = vshll.u32 %v14859_v11, 16 }
 0x195   : > { %v3176_v41 = vrot.slane %v3175_v22, 4  ;;  %v3189_v7 = vor.u32 %v3188_v5, %v3185_v42  ;;  %v3566_v23 = vrot.slane %v14674_v38, 5  ;;  %v11430_v13 = vrot.slane %v3500_v54, 9 }
 0x196   : > { %v3199_v40 = vor.u32 %v3198_v29, %v3194_v60  ;;  %v3171_v47 = vsel %vm13978_vm13, %v3166_v52, %v3170_v20  ;;  %v3204_v10 = vrot.slane %v3202_v1, 5  ;;  %v3569_v53 = vrot.slane %v14694_v61, 5  ;;  %v3501_v61 = vld [vmem:[#allocation2 + $0x18] sm:$0xe]  ;;  %v11512_v52 = vld [vmem:[%s17737_s1 + $0xe] sm:$0x3] }
 0x197   : > { %v3568_v36 = vrot.slane %v3566_v23, 4  ;;  %v376_v11 = vsel %vm13891_vm5, 0, %v375_v34  ;;  %v3573_v59 = vrot.slane %v14692_v37, 5  ;;  %v3567_v49 = vsel %vm14396_vm8, %v11430_v13, %v3566_v23  ;;  %v17881_v1 = vld [vmem:[#allocation6_spill] sm:$0xff]  ;;  %v17885_v34 = vld [vmem:[#allocation9_spill] sm:$0xff]  ;;  %vm15616_vm5 = vmand %vm5599_vm1, %vm322_vm3 }
 0x198   : > { %12535 = vmatmul.mubr.msk.bf16.gmra.mrb[16].mxu0 %vm1453_vm14, %v11407_v43  ;;  %v3178_v43 = vshll.u32 %v14850_v15, 16  ;;  %v3157_v15 = vsel %vm13978_vm13, %v3152_v4, %v3156_v18  ;;  %v3200_v45 = vrot.slane %v3199_v40, 4  ;;  %377 = vst [vmem:[#allocation2 + $0xcc] sm:$0x1] %v376_v11  ;;  %v3580_v44 = vrot.slane %v14722_v30, 5  ;;  %v17887_v11 = vld [vmem:[#allocation10_spill] sm:$0xff] }
 0x199   : > { %12538 = vmatprep.mubr.msk.bf16.mxu0 %vm1453_vm14, %v11408_v39  ;;  %v11411_v58 = vcombine.low %v3147_v31, %v3157_v15  ;;  %v3190_v39 = vrot.slane %v3189_v7, 4  ;;  %v3570_v3 = vsel %vm14396_vm8, %v3568_v36, %v3569_v53  ;;  %v11431_v55 = vrot.slane %v3501_v61, 9  ;;  %v3504_v4 = vld [vmem:[#allocation2 + $0x3c] sm:$0xe] }
 0x19a   : > { %v3180_v21 = vrot.slane %v3178_v43, 5  ;;  %v3205_v20 = vsel %vm13978_vm13, %v3200_v45, %v3204_v10  ;;  %v11447_v0 = vcombine.low %v3567_v49, %v3570_v3  ;;  %v3575_v8 = vrot.slane %v3573_v59, 4  ;;  %v17884_v10 = vld [vmem:[#allocation8_spill] sm:$0xff] }
 0x19b   : > { %v3195_v38 = vsel %vm13978_vm13, %v3190_v39, %v3194_v60  ;;  %v3576_v12 = vrot.slane %v14709_v2, 5  ;;  %v11432_v25 = vrot.slane %v3502_v62, 9  ;;  %v3582_v22 = vrot.slane %v3580_v44, 4  ;;  %v17891_v62 = vld [vmem:[#allocation13_spill] sm:$0xff] }
 0x19c   : > { %v3181_v57 = vsel %vm13978_vm13, %v3176_v41, %v3180_v21  ;;  %v11413_v35 = vcombine.low %v3195_v38, %v3205_v20  ;;  %v3583_v37 = vrot.slane %v14769_v14, 5  ;;  %v3574_v43 = vsel %vm14396_vm8, %v11431_v55, %v3573_v59  ;;  %v17888_v38 = vld [vmem:[#allocation11_spill] sm:$0xff]  ;;  %v3512_v59 = vld [vmem:[#allocation2 + $0x9c] sm:$0xe] }
 0x19d   : > { %v11412_v16 = vcombine.low %v3171_v47, %v3181_v57  ;;  %v3577_v30 = vsel %vm14396_vm8, %v3575_v8, %v3576_v12  ;;  %v4134_v42 = vsel %vm1502_vm0, %v14945_v56, 0  ;;  %v11434_v5 = vrot.slane %v3504_v4, 9  ;;  %v17882_v47 = vld [vmem:[#allocation7_spill] sm:$0xff] }
 0x19e   : > { %v3584_v2 = vsel %vm14396_vm8, %v3582_v22, %v3583_v37  ;;  %v11448_v14 = vcombine.low %v3574_v43, %v3577_v30  ;;  %v3597_v29 = vrot.slane %v14842_v17, 5  ;;  %v3608_v56 = vrot.slane %v14867_v26, 5  ;;  %v3506_v17 = vld [vmem:[#allocation2 + $0x54] sm:$0xe]  ;;  %v17894_v55 = vld [vmem:[#allocation15_spill] sm:$0xff]  ;;  %v17897_v37 = vld [vmem:[#allocation17_spill] sm:$0xff] }
 0x19f   : > { %v11436_v15 = vrot.slane %v3506_v17, 9  ;;  %v3611_v40 = vrot.slane %v14920_v28, 5  ;;  %v17883_v57 = vcombine.low %v17881_v1, %v17882_v47  ;;  %v3622_v54 = vrot.slane %v14934_v48, 5  ;;  %v17896_v22 = vld [vmem:[#allocation16_spill] sm:$0xff]  ;;  %v17899_v43 = vld [vmem:[#allocation19_spill] sm:$0xff] }
 0x1a0   : > { %12539 = vmatmul.mubr.msk.bf16.gmra.mrb[20].mxu0 %vm1453_vm14, %v11409_v6  ;;  %v3581_v6 = vsel %vm14396_vm8, %v11432_v25, %v3580_v44  ;;  %v3610_v7 = vrot.slane %v3608_v56, 4  ;;  %v3625_v28 = vrot.slane %v14966_v9, 5  ;;  %v17886_v13 = vcombine.low %v17884_v10, %v17885_v34  ;;  %v17890_v44 = vld [vmem:[#allocation12_spill] sm:$0xff]  ;;  %v15184_v47 = vld [vmem:[#allocation2 + $0x58] sm:$0xf] }
 0x1a1   : > { %12542 = vmatprep.mubr.msk.bf16.mxu0 %vm1453_vm14, %v11410_v32  ;;  %v17880_v32 = vld [vmem:[#allocation18_spill] sm:$0xff]  ;;  %v11449_v18 = vcombine.low %v3581_v6, %v3584_v2  ;;  %v3609_v23 = vsel %vm14396_vm8, %v11436_v15, %v3608_v56  ;;  %v3624_v45 = vrot.slane %v3622_v54, 4  ;;  %v17889_v20 = vcombine.low %v17887_v11, %v17888_v38  ;;  %v17900_v30 = vld [vmem:[#allocation20_spill] sm:$0xff] }
 0x1a2   : > { %v3594_v24 = vrot.slane %v17880_v32, 5  ;;  %v3612_v26 = vsel %vm14396_vm8, %v3610_v7, %v3611_v40  ;;  %v3650_v9 = vrot.slane %v14990_v27, 5  ;;  %v11442_v49 = vrot.slane %v3512_v59, 9  ;;  %v431_v2 = vld [vmem:[#allocation2 + $0xd4] sm:$0x1]  ;;  %v13686_v7 = vld [vmem:[#allocation2 + $0x48] sm:$0xff]  }
 0x1a3   : > { %v3626_v53 = vsel %vm14396_vm8, %v3624_v45, %v3625_v28  ;;  %v3653_v61 = vrot.slane %v15012_v33, 5  ;;  %v17898_v33 = vcombine.low %v17896_v22, %v17897_v37  ;;  %v17901_v6 = vcombine.low %v17899_v43, %v17900_v30  ;;  %v13688_v28 = vld [vmem:[#allocation2 + $0x60] sm:$0xff]   ;;  %v4329_v59 = vld [vmem:[#allocation2 + $0x18] sm:$0xf]  ;;  %v15224_v22 = vld [vmem:[#allocation2 + $0x88] sm:$0xf] }
 0x1a4   : > { %v3596_v60 = vrot.slane %v3594_v24, 4  ;;  %v3595_v41 = vsel %vm14396_vm8, %v11434_v5, %v3594_v24  ;;  %v3652_v3 = vrot.slane %v3650_v9, 4  ;;  %v3651_v12 = vsel %vm14396_vm8, %v11442_v49, %v3650_v9  ;;  %v13683_v5 = vld [vmem:[#allocation2 + $0x24] sm:$0xff]   ;;  %v13689_v9 = vld [vmem:[#allocation2 + $0x6c] sm:$0xff]   ;;  %v15209_v49 = vld [vmem:[#allocation2 + $0x1c] sm:$0xf] }
 0x1a5   : > { %v17902_v32 = vcombine.low %v14871_v46, %v14877_v51  ;;  %v432_v4 = vsel %vm13899_vm7, 0, %v431_v2  ;;  %v15161_v46 = vld [vmem:[%s17737_s1 + $0x10] sm:$0x3]  ;;  %v15164_v51 = vld [vmem:[#allocation2 + $0x40] sm:$0xf]  ;;  %v5184_v43 = vrot.slane %v15224_v22, 5  ;;  %vm15627_vm7 = vmand %vm5599_vm1, %vm378_vm4 }
 0x1a6   : > { %v3598_v21 = vsel %vm14396_vm8, %v3596_v60, %v3597_v29  ;;  %v3654_v27 = vsel %vm14396_vm8, %v3652_v3, %v3653_v61  ;;  %433 = vst [vmem:[#allocation2 + $0xd4] sm:$0x1] %v432_v4  ;;  %v13684_v60 = vld [vmem:[#allocation2 + $0x30] sm:$0xff]   ;;  %v4860_v29 = vsel %vm1502_vm0, %v11512_v52, 0  ;;  %v13690_v61 = vld [vmem:[#allocation2 + $0x78] sm:$0xff]   ;;  %vm6779_vm3 = vcmask 1043456  }
 0x1a7   : > { %v11451_v31 = vcombine.low %v3595_v41, %v3598_v21  ;;  %v11459_v25 = vcombine.low %v3651_v12, %v3654_v27  ;;  %v15166_v41 = vld [vmem:[#allocation2 + $0x44] sm:$0x1]  ;;  %v5142_v21 = vrot.slane %v15164_v51, 5  ;;  %v4391_v12 = vshrl.u32 %v15209_v49, 16  ;;  %v15226_v37 = vld [vmem:[#allocation2 + $0x8c] sm:$0x1] }
 0x1a8   : > { %12543 = vmatmul.mubr.msk.bf16.gmra.mrb[24].mxu0 %vm1453_vm14, %v11411_v58  ;;  %v3508_v58 = vld [vmem:[#allocation2 + $0x6c] sm:$0xe]  ;;  %v5145_v56 = vrot.slane %v15166_v41, 5  ;;  %v5187_v30 = vrot.slane %v15226_v37, 5  ;;  %v4469_v1 = vshll.u32 %v15166_v41, 16 }
 0x1a9   : > { %12546 = vmatprep.mubr.msk.bf16.mxu0 %vm1453_vm14, %v11412_v16  ;;  %v11453_v16 = vcombine.low %v3609_v23, %v3612_v26  ;;  %v11438_v39 = vrot.slane %v3508_v58, 9  ;;  %v5144_v17 = vrot.slane %v5142_v21, 4  ;;  %v5060_v23 = vld [vmem:[#allocation2 + $0x54] sm:$0xe]  ;;  %v5156_v26 = vrot.slane %v15184_v47, 5 }
 0x1aa   : > { %v11550_v58 = vrot.slane %v5060_v23, 9  ;;  %v5070_v41 = vld [vmem:[#allocation2 + $0xcc] sm:$0xe] }
 0x1ab   : > { %v3623_v36 = vsel %vm14396_vm8, %v11438_v39, %v3622_v54  ;;  %v15179_v40 = vsel %vm14396_vm8, %v5144_v17, %v5145_v56  ;;  %v13687_v39 = vld [vmem:[#allocation2 + $0x54] sm:$0xff]   ;;  %v15246_v17 = vld [vmem:[#allocation2 + $0x2c] sm:$0x1] }
 0x1ac   : > { %v11455_v48 = vcombine.low %v3623_v36, %v3626_v53  ;;  %v15193_v45 = vsel %vm14396_vm8, %v11550_v58, %v5156_v26  ;;  %v15204_v36 = vld [vmem:[#allocation2 + $0x74] sm:$0x1]  ;;  %v5062_v53 = vld [vmem:[#allocation2 + $0x6c] sm:$0xe] }
 0x1ad   : > { %v5173_v11 = vrot.slane %v15204_v36, 5  ;;  %v11552_v38 = vrot.slane %v5062_v53, 9  ;;  %v15258_v53 = vld [vmem:[#allocation2 + $0xa4] sm:$0x1] }
 0x1b0   : > { %12547 = vmatmul.mubr.msk.bf16.gmra.mrb[28].mxu0 %vm1453_vm14, %v11413_v35  ;;  %v17892_v35 = vcombine.low %v17890_v44, %v17891_v62  ;;  %v4332_v44 = vld [vmem:[#allocation2 + $0x24] sm:$0xf] }
 0x1b1   : > { %12552 = vmatprep.mubr.msk.bf16.mxu0 %vm1453_vm14, %v11447_v0  ;;  %v17893_v0 = vld [vmem:[#allocation14_spill] sm:$0xff]  ;;  %v4402_v27 = vshrl.u32 %v4332_v44, 16 }
 0x1b2   : > { %v17895_v8 = vcombine.low %v17893_v0, %v17894_v55  ;;  %v4378_v0 = vshrl.u32 %v4329_v59, 16  ;;  %v4381_v55 = vshll.u32 %v4329_v59, 16 }
 0x1b4   : > { %v4383_v24 = vrot.slane %v4381_v55, 5 }
 0x1b8   : > { %12553 = vmatmul.mubr.msk.bf16.vlgmr.msra.gmra.mrb[0].mxu0 %vm1453_vm14, %v11448_v14  ;;  %v13682_v14 = vld [vmem:[#allocation2 + $0x18] sm:$0xff]  }
 0x1b9   : > { %12585 = vmatpush3.bf16.msra.mxu0 %v4134_v42  ;;  %12556 = vmatprep.mubr.msk.bf16.mxu0 %vm1453_vm14, %v11449_v18  ;;  %v17904_v18 = vld [vmem:[#allocation21_spill] sm:$0xff] }
 0x1ba   : > { %13643 = vmatprep.subr.msk.bf16.mxu0 %vm1502_vm0, %v11512_v52  ;;  %v17905_v42 = vcombine.low %v14881_v50, %v17904_v18  ;;  %v5058_v50 = vld [vmem:[#allocation2 + $0x3c] sm:$0xe]  ;;  %v13691_v18 = vld [vmem:[#allocation2 + $0x84] sm:$0xff]  }
 0x1bb   : > { %v11548_v52 = vrot.slane %v5058_v50, 9 }
 0x1bd   : > { %v15175_v15 = vsel %vm14396_vm8, %v11548_v52, %v5142_v21  ;;  %v13692_v21 = vld [vmem:[#allocation2 + $0x90] sm:$0xff]  }
 0x1c0   : > { %12557 = vmatmul.mubr.msk.bf16.gmra.mrb[4].mxu0 %vm1453_vm14, %v17883_v57  ;;  %v15186_v57 = vld [vmem:[#allocation2 + $0x5c] sm:$0x1] }
 0x1c1   : > { %12560 = vmatprep.mubr.msk.bf16.mxu0 %vm1453_vm14, %v11451_v31  ;;  %v13685_v31 = vld [vmem:[#allocation2 + $0x3c] sm:$0xff]   ;;  %v5159_v54 = vrot.slane %v15186_v57, 5 }
 0x1c8   : > { %12561 = vmatmul.mubr.msk.bf16.gmra.mrb[8].mxu0 %vm1453_vm14, %v17886_v13  ;;  %v15202_v13 = vld [vmem:[#allocation2 + $0x70] sm:$0xf] }
 0x1c9   : > { %12564 = vmatprep.mubr.msk.bf16.mxu0 %vm1453_vm14, %v11453_v16  ;;  %v5158_v16 = vrot.slane %v5156_v26, 4  ;;  %v4335_v26 = vld [vmem:[#allocation2 + $0x30] sm:$0xf] }
 0x1cb   : > { %v15197_v10 = vsel %vm14396_vm8, %v5158_v16, %v5159_v54 }
 0x1d0   : > { %12565 = vmatmul.mubr.msk.bf16.gmra.mrb[12].mxu0 %vm1453_vm14, %v17889_v20 }
 0x1d1   : > { %12568 = vmatprep.mubr.msk.bf16.mxu0 %vm1453_vm14, %v11455_v48  ;;  %v5170_v48 = vrot.slane %v15202_v13, 5 }
 0x1d3   : > { %v5172_v20 = vrot.slane %v5170_v48, 4  ;;  %v15213_v3 = vsel %vm14396_vm8, %v11552_v38, %v5170_v48  ;;  %v5066_v38 = vld [vmem:[#allocation2 + $0x9c] sm:$0xe] }
 0x1d4   : > { %17906 = vst [vmem:[#allocation18_spill] sm:$0xff] %v15213_v3 }
 0x1d5   : > { %v15217_v62 = vsel %vm14396_vm8, %v5172_v20, %v5173_v11  ;;  %v4421_v11 = vshll.u32 %v15246_v17, 16 }
 0x1d6   : > { %17907 = vst [vmem:[#allocation6_spill] sm:$0xff] %v15217_v62 }
 0x1d8   : > { %12569 = vmatmul.mubr.msk.bf16.gmra.mrb[16].mxu0 %vm1453_vm14, %v17892_v35 }
 0x1d9   : > { %12572 = vmatprep.mubr.msk.bf16.mxu0 %vm1453_vm14, %v17895_v8  ;;  %v4387_v8 = vshll.u32 %v15209_v49, 16 }
 0x1db   : > { %v15233_v4 = vrot.slane %v4387_v8, 5 }
 0x1e0   : > { %12573 = vmatmul.mubr.msk.bf16.gmra.mrb[20].mxu0 %vm1453_vm14, %v17898_v33  ;;  %v5064_v33 = vld [vmem:[#allocation2 + $0x84] sm:$0xe] }
 0x1e1   : > { %12576 = vmatprep.mubr.msk.bf16.mxu0 %vm1453_vm14, %v11459_v25  ;;  %v4405_v25 = vshll.u32 %v4332_v44, 16  ;;  %v11554_v2 = vrot.slane %v5064_v33, 9  ;;  %v4429_v44 = vshll.u32 %v4335_v26, 16 }
 0x1e3   : > { %v15239_v50 = vsel %vm14396_vm8, %v11554_v2, %v5184_v43  ;;  %v13694_v2 = vld [vmem:[#allocation2 + $0xa8] sm:$0xff]  }
 0x1e4   : > { %17908 = vst [vmem:[#allocation7_spill] sm:$0xff] %v15239_v50 }
 0x1e8   : > { %12577 = vmatmul.mubr.msk.bf16.gmra.mrb[24].mxu0 %vm1453_vm14, %v17901_v6  ;;  %v15231_v6 = vld [vmem:[#allocation2 + $0x28] sm:$0xf] }
 0x1e9   : > { %12580 = vmatprep.mubr.msk.bf16.mxu0 %vm1453_vm14, %v17902_v32  ;;  %v4380_v32 = vrot.slane %v4378_v0, 4  ;;  %v4411_v56 = vshll.u32 %v15231_v6, 16  ;;  %v11556_v0 = vrot.slane %v5066_v38, 9  ;;  %v15292_v38 = vld [vmem:[#allocation2 + $0xbc] sm:$0x1] }
 0x1eb   : > { %v4384_v54 = vor.u32 %v4383_v24, %v4380_v32  ;;  %v15261_v48 = vrot.slane %v4411_v56, 5  ;;  %v15283_v56 = vld [vmem:[#allocation2 + $0x38] sm:$0x1] }
 0x1f0   : > { %12581 = vmatmul.mubr.msk.bf16.gmra.mrb[28].mxu0 %vm1453_vm14, %v17905_v42  ;;  %v15235_v42 = vld [vmem:[#allocation2 + $0x20] sm:$0x1] }
 0x1f1   : > { %12586 = vmatprep.mubr.msk.bf16.mxu0 %vm1453_vm14, %v13682_v14  ;;  %v5186_v14 = vrot.slane %v5184_v43, 4  ;;  %v4397_v23 = vshll.u32 %v15235_v42, 16  ;;  %v4338_v43 = vld [vmem:[#allocation2 + $0x3c] sm:$0xf] }
 0x1f3   : > { %v15244_v52 = vsel %vm14396_vm8, %v5186_v14, %v5187_v30  ;;  %v4399_v33 = vrot.slane %v4397_v23, 5  ;;  %v15274_v14 = vrot.slane %v4421_v11, 5  ;;  %v15290_v11 = vld [vmem:[#allocation2 + $0xb8] sm:$0xf] }
 0x1f4   : > { %17909 = vst [vmem:[#allocation8_spill] sm:$0xff] %v15244_v52 }
 0x1f8   : > { %12587 = vmatmul.mubr.msk.bf16.vlgmr.msra.gmra.mrb[0].mxu0 %vm1453_vm14, %v13683_v5  ;;  %v4393_v5 = vrot.slane %v4391_v12, 4 }
 0x1f9   : > { %12619 = vmatpush3.bf16.msra.mxu0 %v4860_v29  ;;  %12590 = vmatprep.mubr.msk.bf16.mxu0 %vm1453_vm14, %v13684_v60  ;;  %v4404_v60 = vrot.slane %v4402_v27, 4  ;;  %v4407_v29 = vrot.slane %v4405_v25, 5  ;;  %v13693_v27 = vld [vmem:[#allocation2 + $0x9c] sm:$0xff]   ;;  %v4385_v25 = vrot.slane %v4384_v54, 4  ;;  %v4453_v54 = vshll.u32 %v4338_v43, 16 }
 0x1fa   : > { %13644 = vmatprep.subr.msk.bf16.mxu0 %vm1502_vm0, %v15161_v46  ;;  %v4394_v58 = vor.u32 %v4393_v5, %v15233_v4 }
 0x1fb   : > { %v4408_v16 = vor.u32 %v4407_v29, %v4404_v60  ;;  %v4431_v29 = vrot.slane %v4429_v44, 5  ;;  %v5212_v44 = vrot.slane %v15290_v11, 5 }
 0x1fc   : > { %v4395_v32 = vrot.slane %v4394_v58, 4  ;;  %v4459_v58 = vshll.u32 %v15164_v51, 16 }
 0x1fd   : > { %v15272_v24 = vrot.slane %v4408_v16, 4  ;;  %v4463_v16 = vshrl.u32 %v15164_v51, 16 }
 0x200   : > { %12591 = vmatmul.mubr.msk.bf16.gmra.mrb[4].mxu0 %vm1453_vm14, %v13685_v31  ;;  %v4415_v31 = vshrl.u32 %v15231_v6, 16 }
 0x201   : > { %12594 = vmatprep.mubr.msk.bf16.mxu0 %vm1453_vm14, %v13686_v7 }
 0x202   : > { %v4417_v59 = vrot.slane %v4415_v31, 4 }
 0x204   : > { %v4418_v5 = vor.u32 %v4417_v59, %v15261_v48  ;;  %v4341_v59 = vld [vmem:[#allocation2 + $0x48] sm:$0xf] }
 0x205   : > { %v4474_v7 = vshrl.u32 %v4341_v59, 16 }
 0x206   : > { %v15302_v51 = vrot.slane %v4418_v5, 4 }
 0x208   : > { %12595 = vmatmul.mubr.msk.bf16.gmra.mrb[8].mxu0 %vm1453_vm14, %v13687_v39  ;;  %v15254_v39 = vld [vmem:[#allocation2 + $0x34] sm:$0xf] }
 0x209   : > { %12598 = vmatprep.mubr.msk.bf16.mxu0 %vm1453_vm14, %v13688_v28  ;;  %v15256_v28 = vld [vmem:[#allocation2 + $0xa0] sm:$0xf]  ;;  %v4435_v55 = vshll.u32 %v15254_v39, 16  ;;  %v4439_v8 = vshrl.u32 %v15254_v39, 16 }
 0x20a   : > { %v5198_v20 = vrot.slane %v15256_v28, 5 }
 0x20b   : > { %v15285_v31 = vrot.slane %v4435_v55, 5  ;;  %v4441_v23 = vrot.slane %v4439_v8, 4  ;;  %v4445_v8 = vshll.u32 %v15283_v56, 16 }
 0x20c   : > { %v5200_v12 = vrot.slane %v5198_v20, 4  ;;  %v15270_v30 = vsel %vm14396_vm8, %v11556_v0, %v5198_v20  ;;  %v4390_v20 = vsel %vm13978_vm13, %v4385_v25, %v15233_v4  ;;  %v5215_v0 = vrot.slane %v15292_v38, 5  ;;  %v15306_v4 = vld [vmem:[#allocation2 + $0x4c] sm:$0xf] }
 0x20d   : > { %17910 = vst [vmem:[#allocation9_spill] sm:$0xff] %v15270_v30  ;;  %v5214_v25 = vrot.slane %v5212_v44, 4  ;;  %v4447_v35 = vrot.slane %v4445_v8, 5 }
 0x210   : > { %12599 = vmatmul.mubr.msk.bf16.gmra.mrb[12].mxu0 %vm1453_vm14, %v13689_v9  ;;  %v5201_v9 = vrot.slane %v15258_v53, 5 }
 0x211   : > { %12602 = vmatprep.mubr.msk.bf16.mxu0 %vm1453_vm14, %v13690_v61  ;;  %v4426_v61 = vshrl.u32 %v4335_v26, 16  ;;  %v4450_v26 = vshrl.u32 %v4338_v43, 16 }
 0x213   : > { %v4428_v60 = vrot.slane %v4426_v61, 4  ;;  %v5068_v61 = vld [vmem:[#allocation2 + $0xb4] sm:$0xe]  ;;  %v4452_v43 = vrot.slane %v4450_v26, 4  ;;  %v15320_v26 = vsel %vm14396_vm8, %v5214_v25, %v5215_v0  ;;  %v15335_v0 = vld [vmem:[#allocation2 + $0xd4] sm:$0x1] }
 0x214   : > { %17913 = vst [vmem:[#allocation12_spill] sm:$0xff] %v15320_v26  ;;  %v15340_v25 = vld [vmem:[#allocation2 + $0x50] sm:$0x1] }
 0x215   : > { %v4432_v55 = vor.u32 %v4431_v29, %v4428_v60  ;;  %v13696_v60 = vld [vmem:[#allocation2 + $0xc0] sm:$0xff]   ;;  %v4414_v29 = vsel %vm13978_vm13, %v15272_v24, %v15261_v48  ;;  %v4424_v48 = vsel %vm13978_vm13, %v15302_v51, %v15274_v14 }
 0x218   : > { %12603 = vmatmul.mubr.msk.bf16.gmra.mrb[16].mxu0 %vm1453_vm14, %v13691_v18  ;;  %v15278_v18 = vsel %vm14396_vm8, %v5200_v12, %v5201_v9  ;;  %v4400_v9 = vsel %vm13978_vm13, %v4395_v32, %v4399_v33  ;;  %v11558_v12 = vrot.slane %v5068_v61, 9  ;;  %v13695_v33 = vld [vmem:[#allocation2 + $0xb4] sm:$0xff]   ;;  %v15308_v32 = vrot.slane %v4459_v58, 5 }
 0x219   : > { %12606 = vmatprep.mubr.msk.bf16.mxu0 %vm1453_vm14, %v13692_v21  ;;  %17911 = vst [vmem:[#allocation10_spill] sm:$0xff] %v15278_v18  ;;  %v4465_v21 = vrot.slane %v4463_v16, 4  ;;  %v4483_v58 = vshll.u32 %v15306_v4, 16  ;;  %v4487_v16 = vshrl.u32 %v15306_v4, 16  ;;  %v4344_v61 = vld [vmem:[#allocation2 + $0x54] sm:$0xf] }
 0x21a   : > { %v15312_v5 = vsel %vm14396_vm8, %v11558_v12, %v5212_v44  ;;  %v4433_v12 = vrot.slane %v4432_v55, 4  ;;  %v4498_v8 = vshrl.u32 %v4344_v61, 16 }
 0x21b   : > { %17912 = vst [vmem:[#allocation11_spill] sm:$0xff] %v15312_v5  ;;  %v15342_v14 = vrot.slane %v4483_v58, 5  ;;  %v4489_v51 = vrot.slane %v4487_v16, 4  ;;  %v4507_v5 = vshll.u32 %v15184_v47, 16  ;;  %v4511_v58 = vshrl.u32 %v15184_v47, 16 }
 0x21c   : > { %v4347_v16 = vld [vmem:[#allocation2 + $0x60] sm:$0xf] }
 0x21d   : > { %v4522_v30 = vshrl.u32 %v4347_v16, 16  ;;  %v4525_v52 = vshll.u32 %v4347_v16, 16 }
 0x220   : > { %12607 = vmatmul.mubr.msk.bf16.gmra.mrb[20].mxu0 %vm1453_vm14, %v13693_v27  ;;  %v4442_v27 = vor.u32 %v4441_v23, %v15285_v31  ;;  %v4477_v23 = vshll.u32 %v4341_v59, 16  ;;  %v15333_v59 = vld [vmem:[#allocation2 + $0xd0] sm:$0xf] }
 0x221   : > { %12610 = vmatprep.mubr.msk.bf16.mxu0 %vm1453_vm14, %v13694_v2  ;;  %v4455_v2 = vrot.slane %v4453_v54, 5  ;;  %v11513_v54 = vcombine.low %v4390_v20, %v4400_v9  ;;  %v4466_v20 = vor.u32 %v4465_v21, %v15308_v32  ;;  %v4476_v9 = vrot.slane %v4474_v7, 4 }
 0x222   : > { %v4443_v24 = vrot.slane %v4442_v27, 4  ;;  %v4479_v55 = vrot.slane %v4477_v23, 5  ;;  %v4501_v21 = vshll.u32 %v4344_v61, 16  ;;  %v11560_v7 = vrot.slane %v5070_v41, 9  ;;  %v13697_v27 = vld [vmem:[#allocation2 + $0xcc] sm:$0xff]  }
 0x223   : > { %v4456_v34 = vor.u32 %v4455_v2, %v4452_v43  ;;  %v5226_v43 = vrot.slane %v15333_v59, 5  ;;  %v5229_v2 = vrot.slane %v15335_v0, 5  ;;  %v15349_v23 = vrot.slane %v4469_v1, 5  ;;  %v15355_v61 = vld [vmem:[#allocation2 + $0x64] sm:$0xf] }
 0x224   : > { %v4448_v26 = vsel %vm13978_vm13, %v4443_v24, %v4447_v35  ;;  %v4493_v1 = vshll.u32 %v15340_v25, 16  ;;  %v4490_v35 = vor.u32 %v4489_v51, %v15342_v14  ;;  %v4500_v24 = vrot.slane %v4498_v8, 4 }
 0x225   : > { %v5228_v44 = vrot.slane %v5226_v43, 4  ;;  %v15359_v41 = vsel %vm14396_vm8, %v11560_v7, %v5226_v43  ;;  %v4503_v47 = vrot.slane %v4501_v21, 5  ;;  %v4531_v43 = vshll.u32 %v15355_v61, 16 }
 0x226   : > { %17914 = vst [vmem:[#allocation13_spill] sm:$0xff] %v15359_v41  ;;  %v4491_v7 = vrot.slane %v4490_v35, 4  ;;  %v4559_v35 = vshrl.u32 %v15202_v13, 16  ;;  %v4356_v41 = vld [vmem:[#allocation2 + $0x84] sm:$0xf] }
 0x227   : > { %v15390_v16 = vrot.slane %v4531_v43, 5 }
 0x228   : > { %12611 = vmatmul.mubr.msk.bf16.gmra.mrb[24].mxu0 %vm1453_vm14, %v13695_v33  ;;  %v4438_v33 = vsel %vm13978_vm13, %v4433_v12, %v15285_v31  ;;  %v15361_v31 = vrot.slane %v4466_v20, 4  ;;  %v15366_v12 = vsel %vm14396_vm8, %v5228_v44, %v5229_v2  ;;  %v4535_v20 = vshrl.u32 %v15355_v61, 16 }
 0x229   : > { %12614 = vmatprep.mubr.msk.bf16.mxu0 %vm1453_vm14, %v13696_v60  ;;  %v15347_v60 = vrot.slane %v4456_v34, 4  ;;  %v4480_v34 = vor.u32 %v4479_v55, %v4476_v9  ;;  %17915 = vst [vmem:[#allocation14_spill] sm:$0xff] %v15366_v12  ;;  %v11514_v9 = vcombine.low %v4414_v29, %v4424_v48  ;;  %v5330_v44 = vsel %vm1502_vm0, %v15161_v46, 0  ;;  %v15387_v48 = vld [vmem:[#allocation2 + $0x68] sm:$0x1] }
 0x22a   : > { %v15376_v55 = vrot.slane %v4507_v5, 5  ;;  %v4513_v2 = vrot.slane %v4511_v58, 4  ;;  %v11515_v8 = vcombine.low %v4438_v33, %v4448_v26  ;;  %v4472_v21 = vsel %vm13978_vm13, %v15361_v31, %v15349_v23  ;;  %v4350_v46 = vld [vmem:[#allocation2 + $0x6c] sm:$0xf]  ;;  %v4353_v26 = vld [vmem:[#allocation2 + $0x78] sm:$0xf] }
 0x22b   : > { %v4462_v51 = vsel %vm13978_vm13, %v15347_v60, %v15308_v32  ;;  %v4495_v29 = vrot.slane %v4493_v1, 5  ;;  %v4481_v5 = vrot.slane %v4480_v34, 4  ;;  %v4524_v33 = vrot.slane %v4522_v30, 4  ;;  %v15392_v60 = vld [vmem:[#allocation2 + $0x7c] sm:$0xf] }
 0x22c   : > { %v4527_v58 = vrot.slane %v4525_v52, 5  ;;  %v4537_v32 = vrot.slane %v4535_v20, 4  ;;  %v4514_v18 = vor.u32 %v4513_v2, %v15376_v55  ;;  %v4541_v23 = vshll.u32 %v15387_v48, 16 }
 0x22d   : > { %v4546_v31 = vshrl.u32 %v4350_v46, 16  ;;  %v4549_v1 = vshll.u32 %v4350_v46, 16  ;;  %v4555_v34 = vshll.u32 %v15202_v13, 16  ;;  %v4486_v52 = vsel %vm13978_vm13, %v4481_v5, %v15342_v14 }
 0x22e   : > { %v4583_v43 = vshrl.u32 %v15392_v60, 16  ;;  %v4496_v20 = vsel %vm13978_vm13, %v4491_v7, %v4495_v29  ;;  %v4528_v46 = vor.u32 %v4527_v58, %v4524_v33  ;;  %v4538_v12 = vor.u32 %v4537_v32, %v15390_v16 }
 0x22f   : > { %v4515_v13 = vrot.slane %v4514_v18, 4  ;;  %v4548_v50 = vrot.slane %v4546_v31, 4  ;;  %v4551_v62 = vrot.slane %v4549_v1, 5  ;;  %v15408_v14 = vrot.slane %v4555_v34, 5 }
 0x230   : > { %12615 = vmatmul.mubr.msk.bf16.gmra.mrb[28].mxu0 %vm1453_vm14, %v13697_v27  ;;  %v4504_v27 = vor.u32 %v4503_v47, %v4500_v24  ;;  %v4570_v24 = vshrl.u32 %v4353_v26, 16  ;;  %v4579_v47 = vshll.u32 %v15392_v60, 16  ;;  %v4561_v5 = vrot.slane %v4559_v35, 4 }
 0x231   : > { %12620 = vmatprep.mubr.msk.bf16.mxu0 %vm1453_vm14, %v11513_v54  ;;  %v4517_v54 = vshll.u32 %v15186_v57, 16  ;;  %v4573_v57 = vshll.u32 %v4353_v26, 16  ;;  %v4543_v26 = vrot.slane %v4541_v23, 5  ;;  %v4585_v7 = vrot.slane %v4583_v43, 4 }
 0x232   : > { %v4505_v30 = vrot.slane %v4504_v27, 4  ;;  %v4572_v27 = vrot.slane %v4570_v24, 4  ;;  %v15410_v29 = vrot.slane %v4579_v47, 5  ;;  %v4597_v33 = vshll.u32 %v4356_v41, 16  ;;  %v4359_v24 = vld [vmem:[#allocation2 + $0x90] sm:$0xf] }
 0x233   : > { %v4519_v2 = vrot.slane %v4517_v54, 5  ;;  %v4575_v3 = vrot.slane %v4573_v57, 5  ;;  %v4594_v54 = vshrl.u32 %v4356_v41, 16  ;;  %v4529_v58 = vrot.slane %v4528_v46, 4  ;;  %v15423_v57 = vld [vmem:[#allocation2 + $0x94] sm:$0xf] }
 0x234   : > { %v4539_v32 = vrot.slane %v4538_v12, 4  ;;  %v4603_v18 = vshll.u32 %v15224_v22, 16  ;;  %v11516_v23 = vcombine.low %v4462_v51, %v4472_v21  ;;  %v4510_v31 = vsel %vm13978_vm13, %v4505_v30, %v15376_v55 }
 0x235   : > { %v4520_v1 = vsel %vm13978_vm13, %v4515_v13, %v4519_v2  ;;  %v4552_v34 = vor.u32 %v4551_v62, %v4548_v50  ;;  %v4562_v41 = vor.u32 %v4561_v5, %v15408_v14  ;;  %v4565_v12 = vshll.u32 %v15204_v36, 16 }
 0x236   : > { %v4576_v35 = vor.u32 %v4575_v3, %v4572_v27  ;;  %v4596_v21 = vrot.slane %v4594_v54, 4  ;;  %v4534_v55 = vsel %vm13978_vm13, %v4529_v58, %v15390_v16  ;;  %v4544_v62 = vsel %vm13978_vm13, %v4539_v32, %v4543_v26  ;;  %v15440_v32 = vld [vmem:[#allocation2 + $0x98] sm:$0x1] }
 0x237   : > { %v15432_v50 = vrot.slane %v4603_v18, 5  ;;  %v4618_v3 = vshrl.u32 %v4359_v24, 16  ;;  %v4621_v30 = vshll.u32 %v4359_v24, 16  ;;  %v4627_v47 = vshll.u32 %v15423_v57, 16 }
 0x238   : > { %12621 = vmatmul.mubr.msk.bf16.vlgmr.msra.gmra.mrb[0].mxu0 %vm1453_vm14, %v11514_v9  ;;  %v15412_v9 = vld [vmem:[#allocation2 + $0x80] sm:$0x1]  ;;  %v4631_v43 = vshrl.u32 %v15423_v57, 16  ;;  %v4563_v2 = vrot.slane %v4562_v41, 4  ;;  %v4567_v46 = vrot.slane %v4565_v12, 5  ;;  %v4577_v16 = vrot.slane %v4576_v35, 4 }
 0x239   : > { %12653 = vmatpush3.bf16.msra.mxu0 %v5330_v44  ;;  %12624 = vmatprep.mubr.msk.bf16.mxu0 %vm1453_vm14, %v11515_v8  ;;  %v4607_v44 = vshrl.u32 %v15224_v22, 16  ;;  %v11517_v8 = vcombine.low %v4486_v52, %v4496_v20  ;;  %v4586_v22 = vor.u32 %v4585_v7, %v15410_v29  ;;  %v4589_v51 = vshll.u32 %v15412_v9, 16  ;;  %v4362_v7 = vld [vmem:[#allocation2 + $0x9c] sm:$0xf] }
 0x23a   : > { %v4599_v52 = vrot.slane %v4597_v33, 5  ;;  %v4553_v20 = vrot.slane %v4552_v34, 4  ;;  %v4613_v27 = vshll.u32 %v15226_v37, 16  ;;  %v11518_v54 = vcombine.low %v4510_v31, %v4520_v1  ;;  %v4365_v31 = vld [vmem:[#allocation2 + $0xa8] sm:$0xf] }
 0x23b   : > { %v4609_v36 = vrot.slane %v4607_v44, 4  ;;  %v4587_v13 = vrot.slane %v4586_v22, 4  ;;  %v4591_v5 = vrot.slane %v4589_v51, 5  ;;  %v11519_v33 = vcombine.low %v4534_v55, %v4544_v62  ;;  %v15449_v1 = vld [vmem:[#allocation2 + $0xac] sm:$0xf] }
 0x23c   : > { %v4600_v26 = vor.u32 %v4599_v52, %v4596_v21  ;;  %v4620_v18 = vrot.slane %v4618_v3, 4  ;;  %v4623_v44 = vrot.slane %v4621_v30, 5  ;;  %v4558_v34 = vsel %vm13978_vm13, %v4553_v20, %v15408_v14 }
 0x23d   : > { %v4610_v58 = vor.u32 %v4609_v36, %v15432_v50  ;;  %v4568_v41 = vsel %vm13978_vm13, %v4563_v2, %v4567_v46  ;;  %v4642_v37 = vshrl.u32 %v4362_v7, 16  ;;  %v4645_v12 = vshll.u32 %v4362_v7, 16 }
 0x23e   : > { %v4582_v35 = vsel %vm13978_vm13, %v4577_v16, %v15410_v29  ;;  %v4592_v24 = vsel %vm13978_vm13, %v4587_v13, %v4591_v5  ;;  %v4601_v22 = vrot.slane %v4600_v26, 4  ;;  %v4615_v51 = vrot.slane %v4613_v27, 5  ;;  %v15471_v27 = vld [vmem:[#allocation2 + $0xb0] sm:$0x1] }
 0x23f   : > { %v4611_v21 = vrot.slane %v4610_v58, 4  ;;  %v4637_v14 = vshll.u32 %v15440_v32, 16  ;;  %v4651_v52 = vshll.u32 %v15256_v28, 16  ;;  %v4655_v55 = vshrl.u32 %v15256_v28, 16 }
 0x240   : > { %12625 = vmatmul.mubr.msk.bf16.gmra.mrb[4].mxu0 %vm1453_vm14, %v11516_v23  ;;  %v15442_v23 = vrot.slane %v4627_v47, 5  ;;  %v4666_v62 = vshrl.u32 %v4365_v31, 16  ;;  %v4669_v36 = vshll.u32 %v4365_v31, 16  ;;  %v4675_v3 = vshll.u32 %v15449_v1, 16 }
 0x241   : > { %12628 = vmatprep.mubr.msk.bf16.mxu0 %vm1453_vm14, %v11517_v8  ;;  %v4633_v8 = vrot.slane %v4631_v43, 4  ;;  %v4679_v29 = vshrl.u32 %v15449_v1, 16  ;;  %v4624_v30 = vor.u32 %v4623_v44, %v4620_v18  ;;  %v4644_v43 = vrot.slane %v4642_v37, 4  ;;  %v4368_v18 = vld [vmem:[#allocation2 + $0xb4] sm:$0xf] }
 0x242   : > { %v4647_v20 = vrot.slane %v4645_v12, 5  ;;  %v11520_v2 = vcombine.low %v4558_v34, %v4568_v41  ;;  %v11521_v46 = vcombine.low %v4582_v35, %v4592_v24  ;;  %v4606_v28 = vsel %vm13978_vm13, %v4601_v22, %v15432_v50  ;;  %v4371_v24 = vld [vmem:[#allocation2 + $0xc0] sm:$0xf]  ;;  %v15476_v22 = vld [vmem:[#allocation2 + $0xc4] sm:$0xf] }
 0x243   : > { %v4634_v47 = vor.u32 %v4633_v8, %v15442_v23  ;;  %v4616_v16 = vsel %vm13978_vm13, %v4611_v21, %v4615_v51  ;;  %v4639_v13 = vrot.slane %v4637_v14, 5  ;;  %v15469_v5 = vrot.slane %v4651_v52, 5 }
 0x244   : > { %v4657_v26 = vrot.slane %v4655_v55, 4  ;;  %v4668_v7 = vrot.slane %v4666_v62, 4  ;;  %v4681_v58 = vrot.slane %v4679_v29, 4  ;;  %v4625_v44 = vrot.slane %v4624_v30, 4 }
 0x245   : > { %v4635_v8 = vrot.slane %v4634_v47, 4  ;;  %v4648_v34 = vor.u32 %v4647_v20, %v4644_v43  ;;  %v4661_v41 = vshll.u32 %v15258_v53, 16  ;;  %v4685_v50 = vshll.u32 %v15471_v27, 16 }
 0x246   : > { %v11522_v37 = vcombine.low %v4606_v28, %v4616_v16  ;;  %v4658_v12 = vor.u32 %v4657_v26, %v15469_v5  ;;  %v4690_v31 = vshrl.u32 %v4368_v18, 16  ;;  %v4693_v35 = vshll.u32 %v4368_v18, 16  ;;  %v4374_v18 = vld [vmem:[#allocation2 + $0xcc] sm:$0xf] }
 0x247   : > { %v4699_v14 = vshll.u32 %v15290_v11, 16  ;;  %v4703_v52 = vshrl.u32 %v15290_v11, 16  ;;  %v4630_v53 = vsel %vm13978_vm13, %v4625_v44, %v15442_v23  ;;  %v4640_v55 = vsel %vm13978_vm13, %v4635_v8, %v4639_v13 }
 0x248   : > { %12629 = vmatmul.mubr.msk.bf16.gmra.mrb[8].mxu0 %vm1453_vm14, %v11518_v54  ;;  %v4671_v54 = vrot.slane %v4669_v36, 5  ;;  %v4649_v62 = vrot.slane %v4648_v34, 4  ;;  %v4663_v36 = vrot.slane %v4661_v41, 5  ;;  %v4717_v29 = vshll.u32 %v4371_v24, 16  ;;  %v15494_v41 = vld [vmem:[#allocation2 + $0xc8] sm:$0x1] }
 0x249   : > { %12632 = vmatprep.mubr.msk.bf16.mxu0 %vm1453_vm14, %v11519_v33  ;;  %v4677_v33 = vrot.slane %v4675_v3, 5  ;;  %v4714_v3 = vshrl.u32 %v4371_v24, 16  ;;  %v4723_v30 = vshll.u32 %v15476_v22, 16  ;;  %v4727_v47 = vshrl.u32 %v15476_v22, 16 }
 0x24a   : > { %v4672_v51 = vor.u32 %v4671_v54, %v4668_v7  ;;  %v4659_v43 = vrot.slane %v4658_v12, 4  ;;  %v4687_v20 = vrot.slane %v4685_v50, 5  ;;  %v4692_v11 = vrot.slane %v4690_v31, 4 }
 0x24b   : > { %v4682_v21 = vor.u32 %v4681_v58, %v4677_v33  ;;  %v4701_v16 = vrot.slane %v4699_v14, 5  ;;  %v4705_v26 = vrot.slane %v4703_v52, 4  ;;  %v11523_v23 = vcombine.low %v4630_v53, %v4640_v55 }
 0x24c   : > { %v4716_v7 = vrot.slane %v4714_v3, 4  ;;  %v4719_v54 = vrot.slane %v4717_v29, 5  ;;  %v4725_v13 = vrot.slane %v4723_v30, 5  ;;  %v4729_v58 = vrot.slane %v4727_v47, 4 }
 0x24d   : > { %v4683_v28 = vrot.slane %v4682_v21, 4  ;;  %v4654_v44 = vsel %vm13978_vm13, %v4649_v62, %v15469_v5  ;;  %v4664_v8 = vsel %vm13978_vm13, %v4659_v43, %v4663_v36  ;;  %v4706_v31 = vor.u32 %v4705_v26, %v4701_v16 }
 0x24e   : > { %v4738_v5 = vshrl.u32 %v4374_v18, 16  ;;  %v4741_v24 = vshll.u32 %v4374_v18, 16  ;;  %v4751_v21 = vshrl.u32 %v15333_v59, 16  ;;  %v4720_v14 = vor.u32 %v4719_v54, %v4716_v7  ;;  %v5055_v54 = vld [vmem:[#allocation2 + $0x18] sm:$0xe] }
 0x24f   : > { %v4688_v12 = vsel %vm13978_vm13, %v4683_v28, %v4687_v20  ;;  %v4730_v52 = vor.u32 %v4729_v58, %v4725_v13  ;;  %v11524_v53 = vcombine.low %v4654_v44, %v4664_v8  ;;  %v4707_v62 = vrot.slane %v4706_v31, 4 }
 0x250   : > { %12633 = vmatmul.mubr.msk.bf16.gmra.mrb[12].mxu0 %vm1453_vm14, %v11520_v2  ;;  %v4695_v2 = vrot.slane %v4693_v35, 5  ;;  %v4709_v35 = vshll.u32 %v15292_v38, 16  ;;  %v4740_v3 = vrot.slane %v4738_v5, 4  ;;  %v4743_v29 = vrot.slane %v4741_v24, 5  ;;  %v5056_v5 = vld [vmem:[#allocation2 + $0x24] sm:$0xe] }
 0x251   : > { %12636 = vmatprep.mubr.msk.bf16.mxu0 %vm1453_vm14, %v11521_v46  ;;  %v4673_v46 = vrot.slane %v4672_v51, 4  ;;  %v4747_v51 = vshll.u32 %v15333_v59, 16  ;;  %v4753_v30 = vrot.slane %v4751_v21, 4  ;;  %v4721_v47 = vrot.slane %v4720_v14, 4  ;;  %v5057_v24 = vld [vmem:[#allocation2 + $0x30] sm:$0xe] }
 0x252   : > { %v4696_v34 = vor.u32 %v4695_v2, %v4692_v11  ;;  %v4711_v36 = vrot.slane %v4709_v35, 5  ;;  %v4731_v43 = vrot.slane %v4730_v52, 4  ;;  %v4744_v2 = vor.u32 %v4743_v29, %v4740_v3  ;;  %v5059_v3 = vld [vmem:[#allocation2 + $0x48] sm:$0xe] }
 0x253   : > { %v4678_v50 = vsel %vm13978_vm13, %v4673_v46, %v4677_v33  ;;  %v4749_v38 = vrot.slane %v4747_v51, 5  ;;  %v4757_v28 = vshll.u32 %v15335_v0, 16  ;;  %v4726_v26 = vsel %vm13978_vm13, %v4721_v47, %v4725_v13 }
 0x254   : > { %v11525_v33 = vcombine.low %v4678_v50, %v4688_v12  ;;  %v4697_v55 = vrot.slane %v4696_v34, 4  ;;  %v4712_v11 = vsel %vm13978_vm13, %v4707_v62, %v4711_v36  ;;  %v5121_v7 = vrot.slane %v15209_v49, 5 }
 0x255   : > { %v4754_v46 = vor.u32 %v4753_v30, %v4749_v38  ;;  %v4745_v18 = vrot.slane %v4744_v2, 4  ;;  %v4759_v8 = vrot.slane %v4757_v28, 5  ;;  %v11545_v34 = vrot.slane %v5055_v54, 9 }
 0x256   : > { %v4702_v59 = vsel %vm13978_vm13, %v4697_v55, %v4701_v16  ;;  %v5123_v50 = vrot.slane %v5121_v7, 4  ;;  %v5124_v12 = vrot.slane %v15235_v42, 5  ;;  %v5128_v13 = vrot.slane %v15231_v6, 5 }
 0x257   : > { %v11526_v58 = vcombine.low %v4702_v59, %v4712_v11  ;;  %v4755_v44 = vrot.slane %v4754_v46, 4  ;;  %v4750_v0 = vsel %vm13978_vm13, %v4745_v18, %v4749_v38  ;;  %v5122_v31 = vsel %vm14396_vm8, %v11545_v34, %v5121_v7  ;;  %v5063_v7 = vld [vmem:[#allocation2 + $0x78] sm:$0xe] }
 0x258   : > { %12637 = vmatmul.mubr.msk.bf16.gmra.mrb[16].mxu0 %vm1453_vm14, %v11522_v37  ;;  %v4733_v37 = vshll.u32 %v15494_v41, 16  ;;  %v5125_v35 = vsel %vm14396_vm8, %v5123_v50, %v5124_v12  ;;  %v5135_v42 = vrot.slane %v15254_v39, 5  ;;  %v11546_v14 = vrot.slane %v5056_v5, 9  ;;  %v17918_v12 = vld [vmem:[#allocation18_spill] sm:$0xff] }
 0x259   : > { %12640 = vmatprep.mubr.msk.bf16.mxu0 %vm1453_vm14, %v11523_v23  ;;  %v4760_v49 = vsel %vm13978_vm13, %v4755_v44, %v4759_v8  ;;  %v11562_v21 = vcombine.low %v5122_v31, %v5125_v35  ;;  %v5130_v52 = vrot.slane %v5128_v13, 4  ;;  %v5138_v6 = vrot.slane %v15283_v56, 5  ;;  %v5065_v44 = vld [vmem:[#allocation2 + $0x90] sm:$0xe] }
 0x25a   : > { %v4735_v20 = vrot.slane %v4733_v37, 5  ;;  %v11528_v51 = vcombine.low %v4750_v0, %v4760_v49  ;;  %v5131_v37 = vrot.slane %v15246_v17, 5  ;;  %v5129_v55 = vsel %vm14396_vm8, %v11546_v14, %v5128_v13  ;;  %v5067_v13 = vld [vmem:[#allocation2 + $0xa8] sm:$0xe] }
 0x25b   : > { %v5149_v36 = vrot.slane %v15306_v4, 5  ;;  %v11549_v38 = vrot.slane %v5059_v3, 9  ;;  %v5152_v47 = vrot.slane %v15340_v25, 5  ;;  %v5163_v59 = vrot.slane %v15355_v61, 5  ;;  %v5061_v4 = vld [vmem:[#allocation2 + $0x60] sm:$0xe] }
 0x25c   : > { %v4736_v23 = vsel %vm13978_vm13, %v4731_v43, %v4735_v20  ;;  %v5132_v39 = vsel %vm14396_vm8, %v5130_v52, %v5131_v37  ;;  %v11551_v2 = vrot.slane %v5061_v4, 9  ;;  %v5166_v28 = vrot.slane %v15387_v48, 5  ;;  %v5069_v52 = vld [vmem:[#allocation2 + $0xc0] sm:$0xe]  ;;  %v17928_v3 = vld [vmem:[#allocation12_spill] sm:$0xff] }
 0x25d   : > { %v11527_v16 = vcombine.low %v4726_v26, %v4736_v23  ;;  %v11563_v56 = vcombine.low %v5129_v55, %v5132_v39  ;;  %v5151_v30 = vrot.slane %v5149_v36, 4  ;;  %v5150_v43 = vsel %vm14396_vm8, %v11549_v38, %v5149_v36  ;;  %v17925_v55 = vld [vmem:[#allocation10_spill] sm:$0xff]  ;;  %v17927_v36 = vld [vmem:[#allocation11_spill] sm:$0xff] }
 0x25e   : > { %v5165_v46 = vrot.slane %v5163_v59, 4  ;;  %v17916_v25 = vcombine.low %v15175_v15, %v15179_v40  ;;  %v5164_v26 = vsel %vm14396_vm8, %v11551_v2, %v5163_v59  ;;  %v5177_v61 = vrot.slane %v15392_v60, 5  ;;  %v5610_v59 = vld [vmem:[#allocation3 + $0xc] sm:$0x1]  ;;  %v5668_v2 = vld [vmem:[#allocation3 + $0x20] sm:$0x1] }
 0x25f   : > { %v5153_v20 = vsel %vm14396_vm8, %v5151_v30, %v5152_v47  ;;  %v5180_v48 = vrot.slane %v15412_v9, 5  ;;  %v17917_v15 = vcombine.low %v15193_v45, %v15197_v10  ;;  %v5191_v60 = vrot.slane %v15423_v57, 5  ;;  %v17919_v45 = vld [vmem:[#allocation6_spill] sm:$0xff]  ;;  %v5613_v47 = vld [vmem:[#allocation3 + $0x18] sm:$0x1] }
 0x260   : > { %12641 = vmatmul.mubr.msk.bf16.gmra.mrb[20].mxu0 %vm1453_vm14, %v11524_v53  ;;  %v11547_v53 = vrot.slane %v5057_v24, 9  ;;  %v11566_v11 = vcombine.low %v5150_v43, %v5153_v20  ;;  %v5167_v23 = vsel %vm14396_vm8, %v5165_v46, %v5166_v28  ;;  %v11555_v34 = vrot.slane %v5065_v44, 9  ;;  %v17922_v24 = vld [vmem:[#allocation8_spill] sm:$0xff]  ;;  %v5665_v28 = vld [vmem:[#allocation3 + $0x14] sm:$0x1] }
 0x261   : > { %12644 = vmatprep.mubr.msk.bf16.mxu0 %vm1453_vm14, %v11525_v33  ;;  %v5137_v33 = vrot.slane %v5135_v42, 4  ;;  %v11568_v54 = vcombine.low %v5164_v26, %v5167_v23  ;;  %v5193_v50 = vrot.slane %v5191_v60, 4  ;;  %v5194_v9 = vrot.slane %v15440_v32, 5  ;;  %v5619_v26 = vld [vmem:[#allocation3 + $0x30] sm:$0x1] }
 0x262   : > { %v5136_v62 = vsel %vm14396_vm8, %v11547_v53, %v5135_v42  ;;  %v17920_v10 = vcombine.low %v17918_v12, %v17919_v45  ;;  %v5192_v0 = vsel %vm14396_vm8, %v11555_v34, %v5191_v60  ;;  %v5205_v57 = vrot.slane %v15449_v1, 5  ;;  %v17921_v42 = vld [vmem:[#allocation7_spill] sm:$0xff]  ;;  %v5622_v60 = vld [vmem:[#allocation3 + $0x3c] sm:$0x1] }
 0x263   : > { %v5139_v17 = vsel %vm14396_vm8, %v5137_v33, %v5138_v6  ;;  %v5195_v49 = vsel %vm14396_vm8, %v5193_v50, %v5194_v9  ;;  %v11557_v35 = vrot.slane %v5067_v13, 9  ;;  %v5208_v32 = vrot.slane %v15471_v27, 5  ;;  %v17924_v6 = vld [vmem:[#allocation9_spill] sm:$0xff]  ;;  %v5680_v34 = vld [vmem:[#allocation3 + $0x50] sm:$0x1] }
 0x264   : > { %v11564_v29 = vcombine.low %v5136_v62, %v5139_v17  ;;  %v11572_v31 = vcombine.low %v5192_v0, %v5195_v49  ;;  %v5207_v5 = vrot.slane %v5205_v57, 4  ;;  %v5219_v1 = vrot.slane %v15476_v22, 5  ;;  %v5677_v9 = vld [vmem:[#allocation3 + $0x44] sm:$0x1]  ;;  %v5631_v0 = vld [vmem:[#allocation3 + $0x60] sm:$0x1] }
 0x265   : > { %v11559_v53 = vrot.slane %v5069_v52, 9  ;;  %v5222_v27 = vrot.slane %v15494_v41, 5  ;;  %v17926_v39 = vcombine.low %v17924_v6, %v17925_v55  ;;  %v17930_v41 = vld [vmem:[#allocation13_spill] sm:$0xff]  ;;  %v17933_v30 = vmov 0  ;;  %v5628_v13 = vld [vmem:[#allocation3 + $0x54] sm:$0x1] }
 0x266   : > { %v5209_v14 = vsel %vm14396_vm8, %v5207_v5, %v5208_v32  ;;  %v5221_v33 = vrot.slane %v5219_v1, 4  ;;  %v17934_v30 = vsel %vm15616_vm5, 4294967295, %v17933_v30  ;;  %v17936_v43 = vmov 0   ;;  %v5686_v5 = vld [vmem:[#allocation3 + $0x68] sm:$0x1] }
 0x267   : > { %v5220_v62 = vsel %vm14396_vm8, %v11559_v53, %v5219_v1  ;;  %17935 = vst [vmem:[#allocation15_spill] sm:$0xff] %v17934_v30  ;;  %5600 = vst.msk [vmem:[#allocation3 + $0x8] sm:$0x1] %vm5599_vm1, %v17936_v43  ;;  %v5614_v20 = vsel %vm15616_vm5, 0, %v5613_v47  ;;  %v5611_v4 = vsel %vm15616_vm5, 0, %v5610_v59  ;;  %v5669_v46 = vsel %vm15627_vm7, 0, %v5668_v2 }
 0x268   : > { %12645 = vmatmul.mubr.msk.bf16.gmra.mrb[24].mxu0 %vm1453_vm14, %v11526_v58  ;;  %v11553_v58 = vrot.slane %v5063_v7, 9  ;;  %v5223_v17 = vsel %vm14396_vm8, %v5221_v33, %v5222_v27  ;;  %5604 = vst.msk [vmem:[#allocation3 + $0xd4] sm:$0x1] %vm5599_vm1, %v17936_v43  ;;  %5615 = vst [vmem:[#allocation3 + $0x18] sm:$0x1] %v5614_v20  ;;  %v5620_v23 = vsel %vm15616_vm5, 0, %v5619_v26 }
 0x269   : > { %12648 = vmatprep.mubr.msk.bf16.mxu0 %vm1453_vm14, %v11527_v16  ;;  %v5179_v16 = vrot.slane %v5177_v61, 4  ;;  %v11576_v22 = vcombine.low %v5220_v62, %v5223_v17  ;;  %5612 = vst [vmem:[#allocation3 + $0xc] sm:$0x1] %v5611_v4  ;;  %5670 = vst [vmem:[#allocation3 + $0x20] sm:$0x1] %v5669_v46  ;;  %v5681_v50 = vsel %vm15627_vm7, 0, %v5680_v34 }
 0x26a   : > { %v5178_v40 = vsel %vm14396_vm8, %v11553_v58, %v5177_v61  ;;  %v5616_v61 = vld [vmem:[#allocation3 + $0x24] sm:$0x1]  ;;  %5621 = vst [vmem:[#allocation3 + $0x30] sm:$0x1] %v5620_v23  ;;  %5682 = vst [vmem:[#allocation3 + $0x50] sm:$0x1] %v5681_v50 }
 0x26b   : > { %v5181_v18 = vsel %vm14396_vm8, %v5179_v16, %v5180_v48  ;;  %v5617_v7 = vsel %vm15616_vm5, 0, %v5616_v61  ;;  %v5671_v16 = vld [vmem:[#allocation3 + $0x2c] sm:$0x1]  ;;  %v5678_v45 = vsel %vm15627_vm7, 0, %v5677_v9  ;;  %v6248_v32 = vld [vmem:[#allocation3 + $0x4] sm:$0xf] }
 0x26c   : > { %v11570_v8 = vcombine.low %v5178_v40, %v5181_v18  ;;  %5618 = vst [vmem:[#allocation3 + $0x24] sm:$0x1] %v5617_v7  ;;  %v5672_v48 = vsel %vm15627_vm7, 0, %v5671_v16  ;;  %v5607_v40 = vld [vmem:[#allocation3] sm:$0x1]  ;;  %v6306_v33 = vshll.u32 %v6248_v32, 16 }
 0x26d   : > { %5673 = vst [vmem:[#allocation3 + $0x2c] sm:$0x1] %v5672_v48  ;;  %v5608_v44 = vsel %vm15616_vm5, 0, %v5607_v40  ;;  %5679 = vst [vmem:[#allocation3 + $0x44] sm:$0x1] %v5678_v45  ;;  %v6310_v27 = vshrl.u32 %v6248_v32, 16 }
 0x26e   : > { %5609 = vst [vmem:[#allocation3] sm:$0x1] %v5608_v44  ;;  %v5662_v12 = vld [vmem:[#allocation3 + $0x8] sm:$0x1]  ;;  %v11627_v1 = vld [vmem:[%s17739_s3 + $0x4] sm:$0xf] }
 0x26f   : > { %13645 = vmatprep.subr.msk.bf16.mxu0 %vm6779_vm3, %v11627_v1  ;;  %v6781_v52 = vsel %vm6779_vm3, %v11627_v1, 0  ;;  %13646 = vmatprep.subr.msk.bf16.mxu1 %vm6779_vm3, %v11627_v1  ;;  %v6312_v62 = vrot.slane %v6310_v27, 4  ;;  %v5637_v17 = vld [vmem:[#allocation3 + $0x78] sm:$0x1]  ;;  %v5692_v43 = vld [vmem:[#allocation3 + $0x80] sm:$0x1] }
 0x270   : > { %12649 = vmatmul.mubr.msk.bf16.gmra.mrb[28].mxu0 %vm1453_vm14, %v11528_v51  ;;  %v17923_v51 = vcombine.low %v17921_v42, %v17922_v24  ;;  %v5687_v24 = vsel %vm15627_vm7, 0, %v5686_v5  ;;  %13027 = vmatpush3.bf16.msra.mxu1 %v6781_v52  ;;  %v5693_v59 = vsel %vm15627_vm7, 0, %v5692_v43  ;;  %v5689_v2 = vld [vmem:[#allocation3 + $0x74] sm:$0x1]  ;;  %v5640_v26 = vld [vmem:[#allocation3 + $0x84] sm:$0x1] }
 0x271   : > { %12654 = vmatprep.mubr.msk.bf16.mxu0 %vm1453_vm14, %v11562_v21  ;;  %v5206_v21 = vsel %vm14396_vm8, %v11557_v35, %v5205_v57  ;;  %v5632_v57 = vsel %vm15616_vm5, 0, %v5631_v0  ;;  %v5629_v35 = vsel %vm15616_vm5, 0, %v5628_v13  ;;  %5688 = vst [vmem:[#allocation3 + $0x68] sm:$0x1] %v5687_v24  ;;  %5694 = vst [vmem:[#allocation3 + $0x80] sm:$0x1] %v5693_v59 }
 0x272   : > { %v11574_v37 = vcombine.low %v5206_v21, %v5209_v14  ;;  %5633 = vst [vmem:[#allocation3 + $0x60] sm:$0x1] %v5632_v57  ;;  %5630 = vst [vmem:[#allocation3 + $0x54] sm:$0x1] %v5629_v35  ;;  %v5690_v46 = vsel %vm15627_vm7, 0, %v5689_v2  ;;  %v5641_v61 = vsel %vm15616_vm5, 0, %v5640_v26 }
 0x273   : > { %5691 = vst [vmem:[#allocation3 + $0x74] sm:$0x1] %v5690_v46  ;;  %v5698_v23 = vld [vmem:[#allocation3 + $0x98] sm:$0x1]  ;;  %5642 = vst [vmem:[#allocation3 + $0x84] sm:$0x1] %v5641_v61 }
 0x274   : > { %v5699_v7 = vsel %vm15627_vm7, 0, %v5698_v23  ;;  %v5649_v16 = vld [vmem:[#allocation3 + $0xa8] sm:$0x1]  ;;  %v5704_v40 = vld [vmem:[#allocation3 + $0xb0] sm:$0x1] }
 0x275   : > { %v6247_v49 = vld [vmem:[#allocation3] sm:$0xf]  ;;  %5700 = vst [vmem:[#allocation3 + $0x98] sm:$0x1] %v5699_v7  ;;  %v5650_v48 = vsel %vm15616_vm5, 0, %v5649_v16 }
 0x276   : > { %v6300_v42 = vshll.u32 %v6247_v49, 16  ;;  %5651 = vst [vmem:[#allocation3 + $0xa8] sm:$0x1] %v5650_v48  ;;  %v5701_v44 = vld [vmem:[#allocation3 + $0xa4] sm:$0x1] }
 0x277   : > { %v5655_v34 = vld [vmem:[#allocation3 + $0xc0] sm:$0x1]  ;;  %v5652_v9 = vld [vmem:[#allocation3 + $0xb4] sm:$0x1]  ;;  %v5710_v45 = vld [vmem:[#allocation3 + $0xc8] sm:$0x1] }
 0x278   : > { %12655 = vmatmul.mubr.msk.bf16.vlgmr.msra.gmra.mrb[0].mxu0 %vm1453_vm14, %v11563_v56  ;;  %v17929_v56 = vcombine.low %v17927_v36, %v17928_v3  ;;  %v6302_v53 = vrot.slane %v6300_v42, 5  ;;  %v5634_v36 = vld [vmem:[#allocation3 + $0x6c] sm:$0x1]  ;;  %v5656_v50 = vsel %vm15616_vm5, 0, %v5655_v34  ;;  %v5707_v0 = vld [vmem:[#allocation3 + $0xbc] sm:$0x1] }
 0x279   : > { %12658 = vmatprep.mubr.msk.bf16.mxu0 %vm1453_vm14, %v11564_v29  ;;  %v17931_v29 = vld [vmem:[#allocation14_spill] sm:$0xff]  ;;  %12687 = vmatpush3.bf16.msra.mxu0 %v6781_v52  ;;  %5657 = vst [vmem:[#allocation3 + $0xc0] sm:$0x1] %v5656_v50 }
 0x27a   : > { %v17932_v38 = vcombine.low %v17930_v41, %v17931_v29  ;;  %v5635_v29 = vsel %vm15616_vm5, 0, %v5634_v36  ;;  %v6279_v57 = vld [vmem:[%s17739_s3] sm:$0xf] }
 0x27b   : > { %5636 = vst [vmem:[#allocation3 + $0x6c] sm:$0x1] %v5635_v29  ;;  %13647 = vmatprep.subr.msk.bf16.mxu1 %vm6779_vm3, %v6279_v57  ;;  %v15713_v13 = vld [vmem:[%s17738_s2] ss:$0 sm:$0xff] }
 0x280   : > { %12659 = vmatmul.mubr.msk.bf16.gmra.mrb[4].mxu0 %vm1453_vm14, %v17916_v25  ;;  %v5666_v25 = vsel %vm15627_vm7, 0, %v5665_v28  ;;  %v5643_v28 = vld [vmem:[#allocation3 + $0x90] sm:$0x1] }
 0x281   : > { %12662 = vmatprep.mubr.msk.bf16.mxu0 %vm1453_vm14, %v11566_v11  ;;  %v17937_v11 = vmov 0  ;;  %5667 = vst [vmem:[#allocation3 + $0x14] sm:$0x1] %v5666_v25  ;;  %v5644_v25 = vsel %vm15616_vm5, 0, %v5643_v28 }
 0x282   : > { %v17938_v11 = vsel %vm15627_vm7, 4294967295, %v17937_v11  ;;  %5645 = vst [vmem:[#allocation3 + $0x90] sm:$0x1] %v5644_v25  ;;  %v6135_v25 = vld [vmem:[#allocation3 + $0xc] sm:$0xf] }
 0x283   : > { %17939 = vst [vmem:[#allocation16_spill] sm:$0xff] %v17938_v11 }
 0x288   : > { %12663 = vmatmul.mubr.msk.bf16.gmra.mrb[8].mxu0 %vm1453_vm14, %v17917_v15  ;;  %v5625_v15 = vld [vmem:[#allocation3 + $0x48] sm:$0x1] }
 0x289   : > { %12666 = vmatprep.mubr.msk.bf16.mxu0 %vm1453_vm14, %v11568_v54  ;;  %v5674_v54 = vld [vmem:[#allocation3 + $0x38] sm:$0x1]  ;;  %v5626_v18 = vsel %vm15616_vm5, 0, %v5625_v15  ;;  %v5646_v15 = vld [vmem:[#allocation3 + $0x9c] sm:$0x1] }
 0x28a   : > { %v5675_v58 = vsel %vm15627_vm7, 0, %v5674_v54  ;;  %5627 = vst [vmem:[#allocation3 + $0x48] sm:$0x1] %v5626_v18  ;;  %v5695_v54 = vld [vmem:[#allocation3 + $0x8c] sm:$0x1]  ;;  %v5647_v18 = vsel %vm15616_vm5, 0, %v5646_v15 }
 0x28b   : > { %5676 = vst [vmem:[#allocation3 + $0x38] sm:$0x1] %v5675_v58  ;;  %v5696_v58 = vsel %vm15627_vm7, 0, %v5695_v54  ;;  %5648 = vst [vmem:[#allocation3 + $0x9c] sm:$0x1] %v5647_v18 }
 0x28c   : > { %5697 = vst [vmem:[#allocation3 + $0x8c] sm:$0x1] %v5696_v58  ;;  %v6146_v58 = vld [vmem:[#allocation3 + $0x20] sm:$0x1] }
 0x290   : > { %12667 = vmatmul.mubr.msk.bf16.gmra.mrb[12].mxu0 %vm1453_vm14, %v17920_v10  ;;  %v5663_v10 = vsel %vm15627_vm7, 0, %v5662_v12  ;;  %v5653_v12 = vsel %vm15616_vm5, 0, %v5652_v9 }
 0x291   : > { %12670 = vmatprep.mubr.msk.bf16.mxu0 %vm1453_vm14, %v11570_v8  ;;  %v5623_v8 = vsel %vm15616_vm5, 0, %v5622_v60  ;;  %5664 = vst [vmem:[#allocation3 + $0x8] sm:$0x1] %v5663_v10  ;;  %v5705_v60 = vsel %vm15627_vm7, 0, %v5704_v40  ;;  %5654 = vst [vmem:[#allocation3 + $0xb4] sm:$0x1] %v5653_v12 }
 0x292   : > { %5624 = vst [vmem:[#allocation3 + $0x3c] sm:$0x1] %v5623_v8  ;;  %5706 = vst [vmem:[#allocation3 + $0xb0] sm:$0x1] %v5705_v60  ;;  %v5702_v8 = vsel %vm15627_vm7, 0, %v5701_v44  ;;  %v5711_v10 = vsel %vm15627_vm7, 0, %v5710_v45 }
 0x293   : > { %5703 = vst [vmem:[#allocation3 + $0xa4] sm:$0x1] %v5702_v8  ;;  %5712 = vst [vmem:[#allocation3 + $0xc8] sm:$0x1] %v5711_v10  ;;  %v6139_v60 = vld [vmem:[#allocation3 + $0x14] sm:$0x1] }
 0x298   : > { %12671 = vmatmul.mubr.msk.bf16.gmra.mrb[16].mxu0 %vm1453_vm14, %v17923_v51  ;;  %v5683_v51 = vld [vmem:[#allocation3 + $0x5c] sm:$0x1] }
 0x299   : > { %12674 = vmatprep.mubr.msk.bf16.mxu0 %vm1453_vm14, %v11572_v31  ;;  %v6297_v31 = vshrl.u32 %v6247_v49, 16  ;;  %v5684_v14 = vsel %vm15627_vm7, 0, %v5683_v51  ;;  %v5708_v49 = vsel %vm15627_vm7, 0, %v5707_v0 }
 0x29a   : > { %5685 = vst [vmem:[#allocation3 + $0x5c] sm:$0x1] %v5684_v14  ;;  %5709 = vst [vmem:[#allocation3 + $0xbc] sm:$0x1] %v5708_v49 }
 0x29b   : > { %v6299_v21 = vrot.slane %v6297_v31, 4 }
 0x29d   : > { %v6303_v55 = vor.u32 %v6302_v53, %v6299_v21 }
 0x29f   : > { %v6304_v3 = vrot.slane %v6303_v55, 4 }
 0x2a0   : > { %12675 = vmatmul.mubr.msk.bf16.gmra.mrb[20].mxu0 %vm1453_vm14, %v17926_v39  ;;  %v6308_v39 = vrot.slane %v6306_v33, 5 }
 0x2a1   : > { %12678 = vmatprep.mubr.msk.bf16.mxu0 %vm1453_vm14, %v11574_v37  ;;  %v6280_v37 = vld [vmem:[#allocation3 + $0x8] sm:$0x1] }
 0x2a2   : > { %v6316_v6 = vshll.u32 %v6280_v37, 16 }
 0x2a4   : > { %v6318_v41 = vrot.slane %v6316_v6, 5 }
 0x2a8   : > { %12679 = vmatmul.mubr.msk.bf16.gmra.mrb[24].mxu0 %vm1453_vm14, %v17929_v56  ;;  %v6313_v56 = vor.u32 %v6312_v62, %v6308_v39 }
 0x2a9   : > { %12682 = vmatprep.mubr.msk.bf16.mxu0 %vm1453_vm14, %v11576_v22  ;;  %v5638_v22 = vsel %vm15616_vm5, 0, %v5637_v17 }
 0x2aa   : > { %5639 = vst [vmem:[#allocation3 + $0x78] sm:$0x1] %v5638_v22  ;;  %v6314_v47 = vrot.slane %v6313_v56, 4 }
 0x2ac   : > { %v6319_v20 = vsel %vm13978_vm13, %v6314_v47, %v6318_v41  ;;  %v6142_v47 = vld [vmem:[#allocation3 + $0x18] sm:$0xf] }
 0x2b0   : > { %12683 = vmatmul.mubr.msk.bf16.gmra.mrb[28].mxu0 %vm1453_vm14, %v17932_v38  ;;  %v6309_v38 = vsel %vm13978_vm13, %v6304_v3, %v6308_v39 }
 0x2b1   : > { %v11628_v4 = vcombine.low %v6309_v38, %v6319_v20 }
 0x2b3   : > { %12688 = vmatprep.mubr.msk.bf16.mxu0 %vm6730_vm9, %v11628_v4 }
 0x34b   : > { %v12656_v31 = vpop.f32.mrb[0].mxu0 }
 0x34c   : > { %v5534_v35 = vadd.f32 %v12656_v31, %v15713_v13  ;;  %v5366_v5 = vpop.f32.mrb[1].mxu0 }
 0x34d   : > { %v5532_v32 = vadd.f32 %v15713_v13, %v5366_v5  ;;  %v12657_v42 = vpop.f32.mrb[2].mxu0 }
 0x34e   : > { %v5566_v24 = vmax.f32 %v5534_v35, 0.0  ;;  %v5535_v51 = vadd.f32 %v12657_v42, %v15713_v13  ;;  %v5369_v21 = vpop.f32.mrb[3].mxu0 }
 0x34f   : > { %v5564_v14 = vmax.f32 %v5532_v32, 0.0  ;;  %v5533_v1 = vadd.f32 %v15713_v13, %v5369_v21 }
 0x350   : > { %v12027_v52 = vpack.c.bf16 %v5566_v24, %v5566_v24  ;;  %v5567_v37 = vmax.f32 %v5535_v51, 0.0 }
 0x351   : > { %v12025_v53 = vpack.c.bf16 %v5564_v14, %v5564_v14  ;;  %v5565_v33 = vmax.f32 %v5533_v1, 0.0  ;;  %v6156_v14 = vld [vmem:[#allocation3 + $0x30] sm:$0xf] }
 0x352   : > { %v5830_v27 = vshrl.u32 %v12027_v52, 16  ;;  %v12028_v6 = vpack.c.bf16 %v5567_v37, %v5567_v37  ;;  %v5833_v55 = vshll.u32 %v12027_v52, 16 }
 0x353   : > { %v5813_v39 = vshrl.u32 %v12025_v53, 16  ;;  %v5816_v62 = vshll.u32 %v12025_v53, 16  ;;  %v12026_v17 = vpack.c.bf16 %v5565_v33, %v5565_v33  ;;  %v12660_v22 = vpop.f32.mrb[4].mxu0 }
 0x354   : > { %v5832_v36 = vrot.slane %v5830_v27, 7  ;;  %v5838_v3 = vshrl.u32 %v12028_v6, 16  ;;  %v5841_v56 = vshll.u32 %v12028_v6, 16  ;;  %v5538_v41 = vadd.f32 %v12660_v22, %v15713_v13  ;;  %v5382_v29 = vpop.f32.mrb[5].mxu0  ;;  %v6149_v6 = vld [vmem:[#allocation3 + $0x24] sm:$0xf] }
 0x355   : > { %v5815_v43 = vrot.slane %v5813_v39, 7  ;;  %v5821_v20 = vshrl.u32 %v12026_v17, 16  ;;  %v5824_v59 = vshll.u32 %v12026_v17, 16  ;;  %v5536_v4 = vadd.f32 %v15713_v13, %v5382_v29  ;;  %v12661_v2 = vpop.f32.mrb[6].mxu0 }
 0x356   : > { %v5835_v46 = vor.u32 %v5833_v55, %v5832_v36  ;;  %v5836_v28 = vrot.slane %v5832_v36, 4  ;;  %v5840_v26 = vrot.slane %v5838_v3, 7  ;;  %v5570_v23 = vmax.f32 %v5538_v41, 0.0  ;;  %v5385_v61 = vpop.f32.mrb[7].mxu0 }
 0x357   : > { %v5818_v7 = vor.u32 %v5816_v62, %v5815_v43  ;;  %v5819_v54 = vrot.slane %v5815_v43, 4  ;;  %v5823_v16 = vrot.slane %v5821_v20, 7  ;;  %v5568_v48 = vmax.f32 %v5536_v4, 0.0 }
 0x358   : > { %v6143_v15 = vsel %vm15722_vm10, %v5835_v46, %v6142_v47  ;;  %v5843_v40 = vor.u32 %v5841_v56, %v5840_v26  ;;  %v5845_v18 = vrot.slane %v5840_v26, 4  ;;  %v12031_v44 = vpack.c.bf16 %v5570_v23, %v5570_v23  ;;  %v6160_v26 = vld [vmem:[#allocation3 + $0x38] sm:$0x1]  ;;  %v6153_v23 = vld [vmem:[#allocation3 + $0x2c] sm:$0x1] }
 0x359   : > { %6144 = vst [vmem:[#allocation3 + $0x18] sm:$0xf] %v6143_v15  ;;  %v6136_v8 = vsel %vm15722_vm10, %v5818_v7, %v6135_v25  ;;  %v5826_v34 = vor.u32 %v5824_v59, %v5823_v16  ;;  %v5828_v50 = vrot.slane %v5823_v16, 4  ;;  %v12029_v9 = vpack.c.bf16 %v5568_v48, %v5568_v48 }
 0x35a   : > { %6137 = vst [vmem:[#allocation3 + $0xc] sm:$0xf] %v6136_v8  ;;  %v5844_v45 = vsel %vm13964_vm12, %v5836_v28, %v5843_v40  ;;  %v6147_v10 = vsel %vm15616_vm5, %v5845_v18, %v6146_v58  ;;  %v5864_v0 = vshrl.u32 %v12031_v44, 16  ;;  %v5867_v31 = vshll.u32 %v12031_v44, 16  ;;  %v6170_v8 = vld [vmem:[#allocation3 + $0x48] sm:$0xf] }
 0x35b   : > { %6145 = vst.msk [vmem:[#allocation3 + $0x1c] sm:$0xf] %vm5596_vm6, %v5844_v45  ;;  %6148 = vst [vmem:[#allocation3 + $0x20] sm:$0x1] %v6147_v10  ;;  %v5827_v49 = vsel %vm13964_vm12, %v5819_v54, %v5826_v34  ;;  %v6140_v57 = vsel %vm15616_vm5, %v5828_v50, %v6139_v60  ;;  %v5847_v35 = vshrl.u32 %v12029_v9, 16  ;;  %v12664_v5 = vpop.f32.mrb[8].mxu0  ;;  %v5539_v42 = vadd.f32 %v12661_v2, %v15713_v13 }
 0x35c   : > { %6138 = vst.msk [vmem:[#allocation3 + $0x10] sm:$0xf] %vm5596_vm6, %v5827_v49  ;;  %6141 = vst [vmem:[#allocation3 + $0x14] sm:$0x1] %v6140_v57  ;;  %v15741_v32 = vrot.slane %v5864_v0, 7  ;;  %v5537_v24 = vadd.f32 %v15713_v13, %v5385_v61  ;;  %v5542_v51 = vadd.f32 %v12664_v5, %v15713_v13  ;;  %v5398_v21 = vpop.f32.mrb[9].mxu0 }
 0x35d   : > { %v5849_v1 = vrot.slane %v5847_v35, 7  ;;  %v5850_v52 = vshll.u32 %v12029_v9, 16  ;;  %v5540_v37 = vadd.f32 %v15713_v13, %v5398_v21  ;;  %v12665_v53 = vpop.f32.mrb[10].mxu0  ;;  %v5571_v55 = vmax.f32 %v5539_v42, 0.0 }
 0x35e   : > { %v5869_v33 = vor.u32 %v5867_v31, %v15741_v32  ;;  %v5870_v27 = vrot.slane %v15741_v32, 4  ;;  %v5569_v39 = vmax.f32 %v5537_v24, 0.0  ;;  %v5401_v62 = vpop.f32.mrb[11].mxu0  ;;  %v5574_v36 = vmax.f32 %v5542_v51, 0.0  ;;  %v6163_v31 = vld [vmem:[#allocation3 + $0x3c] sm:$0xf] }
 0x35f   : > { %v5852_v17 = vor.u32 %v5850_v52, %v5849_v1  ;;  %v5853_v22 = vrot.slane %v5849_v1, 4  ;;  %v5572_v3 = vmax.f32 %v5540_v37, 0.0  ;;  %v12032_v41 = vpack.c.bf16 %v5571_v55, %v5571_v55 }
 0x360   : > { %v6157_v56 = vsel %vm15722_vm10, %v5869_v33, %v6156_v14  ;;  %v12030_v29 = vpack.c.bf16 %v5569_v39, %v5569_v39  ;;  %v5543_v47 = vadd.f32 %v12665_v53, %v15713_v13  ;;  %v12035_v20 = vpack.c.bf16 %v5574_v36, %v5574_v36 }
 0x361   : > { %6158 = vst [vmem:[#allocation3 + $0x30] sm:$0xf] %v6157_v56  ;;  %v6150_v43 = vsel %vm15722_vm10, %v5852_v17, %v6149_v6  ;;  %v12033_v59 = vpack.c.bf16 %v5572_v3, %v5572_v3  ;;  %v5541_v4 = vadd.f32 %v15713_v13, %v5401_v62  ;;  %v5872_v2 = vshrl.u32 %v12032_v41, 16  ;;  %v6174_v56 = vld [vmem:[#allocation3 + $0x50] sm:$0x1] }
 0x362   : > { %6151 = vst [vmem:[#allocation3 + $0x24] sm:$0xf] %v6150_v43  ;;  %v5875_v46 = vshll.u32 %v12032_v41, 16  ;;  %v5855_v28 = vshrl.u32 %v12030_v29, 16  ;;  %v5858_v25 = vshll.u32 %v12030_v29, 16  ;;  %v5898_v61 = vshrl.u32 %v12035_v20, 16 }
 0x363   : > { %v5901_v7 = vshll.u32 %v12035_v20, 16  ;;  %v5881_v54 = vshrl.u32 %v12033_v59, 16  ;;  %v5884_v58 = vshll.u32 %v12033_v59, 16  ;;  %v12668_v16 = vpop.f32.mrb[12].mxu0  ;;  %v5874_v48 = vrot.slane %v5872_v2, 7 }
 0x364   : > { %v5857_v15 = vrot.slane %v5855_v28, 7  ;;  %v5575_v40 = vmax.f32 %v5543_v47, 0.0  ;;  %v5573_v18 = vmax.f32 %v5541_v4, 0.0  ;;  %v5414_v60 = vpop.f32.mrb[13].mxu0  ;;  %v15755_v44 = vrot.slane %v5898_v61, 7 }
 0x365   : > { %v15757_v34 = vrot.slane %v5881_v54, 7  ;;  %v5546_v50 = vadd.f32 %v12668_v16, %v15713_v13  ;;  %v5544_v9 = vadd.f32 %v15713_v13, %v5414_v60  ;;  %v12669_v45 = vpop.f32.mrb[14].mxu0  ;;  %v5877_v10 = vor.u32 %v5875_v46, %v5874_v48  ;;  %v6167_v2 = vld [vmem:[#allocation3 + $0x44] sm:$0x1] }
 0x366   : > { %v5879_v0 = vrot.slane %v5874_v48, 4  ;;  %v5860_v49 = vor.u32 %v5858_v25, %v5857_v15  ;;  %v5862_v57 = vrot.slane %v5857_v15, 4  ;;  %v5417_v35 = vpop.f32.mrb[15].mxu0  ;;  %v5903_v5 = vor.u32 %v5901_v7, %v15755_v44 }
 0x367   : > { %v5904_v32 = vrot.slane %v15755_v44, 4  ;;  %v5886_v42 = vor.u32 %v5884_v58, %v15757_v34  ;;  %v5887_v24 = vrot.slane %v15757_v34, 4  ;;  %v5878_v51 = vsel %vm13964_vm12, %v5870_v27, %v5877_v10  ;;  %v6177_v10 = vld [vmem:[#allocation3 + $0x54] sm:$0xf] }
 0x368   : > { %v6161_v21 = vsel %vm15616_vm5, %v5879_v0, %v6160_v26  ;;  %v5861_v14 = vsel %vm13964_vm12, %v5853_v22, %v5860_v49  ;;  %v6154_v1 = vsel %vm15616_vm5, %v5862_v57, %v6153_v23  ;;  %6159 = vst.msk [vmem:[#allocation3 + $0x34] sm:$0xf] %vm5596_vm6, %v5878_v51  ;;  %v6171_v52 = vsel %vm15722_vm10, %v5903_v5, %v6170_v8 }
 0x369   : > { %6162 = vst [vmem:[#allocation3 + $0x38] sm:$0x1] %v6161_v21  ;;  %6152 = vst.msk [vmem:[#allocation3 + $0x28] sm:$0xf] %vm5596_vm6, %v5861_v14  ;;  %v6164_v37 = vsel %vm15722_vm10, %v5886_v42, %v6163_v31  ;;  %v12036_v53 = vpack.c.bf16 %v5575_v40, %v5575_v40  ;;  %v12034_v33 = vpack.c.bf16 %v5573_v18, %v5573_v18  ;;  %v5578_v27 = vmax.f32 %v5546_v50, 0.0 }
 0x36a   : > { %6155 = vst [vmem:[#allocation3 + $0x2c] sm:$0x1] %v6154_v1  ;;  %6172 = vst [vmem:[#allocation3 + $0x48] sm:$0xf] %v6171_v52  ;;  %v5576_v6 = vmax.f32 %v5544_v9, 0.0  ;;  %v5547_v55 = vadd.f32 %v12669_v45, %v15713_v13  ;;  %v5545_v39 = vadd.f32 %v15713_v13, %v5417_v35 }
 0x36b   : > { %6165 = vst [vmem:[#allocation3 + $0x3c] sm:$0xf] %v6164_v37  ;;  %v5906_v62 = vshrl.u32 %v12036_v53, 16  ;;  %v5909_v17 = vshll.u32 %v12036_v53, 16  ;;  %v5889_v22 = vshrl.u32 %v12034_v33, 16  ;;  %v5892_v36 = vshll.u32 %v12034_v33, 16 }
 0x36c   : > { %v12672_v3 = vpop.f32.mrb[16].mxu0  ;;  %v12039_v41 = vpack.c.bf16 %v5578_v27, %v5578_v27  ;;  %v12037_v29 = vpack.c.bf16 %v5576_v6, %v5576_v6  ;;  %v5579_v47 = vmax.f32 %v5547_v55, 0.0  ;;  %v5577_v43 = vmax.f32 %v5545_v39, 0.0  ;;  %v6184_v45 = vld [vmem:[#allocation3 + $0x60] sm:$0xf] }
 0x36d   : > { %v5430_v20 = vpop.f32.mrb[17].mxu0  ;;  %v5908_v59 = vrot.slane %v5906_v62, 7  ;;  %v5891_v4 = vrot.slane %v5889_v22, 7  ;;  %v5550_v46 = vadd.f32 %v12672_v3, %v15713_v13  ;;  %v6249_v35 = vld [vmem:[#allocation3 + $0xc] sm:$0xf] }
 0x36e   : > { %v5548_v28 = vadd.f32 %v15713_v13, %v5430_v20  ;;  %v12673_v25 = vpop.f32.mrb[18].mxu0  ;;  %v5932_v26 = vshrl.u32 %v12039_v41, 16  ;;  %v5935_v23 = vshll.u32 %v12039_v41, 16  ;;  %v5915_v61 = vshrl.u32 %v12037_v29, 16  ;;  %v6188_v1 = vld [vmem:[#allocation3 + $0x68] sm:$0x1] }
 0x36f   : > { %v5918_v7 = vshll.u32 %v12037_v29, 16  ;;  %v5433_v54 = vpop.f32.mrb[19].mxu0  ;;  %v5911_v58 = vor.u32 %v5909_v17, %v5908_v59  ;;  %v5913_v16 = vrot.slane %v5908_v59, 4  ;;  %v5894_v48 = vor.u32 %v5892_v36, %v5891_v4  ;;  %v6181_v52 = vld [vmem:[#allocation3 + $0x5c] sm:$0x1] }
 0x370   : > { %v5896_v15 = vrot.slane %v5891_v4, 4  ;;  %v5934_v40 = vrot.slane %v5932_v26, 7  ;;  %v5917_v18 = vrot.slane %v5915_v61, 7  ;;  %v12040_v60 = vpack.c.bf16 %v5579_v47, %v5579_v47  ;;  %v6250_v36 = vld [vmem:[#allocation3 + $0x10] sm:$0xf] }
 0x371   : > { %v12038_v44 = vpack.c.bf16 %v5577_v43, %v5577_v43  ;;  %v5912_v8 = vsel %vm13964_vm12, %v5904_v32, %v5911_v58  ;;  %v6175_v34 = vsel %vm15616_vm5, %v5913_v16, %v6174_v56  ;;  %v5895_v50 = vsel %vm13964_vm12, %v5887_v24, %v5894_v48  ;;  %v6198_v61 = vld [vmem:[#allocation3 + $0x78] sm:$0xf] }
 0x372   : > { %v6168_v9 = vsel %vm15616_vm5, %v5896_v15, %v6167_v2  ;;  %6173 = vst.msk [vmem:[#allocation3 + $0x4c] sm:$0xf] %vm5596_vm6, %v5912_v8  ;;  %6176 = vst [vmem:[#allocation3 + $0x50] sm:$0x1] %v6175_v34  ;;  %v5937_v0 = vor.u32 %v5935_v23, %v5934_v40  ;;  %v5938_v49 = vrot.slane %v5934_v40, 4  ;;  %v5920_v57 = vor.u32 %v5918_v7, %v5917_v18 }
 0x373   : > { %6166 = vst.msk [vmem:[#allocation3 + $0x40] sm:$0xf] %vm5596_vm6, %v5895_v50  ;;  %6169 = vst [vmem:[#allocation3 + $0x44] sm:$0x1] %v6168_v9  ;;  %v5921_v31 = vrot.slane %v5917_v18, 4  ;;  %v5940_v5 = vshrl.u32 %v12040_v60, 16  ;;  %v5551_v55 = vadd.f32 %v12673_v25, %v15713_v13  ;;  %v5549_v39 = vadd.f32 %v15713_v13, %v5433_v54 }
 0x374   : > { %v5943_v32 = vshll.u32 %v12040_v60, 16  ;;  %v5923_v42 = vshrl.u32 %v12038_v44, 16  ;;  %v5926_v24 = vshll.u32 %v12038_v44, 16  ;;  %v15793_v51 = vpop.f32.mrb[20].mxu0  ;;  %v6185_v21 = vsel %vm15722_vm10, %v5937_v0, %v6184_v45  ;;  %v6191_v7 = vld [vmem:[#allocation3 + $0x6c] sm:$0xf] }
 0x375   : > { %v6178_v14 = vsel %vm15722_vm10, %v5920_v57, %v6177_v10  ;;  %v5582_v37 = vmax.f32 %v5550_v46, 0.0  ;;  %v5580_v53 = vmax.f32 %v5548_v28, 0.0  ;;  %v15799_v33 = vpop.f32.mrb[21].mxu0  ;;  %6186 = vst [vmem:[#allocation3 + $0x60] sm:$0xf] %v6185_v21  ;;  %v5942_v27 = vrot.slane %v5940_v5, 7 }
 0x376   : > { %6179 = vst [vmem:[#allocation3 + $0x54] sm:$0xf] %v6178_v14  ;;  %v5925_v6 = vrot.slane %v5923_v42, 7  ;;  %v15803_v62 = vpop.f32.mrb[22].mxu0  ;;  %v6321_v3 = vshrl.u32 %v6249_v35, 16  ;;  %v6324_v56 = vshll.u32 %v6249_v35, 16 }
 0x377   : > { %v12043_v17 = vpack.c.bf16 %v5582_v37, %v5582_v37  ;;  %v12041_v22 = vpack.c.bf16 %v5580_v53, %v5580_v53  ;;  %v15805_v41 = vpop.f32.mrb[23].mxu0  ;;  %v5945_v29 = vor.u32 %v5943_v32, %v5942_v27  ;;  %v5947_v47 = vrot.slane %v5942_v27, 4  ;;  %v6281_v15 = vld [vmem:[#allocation3 + $0x14] sm:$0x1]  ;;  %v6251_v35 = vld [vmem:[#allocation3 + $0x18] sm:$0xf] }
 0x378   : > { %v5928_v43 = vor.u32 %v5926_v24, %v5925_v6  ;;  %v5930_v20 = vrot.slane %v5925_v6, 4  ;;  %v5583_v16 = vmax.f32 %v5551_v55, 0.0  ;;  %v5581_v48 = vmax.f32 %v5549_v39, 0.0  ;;  %v6252_v14 = vld [vmem:[#allocation3 + $0x1c] sm:$0xf] }
 0x379   : > { %v5966_v59 = vshrl.u32 %v12043_v17, 16  ;;  %v5969_v4 = vshll.u32 %v12043_v17, 16  ;;  %v5949_v2 = vshrl.u32 %v12041_v22, 16  ;;  %v5952_v46 = vshll.u32 %v12041_v22, 16 }
 0x37a   : > { %v5946_v28 = vsel %vm13964_vm12, %v5938_v49, %v5945_v29  ;;  %v6189_v25 = vsel %vm15616_vm5, %v5947_v47, %v6188_v1  ;;  %v5929_v26 = vsel %vm13964_vm12, %v5921_v31, %v5928_v43  ;;  %v6182_v23 = vsel %vm15616_vm5, %v5930_v20, %v6181_v52  ;;  %v6195_v47 = vld [vmem:[#allocation3 + $0x74] sm:$0x1] }
 0x37b   : > { %6187 = vst.msk [vmem:[#allocation3 + $0x64] sm:$0xf] %vm5596_vm6, %v5946_v28  ;;  %6190 = vst [vmem:[#allocation3 + $0x68] sm:$0x1] %v6189_v25  ;;  %v5968_v54 = vrot.slane %v5966_v59, 7  ;;  %v5951_v58 = vrot.slane %v5949_v2, 7  ;;  %v12044_v0 = vpack.c.bf16 %v5583_v16, %v5583_v16  ;;  %v12042_v49 = vpack.c.bf16 %v5581_v48, %v5581_v48 }
 0x37c   : > { %6180 = vst.msk [vmem:[#allocation3 + $0x58] sm:$0xf] %vm5596_vm6, %v5929_v26  ;;  %6183 = vst [vmem:[#allocation3 + $0x5c] sm:$0x1] %v6182_v23  ;;  %v6323_v40 = vrot.slane %v6321_v3, 4  ;;  %v6326_v18 = vrot.slane %v6324_v56, 5 }
 0x37d   : > { %v6330_v60 = vshll.u32 %v6250_v36, 16  ;;  %v6334_v44 = vshrl.u32 %v6250_v36, 16  ;;  %v15817_v8 = vpop.f32.mrb[24].mxu0  ;;  %v5971_v34 = vor.u32 %v5969_v4, %v5968_v54  ;;  %v5972_v50 = vrot.slane %v5968_v54, 4  ;;  %v6202_v36 = vld [vmem:[#allocation3 + $0x80] sm:$0x1] }
 0x37e   : > { %v5954_v9 = vor.u32 %v5952_v46, %v5951_v58  ;;  %v5955_v45 = vrot.slane %v5951_v58, 4  ;;  %v15819_v10 = vpop.f32.mrb[25].mxu0  ;;  %v6327_v57 = vor.u32 %v6326_v18, %v6323_v40  ;;  %v6340_v21 = vshll.u32 %v6281_v15, 16  ;;  %v6282_v26 = vld [vmem:[#allocation3 + $0x20] sm:$0x1] }
 0x37f   : > { %v6332_v31 = vrot.slane %v6330_v60, 5  ;;  %v15821_v5 = vpop.f32.mrb[26].mxu0  ;;  %v6199_v32 = vsel %vm15722_vm10, %v5971_v34, %v6198_v61  ;;  %v6336_v24 = vrot.slane %v6334_v44, 4  ;;  %v5974_v52 = vshrl.u32 %v12044_v0, 16  ;;  %v6253_v16 = vld [vmem:[#allocation3 + $0x24] sm:$0xf] }
 0x380   : > { %v6192_v42 = vsel %vm15722_vm10, %v5954_v9, %v6191_v7  ;;  %v15827_v1 = vpop.f32.mrb[27].mxu0  ;;  %6200 = vst [vmem:[#allocation3 + $0x78] sm:$0xf] %v6199_v32  ;;  %v5977_v37 = vshll.u32 %v12044_v0, 16  ;;  %v5957_v53 = vshrl.u32 %v12042_v49, 16  ;;  %v5960_v27 = vshll.u32 %v12042_v49, 16 }
 0x381   : > { %6193 = vst [vmem:[#allocation3 + $0x6c] sm:$0xf] %v6192_v42  ;;  %v6328_v6 = vrot.slane %v6327_v57, 4  ;;  %v6337_v55 = vor.u32 %v6336_v24, %v6332_v31  ;;  %v6342_v39 = vrot.slane %v6340_v21, 5  ;;  %v6345_v17 = vshrl.u32 %v6251_v35, 16 }
 0x382   : > { %v5976_v22 = vrot.slane %v5974_v52, 7  ;;  %v5959_v3 = vrot.slane %v5957_v53, 7  ;;  %v6348_v56 = vshll.u32 %v6251_v35, 16  ;;  %v6354_v29 = vshll.u32 %v6252_v14, 16  ;;  %v15859_v32 = vld [vmem:[#allocation3 + $0x28] sm:$0xf] }
 0x383   : > { %v6333_v43 = vsel %vm13978_vm13, %v6328_v6, %v6332_v31  ;;  %v6338_v20 = vrot.slane %v6337_v55, 4  ;;  %v6347_v59 = vrot.slane %v6345_v17, 4  ;;  %v6358_v4 = vshrl.u32 %v6252_v14, 16  ;;  %v15831_v23 = vpop.f32.mrb[28].mxu0 }
 0x384   : > { %v5979_v2 = vor.u32 %v5977_v37, %v5976_v22  ;;  %v5981_v46 = vrot.slane %v5976_v22, 4  ;;  %v5962_v28 = vor.u32 %v5960_v27, %v5959_v3  ;;  %v5964_v25 = vrot.slane %v5959_v3, 4  ;;  %v15835_v48 = vpop.f32.mrb[29].mxu0 }
 0x385   : > { %v6343_v61 = vsel %vm13978_vm13, %v6338_v20, %v6342_v39  ;;  %v6350_v7 = vrot.slane %v6348_v56, 5  ;;  %v6356_v54 = vrot.slane %v6354_v29, 5  ;;  %v6360_v58 = vrot.slane %v6358_v4, 4  ;;  %v15845_v44 = vpop.f32.mrb[30].mxu0  ;;  %v6212_v4 = vld [vmem:[#allocation3 + $0x90] sm:$0xf] }
 0x386   : > { %v5980_v15 = vsel %vm13964_vm12, %v5972_v50, %v5979_v2  ;;  %v6203_v40 = vsel %vm15616_vm5, %v5981_v46, %v6202_v36  ;;  %v5963_v18 = vsel %vm13964_vm12, %v5955_v45, %v5962_v28  ;;  %v6196_v60 = vsel %vm15616_vm5, %v5964_v25, %v6195_v47  ;;  %v15849_v49 = vpop.f32.mrb[31].mxu0  ;;  %v6205_v2 = vld [vmem:[#allocation3 + $0x84] sm:$0xf] }
 0x387   : > { %6201 = vst.msk [vmem:[#allocation3 + $0x7c] sm:$0xf] %vm5596_vm6, %v5980_v15  ;;  %6204 = vst [vmem:[#allocation3 + $0x80] sm:$0x1] %v6203_v40  ;;  %v11629_v34 = vcombine.low %v6333_v43, %v6343_v61  ;;  %v6351_v9 = vor.u32 %v6350_v7, %v6347_v59  ;;  %v6361_v50 = vor.u32 %v6360_v58, %v6356_v54  ;;  %v6364_v0 = vshll.u32 %v6282_v26, 16 }
 0x388   : > { %6194 = vst.msk [vmem:[#allocation3 + $0x70] sm:$0xf] %vm5596_vm6, %v5963_v18  ;;  %6197 = vst [vmem:[#allocation3 + $0x74] sm:$0x1] %v6196_v60  ;;  %v5554_v45 = vadd.f32 %v15793_v51, %v15713_v13  ;;  %v5552_v57 = vadd.f32 %v15713_v13, %v15799_v33  ;;  %v5555_v31 = vadd.f32 %v15803_v62, %v15713_v13  ;;  %v6369_v14 = vshrl.u32 %v6253_v16, 16 }
 0x389   : > { %v5553_v35 = vadd.f32 %v15713_v13, %v15805_v41  ;;  %12689 = vmatmul.mubr.msk.bf16.vlgmr.msra.gmra.mrb[32].mxu0 %vm6730_vm9, %v11629_v34  ;;  %v6352_v42 = vrot.slane %v6351_v9, 4  ;;  %v6362_v24 = vrot.slane %v6361_v50, 4  ;;  %v6366_v21 = vrot.slane %v6364_v0, 5  ;;  %v6283_v59 = vld [vmem:[#allocation3 + $0x2c] sm:$0x1] }
 0x38a   : > { %v5586_v52 = vmax.f32 %v5554_v45, 0.0  ;;  %v5584_v37 = vmax.f32 %v5552_v57, 0.0  ;;  %v5587_v51 = vmax.f32 %v5555_v31, 0.0  ;;  %v6371_v27 = vrot.slane %v6369_v14, 4  ;;  %v6209_v18 = vld [vmem:[#allocation3 + $0x8c] sm:$0x1] }
 0x38b   : > { %v5585_v53 = vmax.f32 %v5553_v35, 0.0  ;;  %v6357_v33 = vsel %vm13978_vm13, %v6352_v42, %v6356_v54  ;;  %v6367_v62 = vsel %vm13978_vm13, %v6362_v24, %v6366_v21  ;;  %v6372_v41 = vshll.u32 %v6253_v16, 16  ;;  %v6216_v54 = vld [vmem:[#allocation3 + $0x98] sm:$0x1]  ;;  %v15869_v24 = vld [vmem:[#allocation3 + $0x30] sm:$0xf] }
 0x38c   : > { %v11630_v6 = vcombine.low %v6357_v33, %v6367_v62  ;;  %v12047_v55 = vpack.c.bf16 %v5586_v52, %v5586_v52  ;;  %v12045_v39 = vpack.c.bf16 %v5584_v37, %v5584_v37  ;;  %v12048_v17 = vpack.c.bf16 %v5587_v51, %v5587_v51  ;;  %v15875_v51 = vld [vmem:[#allocation3 + $0x34] sm:$0xf] }
 0x38d   : > { %v12046_v22 = vpack.c.bf16 %v5585_v53, %v5585_v53  ;;  %v6374_v36 = vrot.slane %v6372_v41, 5  ;;  %v6378_v3 = vshll.u32 %v15859_v32, 16  ;;  %v6382_v56 = vshrl.u32 %v15859_v32, 16  ;;  %v6284_v53 = vld [vmem:[#allocation3 + $0x38] sm:$0x1] }
 0x38e   : > { %12692 = vmatprep.mubr.msk.bf16.mxu0 %vm6730_vm9, %v11630_v6  ;;  %v6000_v29 = vshrl.u32 %v12047_v55, 16  ;;  %v6003_v47 = vshll.u32 %v12047_v55, 16  ;;  %v5983_v43 = vshrl.u32 %v12045_v39, 16  ;;  %v5986_v20 = vshll.u32 %v12045_v39, 16 }
 0x38f   : > { %v6008_v46 = vshrl.u32 %v12048_v17, 16  ;;  %v6011_v28 = vshll.u32 %v12048_v17, 16  ;;  %v5991_v25 = vshrl.u32 %v12046_v22, 16  ;;  %v5994_v26 = vshll.u32 %v12046_v22, 16 }
 0x390   : > { %v6002_v61 = vrot.slane %v6000_v29, 7  ;;  %v5985_v7 = vrot.slane %v5983_v43, 7  ;;  %v6375_v58 = vor.u32 %v6374_v36, %v6371_v27  ;;  %v6380_v16 = vrot.slane %v6378_v3, 5 }
 0x391   : > { %v6010_v15 = vrot.slane %v6008_v46, 7  ;;  %v5993_v40 = vrot.slane %v5991_v25, 7  ;;  %v6384_v60 = vrot.slane %v6382_v56, 4  ;;  %v6388_v34 = vshll.u32 %v6283_v59, 16  ;;  %v15899_v59 = vld [vmem:[#allocation3 + $0x3c] sm:$0xf] }
 0x392   : > { %v6005_v9 = vor.u32 %v6003_v47, %v6002_v61  ;;  %v6006_v50 = vrot.slane %v6002_v61, 4  ;;  %v5988_v0 = vor.u32 %v5986_v20, %v5985_v7  ;;  %v5989_v45 = vrot.slane %v5985_v7, 4 }
 0x393   : > { %v6013_v57 = vor.u32 %v6011_v28, %v6010_v15  ;;  %v6015_v31 = vrot.slane %v6010_v15, 4  ;;  %v5996_v35 = vor.u32 %v5994_v26, %v5993_v40  ;;  %v5998_v42 = vrot.slane %v5993_v40, 4 }
 0x394   : > { %v6213_v21 = vsel %vm15722_vm10, %v6005_v9, %v6212_v4  ;;  %v6206_v14 = vsel %vm15722_vm10, %v5988_v0, %v6205_v2  ;;  %v6376_v52 = vrot.slane %v6375_v58, 4  ;;  %v6385_v37 = vor.u32 %v6384_v60, %v6380_v16 }
 0x395   : > { %6214 = vst [vmem:[#allocation3 + $0x90] sm:$0xf] %v6213_v21  ;;  %6207 = vst [vmem:[#allocation3 + $0x84] sm:$0xf] %v6206_v14  ;;  %v6014_v33 = vsel %vm13964_vm12, %v6006_v50, %v6013_v57  ;;  %v6217_v62 = vsel %vm15616_vm5, %v6015_v31, %v6216_v54  ;;  %v5997_v27 = vsel %vm13964_vm12, %v5989_v45, %v5996_v35  ;;  %v6390_v39 = vrot.slane %v6388_v34, 5 }
 0x396   : > { %v6210_v41 = vsel %vm15616_vm5, %v5998_v42, %v6209_v18  ;;  %6215 = vst.msk [vmem:[#allocation3 + $0x94] sm:$0xf] %vm5596_vm6, %v6014_v33  ;;  %6218 = vst [vmem:[#allocation3 + $0x98] sm:$0x1] %v6217_v62  ;;  %v6381_v6 = vsel %vm13978_vm13, %v6376_v52, %v6380_v16  ;;  %v6386_v55 = vrot.slane %v6385_v37, 4  ;;  %v6393_v17 = vshrl.u32 %v15869_v24, 16 }
 0x397   : > { %6208 = vst.msk [vmem:[#allocation3 + $0x88] sm:$0xf] %vm5596_vm6, %v5997_v27  ;;  %6211 = vst [vmem:[#allocation3 + $0x8c] sm:$0x1] %v6210_v41  ;;  %v6396_v22 = vshll.u32 %v15869_v24, 16  ;;  %v6402_v36 = vshll.u32 %v15875_v51, 16  ;;  %v5558_v43 = vadd.f32 %v15817_v8, %v15713_v13  ;;  %v5556_v20 = vadd.f32 %v15713_v13, %v15819_v10 }
 0x398   : > { %v6406_v3 = vshrl.u32 %v15875_v51, 16  ;;  %v6412_v56 = vshll.u32 %v6284_v53, 16  ;;  %v6391_v29 = vsel %vm13978_vm13, %v6386_v55, %v6390_v39  ;;  %v6395_v47 = vrot.slane %v6393_v17, 4  ;;  %v6226_v35 = vld [vmem:[#allocation3 + $0xa8] sm:$0xf] }
 0x399   : > { %v11631_v4 = vcombine.low %v6381_v6, %v6391_v29  ;;  %v6398_v2 = vrot.slane %v6396_v22, 5  ;;  %v6404_v46 = vrot.slane %v6402_v36, 5  ;;  %v5590_v26 = vmax.f32 %v5558_v43, 0.0  ;;  %v6219_v42 = vld [vmem:[#allocation3 + $0x9c] sm:$0xf] }
 0x39a   : > { %v6408_v28 = vrot.slane %v6406_v3, 4  ;;  %v6414_v25 = vrot.slane %v6412_v56, 5  ;;  %v5588_v61 = vmax.f32 %v5556_v20, 0.0  ;;  %v5559_v7 = vadd.f32 %v15821_v5, %v15713_v13  ;;  %v15912_v52 = vld [vmem:[#allocation3 + $0x40] sm:$0xf] }
 0x39b   : > { %12693 = vmatmul.mubr.msk.bf16.gmra.mrb[36].mxu0 %vm6730_vm9, %v11631_v4  ;;  %v6399_v54 = vor.u32 %v6398_v2, %v6395_v47  ;;  %v5557_v8 = vadd.f32 %v15713_v13, %v15827_v1  ;;  %v6417_v10 = vshrl.u32 %v15899_v59, 16  ;;  %v12051_v16 = vpack.c.bf16 %v5590_v26, %v5590_v26  ;;  %v15914_v62 = vld [vmem:[#allocation3 + $0x44] sm:$0x1]  ;;  %v6230_v29 = vld [vmem:[#allocation3 + $0xb0] sm:$0x1] }
 0x39c   : > { %v6409_v58 = vor.u32 %v6408_v28, %v6404_v46  ;;  %v12049_v15 = vpack.c.bf16 %v5588_v61, %v5588_v61  ;;  %v5591_v40 = vmax.f32 %v5559_v7, 0.0  ;;  %v6420_v18 = vshll.u32 %v15899_v59, 16 }
 0x39d   : > { %v6400_v60 = vrot.slane %v6399_v54, 4  ;;  %v5589_v9 = vmax.f32 %v5557_v8, 0.0  ;;  %v6419_v50 = vrot.slane %v6417_v10, 4  ;;  %v6034_v0 = vshrl.u32 %v12051_v16, 16  ;;  %v15926_v8 = vld [vmem:[#allocation3 + $0x4c] sm:$0xf] }
 0x39e   : > { %v6410_v34 = vrot.slane %v6409_v58, 4  ;;  %v6037_v5 = vshll.u32 %v12051_v16, 16  ;;  %v6017_v45 = vshrl.u32 %v12049_v15, 16  ;;  %v6020_v57 = vshll.u32 %v12049_v15, 16  ;;  %v15924_v58 = vld [vmem:[#allocation3 + $0x48] sm:$0xf] }
 0x39f   : > { %v6405_v31 = vsel %vm13978_vm13, %v6400_v60, %v6404_v46  ;;  %v12052_v21 = vpack.c.bf16 %v5591_v40, %v5591_v40  ;;  %v12050_v14 = vpack.c.bf16 %v5589_v9, %v5589_v9  ;;  %v6036_v53 = vrot.slane %v6034_v0, 7  ;;  %v6223_v46 = vld [vmem:[#allocation3 + $0xa4] sm:$0x1] }
 0x3a0   : > { %v6415_v1 = vsel %vm13978_vm13, %v6410_v34, %v6414_v25  ;;  %v6019_v33 = vrot.slane %v6017_v45, 7  ;;  %v6422_v27 = vrot.slane %v6420_v18, 5  ;;  %v6426_v20 = vshll.u32 %v15912_v52, 16  ;;  %v15928_v18 = vld [vmem:[#allocation3 + $0x50] sm:$0x1] }
 0x3a1   : > { %v11632_v37 = vcombine.low %v6405_v31, %v6415_v1  ;;  %v6042_v41 = vshrl.u32 %v12052_v21, 16  ;;  %v6045_v6 = vshll.u32 %v12052_v21, 16  ;;  %v6025_v55 = vshrl.u32 %v12050_v14, 16 }
 0x3a2   : > { %v6028_v39 = vshll.u32 %v12050_v14, 16  ;;  %v6039_v17 = vor.u32 %v6037_v5, %v6036_v53  ;;  %v6040_v22 = vrot.slane %v6036_v53, 4  ;;  %v6022_v36 = vor.u32 %v6020_v57, %v6019_v33 }
 0x3a3   : > { %12696 = vmatprep.mubr.msk.bf16.mxu0 %vm6730_vm9, %v11632_v37  ;;  %v6023_v3 = vrot.slane %v6019_v33, 4  ;;  %v6044_v56 = vrot.slane %v6042_v41, 7  ;;  %v6027_v47 = vrot.slane %v6025_v55, 7  ;;  %v6423_v43 = vor.u32 %v6422_v27, %v6419_v50  ;;  %v15951_v55 = vld [vmem:[#allocation3 + $0x60] sm:$0xf] }
 0x3a4   : > { %v6227_v4 = vsel %vm15722_vm10, %v6039_v17, %v6226_v35  ;;  %v6220_v2 = vsel %vm15722_vm10, %v6022_v36, %v6219_v42  ;;  %v6430_v28 = vshrl.u32 %v15912_v52, 16  ;;  %v6436_v25 = vshll.u32 %v15914_v62, 16 }
 0x3a5   : > { %6228 = vst [vmem:[#allocation3 + $0xa8] sm:$0xf] %v6227_v4  ;;  %6221 = vst [vmem:[#allocation3 + $0x9c] sm:$0xf] %v6220_v2  ;;  %v6047_v26 = vor.u32 %v6045_v6, %v6044_v56  ;;  %v6049_v61 = vrot.slane %v6044_v56, 4  ;;  %v6030_v7 = vor.u32 %v6028_v39, %v6027_v47  ;;  %v6032_v54 = vrot.slane %v6027_v47, 4 }
 0x3a6   : > { %v6424_v10 = vrot.slane %v6423_v43, 4  ;;  %v6428_v16 = vrot.slane %v6426_v20, 5  ;;  %v6432_v15 = vrot.slane %v6430_v28, 4  ;;  %v6438_v40 = vrot.slane %v6436_v25, 5 }
 0x3a7   : > { %v6048_v60 = vsel %vm13964_vm12, %v6040_v22, %v6047_v26  ;;  %v6231_v34 = vsel %vm15616_vm5, %v6049_v61, %v6230_v29  ;;  %v6031_v9 = vsel %vm13964_vm12, %v6023_v3, %v6030_v7  ;;  %v6224_v50 = vsel %vm15616_vm5, %v6032_v54, %v6223_v46 }
 0x3a8   : > { %6229 = vst.msk [vmem:[#allocation3 + $0xac] sm:$0xf] %vm5596_vm6, %v6048_v60  ;;  %6232 = vst [vmem:[#allocation3 + $0xb0] sm:$0x1] %v6231_v34  ;;  %v6429_v0 = vsel %vm13978_vm13, %v6424_v10, %v6428_v16  ;;  %v6433_v5 = vor.u32 %v6432_v15, %v6428_v16  ;;  %v6441_v45 = vshrl.u32 %v15924_v58, 16  ;;  %v6444_v57 = vshll.u32 %v15924_v58, 16 }
 0x3a9   : > { %6222 = vst.msk [vmem:[#allocation3 + $0xa0] sm:$0xf] %vm5596_vm6, %v6031_v9  ;;  %6225 = vst [vmem:[#allocation3 + $0xa4] sm:$0x1] %v6224_v50  ;;  %v6450_v31 = vshll.u32 %v15926_v8, 16  ;;  %v6454_v1 = vshrl.u32 %v15926_v8, 16  ;;  %v5562_v42 = vadd.f32 %v15831_v23, %v15713_v13  ;;  %v5560_v53 = vadd.f32 %v15713_v13, %v15835_v48 }
 0x3aa   : > { %v6460_v35 = vshll.u32 %v15928_v18, 16  ;;  %v6434_v21 = vrot.slane %v6433_v5, 4  ;;  %v6443_v14 = vrot.slane %v6441_v45, 4  ;;  %v6446_v37 = vrot.slane %v6444_v57, 5  ;;  %v13765_v23 = vld [vmem:[%s17738_s2] ss:$0 sm:$0xff] }
 0x3ab   : > { %v6452_v33 = vrot.slane %v6450_v31, 5  ;;  %v6456_v27 = vrot.slane %v6454_v1, 4  ;;  %v5594_v6 = vmax.f32 %v5562_v42, 0.0  ;;  %v5592_v22 = vmax.f32 %v5560_v53, 0.0  ;;  %v15966_v16 = vld [vmem:[#allocation3 + $0x64] sm:$0xf] }
 0x3ac   : > { %v6462_v41 = vrot.slane %v6460_v35, 5  ;;  %v6439_v39 = vsel %vm13978_vm13, %v6434_v21, %v6438_v40  ;;  %v6447_v17 = vor.u32 %v6446_v37, %v6443_v14  ;;  %v5563_v36 = vadd.f32 %v13765_v23, %v15845_v44  ;;  %v6240_v44 = vld [vmem:[#allocation3 + $0xc0] sm:$0xf]  ;;  %v6233_v5 = vld [vmem:[#allocation3 + $0xb4] sm:$0xf] }
 0x3ad   : > { %v11633_v3 = vcombine.low %v6429_v0, %v6439_v39  ;;  %v6457_v56 = vor.u32 %v6456_v27, %v6452_v33  ;;  %v12055_v13 = vpack.c.bf16 %v5594_v6, %v5594_v6  ;;  %v5561_v48 = vadd.f32 %v13765_v23, %v15849_v49  ;;  %v6244_v42 = vld [vmem:[#allocation3 + $0xc8] sm:$0x1] }
 0x3ae   : > { %v6448_v29 = vrot.slane %v6447_v17, 4  ;;  %v12053_v47 = vpack.c.bf16 %v5592_v22, %v5592_v22  ;;  %v5595_v43 = vmax.f32 %v5563_v36, 0.0  ;;  %v6489_v20 = vshrl.u32 %v15951_v55, 16  ;;  %v15972_v53 = vld [vmem:[#allocation3 + $0x68] sm:$0x1] }
 0x3af   : > { %12697 = vmatmul.mubr.msk.bf16.gmra.mrb[40].mxu0 %vm6730_vm9, %v11633_v3  ;;  %v6458_v4 = vrot.slane %v6457_v56, 4  ;;  %v6068_v2 = vshrl.u32 %v12055_v13, 16  ;;  %v6071_v46 = vshll.u32 %v12055_v13, 16  ;;  %v5593_v28 = vmax.f32 %v5561_v48, 0.0  ;;  %v6237_v17 = vld [vmem:[#allocation3 + $0xbc] sm:$0x1] }
 0x3b0   : > { %v6453_v25 = vsel %vm13978_vm13, %v6448_v29, %v6452_v33  ;;  %v6051_v26 = vshrl.u32 %v12053_v47, 16  ;;  %v6054_v61 = vshll.u32 %v12053_v47, 16  ;;  %v12056_v7 = vpack.c.bf16 %v5595_v43, %v5595_v43  ;;  %v15978_v13 = vld [vmem:[#allocation3 + $0x54] sm:$0xf]  ;;  %v15985_v43 = vld [vmem:[#allocation3 + $0x58] sm:$0xf] }
 0x3b1   : > { %v6463_v49 = vsel %vm13978_vm13, %v6458_v4, %v6462_v41  ;;  %v6070_v54 = vrot.slane %v6068_v2, 7  ;;  %v12054_v10 = vpack.c.bf16 %v5593_v28, %v5593_v28  ;;  %v6491_v15 = vrot.slane %v6489_v20, 4  ;;  %v15987_v20 = vld [vmem:[#allocation3 + $0x5c] sm:$0x1]  ;;  %v15994_v28 = vld [vmem:[#allocation3 + $0x6c] sm:$0xf] }
 0x3b2   : > { %v11634_v40 = vcombine.low %v6453_v25, %v6463_v49  ;;  %v6053_v60 = vrot.slane %v6051_v26, 7  ;;  %v6076_v34 = vshrl.u32 %v12056_v7, 16  ;;  %v6079_v9 = vshll.u32 %v12056_v7, 16  ;;  %v13766_v25 = vld [vmem:[%s17739_s3] sm:$0xf] }
 0x3b3   : > { %v6073_v50 = vor.u32 %v6071_v46, %v6070_v54  ;;  %v6074_v0 = vrot.slane %v6070_v54, 4  ;;  %v6059_v45 = vshrl.u32 %v12054_v10, 16  ;;  %v6062_v57 = vshll.u32 %v12054_v10, 16  ;;  %v16005_v49 = vld [vmem:[#allocation3 + $0x70] sm:$0xf] }
 0x3b4   : > { %12700 = vmatprep.mubr.msk.bf16.mxu0 %vm6730_vm9, %v11634_v40  ;;  %v6056_v31 = vor.u32 %v6054_v61, %v6053_v60  ;;  %v6057_v1 = vrot.slane %v6053_v60, 4  ;;  %v6078_v35 = vrot.slane %v6076_v34, 7  ;;  %v6492_v21 = vshll.u32 %v15951_v55, 16  ;;  %v16007_v54 = vld [vmem:[#allocation3 + $0x74] sm:$0x1] }
 0x3b5   : > { %v6241_v14 = vsel %vm15722_vm10, %v6073_v50, %v6240_v44  ;;  %v6061_v37 = vrot.slane %v6059_v45, 7  ;;  %v6498_v33 = vshll.u32 %v15966_v16, 16  ;;  %v6502_v27 = vshrl.u32 %v15966_v16, 16  ;;  %v16012_v34 = vld [vmem:[#allocation3 + $0x78] sm:$0xf] }
 0x3b6   : > { %6242 = vst [vmem:[#allocation3 + $0xc0] sm:$0xf] %v6241_v14  ;;  %v6234_v41 = vsel %vm15722_vm10, %v6056_v31, %v6233_v5  ;;  %v6081_v6 = vor.u32 %v6079_v9, %v6078_v35  ;;  %v6083_v39 = vrot.slane %v6078_v35, 4  ;;  %v6494_v22 = vrot.slane %v6492_v21, 5 }
 0x3b7   : > { %6235 = vst [vmem:[#allocation3 + $0xb4] sm:$0xf] %v6234_v41  ;;  %v6064_v23 = vor.u32 %v6062_v57, %v6061_v37  ;;  %v6066_v36 = vrot.slane %v6061_v37, 4  ;;  %v6500_v3 = vrot.slane %v6498_v33, 5  ;;  %v6504_v56 = vrot.slane %v6502_v27, 4 }
 0x3b8   : > { %v6082_v48 = vsel %vm13964_vm12, %v6074_v0, %v6081_v6  ;;  %v6245_v29 = vsel %vm15616_vm5, %v6083_v39, %v6244_v42  ;;  %v6495_v47 = vor.u32 %v6494_v22, %v6491_v15  ;;  %v6508_v38 = vshll.u32 %v15972_v53, 16  ;;  %v16020_v37 = vld [vmem:[#allocation3 + $0x7c] sm:$0xf] }
 0x3b9   : > { %6243 = vst.msk [vmem:[#allocation3 + $0xc4] sm:$0xf] %vm5596_vm6, %v6082_v48  ;;  %6246 = vst [vmem:[#allocation3 + $0xc8] sm:$0x1] %v6245_v29  ;;  %v6065_v4 = vsel %vm13964_vm12, %v6057_v1, %v6064_v23  ;;  %v6238_v2 = vsel %vm15616_vm5, %v6066_v36, %v6237_v17  ;;  %v6505_v46 = vor.u32 %v6504_v56, %v6500_v3  ;;  %v16000_v44 = vsel %vm6779_vm3, %v13766_v25, 0 }
 0x3ba   : > { %6236 = vst.msk [vmem:[#allocation3 + $0xb8] sm:$0xf] %vm5596_vm6, %v6065_v4  ;;  %6239 = vst [vmem:[#allocation3 + $0xbc] sm:$0x1] %v6238_v2  ;;  %v6496_v26 = vrot.slane %v6495_v47, 4  ;;  %v6510_v61 = vrot.slane %v6508_v38, 5 }
 0x3bb   : > { %v6465_v12 = vshrl.u32 %v15978_v13, 16  ;;  %v6468_v7 = vshll.u32 %v15978_v13, 16  ;;  %v6506_v10 = vrot.slane %v6505_v46, 4  ;;  %v6474_v15 = vshll.u32 %v15985_v43, 16  ;;  %v16028_v29 = vld [vmem:[#allocation3 + $0x80] sm:$0x1] }
 0x3bc   : > { %v6478_v40 = vshrl.u32 %v15985_v43, 16  ;;  %v6484_v60 = vshll.u32 %v15987_v20, 16  ;;  %v6501_v9 = vsel %vm13978_vm13, %v6496_v26, %v6500_v3  ;;  %v6513_v5 = vshrl.u32 %v15994_v28, 16  ;;  %v16032_v46 = vld [vmem:[#allocation3 + $0x84] sm:$0xf] }
 0x3bd   : > { %v6467_v50 = vrot.slane %v6465_v12, 4  ;;  %v6470_v0 = vrot.slane %v6468_v7, 5  ;;  %v6511_v45 = vsel %vm13978_vm13, %v6506_v10, %v6510_v61  ;;  %v6476_v57 = vrot.slane %v6474_v15, 5 }
 0x3be   : > { %v6480_v31 = vrot.slane %v6478_v40, 4  ;;  %v6486_v1 = vrot.slane %v6484_v60, 5  ;;  %v11636_v35 = vcombine.low %v6501_v9, %v6511_v45  ;;  %v6515_v21 = vrot.slane %v6513_v5, 4  ;;  %v16039_v60 = vld [vmem:[#allocation3 + $0x88] sm:$0xf] }
 0x3bf   : > { %v6471_v42 = vor.u32 %v6470_v0, %v6467_v50  ;;  %v6516_v14 = vshll.u32 %v15994_v28, 16  ;;  %v6522_v27 = vshll.u32 %v16005_v49, 16  ;;  %v6526_v41 = vshrl.u32 %v16005_v49, 16  ;;  %v16042_v45 = vld [vmem:[#allocation3 + $0x90] sm:$0xf] }
 0x3c0   : > { %v6481_v33 = vor.u32 %v6480_v31, %v6476_v57  ;;  %v6532_v6 = vshll.u32 %v16007_v54, 16  ;;  %12704 = vmatprep.mubr.msk.bf16.mxu1 %vm6730_vm9, %v11636_v35  ;;  %v6537_v22 = vshrl.u32 %v16012_v34, 16  ;;  %v6540_v23 = vshll.u32 %v16012_v34, 16  ;;  %v16047_v35 = vld [vmem:[#allocation3 + $0x8c] sm:$0x1] }
 0x3c1   : > { %v6472_v39 = vrot.slane %v6471_v42, 4  ;;  %v6518_v17 = vrot.slane %v6516_v14, 5  ;;  %v6524_v3 = vrot.slane %v6522_v27, 5  ;;  %v6528_v56 = vrot.slane %v6526_v41, 4  ;;  %v16053_v41 = vld [vmem:[#allocation3 + $0x94] sm:$0xf] }
 0x3c2   : > { %v6482_v36 = vrot.slane %v6481_v33, 4  ;;  %v6534_v48 = vrot.slane %v6532_v6, 5  ;;  %v6539_v4 = vrot.slane %v6537_v22, 4  ;;  %v6542_v2 = vrot.slane %v6540_v23, 5  ;;  %v16058_v6 = vld [vmem:[%s17739_s3 + $0x8] sm:$0xf] }
 0x3c3   : > { %v6477_v47 = vsel %vm13978_vm13, %v6472_v39, %v6476_v57  ;;  %v6519_v38 = vor.u32 %v6518_v17, %v6515_v21  ;;  %v6529_v26 = vor.u32 %v6528_v56, %v6524_v3  ;;  %v6546_v61 = vshll.u32 %v16020_v37, 16 }
 0x3c4   : > { %v6487_v25 = vsel %vm13978_vm13, %v6482_v36, %v6486_v1  ;;  %v6550_v12 = vshrl.u32 %v16020_v37, 16  ;;  %v6543_v15 = vor.u32 %v6542_v2, %v6539_v4  ;;  %v6556_v40 = vshll.u32 %v16028_v29, 16  ;;  %v16063_v36 = vld [vmem:[#allocation3 + $0x98] sm:$0x1] }
 0x3c5   : > { %v11635_v7 = vcombine.low %v6477_v47, %v6487_v25  ;;  %v6520_v10 = vrot.slane %v6519_v38, 4  ;;  %v6530_v9 = vrot.slane %v6529_v26, 4  ;;  %v6548_v50 = vrot.slane %v6546_v61, 5  ;;  %v16067_v38 = vld [vmem:[#allocation3 + $0x9c] sm:$0xf] }
 0x3c6   : > { %v6552_v0 = vrot.slane %v6550_v12, 4  ;;  %v6561_v5 = vshrl.u32 %v16032_v46, 16  ;;  %v6544_v31 = vrot.slane %v6543_v15, 4  ;;  %v6558_v1 = vrot.slane %v6556_v40, 5  ;;  %v16072_v61 = vld [vmem:[#allocation3 + $0xa0] sm:$0xf] }
 0x3c7   : > { %12701 = vmatmul.mubr.msk.bf16.gmra.mrb[44].mxu0 %vm6730_vm9, %v11635_v7  ;;  %v6525_v57 = vsel %vm13978_vm13, %v6520_v10, %v6524_v3  ;;  %v6564_v42 = vshll.u32 %v16032_v46, 16  ;;  %v6535_v21 = vsel %vm13978_vm13, %v6530_v9, %v6534_v48  ;;  %v6570_v27 = vshll.u32 %v16039_v60, 16 }
 0x3c8   : > { %v6553_v14 = vor.u32 %v6552_v0, %v6548_v50  ;;  %v6563_v33 = vrot.slane %v6561_v5, 4  ;;  %v11637_v39 = vcombine.low %v6525_v57, %v6535_v21  ;;  %v6549_v17 = vsel %vm13978_vm13, %v6544_v31, %v6548_v50  ;;  %v16078_v5 = vld [vmem:[#allocation3 + $0xa4] sm:$0x1] }
 0x3c9   : > { %v6566_v22 = vrot.slane %v6564_v42, 5  ;;  %v6574_v23 = vshrl.u32 %v16039_v60, 16  ;;  %v6572_v56 = vrot.slane %v6570_v27, 5  ;;  %v6580_v48 = vshll.u32 %v16047_v35, 16 }
 0x3ca   : > { %v6554_v3 = vrot.slane %v6553_v14, 4  ;;  %v6585_v47 = vshrl.u32 %v16042_v45, 16  ;;  %12705 = vmatmul.mubr.msk.bf16.vlgmr.msra.gmra.mrb[0].mxu1 %vm6730_vm9, %v11637_v39  ;;  %v6588_v25 = vshll.u32 %v16042_v45, 16  ;;  %v6594_v26 = vshll.u32 %v16053_v41, 16 }
 0x3cb   : > { %v6567_v4 = vor.u32 %v6566_v22, %v6563_v33  ;;  %v6576_v2 = vrot.slane %v6574_v23, 4  ;;  %12721 = vmatpush3.bf16.msra.mxu1 %v16000_v44  ;;  %v6582_v7 = vrot.slane %v6580_v48, 5  ;;  %v6598_v15 = vshrl.u32 %v16053_v41, 16 }
 0x3cc   : > { %v6559_v12 = vsel %vm13978_vm13, %v6554_v3, %v6558_v1  ;;  %v6587_v10 = vrot.slane %v6585_v47, 4  ;;  %v6590_v0 = vrot.slane %v6588_v25, 5  ;;  %13648 = vmatprep.subr.msk.bf16.mxu1 %vm6779_vm3, %v16058_v6  ;;  %v6596_v57 = vrot.slane %v6594_v26, 5  ;;  %v16084_v1 = vld [vmem:[#allocation3 + $0xa8] sm:$0xf] }
 0x3cd   : > { %v11638_v40 = vcombine.low %v6549_v17, %v6559_v12  ;;  %v6568_v9 = vrot.slane %v6567_v4, 4  ;;  %v6577_v50 = vor.u32 %v6576_v2, %v6572_v56  ;;  %v6600_v31 = vrot.slane %v6598_v15, 4  ;;  %v16094_v2 = vld [vmem:[#allocation3 + $0xac] sm:$0xf] }
 0x3ce   : > { %v6604_v44 = vshll.u32 %v16063_v36, 16  ;;  %v6609_v42 = vshrl.u32 %v16067_v38, 16  ;;  %v6591_v33 = vor.u32 %v6590_v0, %v6587_v10  ;;  %v6612_v27 = vshll.u32 %v16067_v38, 16  ;;  %v16097_v10 = vld [vmem:[#allocation3 + $0xb0] sm:$0x1] }
 0x3cf   : > { %12708 = vmatprep.mubr.msk.bf16.mxu1 %vm6730_vm9, %v11638_v40  ;;  %v6573_v21 = vsel %vm13978_vm13, %v6568_v9, %v6572_v56  ;;  %v6578_v14 = vrot.slane %v6577_v50, 4  ;;  %v6601_v39 = vor.u32 %v6600_v31, %v6596_v57  ;;  %v6618_v23 = vshll.u32 %v16072_v61, 16  ;;  %v16100_v50 = vld [vmem:[#allocation3 + $0xb4] sm:$0xf] }
 0x3d0   : > { %v6606_v17 = vrot.slane %v6604_v44, 5  ;;  %v6611_v22 = vrot.slane %v6609_v42, 4  ;;  %v6592_v48 = vrot.slane %v6591_v33, 4  ;;  %v6614_v47 = vrot.slane %v6612_v27, 5  ;;  %v16109_v42 = vld [vmem:[#allocation3 + $0xb8] sm:$0xf] }
 0x3d1   : > { %v6583_v3 = vsel %vm13978_vm13, %v6578_v14, %v6582_v7  ;;  %v6622_v4 = vshrl.u32 %v16072_v61, 16  ;;  %v6602_v56 = vrot.slane %v6601_v39, 4  ;;  %v6620_v26 = vrot.slane %v6618_v23, 5 }
 0x3d2   : > { %v11639_v25 = vcombine.low %v6573_v21, %v6583_v3  ;;  %v6628_v12 = vshll.u32 %v16078_v5, 16  ;;  %v6615_v15 = vor.u32 %v6614_v47, %v6611_v22  ;;  %v6633_v9 = vshrl.u32 %v16084_v1, 16 }
 0x3d3   : > { %v6624_v40 = vrot.slane %v6622_v4, 4  ;;  %v6597_v7 = vsel %vm13978_vm13, %v6592_v48, %v6596_v57  ;;  %v6607_v0 = vsel %vm13978_vm13, %v6602_v56, %v6606_v17  ;;  %v6636_v31 = vshll.u32 %v16084_v1, 16 }
 0x3d4   : > { %12709 = vmatmul.mubr.msk.bf16.gmra.mrb[4].mxu1 %vm6730_vm9, %v11639_v25  ;;  %v6642_v44 = vshll.u32 %v16094_v2, 16  ;;  %v11640_v21 = vcombine.low %v6597_v7, %v6607_v0  ;;  %v6616_v14 = vrot.slane %v6615_v15, 4  ;;  %v6635_v27 = vrot.slane %v6633_v9, 4  ;;  %v16118_v15 = vld [vmem:[#allocation3 + $0xbc] sm:$0x1] }
 0x3d5   : > { %v6625_v33 = vor.u32 %v6624_v40, %v6620_v26  ;;  %v6630_v39 = vrot.slane %v6628_v12, 5  ;;  %v6638_v22 = vrot.slane %v6636_v31, 5  ;;  %v6646_v3 = vshrl.u32 %v16094_v2, 16 }
 0x3d6   : > { %v6644_v23 = vrot.slane %v6642_v44, 5  ;;  %12712 = vmatprep.mubr.msk.bf16.mxu1 %vm6730_vm9, %v11640_v21  ;;  %v6652_v17 = vshll.u32 %v16097_v10, 16  ;;  %v6657_v48 = vshrl.u32 %v16100_v50, 16  ;;  %v6660_v47 = vshll.u32 %v16100_v50, 16 }
 0x3d7   : > { %v6626_v57 = vrot.slane %v6625_v33, 4  ;;  %v6621_v4 = vsel %vm13978_vm13, %v6616_v14, %v6620_v26  ;;  %v6639_v25 = vor.u32 %v6638_v22, %v6635_v27  ;;  %v6648_v56 = vrot.slane %v6646_v3, 4 }
 0x3d8   : > { %v6666_v12 = vshll.u32 %v16109_v42, 16  ;;  %v6659_v9 = vrot.slane %v6657_v48, 4  ;;  %v6662_v7 = vrot.slane %v6660_v47, 5  ;;  %v6670_v0 = vshrl.u32 %v16109_v42, 16  ;;  %v13767_v48 = vld [vmem:[#allocation3] sm:$0xf] }
 0x3d9   : > { %v6631_v40 = vsel %vm13978_vm13, %v6626_v57, %v6630_v39  ;;  %v6640_v44 = vrot.slane %v6639_v25, 4  ;;  %v6649_v21 = vor.u32 %v6648_v56, %v6644_v23  ;;  %v6676_v26 = vshll.u32 %v16118_v15, 16  ;;  %v16130_v47 = vld [vmem:[#allocation3 + $0x4] sm:$0xf] }
 0x3da   : > { %v11641_v31 = vcombine.low %v6621_v4, %v6631_v40  ;;  %v6668_v33 = vrot.slane %v6666_v12, 5  ;;  %v6663_v11 = vor.u32 %v6662_v7, %v6659_v9  ;;  %v6672_v30 = vrot.slane %v6670_v0, 4 }
 0x3db   : > { %v6650_v14 = vrot.slane %v6649_v21, 4  ;;  %v6654_v27 = vrot.slane %v6652_v17, 5  ;;  %v6645_v39 = vsel %vm13978_vm13, %v6640_v44, %v6644_v23  ;;  %v11660_v4 = vcombine.low %v13767_v48, %v16130_v47  ;;  %v16169_v48 = vld [vmem:[%s17739_s3 + $0xc] sm:$0xf]  ;;  %v7247_v21 = vld [vmem:[#allocation3 + $0x84] sm:$0xe] }
 0x3dc   : > { %12713 = vmatmul.mubr.msk.bf16.gmra.mrb[8].mxu1 %vm6730_vm9, %v11641_v31  ;;  %v6664_v22 = vrot.slane %v6663_v11, 4  ;;  %v6673_v3 = vor.u32 %v6672_v30, %v6668_v33  ;;  %v6678_v40 = vrot.slane %v6676_v26, 5  ;;  %v11667_v30 = vcombine.low %v15978_v13, %v15985_v43  ;;  %v13769_v26 = vld [vmem:[#allocation3 + $0xc] sm:$0xf]  ;;  %v7236_v13 = vld [vmem:[#allocation3] sm:$0xe] }
 0x3dd   : > { %v6655_v57 = vsel %vm13978_vm13, %v6650_v14, %v6654_v27  ;;  %v11668_v11 = vcombine.low %v15951_v55, %v15966_v16  ;;  %v11669_v23 = vcombine.low %v15994_v28, %v16005_v49  ;;  %v11670_v17 = vcombine.low %v16012_v34, %v16020_v37  ;;  %v16158_v14 = vld [vmem:[#allocation3 + $0x10] sm:$0xf] }
 0x3de   : > { %v11642_v25 = vcombine.low %v6645_v39, %v6655_v57  ;;  %v6669_v56 = vsel %vm13978_vm13, %v6664_v22, %v6668_v33  ;;  %v6674_v12 = vrot.slane %v6673_v3, 4  ;;  %v11671_v7 = vcombine.low %v16032_v46, %v16039_v60  ;;  %v13771_v3 = vld [vmem:[#allocation3 + $0x18] sm:$0xf]  ;;  %v16163_v39 = vld [vmem:[#allocation3 + $0x1c] sm:$0xf] }
 0x3df   : > { %v11661_v27 = vcombine.low %v13769_v26, %v16158_v14  ;;  %v7495_v22 = vsel %vm6779_vm3, %v16058_v6, 0  ;;  %v11662_v57 = vcombine.low %v13771_v3, %v16163_v39  ;;  %v7244_v6 = vld [vmem:[#allocation3 + $0x60] sm:$0xe]  ;;  %v13773_v26 = vld [vmem:[#allocation3 + $0x24] sm:$0xf]  ;;  %v11665_v3 = vcombine.low %v15899_v59, %v15912_v52 }
 0x3e0   : > { %12716 = vmatprep.mubr.msk.bf16.mxu1 %vm6730_vm9, %v11642_v25  ;;  %v6679_v9 = vsel %vm13978_vm13, %v6674_v12, %v6678_v40  ;;  %v7335_v25 = vrot.slane %v15985_v43, 5  ;;  %v7246_v33 = vld [vmem:[#allocation3 + $0x78] sm:$0xe]  ;;  %v7352_v59 = vrot.slane %v16007_v54, 5  ;;  %v7359_v54 = vrot.slane %v16028_v29, 5 }
 0x3e1   : > { %v11643_v44 = vcombine.low %v6669_v56, %v6679_v9  ;;  %v7345_v56 = vrot.slane %v15972_v53, 5  ;;  %v7338_v9 = vrot.slane %v15987_v20, 5  ;;  %v7380_v0 = vrot.slane %v16078_v5, 5 }
 0x3e2   : > { %v7337_v40 = vrot.slane %v7335_v25, 4  ;;  %v17943_v55 = vcombine.low %v16042_v45, %v16053_v41  ;;  %v11692_v43 = vrot.slane %v7236_v13, 9  ;;  %v17944_v34 = vcombine.low %v16067_v38, %v16072_v61  ;;  %v16351_v13 = vld [vmem:[%s17739_s3 + $0x10] sm:$0xf] }
 0x3e3   : > { %v7293_v45 = vrot.slane %v16158_v14, 5  ;;  %v17946_v38 = vcombine.low %v16100_v50, %v16109_v42 }
 0x3e4   : > { %12717 = vmatmul.mubr.msk.bf16.gmra.mrb[12].mxu1 %vm6730_vm9, %v11643_v44  ;;  %v7245_v44 = vld [vmem:[#allocation3 + $0x6c] sm:$0xe]  ;;  %v16190_v20 = vsel %vm14396_vm8, %v7337_v40, %v7338_v9  ;;  %v7356_v40 = vrot.slane %v16020_v37, 5  ;;  %v17945_v37 = vcombine.low %v16084_v1, %v16094_v2 }
 0x3e5   : > { %12722 = vmatprep.mubr.msk.bf16.mxu1 %vm6730_vm9, %v11660_v4  ;;  %v7243_v4 = vld [vmem:[#allocation3 + $0x54] sm:$0xe] }
 0x3e6   : > { %v11699_v12 = vrot.slane %v7243_v4, 9  ;;  %v11700_v4 = vrot.slane %v7244_v6, 9 }
 0x3e8   : > { %v16186_v53 = vsel %vm14396_vm8, %v11699_v12, %v7335_v25  ;;  %v11702_v12 = vrot.slane %v7246_v33, 9 }
 0x3ea   : > { %v16226_v33 = vsel %vm14396_vm8, %v11702_v12, %v7356_v40  ;;  %v7377_v12 = vrot.slane %v16072_v61, 5  ;;  %v7237_v61 = vld [vmem:[#allocation3 + $0xc] sm:$0xe] }
 0x3ec   : > { %12723 = vmatmul.mubr.msk.bf16.vlgmr.msra.gmra.mrb[16].mxu1 %vm6730_vm9, %v11661_v27  ;;  %v11663_v27 = vcombine.low %v13773_v26, %v15859_v32  ;;  %v7349_v32 = vrot.slane %v16005_v49, 5  ;;  %v11701_v26 = vrot.slane %v7245_v44, 9  ;;  %v7363_v44 = vrot.slane %v16039_v60, 5  ;;  %v13774_v49 = vld [vmem:[#allocation3 + $0x8] sm:$0x1] }
 0x3ed   : > { %12755 = vmatpush3.bf16.msra.mxu1 %v7495_v22  ;;  %12726 = vmatprep.mubr.msk.bf16.mxu1 %vm6730_vm9, %v11662_v57  ;;  %v11664_v22 = vcombine.low %v15869_v24, %v15875_v51  ;;  %v7342_v57 = vrot.slane %v15966_v16, 5  ;;  %v7286_v16 = vrot.slane %v16130_v47, 5 }
 0x3ee   : > { %13649 = vmatprep.subr.msk.bf16.mxu1 %vm6779_vm3, %v16169_v48  ;;  %v7351_v25 = vrot.slane %v7349_v32, 4  ;;  %v16208_v9 = vsel %vm14396_vm8, %v11701_v26, %v7349_v32  ;;  %v11666_v32 = vcombine.low %v15924_v58, %v15926_v8  ;;  %v7366_v26 = vrot.slane %v16047_v35, 5 }
 0x3ef   : > { %v7344_v51 = vrot.slane %v7342_v57, 4  ;;  %v16198_v31 = vsel %vm14396_vm8, %v11700_v4, %v7342_v57  ;;  %v7358_v57 = vrot.slane %v7356_v40, 4  ;;  %v7248_v4 = vld [vmem:[#allocation3 + $0x90] sm:$0xe]  ;;  %v7370_v58 = vrot.slane %v16053_v41, 5 }
 0x3f0   : > { %v11704_v29 = vrot.slane %v7248_v4, 9  ;;  %v7250_v40 = vld [vmem:[#allocation3 + $0xa8] sm:$0xe]  ;;  %v7251_v4 = vld [vmem:[#allocation3 + $0xb4] sm:$0xe]  ;;  %v7288_v28 = vrot.slane %v7286_v16, 4  ;;  %v7287_v46 = vsel %vm14396_vm8, %v11692_v43, %v7286_v16 }
 0x3f1   : > { %v16204_v6 = vsel %vm14396_vm8, %v7344_v51, %v7345_v56  ;;  %v11703_v56 = vrot.slane %v7247_v21, 9  ;;  %v7365_v51 = vrot.slane %v7363_v44, 4  ;;  %v7300_v41 = vrot.slane %v16163_v39, 5  ;;  %v13777_v39 = vld [vmem:[#allocation3 + $0x28] sm:$0xf] }
 0x3f2   : > { %v16249_v24 = vsel %vm14396_vm8, %v11704_v29, %v7370_v58  ;;  %v7239_v43 = vld [vmem:[#allocation3 + $0x24] sm:$0xe] }
 0x3f3   : > { %v16234_v21 = vsel %vm14396_vm8, %v11703_v56, %v7363_v44  ;;  %v16241_v35 = vsel %vm14396_vm8, %v7365_v51, %v7366_v26  ;;  %v7373_v44 = vrot.slane %v16063_v36, 5  ;;  %v7384_v51 = vrot.slane %v16094_v2, 5  ;;  %v13775_v2 = vld [vmem:[#allocation3 + $0x14] sm:$0x1] }
 0x3f4   : > { %12727 = vmatmul.mubr.msk.bf16.gmra.mrb[20].mxu1 %vm6730_vm9, %v11663_v27  ;;  %v16217_v27 = vsel %vm14396_vm8, %v7351_v25, %v7352_v59  ;;  %v16230_v59 = vsel %vm14396_vm8, %v7358_v57, %v7359_v54  ;;  %v7372_v57 = vrot.slane %v7370_v58, 4  ;;  %v7379_v25 = vrot.slane %v7377_v12, 4 }
 0x3f5   : > { %12730 = vmatprep.mubr.msk.bf16.mxu1 %vm6730_vm9, %v11664_v22  ;;  %v7249_v22 = vld [vmem:[#allocation3 + $0x9c] sm:$0xe]  ;;  %v11706_v36 = vrot.slane %v7250_v40, 9  ;;  %v7386_v58 = vrot.slane %v7384_v51, 4  ;;  %v11707_v40 = vrot.slane %v7251_v4, 9  ;;  %v7302_v1 = vrot.slane %v7300_v41, 4 }
 0x3f6   : > { %v11705_v56 = vrot.slane %v7249_v22, 9  ;;  %v16255_v26 = vsel %vm14396_vm8, %v7372_v57, %v7373_v44  ;;  %v7391_v22 = vrot.slane %v16109_v42, 5  ;;  %v16267_v5 = vsel %vm14396_vm8, %v7379_v25, %v7380_v0  ;;  %v13778_v42 = vld [vmem:[#allocation3 + $0x34] sm:$0xf] }
 0x3f7   : > { %v11721_v29 = vcombine.low %v16249_v24, %v16255_v26  ;;  %v7387_v57 = vrot.slane %v16097_v10, 5  ;;  %v11693_v4 = vrot.slane %v7237_v61, 9 }
 0x3f8   : > { %v16259_v54 = vsel %vm14396_vm8, %v11705_v56, %v7377_v12  ;;  %v7393_v44 = vrot.slane %v7391_v22, 4  ;;  %v7394_v56 = vrot.slane %v16118_v15, 5  ;;  %v17963_v15 = vcombine.low %v16234_v21, %v16241_v35  ;;  %v16538_v35 = vld [vmem:[#allocation3 + $0xac] sm:$0xf]  ;;  %v16558_v12 = vld [vmem:[#allocation3 + $0xb8] sm:$0xf] }
 0x3f9   : > { %v16280_v0 = vsel %vm14396_vm8, %v7386_v58, %v7387_v57  ;;  %v7314_v58 = vrot.slane %v13778_v42, 5  ;;  %v7294_v57 = vsel %vm14396_vm8, %v11693_v4, %v7293_v45 }
 0x3fa   : > { %v16290_v25 = vsel %vm14396_vm8, %v7393_v44, %v7394_v56  ;;  %v7853_v44 = vsel %vm6779_vm3, %v16169_v48, 0  ;;  %v7240_v48 = vld [vmem:[#allocation3 + $0x30] sm:$0xe] }
 0x3fc   : > { %12731 = vmatmul.mubr.msk.bf16.gmra.mrb[24].mxu1 %vm6730_vm9, %v11665_v3  ;;  %v16276_v3 = vsel %vm14396_vm8, %v11706_v36, %v7384_v51  ;;  %v7307_v36 = vrot.slane %v13777_v39, 5 }
 0x3fd   : > { %12734 = vmatprep.mubr.msk.bf16.mxu1 %vm6730_vm9, %v11666_v32  ;;  %v16286_v32 = vsel %vm14396_vm8, %v11707_v40, %v7391_v22 }
 0x3fe   : > { %v7309_v16 = vrot.slane %v7307_v36, 4 }
 0x404   : > { %12735 = vmatmul.mubr.msk.bf16.gmra.mrb[28].mxu1 %vm6730_vm9, %v11667_v30  ;;  %v7289_v30 = vrot.slane %v13774_v49, 5  ;;  %v13779_v49 = vld [vmem:[#allocation3 + $0x2c] sm:$0x1] }
 0x405   : > { %12738 = vmatprep.mubr.msk.bf16.mxu1 %vm6730_vm9, %v11668_v11  ;;  %v7295_v11 = vrot.slane %v7293_v45, 4  ;;  %v7321_v45 = vrot.slane %v15912_v52, 5  ;;  %v7324_v52 = vrot.slane %v15914_v62, 5  ;;  %v16381_v62 = vld [vmem:[#allocation3 + $0x28] sm:$0xf] }
 0x406   : > { %v7290_v60 = vsel %vm14396_vm8, %v7288_v28, %v7289_v30  ;;  %v7316_v28 = vrot.slane %v7314_v58, 4  ;;  %v7310_v30 = vrot.slane %v13779_v49, 5 }
 0x407   : > { %v11709_v47 = vcombine.low %v7287_v46, %v7290_v60  ;;  %v11695_v46 = vrot.slane %v7239_v43, 9  ;;  %v16397_v43 = vld [vmem:[#allocation3 + $0x40] sm:$0xf] }
 0x408   : > { %v7311_v60 = vsel %vm14396_vm8, %v7309_v16, %v7310_v30  ;;  %v8777_v16 = vld [vmem:[#allocation3 + $0x30] sm:$0xe]  ;;  %v16403_v30 = vld [vmem:[#allocation3 + $0x4c] sm:$0xf] }
 0x40c   : > { %12739 = vmatmul.mubr.msk.bf16.gmra.mrb[0].mxu1 %vm6730_vm9, %v11669_v23  ;;  %v7296_v23 = vrot.slane %v13775_v2, 5 }
 0x40d   : > { %12742 = vmatprep.mubr.msk.bf16.mxu1 %vm6730_vm9, %v11670_v17  ;;  %v7238_v17 = vld [vmem:[#allocation3 + $0x18] sm:$0xe] }
 0x40e   : > { %v7297_v14 = vsel %vm14396_vm8, %v7295_v11, %v7296_v23  ;;  %v11694_v22 = vrot.slane %v7238_v17, 9  ;;  %v7328_v11 = vrot.slane %v15926_v8, 5  ;;  %v7323_v23 = vrot.slane %v7321_v45, 4  ;;  %v7241_v17 = vld [vmem:[#allocation3 + $0x3c] sm:$0xe] }
 0x40f   : > { %v11710_v40 = vcombine.low %v7294_v57, %v7297_v14  ;;  %v7331_v8 = vrot.slane %v15928_v18, 5  ;;  %v11697_v4 = vrot.slane %v7241_v17, 9  ;;  %v16383_v18 = vld [vmem:[#allocation3 + $0x34] sm:$0xf]  ;;  %v17947_v57 = vcombine.low %v16186_v53, %v16190_v20  ;;  %v8778_v53 = vld [vmem:[#allocation3 + $0x3c] sm:$0xe] }
 0x410   : > { %v7301_v56 = vsel %vm14396_vm8, %v11694_v22, %v7300_v41  ;;  %v11696_v41 = vrot.slane %v7240_v48, 9  ;;  %v7325_v14 = vsel %vm14396_vm8, %v7323_v23, %v7324_v52  ;;  %v8861_v49 = vrot.slane %v16383_v18, 5  ;;  %v16401_v20 = vld [vmem:[#allocation3 + $0x44] sm:$0x1]  ;;  %v8780_v17 = vld [vmem:[#allocation3 + $0x54] sm:$0xe] }
 0x411   : > { %v7322_v22 = vsel %vm14396_vm8, %v11697_v4, %v7321_v45  ;;  %v8875_v23 = vrot.slane %v16403_v30, 5  ;;  %v16428_v52 = vld [vmem:[#allocation3 + $0x64] sm:$0xf] }
 0x414   : > { %12743 = vmatmul.mubr.msk.bf16.gmra.mrb[4].mxu1 %vm6730_vm9, %v11671_v7  ;;  %v13776_v7 = vld [vmem:[#allocation3 + $0x20] sm:$0x1] }
 0x415   : > { %12746 = vmatprep.mubr.msk.bf16.mxu1 %vm6730_vm9, %v17943_v55  ;;  %v7303_v51 = vrot.slane %v13776_v7, 5  ;;  %v7330_v7 = vrot.slane %v7328_v11, 4 }
 0x417   : > { %v7304_v50 = vsel %vm14396_vm8, %v7302_v1, %v7303_v51  ;;  %v7315_v1 = vsel %vm14396_vm8, %v11696_v41, %v7314_v58  ;;  %v7242_v51 = vld [vmem:[#allocation3 + $0x48] sm:$0xe]  ;;  %v8863_v41 = vrot.slane %v8861_v49, 4 }
 0x418   : > { %v11711_v55 = vcombine.low %v7301_v56, %v7304_v50  ;;  %v11698_v39 = vrot.slane %v7242_v51, 9  ;;  %v11714_v50 = vcombine.low %v7322_v22, %v7325_v14  ;;  %v16393_v56 = vld [vmem:[#allocation3 + $0x2c] sm:$0x1]  ;;  %v8785_v51 = vld [vmem:[#allocation3 + $0x90] sm:$0xe] }
 0x41a   : > { %v7329_v42 = vsel %vm14396_vm8, %v11698_v39, %v7328_v11  ;;  %v8868_v11 = vrot.slane %v16397_v43, 5  ;;  %v17953_v39 = vcombine.low %v16208_v9, %v16217_v27  ;;  %v16453_v9 = vld [vmem:[#allocation3 + $0x70] sm:$0xf] }
 0x41c   : > { %12747 = vmatmul.mubr.msk.bf16.gmra.mrb[8].mxu1 %vm6730_vm9, %v17944_v34  ;;  %v13780_v34 = vld [vmem:[#allocation3 + $0x38] sm:$0x1]  ;;  %v8870_v4 = vrot.slane %v8868_v11, 4 }
 0x41d   : > { %12750 = vmatprep.mubr.msk.bf16.mxu1 %vm6730_vm9, %v17945_v37  ;;  %v7317_v37 = vrot.slane %v13780_v34, 5  ;;  %v11810_v34 = vrot.slane %v8777_v16, 9  ;;  %v11813_v16 = vrot.slane %v8780_v17, 9 }
 0x424   : > { %12751 = vmatmul.mubr.msk.bf16.gmra.mrb[12].mxu1 %vm6730_vm9, %v17946_v38  ;;  %v7308_v38 = vsel %vm14396_vm8, %v11695_v46, %v7307_v36  ;;  %v7332_v36 = vsel %vm14396_vm8, %v7330_v7, %v7331_v8  ;;  %v8779_v46 = vld [vmem:[#allocation3 + $0x48] sm:$0xe]  ;;  %v16426_v7 = vld [vmem:[#allocation3 + $0x5c] sm:$0x1] }
 0x425   : > { %12756 = vmatprep.mubr.msk.bf16.mxu1 %vm6730_vm9, %v11709_v47  ;;  %v7318_v47 = vsel %vm14396_vm8, %v7316_v28, %v7317_v37  ;;  %v11712_v61 = vcombine.low %v7308_v38, %v7311_v60  ;;  %v11715_v58 = vcombine.low %v7329_v42, %v7332_v36  ;;  %v8854_v28 = vrot.slane %v16381_v62, 5  ;;  %v16407_v60 = vld [vmem:[#allocation3 + $0x50] sm:$0x1]  ;;  %v16414_v38 = vld [vmem:[#allocation3 + $0x58] sm:$0xf] }
 0x426   : > { %v11713_v2 = vcombine.low %v7315_v1, %v7318_v47  ;;  %v11811_v47 = vrot.slane %v8778_v53, 9  ;;  %v16422_v1 = vsel %vm14396_vm8, %v11810_v34, %v8861_v49  ;;  %v11812_v14 = vrot.slane %v8779_v46, 9  ;;  %v16440_v36 = vld [vmem:[#allocation3 + $0x68] sm:$0x1]  ;;  %v8782_v49 = vld [vmem:[#allocation3 + $0x6c] sm:$0xe] }
 0x427   : > { %17951 = vst [vmem:[#allocation20_spill] sm:$0xff] %v16422_v1  ;;  %v8877_v42 = vrot.slane %v8875_v23, 4  ;;  %v16464_v53 = vld [vmem:[#allocation3 + $0x74] sm:$0x1]  ;;  %v11815_v17 = vrot.slane %v8782_v49, 9  ;;  %v13715_v1 = vld [vmem:[#allocation3 + $0x6c] sm:$0xff]  }
 0x42c   : > { %12757 = vmatmul.mubr.msk.bf16.vlgmr.msra.gmra.mrb[16].mxu1 %vm6730_vm9, %v11710_v40  ;;  %v8776_v40 = vld [vmem:[#allocation3 + $0x24] sm:$0xe] }
 0x42d   : > { %12789 = vmatpush3.bf16.msra.mxu1 %v7853_v44  ;;  %12760 = vmatprep.mubr.msk.bf16.mxu1 %vm6730_vm9, %v11711_v55  ;;  %v17948_v44 = vcombine.low %v16198_v31, %v16204_v6  ;;  %v16395_v55 = vld [vmem:[#allocation3 + $0x38] sm:$0x1]  ;;  %v11809_v48 = vrot.slane %v8776_v40, 9  ;;  %v8856_v31 = vrot.slane %v8854_v28, 4  ;;  %v8857_v6 = vrot.slane %v16393_v56, 5 }
 0x42e   : > { %13650 = vmatprep.subr.msk.bf16.mxu1 %vm6779_vm3, %v16351_v13  ;;  %v8864_v37 = vrot.slane %v16395_v55, 5  ;;  %v17955_v40 = vcombine.low %v16226_v33, %v16230_v59  ;;  %v16508_v33 = vld [vmem:[#allocation3 + $0x98] sm:$0x1] }
 0x42f   : > { %v16411_v45 = vsel %vm14396_vm8, %v11809_v48, %v8854_v28  ;;  %v8882_v28 = vrot.slane %v16414_v38, 5  ;;  %v16466_v48 = vld [vmem:[#allocation3 + $0x7c] sm:$0xf] }
 0x430   : > { %17949 = vst [vmem:[#allocation17_spill] sm:$0xff] %v16411_v45  ;;  %v16434_v8 = vsel %vm14396_vm8, %v8863_v41, %v8864_v37  ;;  %v8892_v41 = vrot.slane %v16440_v36, 5 }
 0x431   : > { %17952 = vst [vmem:[#allocation4_spill] sm:$0xff] %v16434_v8  ;;  %v8884_v37 = vrot.slane %v8882_v28, 4  ;;  %v16693_v8 = vld [vmem:[#allocation3 + $0x20] sm:$0x1] }
 0x432   : > { %17991 = vst [vmem:[#allocation42_spill] sm:$0xff] %v16693_v8 }
 0x434   : > { %12761 = vmatmul.mubr.msk.bf16.gmra.mrb[20].mxu1 %vm6730_vm9, %v11712_v61  ;;  %v16418_v61 = vsel %vm14396_vm8, %v8856_v31, %v8857_v6  ;;  %v8885_v31 = vrot.slane %v16426_v7, 5  ;;  %v8889_v6 = vrot.slane %v16428_v52, 5 }
 0x435   : > { %12764 = vmatprep.mubr.msk.bf16.mxu1 %vm6730_vm9, %v11713_v2  ;;  %17950 = vst [vmem:[#allocation19_spill] sm:$0xff] %v16418_v61  ;;  %v8871_v2 = vrot.slane %v16401_v20, 5 }
 0x437   : > { %v16457_v27 = vsel %vm14396_vm8, %v8870_v4, %v8871_v2  ;;  %v16483_v2 = vsel %vm14396_vm8, %v11813_v16, %v8882_v28  ;;  %v8896_v4 = vrot.slane %v16453_v9, 5  ;;  %v16500_v16 = vld [vmem:[#allocation3 + $0x94] sm:$0xf]  ;;  %v16517_v28 = vld [vmem:[#allocation3 + $0xa0] sm:$0xf] }
 0x438   : > { %17956 = vst [vmem:[#allocation18_spill] sm:$0xff] %v16457_v27  ;;  %17959 = vst [vmem:[#allocation8_spill] sm:$0xff] %v16483_v2  ;;  %v8057_v27 = vld [vmem:[#allocation3 + $0x30] sm:$0xf] }
 0x439   : > { %v8898_v34 = vrot.slane %v8896_v4, 4 }
 0x43c   : > { %12765 = vmatmul.mubr.msk.bf16.gmra.mrb[24].mxu1 %vm6730_vm9, %v11714_v50  ;;  %v16446_v50 = vsel %vm14396_vm8, %v11811_v47, %v8868_v11  ;;  %v8783_v47 = vld [vmem:[#allocation3 + $0x78] sm:$0xe]  ;;  %v16479_v11 = vld [vmem:[#allocation3 + $0x80] sm:$0x1] }
 0x43d   : > { %12768 = vmatprep.mubr.msk.bf16.mxu1 %vm6730_vm9, %v11715_v58  ;;  %17954 = vst [vmem:[#allocation21_spill] sm:$0xff] %v16446_v50  ;;  %v8878_v58 = vrot.slane %v16407_v60, 5  ;;  %v8906_v22 = vrot.slane %v16479_v11, 5 }
 0x43f   : > { %v16472_v59 = vsel %vm14396_vm8, %v8877_v42, %v8878_v58  ;;  %v16492_v42 = vsel %vm14396_vm8, %v8884_v37, %v8885_v31  ;;  %v11816_v31 = vrot.slane %v8783_v47, 9  ;;  %v8784_v37 = vld [vmem:[#allocation3 + $0x84] sm:$0xe]  ;;  %v16523_v47 = vsel %vm14396_vm8, %v11815_v17, %v8896_v4 }
 0x440   : > { %17958 = vst [vmem:[#allocation7_spill] sm:$0xff] %v16472_v59  ;;  %17960 = vst [vmem:[#allocation9_spill] sm:$0xff] %v16492_v42  ;;  %v11817_v17 = vrot.slane %v8784_v37, 9  ;;  %v8917_v4 = vrot.slane %v16500_v16, 5  ;;  %v8924_v37 = vrot.slane %v16517_v28, 5 }
 0x441   : > { %17964 = vst [vmem:[#allocation12_spill] sm:$0xff] %v16523_v47  ;;  %v16583_v42 = vld [vmem:[#allocation3 + $0xc8] sm:$0x1] }
 0x442   : > { %v8919_v10 = vrot.slane %v8917_v4, 4 }
 0x444   : > { %12769 = vmatmul.mubr.msk.bf16.gmra.mrb[28].mxu1 %vm6730_vm9, %v17947_v57  ;;  %v8781_v57 = vld [vmem:[#allocation3 + $0x60] sm:$0xe] }
 0x445   : > { %12772 = vmatprep.mubr.msk.bf16.mxu1 %vm6730_vm9, %v17948_v44  ;;  %v16461_v44 = vsel %vm14396_vm8, %v11812_v14, %v8875_v23  ;;  %v11814_v46 = vrot.slane %v8781_v57, 9  ;;  %v8891_v23 = vrot.slane %v8889_v6, 4  ;;  %v16486_v14 = vld [vmem:[#allocation3 + $0x88] sm:$0xf]  ;;  %v8899_v57 = vrot.slane %v16464_v53, 5 }
 0x446   : > { %17957 = vst [vmem:[#allocation6_spill] sm:$0xff] %v16461_v44  ;;  %v8910_v21 = vrot.slane %v16486_v14, 5 }
 0x447   : > { %v16496_v58 = vsel %vm14396_vm8, %v11814_v46, %v8889_v6  ;;  %v16506_v49 = vsel %vm14396_vm8, %v8891_v23, %v8892_v41  ;;  %v16519_v41 = vld [vmem:[#allocation3 + $0xa4] sm:$0x1]  ;;  %v16527_v23 = vsel %vm14396_vm8, %v8898_v34, %v8899_v57  ;;  %v8786_v57 = vld [vmem:[#allocation3 + $0x9c] sm:$0xe] }
 0x448   : > { %17961 = vst [vmem:[#allocation10_spill] sm:$0xff] %v16496_v58  ;;  %17962 = vst [vmem:[#allocation11_spill] sm:$0xff] %v16506_v49  ;;  %v8912_v26 = vrot.slane %v8910_v21, 4  ;;  %v8788_v58 = vld [vmem:[#allocation3 + $0xb4] sm:$0xe] }
 0x449   : > { %17965 = vst [vmem:[#allocation13_spill] sm:$0xff] %v16527_v23 }
 0x44c   : > { %12773 = vmatmul.mubr.msk.bf16.gmra.mrb[0].mxu1 %vm6730_vm9, %v17953_v39  ;;  %v16488_v39 = vld [vmem:[#allocation3 + $0x8c] sm:$0x1] }
 0x44d   : > { %12776 = vmatprep.mubr.msk.bf16.mxu1 %vm6730_vm9, %v17955_v40  ;;  %v8903_v40 = vrot.slane %v16466_v48, 5 }
 0x44f   : > { %v8905_v46 = vrot.slane %v8903_v40, 4  ;;  %v16531_v6 = vsel %vm14396_vm8, %v11816_v31, %v8903_v40  ;;  %v16547_v40 = vld [vmem:[#allocation3 + $0xb0] sm:$0x1]  ;;  %v11818_v31 = vrot.slane %v8785_v51, 9  ;;  %v11819_v51 = vrot.slane %v8786_v57, 9 }
 0x450   : > { %17966 = vst [vmem:[#allocation14_spill] sm:$0xff] %v16531_v6  ;;  %v8934_v49 = vrot.slane %v16547_v40, 5 }
 0x451   : > { %v16544_v34 = vsel %vm14396_vm8, %v8905_v46, %v8906_v22  ;;  %v8920_v22 = vrot.slane %v16508_v33, 5  ;;  %v8787_v46 = vld [vmem:[#allocation3 + $0xa8] sm:$0xe]  ;;  %v16566_v24 = vsel %vm14396_vm8, %v11818_v31, %v8917_v4  ;;  %v16587_v6 = vsel %vm14396_vm8, %v11819_v51, %v8924_v37 }
 0x452   : > { %17967 = vst [vmem:[#allocation5_spill] sm:$0xff] %v16544_v34  ;;  %17970 = vst [vmem:[#allocation24_spill] sm:$0xff] %v16566_v24  ;;  %v16571_v34 = vld [vmem:[#allocation3 + $0xc4] sm:$0xf]  ;;  %v11820_v57 = vrot.slane %v8787_v46, 9  ;;  %v17974_v46 = vcombine.low %v16259_v54, %v16267_v5  ;;  %v8948_v4 = vrot.slane %v16583_v42, 5 }
 0x453   : > { %v16577_v47 = vsel %vm14396_vm8, %v8919_v10, %v8920_v22  ;;  %17972 = vst [vmem:[#allocation26_spill] sm:$0xff] %v16587_v6  ;;  %v8938_v22 = vrot.slane %v16558_v12, 5  ;;  %v8945_v51 = vrot.slane %v16571_v34, 5 }
 0x454   : > { %12777 = vmatmul.mubr.msk.bf16.gmra.mrb[4].mxu1 %vm6730_vm9, %v17963_v15  ;;  %v16554_v15 = vsel %vm14396_vm8, %v11817_v17, %v8910_v21  ;;  %v8931_v21 = vrot.slane %v16538_v35, 5  ;;  %v16569_v17 = vld [vmem:[#allocation3 + $0xbc] sm:$0x1]  ;;  %17971 = vst [vmem:[#allocation25_spill] sm:$0xff] %v16577_v47 }
 0x455   : > { %12780 = vmatprep.mubr.msk.bf16.mxu1 %vm6730_vm9, %v11721_v29  ;;  %v8913_v29 = vrot.slane %v16488_v39, 5  ;;  %17968 = vst [vmem:[#allocation22_spill] sm:$0xff] %v16554_v15 }
 0x456   : > { %v8933_v31 = vrot.slane %v8931_v21, 4  ;;  %v16602_v47 = vsel %vm14396_vm8, %v11820_v57, %v8931_v21  ;;  %v8941_v21 = vrot.slane %v16569_v17, 5 }
 0x457   : > { %v16562_v23 = vsel %vm14396_vm8, %v8912_v26, %v8913_v29  ;;  %v8926_v26 = vrot.slane %v8924_v37, 4  ;;  %v8927_v29 = vrot.slane %v16519_v41, 5  ;;  %17975 = vst [vmem:[#allocation28_spill] sm:$0xff] %v16602_v47 }
 0x458   : > { %17969 = vst [vmem:[#allocation23_spill] sm:$0xff] %v16562_v23  ;;  %v8789_v23 = vld [vmem:[#allocation3 + $0xc0] sm:$0xe]  ;;  %v16606_v37 = vsel %vm14396_vm8, %v8933_v31, %v8934_v49  ;;  %v8947_v31 = vrot.slane %v8945_v51, 4 }
 0x459   : > { %v16591_v10 = vsel %vm14396_vm8, %v8926_v26, %v8927_v29  ;;  %17976 = vst [vmem:[#allocation29_spill] sm:$0xff] %v16606_v37  ;;  %v17977_v26 = vcombine.low %v16276_v3, %v16280_v0  ;;  %v11821_v29 = vrot.slane %v8788_v58, 9  ;;  %v11822_v49 = vrot.slane %v8789_v23, 9 }
 0x45a   : > { %17973 = vst [vmem:[#allocation27_spill] sm:$0xff] %v16591_v10  ;;  %v16641_v5 = vsel %vm14396_vm8, %v8947_v31, %v8948_v4  ;;  %v16655_v4 = vld [vmem:[%s17739_s3 + $0x14] sm:$0xf]  ;;  %v8158_v37 = vshrl.u32 %v16381_v62, 16 }
 0x45b   : > { %v16625_v3 = vsel %vm14396_vm8, %v11821_v29, %v8938_v22  ;;  %v16637_v23 = vsel %vm14396_vm8, %v11822_v49, %v8945_v51  ;;  %17985 = vst [vmem:[#allocation37_spill] sm:$0xff] %v16641_v5  ;;  %v13707_v29 = vld [vmem:[#allocation3 + $0xc] sm:$0xff]   ;;  %v8579_v51 = vsel %vm6779_vm3, %v16351_v13, 0  ;;  %v13709_v49 = vld [vmem:[#allocation3 + $0x24] sm:$0xff]   ;;  %v13713_v5 = vld [vmem:[#allocation3 + $0x54] sm:$0xff]  }
 0x45c   : > { %12781 = vmatmul.mubr.msk.bf16.gmra.mrb[8].mxu1 %vm6730_vm9, %v17974_v46  ;;  %v16613_v54 = vpop.f32.mrb[32].mxu0  ;;  %v8940_v46 = vrot.slane %v8938_v22, 4  ;;  %17981 = vst [vmem:[#allocation33_spill] sm:$0xff] %v16625_v3  ;;  %17984 = vst [vmem:[#allocation36_spill] sm:$0xff] %v16637_v23  ;;  %v13710_v13 = vld [vmem:[#allocation3 + $0x30] sm:$0xff]   ;;  %v8154_v3 = vshll.u32 %v16381_v62, 16 }
 0x45d   : > { %12784 = vmatprep.mubr.msk.bf16.mxu1 %vm6730_vm9, %v17977_v26  ;;  %17978 = vst [vmem:[#allocation30_spill] sm:$0xff] %v16613_v54  ;;  %v16618_v57 = vpop.f32.mrb[33].mxu0  ;;  %v16669_v22 = vld [vmem:[#allocation3 + $0x10] sm:$0xf]  ;;  %v8051_v26 = vld [vmem:[#allocation3 + $0x18] sm:$0xf] }
 0x45e   : > { %17979 = vst [vmem:[#allocation31_spill] sm:$0xff] %v16618_v57  ;;  %v16621_v10 = vpop.f32.mrb[34].mxu0  ;;  %v16629_v0 = vsel %vm14396_vm8, %v8940_v46, %v8941_v21  ;;  %v17986_v46 = vcombine.low %v16286_v32, %v16290_v25  ;;  %v13708_v21 = vld [vmem:[#allocation3 + $0x18] sm:$0xff]   ;;  %v16691_v59 = vrot.slane %v8154_v3, 5  ;;  %v8160_v44 = vrot.slane %v8158_v37, 4  ;;  %v13714_v62 = vld [vmem:[#allocation3 + $0x60] sm:$0xff]  }
 0x45f   : > { %17980 = vst [vmem:[#allocation32_spill] sm:$0xff] %v16621_v10  ;;  %17982 = vst [vmem:[#allocation34_spill] sm:$0xff] %v16629_v0  ;;  %v16631_v58 = vpop.f32.mrb[35].mxu0  ;;  %v8121_v10 = vshrl.u32 %v8051_v26, 16  ;;  %v8054_v0 = vld [vmem:[#allocation3 + $0x24] sm:$0xf] }
 0x460   : > { %17983 = vst [vmem:[#allocation35_spill] sm:$0xff] %v16631_v58  ;;  %v8145_v2 = vshrl.u32 %v8054_v0, 16  ;;  %v8161_v37 = vor.u32 %v8160_v44, %v16691_v59  ;;  %v8060_v44 = vld [vmem:[#allocation3 + $0x3c] sm:$0xf] }
 0x461   : > { %v8123_v47 = vrot.slane %v8121_v10, 4  ;;  %v8193_v45 = vshrl.u32 %v8060_v44, 16 }
 0x464   : > { %12785 = vmatmul.mubr.msk.bf16.gmra.mrb[12].mxu1 %vm6730_vm9, %v17986_v46  ;;  %v13711_v46 = vld [vmem:[#allocation3 + $0x3c] sm:$0xff]  }
 0x465   : > { %12790 = vmatprep.mubr.msk.bf16.mxu1 %vm6730_vm9, %v13707_v29 }
 0x46c   : > { %12791 = vmatmul.mubr.msk.bf16.vlgmr.msra.gmra.mrb[16].mxu1 %vm6730_vm9, %v13708_v21  ;;  %v8048_v21 = vld [vmem:[#allocation3 + $0xc] sm:$0xf] }
 0x46d   : > { %12823 = vmatpush3.bf16.msra.mxu1 %v8579_v51  ;;  %12794 = vmatprep.mubr.msk.bf16.mxu1 %vm6730_vm9, %v13709_v49  ;;  %v8106_v51 = vshll.u32 %v16669_v22, 16  ;;  %v8110_v49 = vshrl.u32 %v16669_v22, 16  ;;  %v8100_v57 = vshll.u32 %v8048_v21, 16 }
 0x46e   : > { %13651 = vmatprep.subr.msk.bf16.mxu1 %vm6779_vm3, %v16655_v4  ;;  %v16661_v32 = vpop.f32.mrb[36].mxu0 }
 0x46f   : > { %17987 = vst [vmem:[#allocation38_spill] sm:$0xff] %v16661_v32  ;;  %v16663_v25 = vpop.f32.mrb[37].mxu0  ;;  %v16675_v32 = vld [vmem:[#allocation3 + $0x1c] sm:$0xf]  ;;  %v16679_v54 = vrot.slane %v8106_v51, 5  ;;  %v8112_v58 = vrot.slane %v8110_v49, 4 }
 0x470   : > { %17988 = vst [vmem:[#allocation39_spill] sm:$0xff] %v16663_v25  ;;  %v16665_v31 = vpop.f32.mrb[38].mxu0  ;;  %v16677_v25 = vld [vmem:[#allocation3 + $0x14] sm:$0x1]  ;;  %v8134_v23 = vshrl.u32 %v16675_v32, 16  ;;  %v8102_v49 = vrot.slane %v8100_v57, 5 }
 0x471   : > { %17989 = vst [vmem:[#allocation40_spill] sm:$0xff] %v16665_v31  ;;  %v16667_v29 = vpop.f32.mrb[39].mxu0  ;;  %v8097_v31 = vshrl.u32 %v8048_v21, 16  ;;  %v8116_v51 = vshll.u32 %v16677_v25, 16 }
 0x472   : > { %17990 = vst [vmem:[#allocation41_spill] sm:$0xff] %v16667_v29  ;;  %v13712_v29 = vld [vmem:[#allocation3 + $0x48] sm:$0xff]   ;;  %v8136_v15 = vrot.slane %v8134_v23, 4 }
 0x473   : > { %v8099_v21 = vrot.slane %v8097_v31, 4  ;;  %v8118_v31 = vrot.slane %v8116_v51, 5  ;;  %v8182_v51 = vshrl.u32 %v16383_v18, 16 }
 0x474   : > { %12795 = vmatmul.mubr.msk.bf16.gmra.mrb[20].mxu1 %vm6730_vm9, %v13710_v13  ;;  %v8124_v13 = vshll.u32 %v8051_v26, 16  ;;  %v8113_v26 = vor.u32 %v8112_v58, %v16679_v54 }
 0x475   : > { %12798 = vmatprep.mubr.msk.bf16.mxu1 %vm6730_vm9, %v13711_v46  ;;  %v8130_v46 = vshll.u32 %v16675_v32, 16  ;;  %v8103_v50 = vor.u32 %v8102_v49, %v8099_v21  ;;  %v8178_v21 = vshll.u32 %v16383_v18, 16  ;;  %v8162_v18 = vrot.slane %v8161_v37, 4 }
 0x476   : > { %v8126_v6 = vrot.slane %v8124_v13, 5  ;;  %v8147_v13 = vrot.slane %v8145_v2, 4 }
 0x477   : > { %v16689_v24 = vrot.slane %v8130_v46, 5  ;;  %v8169_v46 = vshrl.u32 %v8057_v27, 16 }
 0x478   : > { %v8127_v57 = vor.u32 %v8126_v6, %v8123_v47  ;;  %v8140_v47 = vshll.u32 %v16693_v8, 16  ;;  %v8196_v8 = vshll.u32 %v8060_v44, 16 }
 0x479   : > { %v8137_v10 = vor.u32 %v8136_v15, %v16689_v24  ;;  %v8104_v15 = vrot.slane %v8103_v50, 4 }
 0x47a   : > { %v8142_v61 = vrot.slane %v8140_v47, 5  ;;  %v8198_v47 = vrot.slane %v8196_v8, 5 }
 0x47b   : > { %v8109_v50 = vsel %vm13978_vm13, %v8104_v15, %v16679_v54 }
 0x47c   : > { %12799 = vmatmul.mubr.msk.bf16.gmra.mrb[24].mxu1 %vm6730_vm9, %v13712_v29  ;;  %v8148_v29 = vshll.u32 %v8054_v0, 16  ;;  %v8172_v0 = vshll.u32 %v8057_v27, 16  ;;  %v8128_v27 = vrot.slane %v8127_v57, 4  ;;  %v8063_v57 = vld [vmem:[#allocation3 + $0x48] sm:$0xf] }
 0x47d   : > { %12802 = vmatprep.mubr.msk.bf16.mxu1 %vm6730_vm9, %v13713_v5  ;;  %v8114_v5 = vrot.slane %v8113_v26, 4  ;;  %v8164_v26 = vshll.u32 %v16393_v56, 16  ;;  %v8202_v56 = vshll.u32 %v16397_v43, 16  ;;  %v8217_v15 = vshrl.u32 %v8063_v57, 16 }
 0x47e   : > { %v8150_v23 = vrot.slane %v8148_v29, 5  ;;  %v8138_v29 = vrot.slane %v8137_v10, 4  ;;  %v13717_v10 = vld [vmem:[#allocation3 + $0x84] sm:$0xff]  }
 0x47f   : > { %v8119_v49 = vsel %vm13978_vm13, %v8114_v5, %v8118_v31  ;;  %v8166_v5 = vrot.slane %v8164_v26, 5  ;;  %v8206_v31 = vshrl.u32 %v16397_v43, 16  ;;  %v8226_v26 = vshll.u32 %v16403_v30, 16 }
 0x481   : > { %v8167_v54 = vsel %vm13978_vm13, %v8162_v18, %v8166_v5 }
 0x482   : > { %v16695_v58 = vpop.f32.mrb[40].mxu0 }
 0x483   : > { %17992 = vst [vmem:[#allocation43_spill] sm:$0xff] %v16695_v58  ;;  %v16699_v3 = vpop.f32.mrb[41].mxu0  ;;  %v8174_v58 = vrot.slane %v8172_v0, 5 }
 0x484   : > { %12803 = vmatmul.mubr.msk.bf16.gmra.mrb[28].mxu1 %vm6730_vm9, %v13714_v62  ;;  %17993 = vst [vmem:[#allocation44_spill] sm:$0xff] %v16699_v3  ;;  %v16705_v6 = vpop.f32.mrb[42].mxu0  ;;  %v8151_v62 = vor.u32 %v8150_v23, %v8147_v13  ;;  %v8171_v3 = vrot.slane %v8169_v46, 4  ;;  %v16720_v13 = vcombine.low %v8109_v50, %v8119_v49  ;;  %v8133_v23 = vsel %vm13978_vm13, %v8128_v27, %v16689_v24 }
 0x485   : > { %12806 = vmatprep.mubr.msk.bf16.mxu1 %vm6730_vm9, %v13715_v1  ;;  %17994 = vst [vmem:[#allocation45_spill] sm:$0xff] %v16705_v6  ;;  %v16708_v2 = vpop.f32.mrb[43].mxu0  ;;  %v16713_v1 = vrot.slane %v8178_v21, 5  ;;  %v8184_v6 = vrot.slane %v8182_v51, 4  ;;  %v8143_v46 = vsel %vm13978_vm13, %v8138_v29, %v8142_v61  ;;  %v8188_v21 = vshll.u32 %v16395_v55, 16 }
 0x486   : > { %17995 = vst [vmem:[#allocation46_spill] sm:$0xff] %v16708_v2  ;;  %v13716_v2 = vld [vmem:[#allocation3 + $0x78] sm:$0xff]   ;;  %v8152_v37 = vrot.slane %v8151_v62, 4  ;;  %v8175_v0 = vor.u32 %v8174_v58, %v8171_v3  ;;  %v8195_v51 = vrot.slane %v8193_v45, 4  ;;  %v8220_v24 = vshll.u32 %v8063_v57, 16 }
 0x487   : > { %v8185_v43 = vor.u32 %v8184_v6, %v16713_v1  ;;  %v16733_v49 = vrot.slane %v8202_v56, 5  ;;  %v8208_v61 = vrot.slane %v8206_v31, 4  ;;  %v16737_v44 = vcombine.low %v8133_v23, %v8143_v46  ;;  %v8066_v55 = vld [vmem:[#allocation3 + $0x54] sm:$0xf]  ;;  %v8069_v62 = vld [vmem:[#allocation3 + $0x60] sm:$0xf] }
 0x488   : > { %v8157_v58 = vsel %vm13978_vm13, %v8152_v37, %v16691_v59  ;;  %v8250_v3 = vshll.u32 %v16414_v38, 16  ;;  %v8254_v45 = vshrl.u32 %v16414_v38, 16  ;;  %v8176_v6 = vrot.slane %v8175_v0, 4  ;;  %v13718_v56 = vld [vmem:[#allocation3 + $0x90] sm:$0xff]   ;;  %v8072_v23 = vld [vmem:[#allocation3 + $0x6c] sm:$0xf] }
 0x489   : > { %v16744_v8 = vcombine.low %v8157_v58, %v8167_v54  ;;  %v8190_v27 = vrot.slane %v8188_v21, 5  ;;  %v8212_v29 = vshll.u32 %v16401_v20, 16  ;;  %v8186_v18 = vrot.slane %v8185_v43, 4  ;;  %v13719_v38 = vld [vmem:[#allocation3 + $0x9c] sm:$0xff]  }
 0x48a   : > { %v8219_v50 = vrot.slane %v8217_v15, 4  ;;  %v8222_v5 = vrot.slane %v8220_v24, 5  ;;  %v8209_v31 = vor.u32 %v8208_v61, %v16733_v49  ;;  %v16748_v59 = vrot.slane %v8226_v26, 5 }
 0x48b   : > { %v8244_v46 = vshll.u32 %v8066_v55, 16  ;;  %v16750_v37 = vrot.slane %v8250_v3, 5  ;;  %v8256_v54 = vrot.slane %v8254_v45, 4  ;;  %v8265_v0 = vshrl.u32 %v8069_v62, 16 }
 0x48c   : > { %12807 = vmatmul.mubr.msk.bf16.gmra.mrb[0].mxu1 %vm6730_vm9, %v13716_v2  ;;  %v8230_v2 = vshrl.u32 %v16403_v30, 16  ;;  %v8199_v30 = vor.u32 %v8198_v47, %v8195_v51  ;;  %v8181_v20 = vsel %vm13978_vm13, %v8176_v6, %v16713_v1  ;;  %v8268_v43 = vshll.u32 %v8069_v62, 16 }
 0x48d   : > { %12810 = vmatprep.mubr.msk.bf16.mxu1 %vm6730_vm9, %v13717_v10  ;;  %v8241_v10 = vshrl.u32 %v8066_v55, 16  ;;  %v8274_v21 = vshll.u32 %v16428_v52, 16  ;;  %v8278_v51 = vshrl.u32 %v16428_v52, 16  ;;  %v8191_v47 = vsel %vm13978_vm13, %v8186_v18, %v8190_v27 }
 0x48e   : > { %v8232_v57 = vrot.slane %v8230_v2, 4  ;;  %v8200_v15 = vrot.slane %v8199_v30, 4  ;;  %v8289_v24 = vshrl.u32 %v8072_v23, 16  ;;  %v8292_v61 = vshll.u32 %v8072_v23, 16 }
 0x48f   : > { %v8210_v26 = vrot.slane %v8209_v31, 4  ;;  %v8223_v2 = vor.u32 %v8222_v5, %v8219_v50  ;;  %v8236_v58 = vshll.u32 %v16407_v60, 16  ;;  %v8243_v55 = vrot.slane %v8241_v10, 4  ;;  %v13720_v60 = vld [vmem:[#allocation3 + $0xa8] sm:$0xff]  }
 0x490   : > { %v8233_v1 = vor.u32 %v8232_v57, %v16748_v59  ;;  %v8246_v3 = vrot.slane %v8244_v46, 5  ;;  %v8257_v45 = vor.u32 %v8256_v54, %v16750_v37  ;;  %v8267_v6 = vrot.slane %v8265_v0, 4  ;;  %v8075_v46 = vld [vmem:[#allocation3 + $0x78] sm:$0xf] }
 0x491   : > { %v8270_v52 = vrot.slane %v8268_v43, 5  ;;  %v16764_v62 = vrot.slane %v8274_v21, 5  ;;  %v8298_v27 = vshll.u32 %v16453_v9, 16  ;;  %v8214_v18 = vrot.slane %v8212_v29, 5  ;;  %v13721_v29 = vld [vmem:[#allocation3 + $0xb4] sm:$0xff]  }
 0x492   : > { %v8291_v30 = vrot.slane %v8289_v24, 4  ;;  %v8294_v23 = vrot.slane %v8292_v61, 5  ;;  %v8302_v50 = vshrl.u32 %v16453_v9, 16  ;;  %v16770_v31 = vcombine.low %v8181_v20, %v8191_v47 }
 0x493   : > { %v8205_v57 = vsel %vm13978_vm13, %v8200_v15, %v16733_v49  ;;  %v8224_v10 = vrot.slane %v8223_v2, 4  ;;  %v8215_v0 = vsel %vm13978_vm13, %v8210_v26, %v8214_v18  ;;  %v8234_v9 = vrot.slane %v8233_v1, 4 }
 0x494   : > { %12811 = vmatmul.mubr.msk.bf16.gmra.mrb[4].mxu1 %vm6730_vm9, %v13718_v56  ;;  %v8280_v56 = vrot.slane %v8278_v51, 4  ;;  %v8238_v43 = vrot.slane %v8236_v58, 5  ;;  %v8247_v21 = vor.u32 %v8246_v3, %v8243_v55  ;;  %v8258_v20 = vrot.slane %v8257_v45, 4 }
 0x495   : > { %12814 = vmatprep.mubr.msk.bf16.mxu1 %vm6730_vm9, %v13719_v38  ;;  %v8260_v38 = vshll.u32 %v16426_v7, 16  ;;  %v8271_v47 = vor.u32 %v8270_v52, %v8267_v6  ;;  %v16784_v15 = vrot.slane %v8298_v27, 5  ;;  %v8295_v24 = vor.u32 %v8294_v23, %v8291_v30  ;;  %v8078_v27 = vld [vmem:[#allocation3 + $0x84] sm:$0xf] }
 0x496   : > { %v8281_v49 = vor.u32 %v8280_v56, %v16764_v62  ;;  %v8304_v61 = vrot.slane %v8302_v50, 4  ;;  %v8313_v26 = vshrl.u32 %v8075_v46, 16  ;;  %v8316_v2 = vshll.u32 %v8075_v46, 16 }
 0x497   : > { %v16789_v58 = vcombine.low %v8205_v57, %v8215_v0  ;;  %v8229_v55 = vsel %vm13978_vm13, %v8224_v10, %v16748_v59  ;;  %v8262_v1 = vrot.slane %v8260_v38, 5  ;;  %v8284_v3 = vshll.u32 %v16440_v36, 16  ;;  %v16813_v10 = vld [vmem:[#allocation3 + $0x34] sm:$0xf] }
 0x498   : > { %v8239_v45 = vsel %vm13978_vm13, %v8234_v9, %v8238_v43  ;;  %v8248_v6 = vrot.slane %v8247_v21, 4  ;;  %v8322_v52 = vshll.u32 %v16466_v48, 16  ;;  %v8326_v56 = vshrl.u32 %v16466_v48, 16  ;;  %v13722_v48 = vld [vmem:[#allocation3 + $0xc0] sm:$0xff]   ;;  %v16820_v9 = vld [vmem:[#allocation3 + $0x38] sm:$0x1] }
 0x499   : > { %v8263_v18 = vsel %vm13978_vm13, %v8258_v20, %v8262_v1  ;;  %v16801_v30 = vrot.slane %v8271_v47, 4  ;;  %v16803_v23 = vrot.slane %v8281_v49, 4  ;;  %v8308_v59 = vshll.u32 %v16464_v53, 16  ;;  %18000 = vst [vmem:[#allocation51_spill] sm:$0xff] %v16820_v9  ;;  %v10331_v47 = vld [vmem:[#allocation3 + $0x30] sm:$0xe] }
 0x49a   : > { %v16768_v5 = vpop.f32.mrb[44].mxu0  ;;  %v16806_v50 = vrot.slane %v8295_v24, 4  ;;  %v8305_v36 = vor.u32 %v8304_v61, %v16784_v15  ;;  %v16811_v57 = vrot.slane %v8316_v2, 5  ;;  %v16815_v38 = vcombine.low %v8229_v55, %v8239_v45  ;;  %v16842_v61 = vld [vmem:[#allocation3 + $0x40] sm:$0xf] }
 0x49b   : > { %17996 = vst [vmem:[#allocation47_spill] sm:$0xff] %v16768_v5  ;;  %v16776_v54 = vpop.f32.mrb[45].mxu0  ;;  %v16817_v46 = vrot.slane %v8284_v3, 5  ;;  %v8337_v0 = vshrl.u32 %v8078_v27, 16  ;;  %v8253_v53 = vsel %vm13978_vm13, %v8248_v6, %v16750_v37  ;;  %v16825_v43 = vrot.slane %v8322_v52, 5  ;;  %18001 = vst [vmem:[#allocation52_spill] sm:$0xff] %v16842_v61 }
 0x49c   : > { %17997 = vst [vmem:[#allocation48_spill] sm:$0xff] %v16776_v54  ;;  %v16780_v51 = vpop.f32.mrb[46].mxu0  ;;  %12815 = vmatmul.mubr.msk.bf16.gmra.mrb[8].mxu1 %vm6730_vm9, %v13720_v60  ;;  %v16809_v60 = vrot.slane %v8313_v26, 4  ;;  %v16827_v21 = vrot.slane %v8326_v56, 4  ;;  %v8340_v20 = vshll.u32 %v8078_v27, 16  ;;  %v16830_v49 = vcombine.low %v8253_v53, %v8263_v18 }
 0x49d   : > { %17998 = vst [vmem:[#allocation49_spill] sm:$0xff] %v16780_v51  ;;  %v16786_v7 = vpop.f32.mrb[47].mxu0  ;;  %12818 = vmatprep.mubr.msk.bf16.mxu1 %vm6730_vm9, %v13721_v29  ;;  %v8332_v29 = vshll.u32 %v16479_v11, 16  ;;  %v16840_v24 = vrot.slane %v8308_v59, 5  ;;  %v16844_v26 = vld [vmem:[#allocation3 + $0x44] sm:$0x1] }
 0x49e   : > { %17999 = vst [vmem:[#allocation50_spill] sm:$0xff] %v16786_v7  ;;  %18002 = vst [vmem:[#allocation53_spill] sm:$0xff] %v16844_v26  ;;  %v16846_v2 = vld [vmem:[#allocation3 + $0x4c] sm:$0xf]  ;;  %v16854_v1 = vrot.slane %v8305_v36, 4  ;;  %v10409_v52 = vrot.slane %v16813_v10, 5 }
 0x49f   : > { %v16858_v45 = vld [vmem:[#allocation3 + $0x50] sm:$0x1]  ;;  %v16860_v6 = vld [vmem:[#allocation3 + $0x58] sm:$0xf]  ;;  %v10332_v56 = vld [vmem:[#allocation3 + $0x3c] sm:$0xe] }
 0x4a0   : > { %18003 = vst [vmem:[#allocation54_spill] sm:$0xff] %v16858_v45  ;;  %18004 = vst [vmem:[#allocation55_spill] sm:$0xff] %v16860_v6  ;;  %v16863_v27 = vrot.slane %v8332_v29, 5  ;;  %v11924_v59 = vrot.slane %v10331_v47, 9  ;;  %v16870_v53 = vrot.slane %v8340_v20, 5  ;;  %v10411_v55 = vrot.slane %v10409_v52, 4 }
 0x4a1   : > { %v16872_v3 = vld [vmem:[#allocation3 + $0x5c] sm:$0x1]  ;;  %v10412_v11 = vrot.slane %v16820_v9, 5  ;;  %v9049_v29 = vsel %vm6779_vm3, %v16655_v4, 0  ;;  %v16877_v37 = vld [vmem:[#allocation3 + $0x64] sm:$0xf] }
 0x4a2   : > { %18005 = vst [vmem:[#allocation56_spill] sm:$0xff] %v16872_v3  ;;  %18006 = vst [vmem:[#allocation57_spill] sm:$0xff] %v16877_v37  ;;  %v11925_v47 = vrot.slane %v10332_v56, 9  ;;  %v10416_v18 = vrot.slane %v16842_v61, 5  ;;  %v10334_v36 = vld [vmem:[#allocation3 + $0x54] sm:$0xe] }
 0x4a3   : > { %v16886_v20 = vsel %vm14396_vm8, %v10411_v55, %v10412_v11  ;;  %v10419_v7 = vrot.slane %v16844_v26, 5  ;;  %v10423_v54 = vrot.slane %v16846_v2, 5  ;;  %v10335_v4 = vld [vmem:[#allocation3 + $0x60] sm:$0xe]  ;;  %v16890_v5 = vld [vmem:[#allocation3 + $0x68] sm:$0x1] }
 0x4a4   : > { %12819 = vmatmul.mubr.msk.bf16.gmra.mrb[12].mxu1 %vm6730_vm9, %v13722_v48  ;;  %v10333_v48 = vld [vmem:[#allocation3 + $0x48] sm:$0xe]  ;;  %18008 = vst [vmem:[#allocation59_spill] sm:$0xff] %v16886_v20  ;;  %18009 = vst [vmem:[#allocation60_spill] sm:$0xff] %v16890_v5  ;;  %v16892_v9 = vld [vmem:[#allocation3 + $0x70] sm:$0xf]  ;;  %v16905_v55 = vsel %vm14396_vm8, %v11925_v47, %v10416_v18 }
 0x4a5   : > { %12824 = vmatprep.mubr.msk.bf16.mxu1 %vm6730_vm9, %v16720_v13  ;;  %v16865_v13 = vrot.slane %v8337_v0, 4  ;;  %v16881_v0 = vsel %vm14396_vm8, %v11924_v59, %v10409_v52  ;;  %v11926_v51 = vrot.slane %v10333_v48, 9  ;;  %18010 = vst [vmem:[#allocation61_spill] sm:$0xff] %v16892_v9  ;;  %v10418_v56 = vrot.slane %v10416_v18, 4  ;;  %v16901_v11 = vld [vmem:[%s17739_s3 + $0x18] sm:$0xf] }
 0x4a6   : > { %18007 = vst [vmem:[#allocation58_spill] sm:$0xff] %v16881_v0  ;;  %v10426_v59 = vrot.slane %v16858_v45, 5  ;;  %v10430_v61 = vrot.slane %v16860_v6, 5  ;;  %18011 = vst [vmem:[#allocation62_spill] sm:$0xff] %v16905_v55  ;;  %v10425_v26 = vrot.slane %v10423_v54, 4  ;;  %v11927_v52 = vrot.slane %v10334_v36, 9 }
 0x4a7   : > { %v16909_v48 = vsel %vm14396_vm8, %v11926_v51, %v10423_v54  ;;  %v10336_v20 = vld [vmem:[#allocation3 + $0x6c] sm:$0xe]  ;;  %v16913_v0 = vld [vmem:[#allocation3 + $0x7c] sm:$0xf]  ;;  %v16917_v45 = vsel %vm14396_vm8, %v10418_v56, %v10419_v7  ;;  %v10433_v18 = vrot.slane %v16872_v3, 5  ;;  %v11928_v47 = vrot.slane %v10335_v4, 9 }
 0x4a8   : > { %18012 = vst [vmem:[#allocation63_spill] sm:$0xff] %v16909_v48  ;;  %18013 = vst [vmem:[#allocation64_spill] sm:$0xff] %v16913_v0  ;;  %v10432_v6 = vrot.slane %v10430_v61, 4  ;;  %v16922_v54 = vld [vmem:[#allocation3 + $0x74] sm:$0x1]  ;;  %v16930_v36 = vsel %vm14396_vm8, %v10425_v26, %v10426_v59  ;;  %v16934_v7 = vsel %vm14396_vm8, %v11927_v52, %v10430_v61  ;;  %v11929_v26 = vrot.slane %v10336_v20, 9 }
 0x4a9   : > { %18014 = vst [vmem:[#allocation65_spill] sm:$0xff] %v16917_v45  ;;  %18015 = vst [vmem:[#allocation66_spill] sm:$0xff] %v16922_v54  ;;  %v16924_v51 = vld [vmem:[#allocation3 + $0x80] sm:$0x1]  ;;  %v10444_v59 = vrot.slane %v16892_v9, 5  ;;  %v10440_v4 = vrot.slane %v16890_v5, 5 }
 0x4aa   : > { %18016 = vst [vmem:[#allocation67_spill] sm:$0xff] %v16924_v51  ;;  %18017 = vst [vmem:[#allocation68_spill] sm:$0xff] %v16930_v36  ;;  %v16945_v56 = vsel %vm14396_vm8, %v10432_v6, %v10433_v18  ;;  %v16948_v61 = vld [vmem:[#allocation3 + $0x94] sm:$0xf]  ;;  %v10338_v36 = vld [vmem:[#allocation3 + $0x84] sm:$0xe] }
 0x4ab   : > { %18018 = vst [vmem:[#allocation69_spill] sm:$0xff] %v16934_v7  ;;  %18020 = vst [vmem:[#allocation71_spill] sm:$0xff] %v16945_v56  ;;  %v16957_v48 = vld [vmem:[#allocation3 + $0x8c] sm:$0x1]  ;;  %v16961_v6 = vsel %vm14396_vm8, %v11929_v26, %v10444_v59  ;;  %v10446_v20 = vrot.slane %v10444_v59, 4  ;;  %v10447_v18 = vrot.slane %v16922_v54, 5 }
 0x4ac   : > { %12825 = vmatmul.mubr.msk.bf16.vlgmr.msra.gmra.mrb[16].mxu1 %vm6730_vm9, %v16737_v44  ;;  %v10337_v44 = vld [vmem:[#allocation3 + $0x78] sm:$0xe]  ;;  %18022 = vst [vmem:[#allocation73_spill] sm:$0xff] %v16957_v48  ;;  %18023 = vst [vmem:[#allocation74_spill] sm:$0xff] %v16961_v6  ;;  %v10451_v9 = vrot.slane %v16913_v0, 5  ;;  %v10454_v56 = vrot.slane %v16924_v51, 5 }
 0x4ad   : > { %12857 = vmatpush3.bf16.msra.mxu1 %v9049_v29  ;;  %12828 = vmatprep.mubr.msk.bf16.mxu1 %vm6730_vm9, %v16744_v8  ;;  %v10437_v29 = vrot.slane %v16877_v37, 5  ;;  %v16939_v8 = vld [vmem:[#allocation3 + $0x88] sm:$0xf]  ;;  %v16965_v52 = vld [vmem:[#allocation3 + $0x98] sm:$0x1]  ;;  %v16981_v54 = vsel %vm14396_vm8, %v10446_v20, %v10447_v18  ;;  %v11931_v3 = vrot.slane %v10338_v36, 9 }
 0x4ae   : > { %13652 = vmatprep.subr.msk.bf16.mxu1 %vm6779_vm3, %v16901_v11  ;;  %18019 = vst [vmem:[#allocation70_spill] sm:$0xff] %v16939_v8  ;;  %18024 = vst [vmem:[#allocation75_spill] sm:$0xff] %v16965_v52  ;;  %v10458_v7 = vrot.slane %v16939_v8, 5  ;;  %v16973_v5 = vld [vmem:[#allocation3 + $0xa0] sm:$0xf]  ;;  %v10453_v0 = vrot.slane %v10451_v9, 4 }
 0x4af   : > { %v16954_v45 = vsel %vm14396_vm8, %v11928_v47, %v10437_v29  ;;  %v10439_v55 = vrot.slane %v10437_v29, 4  ;;  %v11930_v29 = vrot.slane %v10337_v44, 9  ;;  %18026 = vst [vmem:[#allocation77_spill] sm:$0xff] %v16973_v5  ;;  %v16975_v26 = vld [vmem:[#allocation3 + $0xac] sm:$0xf]  ;;  %18028 = vst [vmem:[#allocation79_spill] sm:$0xff] %v16981_v54 }
 0x4b0   : > { %18021 = vst [vmem:[#allocation72_spill] sm:$0xff] %v16954_v45  ;;  %18027 = vst [vmem:[#allocation78_spill] sm:$0xff] %v16975_v26  ;;  %v8350_v44 = vshrl.u32 %v16486_v14, 16  ;;  %v10460_v51 = vrot.slane %v10458_v7, 4  ;;  %v10461_v8 = vrot.slane %v16957_v48, 5  ;;  %v16999_v20 = vsel %vm14396_vm8, %v10453_v0, %v10454_v56  ;;  %v18111_v63 = vld [vmem:[#allocation63_spill] sm:$0xff] }
 0x4b1   : > { %v16969_v47 = vsel %vm14396_vm8, %v10439_v55, %v10440_v4  ;;  %v10339_v55 = vld [vmem:[#allocation3 + $0x90] sm:$0xe]  ;;  %v10340_v37 = vld [vmem:[#allocation3 + $0x9c] sm:$0xe]  ;;  %v16989_v59 = vld [vmem:[#allocation3 + $0xa4] sm:$0x1]  ;;  %v16995_v36 = vsel %vm14396_vm8, %v11930_v29, %v10451_v9  ;;  %v17003_v18 = vsel %vm14396_vm8, %v11931_v3, %v10458_v7 }
 0x4b2   : > { %18025 = vst [vmem:[#allocation76_spill] sm:$0xff] %v16969_v47  ;;  %18029 = vst [vmem:[#allocation80_spill] sm:$0xff] %v16989_v59  ;;  %v16991_v47 = vld [vmem:[#allocation3 + $0xb0] sm:$0x1]  ;;  %v10465_v4 = vrot.slane %v16948_v61, 5  ;;  %v17014_v9 = vsel %vm14396_vm8, %v10460_v51, %v10461_v8  ;;  %v11932_v0 = vrot.slane %v10339_v55, 9 }
 0x4b3   : > { %18030 = vst [vmem:[#allocation81_spill] sm:$0xff] %v16995_v36  ;;  %18031 = vst [vmem:[#allocation82_spill] sm:$0xff] %v16999_v20  ;;  %v10472_v56 = vrot.slane %v16973_v5, 5  ;;  %v10341_v29 = vld [vmem:[#allocation3 + $0xa8] sm:$0xe]  ;;  %v11933_v45 = vrot.slane %v10340_v37, 9 }
 0x4b4   : > { %12829 = vmatmul.mubr.msk.bf16.gmra.mrb[20].mxu1 %vm6730_vm9, %v16770_v31  ;;  %18032 = vst [vmem:[#allocation83_spill] sm:$0xff] %v17003_v18  ;;  %v17008_v31 = vld [vmem:[#allocation3 + $0xb8] sm:$0xf]  ;;  %18034 = vst [vmem:[#allocation85_spill] sm:$0xff] %v17014_v9  ;;  %v9644_v3 = vld [vmem:[#allocation3 + $0xbc] sm:$0x1]  ;;  %v17022_v48 = vsel %vm14396_vm8, %v11932_v0, %v10465_v4 }
 0x4b5   : > { %12832 = vmatprep.mubr.msk.bf16.mxu1 %vm6730_vm9, %v16789_v58  ;;  %18033 = vst [vmem:[#allocation84_spill] sm:$0xff] %v17008_v31  ;;  %v10467_v6 = vrot.slane %v10465_v4, 4  ;;  %v10468_v58 = vrot.slane %v16965_v52, 5  ;;  %v10474_v54 = vrot.slane %v10472_v56, 4  ;;  %v10475_v51 = vrot.slane %v16989_v59, 5 }
 0x4b6   : > { %v10479_v8 = vrot.slane %v16975_v26, 5  ;;  %v10342_v55 = vld [vmem:[#allocation3 + $0xb4] sm:$0xe]  ;;  %v17026_v20 = vld [vmem:[#allocation3 + $0xc4] sm:$0xf]  ;;  %v17034_v7 = vsel %vm14396_vm8, %v11933_v45, %v10472_v56  ;;  %v11934_v37 = vrot.slane %v10341_v29, 9 }
 0x4b7   : > { %v17030_v36 = vsel %vm14396_vm8, %v10467_v6, %v10468_v58  ;;  %v10486_v4 = vrot.slane %v17008_v31, 5  ;;  %v9647_v0 = vld [vmem:[#allocation3 + $0xc8] sm:$0x1]  ;;  %v17041_v18 = vsel %vm14396_vm8, %v10474_v54, %v10475_v51  ;;  %v10482_v26 = vrot.slane %v16991_v47, 5  ;;  %v10343_v29 = vld [vmem:[#allocation3 + $0xc0] sm:$0xe] }
 0x4b8   : > { %v10481_v59 = vrot.slane %v10479_v8, 4  ;;  %v11950_v6 = vcombine.low %v17034_v7, %v17041_v18  ;;  %v11935_v58 = vrot.slane %v10342_v55, 9  ;;  %v10489_v56 = vrot.slane %v9644_v3, 5  ;;  %v8081_v5 = vld [vmem:[#allocation3 + $0x90] sm:$0xf] }
 0x4b9   : > { %v10488_v45 = vrot.slane %v10486_v4, 4  ;;  %v18035_v31 = vshll.u32 %v16486_v14, 16  ;;  %v17052_v9 = vsel %vm14396_vm8, %v11934_v37, %v10479_v8  ;;  %v10493_v51 = vrot.slane %v17026_v20, 5  ;;  %v8084_v14 = vld [vmem:[#allocation3 + $0x9c] sm:$0xf]  ;;  %v13784_v18 = vld [vmem:[%s13936_s10 + $0x8] sm:$0xff] }
 0x4ba   : > { %v17056_v54 = vsel %vm14396_vm8, %v10481_v59, %v10482_v26  ;;  %v8352_v3 = vrot.slane %v8350_v44, 4  ;;  %v11936_v59 = vrot.slane %v10343_v29, 9  ;;  %v10496_v44 = vrot.slane %v9647_v0, 5 }
 0x4bb   : > { %v17048_v52 = vrot.slane %v18035_v31, 5  ;;  %v17065_v31 = vsel %vm14396_vm8, %v11935_v58, %v10486_v4  ;;  %v17069_v8 = vsel %vm14396_vm8, %v10488_v45, %v10489_v56  ;;  %v8311_v55 = vsel %vm13978_vm13, %v16854_v1, %v16840_v24 }
 0x4bc   : > { %12833 = vmatmul.mubr.msk.bf16.gmra.mrb[24].mxu1 %vm6730_vm9, %v16815_v38  ;;  %v11952_v26 = vcombine.low %v17065_v31, %v17069_v8  ;;  %v10495_v38 = vrot.slane %v10493_v51, 4  ;;  %v18036_v37 = vor.u32 %v16827_v21, %v16825_v43  ;;  %v8361_v58 = vshrl.u32 %v8081_v5, 16  ;;  %v13787_v31 = vld [vmem:[%s13936_s10 + $0x20] sm:$0xff]  ;;  %v13788_v8 = vld [vmem:[%s13936_s10 + $0x28] sm:$0xff] }
 0x4bd   : > { %12836 = vmatprep.mubr.msk.bf16.mxu1 %vm6730_vm9, %v16830_v49  ;;  %v8364_v45 = vshll.u32 %v8081_v5, 16  ;;  %v8370_v56 = vshll.u32 %v16500_v16, 16  ;;  %v8374_v49 = vshrl.u32 %v16500_v16, 16  ;;  %v17086_v29 = vsel %vm14396_vm8, %v11936_v59, %v10493_v51 }
 0x4be   : > { %v8330_v4 = vrot.slane %v18036_v37, 4  ;;  %v17090_v0 = vsel %vm14396_vm8, %v10495_v38, %v10496_v44  ;;  %v8353_v24 = vor.u32 %v8352_v3, %v17048_v52  ;;  %v8394_v21 = vshll.u32 %v16517_v28, 16 }
 0x4bf   : > { %v8398_v1 = vshrl.u32 %v16517_v28, 16  ;;  %v18037_v16 = vsel %vm13978_vm13, %v16803_v23, %v16817_v46  ;;  %v18038_v51 = vsel %vm13978_vm13, %v16801_v30, %v16764_v62  ;;  %v18039_v3 = vsel %vm13978_vm13, %v16806_v50, %v16784_v15 }
 0x4c0   : > { %v11782_v59 = vcombine.low %v18038_v51, %v18037_v16  ;;  %v11783_v28 = vcombine.low %v18039_v3, %v8311_v55  ;;  %v18040_v38 = vor.u32 %v16811_v57, %v16809_v60  ;;  %v8343_v37 = vor.u32 %v16870_v53, %v16865_v13 }
 0x4c1   : > { %v8335_v23 = vsel %vm13978_vm13, %v8330_v4, %v16863_v27  ;;  %v8356_v62 = vshll.u32 %v16488_v39, 16  ;;  %v8385_v30 = vshrl.u32 %v8084_v14, 16  ;;  %v8388_v46 = vshll.u32 %v8084_v14, 16  ;;  %v8087_v4 = vld [vmem:[#allocation3 + $0xa8] sm:$0xf] }
 0x4c2   : > { %v8320_v44 = vrot.slane %v18040_v38, 4  ;;  %v8363_v16 = vrot.slane %v8361_v58, 4  ;;  %v8366_v51 = vrot.slane %v8364_v45, 5  ;;  %v8372_v5 = vrot.slane %v8370_v56, 5 }
 0x4c3   : > { %v8376_v15 = vrot.slane %v8374_v49, 4  ;;  %v8354_v50 = vrot.slane %v8353_v24, 4  ;;  %v8396_v60 = vrot.slane %v8394_v21, 5  ;;  %v8400_v57 = vrot.slane %v8398_v1, 4  ;;  %v8090_v24 = vld [vmem:[#allocation3 + $0xb4] sm:$0xf] }
 0x4c4   : > { %12837 = vmatmul.mubr.msk.bf16.gmra.mrb[28].mxu1 %vm6730_vm9, %v11782_v59  ;;  %v8325_v13 = vsel %vm13978_vm13, %v8320_v44, %v16825_v43  ;;  %v8344_v27 = vrot.slane %v8343_v37, 4  ;;  %v8358_v39 = vrot.slane %v8356_v62, 5  ;;  %v8387_v55 = vrot.slane %v8385_v30, 4 }
 0x4c5   : > { %12840 = vmatprep.mubr.msk.bf16.mxu1 %vm6730_vm9, %v11783_v28  ;;  %v11784_v53 = vcombine.low %v8325_v13, %v8335_v23  ;;  %v8390_v14 = vrot.slane %v8388_v46, 5  ;;  %v8367_v58 = vor.u32 %v8366_v51, %v8363_v16  ;;  %v8377_v45 = vor.u32 %v8376_v15, %v8372_v5 }
 0x4c6   : > { %v8418_v56 = vshll.u32 %v16538_v35, 16  ;;  %v8422_v49 = vshrl.u32 %v16538_v35, 16  ;;  %v8359_v21 = vsel %vm13978_vm13, %v8354_v50, %v8358_v39  ;;  %v8401_v1 = vor.u32 %v8400_v57, %v8396_v60 }
 0x4c7   : > { %v8442_v59 = vshll.u32 %v16558_v12, 16  ;;  %v8446_v43 = vshrl.u32 %v16558_v12, 16  ;;  %v8349_v3 = vsel %vm13978_vm13, %v8344_v27, %v17048_v52  ;;  %v8380_v28 = vshll.u32 %v16508_v33, 16 }
 0x4c8   : > { %v8409_v38 = vshrl.u32 %v8087_v4, 16  ;;  %v8412_v44 = vshll.u32 %v8087_v4, 16  ;;  %v8391_v37 = vor.u32 %v8390_v14, %v8387_v55  ;;  %v8404_v35 = vshll.u32 %v16519_v41, 16  ;;  %v8093_v14 = vld [vmem:[#allocation3 + $0xc0] sm:$0xf] }
 0x4c9   : > { %v8433_v23 = vshrl.u32 %v8090_v24, 16  ;;  %v8436_v62 = vshll.u32 %v8090_v24, 16  ;;  %v11785_v30 = vcombine.low %v8349_v3, %v8359_v21  ;;  %v8378_v46 = vrot.slane %v8377_v45, 4 }
 0x4ca   : > { %v8420_v16 = vrot.slane %v8418_v56, 5  ;;  %v8424_v51 = vrot.slane %v8422_v49, 4  ;;  %v8368_v12 = vrot.slane %v8367_v58, 4  ;;  %v8402_v15 = vrot.slane %v8401_v1, 4 }
 0x4cb   : > { %v8444_v50 = vrot.slane %v8442_v59, 5  ;;  %v8448_v57 = vrot.slane %v8446_v43, 4  ;;  %v8382_v33 = vrot.slane %v8380_v28, 5  ;;  %v8411_v52 = vrot.slane %v8409_v38, 4 }
 0x4cc   : > { %12841 = vmatmul.mubr.msk.bf16.gmra.mrb[0].mxu1 %vm6730_vm9, %v11784_v53  ;;  %v8414_v13 = vrot.slane %v8412_v44, 5  ;;  %v8392_v27 = vrot.slane %v8391_v37, 4  ;;  %v8406_v39 = vrot.slane %v8404_v35, 5  ;;  %v8435_v41 = vrot.slane %v8433_v23, 4 }
 0x4cd   : > { %12844 = vmatprep.mubr.msk.bf16.mxu1 %vm6730_vm9, %v11785_v30  ;;  %v8438_v55 = vrot.slane %v8436_v62, 5  ;;  %v8383_v4 = vsel %vm13978_vm13, %v8378_v46, %v8382_v33  ;;  %v8425_v45 = vor.u32 %v8424_v51, %v8420_v16  ;;  %v8466_v53 = vshll.u32 %v16571_v34, 16 }
 0x4ce   : > { %v8470_v58 = vshrl.u32 %v16571_v34, 16  ;;  %v8373_v56 = vsel %vm13978_vm13, %v8368_v12, %v8372_v5  ;;  %v8407_v49 = vsel %vm13978_vm13, %v8402_v15, %v8406_v39  ;;  %v8449_v24 = vor.u32 %v8448_v57, %v8444_v50 }
 0x4cf   : > { %v8415_v21 = vor.u32 %v8414_v13, %v8411_v52  ;;  %v8428_v1 = vshll.u32 %v16547_v40, 16  ;;  %v8457_v59 = vshrl.u32 %v8093_v14, 16  ;;  %v8460_v43 = vshll.u32 %v8093_v14, 16 }
 0x4d0   : > { %v11786_v3 = vcombine.low %v8373_v56, %v8383_v4  ;;  %v8397_v28 = vsel %vm13978_vm13, %v8392_v27, %v8396_v60  ;;  %v8439_v38 = vor.u32 %v8438_v55, %v8435_v41  ;;  %v8452_v44 = vshll.u32 %v16569_v17, 16 }
 0x4d1   : > { %v11787_v34 = vcombine.low %v8397_v28, %v8407_v49  ;;  %v8426_v37 = vrot.slane %v8425_v45, 4  ;;  %v8468_v35 = vrot.slane %v8466_v53, 5  ;;  %v8472_v5 = vrot.slane %v8470_v58, 4  ;;  %v5658_v53 = vld [vmem:[#allocation3 + $0xcc] sm:$0x1]  ;;  %v18068_v58 = vld [vmem:[#allocation23_spill] sm:$0xff] }
 0x4d2   : > { %v8450_v23 = vrot.slane %v8449_v24, 4  ;;  %v8416_v62 = vrot.slane %v8415_v21, 4  ;;  %v8430_v40 = vrot.slane %v8428_v1, 5  ;;  %v8459_v30 = vrot.slane %v8457_v59, 4 }
 0x4d3   : > { %v8462_v46 = vrot.slane %v8460_v43, 5  ;;  %v8440_v51 = vrot.slane %v8439_v38, 4  ;;  %v8454_v12 = vrot.slane %v8452_v44, 5  ;;  %v8473_v15 = vor.u32 %v8472_v5, %v8468_v35  ;;  %v11889_v5 = vld [vmem:[%s17739_s3 + $0x1c] sm:$0xf] }
 0x4d4   : > { %12845 = vmatmul.mubr.msk.bf16.gmra.mrb[4].mxu1 %vm6730_vm9, %v11786_v3  ;;  %v8431_v60 = vsel %vm13978_vm13, %v8426_v37, %v8430_v40  ;;  %v8840_v57 = vrot.slane %v16669_v22, 5  ;;  %v8421_v33 = vsel %vm13978_vm13, %v8416_v62, %v8420_v16  ;;  %v8476_v13 = vshll.u32 %v16583_v42, 16  ;;  %v8774_v22 = vld [vmem:[#allocation3 + $0xc] sm:$0xe]  ;;  %v8775_v3 = vld [vmem:[#allocation3 + $0x18] sm:$0xe] }
 0x4d5   : > { %12848 = vmatprep.mubr.msk.bf16.mxu1 %vm6730_vm9, %v11787_v34  ;;  %v8455_v17 = vsel %vm13978_vm13, %v8450_v23, %v8454_v12  ;;  %v8463_v52 = vor.u32 %v8462_v46, %v8459_v30  ;;  %v11788_v27 = vcombine.low %v8421_v33, %v8431_v60  ;;  %v8445_v39 = vsel %vm13978_vm13, %v8440_v51, %v8444_v50  ;;  %v18043_v23 = vld [vmem:[#allocation17_spill] sm:$0xff]  ;;  %v18044_v62 = vld [vmem:[#allocation19_spill] sm:$0xff]  ;;  %v18046_v30 = vld [vmem:[#allocation20_spill] sm:$0xff] }
 0x4d6   : > { %v11789_v41 = vcombine.low %v8445_v39, %v8455_v17  ;;  %v8474_v55 = vrot.slane %v8473_v15, 4  ;;  %v8842_v14 = vrot.slane %v8840_v57, 4  ;;  %v8478_v45 = vrot.slane %v8476_v13, 5  ;;  %v18047_v46 = vld [vmem:[#allocation4_spill] sm:$0xff]  ;;  %v18050_v12 = vld [vmem:[#allocation18_spill] sm:$0xff]  ;;  %v18053_v17 = vld [vmem:[#allocation7_spill] sm:$0xff] }
 0x4d7   : > { %v8464_v4 = vrot.slane %v8463_v52, 4  ;;  %v8843_v16 = vrot.slane %v16677_v25, 5  ;;  %v5659_v42 = vsel %vm15616_vm5, 0, %v5658_v53  ;;  %v8847_v50 = vrot.slane %v16675_v32, 5  ;;  %v18042_v32 = vld [vmem:[#allocation42_spill] sm:$0xff]  ;;  %v18055_v33 = vld [vmem:[#allocation8_spill] sm:$0xff] }
 0x4d8   : > { %v8479_v56 = vsel %vm13978_vm13, %v8474_v55, %v8478_v45  ;;  %5660 = vst [vmem:[#allocation3 + $0xcc] sm:$0x1] %v5659_v42  ;;  %v11807_v49 = vrot.slane %v8774_v22, 9  ;;  %v8850_v28 = vrot.slane %v18042_v32, 5  ;;  %v11808_v38 = vrot.slane %v8775_v3, 9  ;;  %v18052_v15 = vld [vmem:[#allocation6_spill] sm:$0xff] }
 0x4d9   : > { %v8844_v24 = vsel %vm14396_vm8, %v8842_v14, %v8843_v16  ;;  %v8469_v21 = vsel %vm13978_vm13, %v8464_v4, %v8468_v35  ;;  %v8849_v43 = vrot.slane %v8847_v50, 4  ;;  %v9408_v35 = vsel %vm6779_vm3, %v16901_v11, 0  ;;  %v18049_v11 = vld [vmem:[#allocation21_spill] sm:$0xff]  ;;  %v18059_v39 = vld [vmem:[#allocation11_spill] sm:$0xff]  ;;  %v18061_v55 = vld [vmem:[#allocation12_spill] sm:$0xff] }
 0x4da   : > { %v11790_v1 = vcombine.low %v8469_v21, %v8479_v56  ;;  %v8841_v25 = vsel %vm14396_vm8, %v11807_v49, %v8840_v57  ;;  %v8848_v34 = vsel %vm14396_vm8, %v11808_v38, %v8847_v50  ;;  %v18045_v40 = vcombine.low %v18043_v23, %v18044_v62  ;;  %v18056_v52 = vld [vmem:[#allocation9_spill] sm:$0xff]  ;;  %v18064_v45 = vld [vmem:[#allocation14_spill] sm:$0xff]  ;;  %v18070_v56 = vld [vmem:[#allocation24_spill] sm:$0xff] }
 0x4db   : > { %v11824_v59 = vcombine.low %v8841_v25, %v8844_v24  ;;  %v8851_v44 = vsel %vm14396_vm8, %v8849_v43, %v8850_v28  ;;  %v18048_v51 = vcombine.low %v18046_v30, %v18047_v46  ;;  %v18051_v60 = vcombine.low %v18049_v11, %v18050_v12  ;;  %v18062_v14 = vld [vmem:[#allocation13_spill] sm:$0xff]  ;;  %v18067_v16 = vld [vmem:[#allocation22_spill] sm:$0xff]  ;;  %v18074_v21 = vld [vmem:[#allocation27_spill] sm:$0xff] }
 0x4dc   : > { %12849 = vmatmul.mubr.msk.bf16.gmra.mrb[8].mxu1 %vm6730_vm9, %v11788_v27  ;;  %v11825_v37 = vcombine.low %v8848_v34, %v8851_v44  ;;  %v18054_v57 = vcombine.low %v18052_v15, %v18053_v17  ;;  %v18057_v13 = vcombine.low %v18055_v33, %v18056_v52  ;;  %v18058_v27 = vld [vmem:[#allocation10_spill] sm:$0xff]  ;;  %v18063_v4 = vcombine.low %v18061_v55, %v18062_v14  ;;  %v18065_v22 = vld [vmem:[#allocation5_spill] sm:$0xff]  ;;  %v18076_v25 = vld [vmem:[#allocation28_spill] sm:$0xff] }
 0x4dd   : > { %12852 = vmatprep.mubr.msk.bf16.mxu1 %vm6730_vm9, %v11789_v41  ;;  %v18060_v41 = vcombine.low %v18058_v27, %v18059_v39  ;;  %v18066_v53 = vcombine.low %v18064_v45, %v18065_v22  ;;  %v18069_v42 = vcombine.low %v18067_v16, %v18068_v58  ;;  %v18071_v50 = vld [vmem:[#allocation25_spill] sm:$0xff]  ;;  %v18073_v24 = vld [vmem:[#allocation26_spill] sm:$0xff]  ;;  %v5713_v38 = vld [vmem:[#allocation3 + $0xd4] sm:$0x1]  ;;  %v10134_v30 = vsel %vm6779_vm3, %v11889_v5, 0 }
 0x4de   : > { %v18072_v49 = vcombine.low %v18070_v56, %v18071_v50  ;;  %v18079_v3 = vld [vmem:[#allocation33_spill] sm:$0xff]  ;;  %v18080_v32 = vld [vmem:[#allocation34_spill] sm:$0xff]  ;;  %v5714_v34 = vsel %vm15627_vm7, 0, %v5713_v38  ;;  %v13725_v46 = vld [vmem:[#allocation3 + $0x30] sm:$0xff]  }
 0x4df   : > { %v18081_v28 = vcombine.low %v18079_v3, %v18080_v32  ;;  %5715 = vst [vmem:[#allocation3 + $0xd4] sm:$0x1] %v5714_v34  ;;  %v18084_v23 = vld [vmem:[#allocation37_spill] sm:$0xff]  ;;  %v13727_v12 = vld [vmem:[#allocation3 + $0x48] sm:$0xff]   ;;  %v13731_v17 = vld [vmem:[#allocation3 + $0x78] sm:$0xff]  }
 0x4e0   : > { %v13726_v11 = vld [vmem:[#allocation3 + $0x3c] sm:$0xff]   ;;  %v13730_v15 = vld [vmem:[#allocation3 + $0x6c] sm:$0xff]   ;;  %v9603_v33 = vld [vmem:[#allocation3 + $0x18] sm:$0xf] }
 0x4e1   : > { %v13732_v27 = vld [vmem:[#allocation3 + $0x84] sm:$0xff]   ;;  %v9652_v39 = vshrl.u32 %v9603_v33, 16  ;;  %v13733_v55 = vld [vmem:[#allocation3 + $0x90] sm:$0xff]   ;;  %v17281_v44 = vld [vmem:[#allocation3 + $0x2c] sm:$0x1] }
 0x4e2   : > { %v9606_v14 = vld [vmem:[#allocation3 + $0x24] sm:$0xf]  ;;  %v10405_v19 = vrot.slane %v17281_v44, 5 }
 0x4e3   : > { %v9676_v58 = vshrl.u32 %v9606_v14, 16 }
 0x4e4   : > { %12853 = vmatmul.mubr.msk.bf16.gmra.mrb[12].mxu1 %vm6730_vm9, %v11790_v1  ;;  %v18075_v1 = vcombine.low %v18073_v24, %v18074_v21  ;;  %v9609_v21 = vld [vmem:[#allocation3 + $0x30] sm:$0xf] }
 0x4e5   : > { %12858 = vmatprep.mubr.msk.bf16.mxu1 %vm6730_vm9, %v11824_v59  ;;  %v18077_v59 = vld [vmem:[#allocation29_spill] sm:$0xff]  ;;  %v9678_v3 = vrot.slane %v9676_v58, 4  ;;  %v18086_v58 = vld [vmem:[#allocation51_spill] sm:$0xff] }
 0x4e6   : > { %v18078_v43 = vcombine.low %v18076_v25, %v18077_v59  ;;  %v9713_v25 = vshrl.u32 %v16813_v10, 16  ;;  %v13734_v59 = vld [vmem:[#allocation3 + $0x9c] sm:$0xff]  }
 0x4ec   : > { %12859 = vmatmul.mubr.msk.bf16.vlgmr.msra.gmra.mrb[16].mxu1 %vm6730_vm9, %v11825_v37  ;;  %v13723_v37 = vld [vmem:[#allocation3 + $0x18] sm:$0xff]  }
 0x4ed   : > { %12891 = vmatpush3.bf16.msra.mxu1 %v9408_v35  ;;  %12862 = vmatprep.mubr.msk.bf16.mxu1 %vm6730_vm9, %v18045_v40  ;;  %v18083_v35 = vld [vmem:[#allocation36_spill] sm:$0xff]  ;;  %v13724_v40 = vld [vmem:[#allocation3 + $0x24] sm:$0xff]  }
 0x4ee   : > { %13653 = vmatprep.subr.msk.bf16.mxu1 %vm6779_vm3, %v11889_v5  ;;  %v18085_v62 = vcombine.low %v18083_v35, %v18084_v23  ;;  %v13728_v5 = vld [vmem:[#allocation3 + $0x54] sm:$0xff]   ;;  %v9700_v35 = vshrl.u32 %v9609_v21, 16  ;;  %v9703_v23 = vshll.u32 %v9609_v21, 16 }
 0x4f4   : > { %12863 = vmatmul.mubr.msk.bf16.gmra.mrb[20].mxu1 %vm6730_vm9, %v18048_v51  ;;  %v17254_v51 = vld [vmem:[%s17739_s3 + $0x20] sm:$0xf] }
 0x4f5   : > { %12866 = vmatprep.mubr.msk.bf16.mxu1 %vm6730_vm9, %v18051_v60  ;;  %v13729_v60 = vld [vmem:[#allocation3 + $0x60] sm:$0xff]  }
 0x4fc   : > { %12867 = vmatmul.mubr.msk.bf16.gmra.mrb[24].mxu1 %vm6730_vm9, %v18054_v57  ;;  %v17266_v57 = vld [vmem:[#allocation3 + $0x1c] sm:$0xf] }
 0x4fd   : > { %12870 = vmatprep.mubr.msk.bf16.mxu1 %vm6730_vm9, %v18057_v13  ;;  %v9661_v52 = vshll.u32 %v17266_v57, 16  ;;  %v9665_v13 = vshrl.u32 %v17266_v57, 16 }
 0x4ff   : > { %v9663_v45 = vrot.slane %v9661_v52, 5  ;;  %v9667_v22 = vrot.slane %v9665_v13, 4 }
 0x501   : > { %v9668_v24 = vor.u32 %v9667_v22, %v9663_v45  ;;  %v9615_v22 = vld [vmem:[#allocation3 + $0x48] sm:$0xf] }
 0x504   : > { %12871 = vmatmul.mubr.msk.bf16.gmra.mrb[28].mxu1 %vm6730_vm9, %v18060_v41  ;;  %v9655_v41 = vshll.u32 %v9603_v33, 16 }
 0x505   : > { %12874 = vmatprep.mubr.msk.bf16.mxu1 %vm6730_vm9, %v18063_v4  ;;  %v17271_v4 = vld [vmem:[#allocation3 + $0x28] sm:$0xf] }
 0x506   : > { %v9657_v16 = vrot.slane %v9655_v41, 5  ;;  %v9685_v56 = vshll.u32 %v17271_v4, 16  ;;  %v9689_v50 = vshrl.u32 %v17271_v4, 16 }
 0x508   : > { %v17283_v34 = vrot.slane %v9685_v56, 5  ;;  %v18087_v56 = vld [vmem:[#allocation52_spill] sm:$0xff] }
 0x50c   : > { %12875 = vmatmul.mubr.msk.bf16.gmra.mrb[0].mxu1 %vm6730_vm9, %v18066_v53  ;;  %v9654_v53 = vrot.slane %v9652_v39, 4 }
 0x50d   : > { %12878 = vmatprep.mubr.msk.bf16.mxu1 %vm6730_vm9, %v18069_v42  ;;  %v9679_v42 = vshll.u32 %v9606_v14, 16 }
 0x50f   : > { %v9681_v32 = vrot.slane %v9679_v42, 5  ;;  %v9719_v42 = vshll.u32 %v18086_v58, 16 }
 0x514   : > { %12879 = vmatmul.mubr.msk.bf16.gmra.mrb[4].mxu1 %vm6730_vm9, %v18072_v49  ;;  %v17276_v49 = vld [vmem:[#allocation3 + $0x20] sm:$0x1] }
 0x515   : > { %12882 = vmatprep.mubr.msk.bf16.mxu1 %vm6730_vm9, %v18075_v1  ;;  %v9709_v1 = vshll.u32 %v16813_v10, 16  ;;  %v9671_v38 = vshll.u32 %v17276_v49, 16 }
 0x517   : > { %v17287_v10 = vrot.slane %v9709_v1, 5 }
 0x51c   : > { %12883 = vmatmul.mubr.msk.bf16.gmra.mrb[8].mxu1 %vm6730_vm9, %v18078_v43  ;;  %v9658_v43 = vor.u32 %v9657_v16, %v9654_v53  ;;  %v13737_v53 = vld [vmem:[#allocation3 + $0xc0] sm:$0xff]  }
 0x51d   : > { %12886 = vmatprep.mubr.msk.bf16.mxu1 %vm6730_vm9, %v18081_v28  ;;  %v13735_v28 = vld [vmem:[#allocation3 + $0xa8] sm:$0xff]  }
 0x524   : > { %12887 = vmatmul.mubr.msk.bf16.gmra.mrb[12].mxu1 %vm6730_vm9, %v18085_v62  ;;  %v9669_v62 = vrot.slane %v9668_v24, 4  ;;  %v9737_v24 = vshrl.u32 %v18087_v56, 16 }
 0x525   : > { %12892 = vmatprep.mubr.msk.bf16.mxu1 %vm6730_vm9, %v13723_v37  ;;  %v9691_v37 = vrot.slane %v9689_v50, 4  ;;  %v9733_v50 = vshll.u32 %v18087_v56, 16 }
 0x52c   : > { %12893 = vmatmul.mubr.msk.bf16.vlgmr.msra.gmra.mrb[16].mxu1 %vm6730_vm9, %v13724_v40  ;;  %v9715_v40 = vrot.slane %v9713_v25, 4  ;;  %v9761_v25 = vshrl.u32 %v16846_v2, 16 }
 0x52d   : > { %12925 = vmatpush3.bf16.msra.mxu1 %v10134_v30  ;;  %12896 = vmatprep.mubr.msk.bf16.mxu1 %vm6730_vm9, %v13725_v46  ;;  %v9659_v30 = vrot.slane %v9658_v43, 4  ;;  %v9682_v46 = vor.u32 %v9681_v32, %v9678_v3  ;;  %v17308_v43 = vld [vmem:[#allocation3 + $0xd4] sm:$0x1] }
 0x52e   : > { %13654 = vmatprep.subr.msk.bf16.mxu1 %vm6779_vm3, %v17254_v51  ;;  %v9716_v52 = vor.u32 %v9715_v40, %v17287_v10 }
 0x52f   : > { %v9664_v39 = vsel %vm13978_vm13, %v9659_v30, %v9663_v45  ;;  %v17296_v41 = vrot.slane %v9682_v46, 4  ;;  %v9757_v45 = vshll.u32 %v16846_v2, 16  ;;  %v17315_v46 = vrot.slane %v9733_v50, 5  ;;  %v9621_v50 = vld [vmem:[#allocation3 + $0x60] sm:$0xf] }
 0x530   : > { %v9717_v3 = vrot.slane %v9716_v52, 4 }
 0x534   : > { %12897 = vmatmul.mubr.msk.bf16.gmra.mrb[20].mxu1 %vm6730_vm9, %v13726_v11  ;;  %v9695_v11 = vshll.u32 %v17281_v44, 16  ;;  %v18108_v44 = vld [vmem:[#allocation62_spill] sm:$0xff] }
 0x535   : > { %12900 = vmatprep.mubr.msk.bf16.mxu1 %vm6730_vm9, %v13727_v12  ;;  %v9612_v12 = vld [vmem:[#allocation3 + $0x3c] sm:$0xf] }
 0x536   : > { %v9724_v13 = vshrl.u32 %v9612_v12, 16  ;;  %v9727_v14 = vshll.u32 %v9612_v12, 16  ;;  %v9748_v12 = vshrl.u32 %v9615_v22, 16 }
 0x538   : > { %v9726_v32 = vrot.slane %v9724_v13, 4  ;;  %v9721_v13 = vrot.slane %v9719_v42, 5 }
 0x53c   : > { %12901 = vmatmul.mubr.msk.bf16.gmra.mrb[24].mxu1 %vm6730_vm9, %v13728_v5  ;;  %v9673_v5 = vrot.slane %v9671_v38, 5 }
 0x53d   : > { %12904 = vmatprep.mubr.msk.bf16.mxu1 %vm6730_vm9, %v13729_v60  ;;  %v9692_v60 = vor.u32 %v9691_v37, %v17283_v34  ;;  %v10503_v37 = vrot.slane %v17308_v43, 5 }
 0x53e   : > { %v9674_v33 = vsel %vm13978_vm13, %v9669_v62, %v9673_v5  ;;  %v18088_v62 = vld [vmem:[#allocation55_spill] sm:$0xff] }
 0x53f   : > { %v9693_v16 = vrot.slane %v9692_v60, 4  ;;  %v11890_v21 = vcombine.low %v9664_v39, %v9674_v33  ;;  %v9781_v40 = vshll.u32 %v18088_v62, 16  ;;  %v9785_v30 = vshrl.u32 %v18088_v62, 16  ;;  %v13738_v60 = vld [vmem:[#allocation3 + $0xcc] sm:$0xff]  }
 0x540   : > { %v9763_v33 = vrot.slane %v9761_v25, 4  ;;  %v9799_v62 = vshll.u32 %v9621_v50, 16 }
 0x541   : > { %v17327_v58 = vrot.slane %v9781_v40, 5  ;;  %v9787_v56 = vrot.slane %v9785_v30, 4 }
 0x544   : > { %12905 = vmatmul.mubr.msk.bf16.gmra.mrb[28].mxu1 %vm6730_vm9, %v13730_v15  ;;  %v9702_v15 = vrot.slane %v9700_v35, 4  ;;  %v9729_v35 = vrot.slane %v9727_v14, 5 }
 0x545   : > { %12908 = vmatprep.mubr.msk.bf16.mxu1 %vm6730_vm9, %v13731_v17  ;;  %v9705_v17 = vrot.slane %v9703_v23, 5  ;;  %v9618_v23 = vld [vmem:[#allocation3 + $0x54] sm:$0xf] }
 0x546   : > { %v9775_v39 = vshll.u32 %v9618_v23, 16 }
 0x547   : > { %v9706_v1 = vor.u32 %v9705_v17, %v9702_v15  ;;  %v9751_v15 = vshll.u32 %v9615_v22, 16  ;;  %v17317_v17 = vrot.slane %v9757_v45, 5  ;;  %v9722_v45 = vsel %vm13978_vm13, %v9717_v3, %v9721_v13  ;;  %v18089_v3 = vld [vmem:[#allocation57_spill] sm:$0xff] }
 0x54c   : > { %12909 = vmatmul.mubr.msk.bf16.gmra.mrb[0].mxu1 %vm6730_vm9, %v13732_v27  ;;  %v13736_v27 = vld [vmem:[#allocation3 + $0xb4] sm:$0xff]  }
 0x54d   : > { %12912 = vmatprep.mubr.msk.bf16.mxu1 %vm6730_vm9, %v13733_v55  ;;  %v17298_v55 = vrot.slane %v9695_v11, 5  ;;  %v9739_v11 = vrot.slane %v9737_v24, 4  ;;  %v9688_v24 = vsel %vm13978_vm13, %v17296_v41, %v17283_v34  ;;  %v9777_v34 = vrot.slane %v9775_v39, 5 }
 0x54e   : > { %v9796_v41 = vshrl.u32 %v9621_v50, 16  ;;  %v10604_v50 = vsel %vm6779_vm3, %v17254_v51, 0 }
 0x54f   : > { %v9698_v42 = vsel %vm13978_vm13, %v9693_v16, %v17298_v55  ;;  %v9740_v25 = vor.u32 %v9739_v11, %v17315_v46  ;;  %v9788_v16 = vor.u32 %v9787_v56, %v17327_v58  ;;  %v9801_v56 = vrot.slane %v9799_v62, 5 }
 0x550   : > { %v11891_v40 = vcombine.low %v9688_v24, %v9698_v42 }
 0x554   : > { %12913 = vmatmul.mubr.msk.bf16.gmra.mrb[4].mxu1 %vm6730_vm9, %v13734_v59  ;;  %v17306_v59 = vld [vmem:[#allocation3 + $0xd0] sm:$0xf] }
 0x555   : > { %12916 = vmatprep.mubr.msk.bf16.mxu1 %vm6730_vm9, %v13735_v28  ;;  %v10344_v28 = vld [vmem:[#allocation3 + $0xcc] sm:$0xe]  ;;  %v10500_v38 = vrot.slane %v17306_v59, 5 }
 0x556   : > { %v11937_v2 = vrot.slane %v10344_v28, 9  ;;  %v9750_v28 = vrot.slane %v9748_v12, 4  ;;  %v18091_v12 = vld [vmem:[#allocation54_spill] sm:$0xff] }
 0x557   : > { %v10502_v5 = vrot.slane %v10500_v38, 4 }
 0x558   : > { %v17321_v52 = vsel %vm14396_vm8, %v11937_v2, %v10500_v38  ;;  %v9753_v38 = vrot.slane %v9751_v15, 5  ;;  %v18090_v2 = vld [vmem:[#allocation53_spill] sm:$0xff] }
 0x559   : > { %v17325_v14 = vsel %vm14396_vm8, %v10502_v5, %v10503_v37  ;;  %v9764_v37 = vor.u32 %v9763_v33, %v17317_v17  ;;  %v9743_v11 = vshll.u32 %v18090_v2, 16  ;;  %v18092_v33 = vld [vmem:[#allocation56_spill] sm:$0xff] }
 0x55a   : > { %v11954_v22 = vcombine.low %v17321_v52, %v17325_v14  ;;  %v9754_v15 = vor.u32 %v9753_v38, %v9750_v28  ;;  %v9791_v13 = vshll.u32 %v18092_v33, 16  ;;  %v18093_v38 = vld [vmem:[#allocation61_spill] sm:$0xff]  ;;  %v13791_v14 = vld [vmem:[%s13936_s10 + $0x40] sm:$0xff] }
 0x55b   : > { %v9765_v39 = vrot.slane %v9764_v37, 4  ;;  %v9829_v37 = vshll.u32 %v18093_v38, 16 }
 0x55c   : > { %12917 = vmatmul.mubr.msk.bf16.gmra.mrb[8].mxu1 %vm6730_vm9, %v13736_v27  ;;  %v9772_v27 = vshrl.u32 %v9618_v23, 16  ;;  %v9793_v51 = vrot.slane %v9791_v13, 5  ;;  %v9755_v62 = vrot.slane %v9754_v15, 4  ;;  %v18095_v13 = vld [vmem:[#allocation64_spill] sm:$0xff] }
 0x55d   : > { %12920 = vmatprep.mubr.msk.bf16.mxu1 %vm6730_vm9, %v13737_v53  ;;  %v9707_v53 = vrot.slane %v9706_v1, 4  ;;  %v9730_v1 = vor.u32 %v9729_v35, %v9726_v32  ;;  %v9805_v32 = vshll.u32 %v18089_v3, 16  ;;  %v9809_v35 = vshrl.u32 %v18089_v3, 16 }
 0x55e   : > { %v9774_v23 = vrot.slane %v9772_v27, 4  ;;  %v9624_v27 = vld [vmem:[#allocation3 + $0x6c] sm:$0xf]  ;;  %v9789_v3 = vrot.slane %v9788_v16, 4  ;;  %v17379_v15 = vrot.slane %v9829_v37, 5 }
 0x55f   : > { %v9712_v55 = vsel %vm13978_vm13, %v9707_v53, %v17287_v10  ;;  %v9731_v5 = vrot.slane %v9730_v1, 4  ;;  %v9798_v53 = vrot.slane %v9796_v41, 4  ;;  %v17355_v24 = vrot.slane %v9805_v32, 5 }
 0x560   : > { %v11892_v30 = vcombine.low %v9712_v55, %v9722_v45  ;;  %v9778_v10 = vor.u32 %v9777_v34, %v9774_v23  ;;  %v9811_v42 = vrot.slane %v9809_v35, 4  ;;  %v9745_v45 = vrot.slane %v9743_v11, 5  ;;  %v9627_v34 = vld [vmem:[#allocation3 + $0x78] sm:$0xf] }
 0x561   : > { %v9820_v2 = vshrl.u32 %v9624_v27, 16  ;;  %v9823_v1 = vshll.u32 %v9624_v27, 16  ;;  %v9736_v28 = vsel %vm13978_vm13, %v9731_v5, %v17315_v46  ;;  %v9833_v23 = vshrl.u32 %v18093_v38, 16  ;;  %v18094_v11 = vld [vmem:[#allocation60_spill] sm:$0xff] }
 0x562   : > { %v9779_v32 = vrot.slane %v9778_v10, 4  ;;  %v9794_v46 = vsel %vm13978_vm13, %v9789_v3, %v9793_v51  ;;  %v9802_v35 = vor.u32 %v9801_v56, %v9798_v53  ;;  %v9844_v5 = vshrl.u32 %v9627_v34, 16 }
 0x563   : > { %v9835_v33 = vrot.slane %v9833_v23, 4  ;;  %v9853_v27 = vshll.u32 %v18095_v13, 16  ;;  %v9760_v53 = vsel %vm13978_vm13, %v9755_v62, %v17317_v17  ;;  %v9633_v23 = vld [vmem:[#allocation3 + $0x90] sm:$0xf] }
 0x564   : > { %12921 = vmatmul.mubr.msk.bf16.gmra.mrb[12].mxu1 %vm6730_vm9, %v13738_v60  ;;  %v9741_v60 = vrot.slane %v9740_v25, 4  ;;  %v17360_v25 = vld [vmem:[%s17741_s5] sm:$0x3]  ;;  %v9784_v56 = vsel %vm13978_vm13, %v9779_v32, %v17327_v58  ;;  %v9846_v38 = vrot.slane %v9844_v5, 4 }
 0x565   : > { %12926 = vmatprep.mubr.msk.bf16.mxu1 %vm6730_vm9, %v11890_v21  ;;  %v9767_v21 = vshll.u32 %v18091_v12, 16  ;;  %v9815_v12 = vshll.u32 %v18094_v11, 16  ;;  %v11895_v3 = vcombine.low %v9784_v56, %v9794_v46  ;;  %v9836_v17 = vor.u32 %v9835_v33, %v17379_v15 }
 0x566   : > { %v9746_v41 = vsel %vm13978_vm13, %v9741_v60, %v9745_v45  ;;  %v9847_v60 = vshll.u32 %v9627_v34, 16  ;;  %v9855_v34 = vrot.slane %v9853_v27, 5  ;;  %v9901_v11 = vshll.u32 %v16948_v61, 16 }
 0x567   : > { %v9769_v55 = vrot.slane %v9767_v21, 5  ;;  %v9825_v21 = vrot.slane %v9823_v1, 5  ;;  %v11893_v10 = vcombine.low %v9736_v28, %v9746_v41  ;;  %v9817_v45 = vrot.slane %v9815_v12, 5  ;;  %v18096_v1 = vld [vmem:[#allocation66_spill] sm:$0xff] }
 0x568   : > { %v9839_v51 = vshll.u32 %v18096_v1, 16  ;;  %v9849_v37 = vrot.slane %v9847_v60, 5  ;;  %v9905_v12 = vshrl.u32 %v16948_v61, 16 }
 0x569   : > { %v9770_v16 = vsel %vm13978_vm13, %v9765_v39, %v9769_v55  ;;  %v9857_v39 = vshrl.u32 %v18095_v13, 16  ;;  %v9630_v55 = vld [vmem:[#allocation3 + $0x84] sm:$0xf]  ;;  %v9837_v13 = vrot.slane %v9836_v17, 4 }
 0x56a   : > { %v9868_v58 = vshrl.u32 %v9630_v55, 16  ;;  %v9871_v62 = vshll.u32 %v9630_v55, 16  ;;  %v9841_v5 = vrot.slane %v9839_v51, 5  ;;  %v9850_v60 = vor.u32 %v9849_v37, %v9846_v38 }
 0x56b   : > { %v9859_v41 = vrot.slane %v9857_v39, 4  ;;  %v18098_v39 = vld [vmem:[#allocation67_spill] sm:$0xff] }
 0x56c   : > { %12927 = vmatmul.mubr.msk.bf16.vlgmr.msra.gmra.mrb[16].mxu1 %vm6730_vm9, %v11891_v40  ;;  %v9812_v40 = vor.u32 %v9811_v42, %v17355_v24  ;;  %v9803_v42 = vrot.slane %v9802_v35, 4  ;;  %v9892_v35 = vshrl.u32 %v9633_v23, 16  ;;  %v9873_v56 = vrot.slane %v9871_v62, 5  ;;  %v18099_v62 = vld [vmem:[#allocation73_spill] sm:$0xff] }
 0x56d   : > { %12959 = vmatpush3.bf16.msra.mxu1 %v10604_v50  ;;  %12930 = vmatprep.mubr.msk.bf16.mxu1 %vm6730_vm9, %v11892_v30  ;;  %v9822_v30 = vrot.slane %v9820_v2, 4  ;;  %v11894_v50 = vcombine.low %v9760_v53, %v9770_v16  ;;  %v18097_v16 = vld [vmem:[#allocation70_spill] sm:$0xff]  ;;  %v9860_v27 = vor.u32 %v9859_v41, %v9855_v34  ;;  %v9870_v53 = vrot.slane %v9868_v58, 4 }
 0x56e   : > { %13655 = vmatprep.subr.msk.bf16.mxu1 %vm1502_vm0, %v17360_v25  ;;  %v9813_v2 = vrot.slane %v9812_v40, 4  ;;  %v9877_v32 = vshll.u32 %v18097_v16, 16  ;;  %v9881_v46 = vshrl.u32 %v18097_v16, 16  ;;  %v9895_v40 = vshll.u32 %v9633_v23, 16 }
 0x56f   : > { %v9826_v28 = vor.u32 %v9825_v21, %v9822_v30  ;;  %v9808_v30 = vsel %vm13978_vm13, %v9803_v42, %v17355_v24  ;;  %v9894_v61 = vrot.slane %v9892_v35, 4  ;;  %v17405_v23 = vrot.slane %v9901_v11, 5  ;;  %v9636_v42 = vld [vmem:[#allocation3 + $0x9c] sm:$0xf] }
 0x570   : > { %v9818_v21 = vsel %vm13978_vm13, %v9813_v2, %v9817_v45  ;;  %v9883_v55 = vrot.slane %v9881_v46, 4  ;;  %v9897_v1 = vrot.slane %v9895_v40, 5  ;;  %v9907_v24 = vrot.slane %v9905_v12, 4  ;;  %v18100_v40 = vld [vmem:[#allocation77_spill] sm:$0xff] }
 0x571   : > { %v9827_v33 = vrot.slane %v9826_v28, 4  ;;  %v11896_v16 = vcombine.low %v9808_v30, %v9818_v21  ;;  %v9851_v45 = vrot.slane %v9850_v60, 4  ;;  %v9842_v51 = vsel %vm13978_vm13, %v9837_v13, %v9841_v5  ;;  %v9639_v30 = vld [vmem:[#allocation3 + $0xa8] sm:$0xf]  ;;  %v18101_v5 = vld [vmem:[#allocation75_spill] sm:$0xff] }
 0x572   : > { %v9861_v38 = vrot.slane %v9860_v27, 4  ;;  %v9874_v37 = vor.u32 %v9873_v56, %v9870_v53  ;;  %v9916_v17 = vshrl.u32 %v9636_v42, 16  ;;  %v9919_v41 = vshll.u32 %v9636_v42, 16 }
 0x573   : > { %v9832_v2 = vsel %vm13978_vm13, %v9827_v33, %v17379_v15  ;;  %v9898_v46 = vor.u32 %v9897_v1, %v9894_v61  ;;  %v9856_v15 = vsel %vm13978_vm13, %v9851_v45, %v9855_v34  ;;  %v9925_v11 = vshll.u32 %v18100_v40, 16  ;;  %v18102_v33 = vld [vmem:[#allocation78_spill] sm:$0xff] }
 0x574   : > { %12931 = vmatmul.mubr.msk.bf16.gmra.mrb[20].mxu1 %vm6730_vm9, %v11893_v10  ;;  %v9863_v10 = vshll.u32 %v18098_v39, 16  ;;  %v11897_v35 = vcombine.low %v9832_v2, %v9842_v51  ;;  %v9929_v12 = vshrl.u32 %v18100_v40, 16  ;;  %v9911_v60 = vshll.u32 %v18101_v5, 16 }
 0x575   : > { %12934 = vmatprep.mubr.msk.bf16.mxu1 %vm6730_vm9, %v11894_v50  ;;  %v17403_v50 = vrot.slane %v9877_v32, 5  ;;  %v9887_v32 = vshll.u32 %v18099_v62, 16  ;;  %v9949_v13 = vshll.u32 %v18102_v33, 16  ;;  %v9953_v27 = vshrl.u32 %v18102_v33, 16 }
 0x576   : > { %v9865_v58 = vrot.slane %v9863_v10, 5  ;;  %v9875_v39 = vrot.slane %v9874_v37, 4  ;;  %v9918_v53 = vrot.slane %v9916_v17, 4  ;;  %v9921_v56 = vrot.slane %v9919_v41, 5  ;;  %v18103_v41 = vld [vmem:[#allocation80_spill] sm:$0xff] }
 0x577   : > { %v9884_v28 = vor.u32 %v9883_v55, %v17403_v50  ;;  %v9899_v55 = vrot.slane %v9898_v46, 4  ;;  %v9940_v61 = vshrl.u32 %v9639_v30, 16  ;;  %v9943_v1 = vshll.u32 %v9639_v30, 16  ;;  %v9645_v30 = vld [vmem:[#allocation3 + $0xc0] sm:$0xf] }
 0x578   : > { %v9866_v21 = vsel %vm13978_vm13, %v9861_v38, %v9865_v58  ;;  %v9889_v42 = vrot.slane %v9887_v32, 5  ;;  %v9931_v45 = vrot.slane %v9929_v12, 4  ;;  %v9913_v2 = vrot.slane %v9911_v60, 5  ;;  %v9642_v58 = vld [vmem:[#allocation3 + $0xb4] sm:$0xf] }
 0x579   : > { %v9885_v10 = vrot.slane %v9884_v28, 4  ;;  %v17429_v51 = vrot.slane %v9949_v13, 5  ;;  %v9955_v38 = vrot.slane %v9953_v27, 4  ;;  %v9880_v37 = vsel %vm13978_vm13, %v9875_v39, %v17403_v50 }
 0x57a   : > { %v9922_v17 = vor.u32 %v9921_v56, %v9918_v53  ;;  %v9935_v62 = vshll.u32 %v18103_v41, 16  ;;  %v9904_v32 = vsel %vm13978_vm13, %v9899_v55, %v17405_v23  ;;  %v9964_v40 = vshrl.u32 %v9642_v58, 16 }
 0x57b   : > { %v9890_v28 = vsel %vm13978_vm13, %v9885_v10, %v9889_v42  ;;  %v9967_v5 = vshll.u32 %v9642_v58, 16  ;;  %v9997_v60 = vshll.u32 %v17026_v20, 16  ;;  %v9959_v53 = vshll.u32 %v16991_v47, 16 }
 0x57c   : > { %12935 = vmatmul.mubr.msk.bf16.gmra.mrb[24].mxu1 %vm6730_vm9, %v11895_v3  ;;  %v9908_v3 = vor.u32 %v9907_v24, %v17405_v23  ;;  %v11898_v24 = vcombine.low %v9856_v15, %v9866_v21  ;;  %v9956_v21 = vor.u32 %v9955_v38, %v17429_v51  ;;  %v10001_v23 = vshrl.u32 %v17026_v20, 16 }
 0x57d   : > { %12938 = vmatprep.mubr.msk.bf16.mxu1 %vm6730_vm9, %v11896_v16  ;;  %v17426_v16 = vrot.slane %v9925_v11, 5  ;;  %v18104_v11 = vld [vmem:[#allocation84_spill] sm:$0xff]  ;;  %v11899_v33 = vcombine.low %v9880_v37, %v9890_v28  ;;  %v9923_v27 = vrot.slane %v9922_v17, 4  ;;  %v9937_v39 = vrot.slane %v9935_v62, 5 }
 0x57e   : > { %v9909_v34 = vrot.slane %v9908_v3, 4  ;;  %v9942_v3 = vrot.slane %v9940_v61, 4  ;;  %v9973_v50 = vshll.u32 %v18104_v11, 16  ;;  %v9977_v12 = vshrl.u32 %v18104_v11, 16  ;;  %v13781_v11 = vld [vmem:[#allocation3 + $0xbc] sm:$0x1] }
 0x57f   : > { %v9932_v15 = vor.u32 %v9931_v45, %v17426_v16  ;;  %v9988_v56 = vshrl.u32 %v9645_v30, 16  ;;  %v9991_v55 = vshll.u32 %v9645_v30, 16  ;;  %v9957_v45 = vrot.slane %v9956_v21, 4 }
 0x580   : > { %v9914_v46 = vsel %vm13978_vm13, %v9909_v34, %v9913_v2  ;;  %v9648_v34 = vld [vmem:[#allocation3 + $0xcc] sm:$0xf]  ;;  %v9979_v42 = vrot.slane %v9977_v12, 4  ;;  %v9969_v2 = vrot.slane %v9967_v5, 5  ;;  %v9999_v38 = vrot.slane %v9997_v60, 5 }
 0x581   : > { %v11900_v13 = vcombine.low %v9904_v32, %v9914_v46  ;;  %v9933_v61 = vrot.slane %v9932_v15, 4  ;;  %v10003_v20 = vrot.slane %v10001_v23, 4  ;;  %v10012_v58 = vshrl.u32 %v9648_v34, 16 }
 0x582   : > { %v10015_v37 = vshll.u32 %v9648_v34, 16  ;;  %v10021_v28 = vshll.u32 %v17306_v59, 16  ;;  %v10025_v47 = vshrl.u32 %v17306_v59, 16  ;;  %v9961_v41 = vrot.slane %v9959_v53, 5 }
 0x583   : > { %v9990_v62 = vrot.slane %v9988_v56, 4  ;;  %v9993_v32 = vrot.slane %v9991_v55, 5  ;;  %v9928_v46 = vsel %vm13978_vm13, %v9923_v27, %v17426_v16  ;;  %v10004_v12 = vor.u32 %v10003_v20, %v9999_v38 }
 0x584   : > { %12939 = vmatmul.mubr.msk.bf16.gmra.mrb[28].mxu1 %vm6730_vm9, %v11897_v35  ;;  %v9945_v35 = vrot.slane %v9943_v1, 5  ;;  %v9966_v1 = vrot.slane %v9964_v40, 4  ;;  %v9962_v15 = vsel %vm13978_vm13, %v9957_v45, %v9961_v41  ;;  %v10014_v59 = vrot.slane %v10012_v58, 4 }
 0x585   : > { %12942 = vmatprep.mubr.msk.bf16.mxu1 %vm6730_vm9, %v11898_v24  ;;  %v9975_v24 = vrot.slane %v9973_v50, 5  ;;  %v9983_v50 = vshll.u32 %v13781_v11, 16  ;;  %v10017_v30 = vrot.slane %v10015_v37, 5  ;;  %v10023_v21 = vrot.slane %v10021_v28, 5 }
 0x586   : > { %v9946_v10 = vor.u32 %v9945_v35, %v9942_v3  ;;  %v9938_v3 = vsel %vm13978_vm13, %v9933_v61, %v9937_v39  ;;  %v9970_v40 = vor.u32 %v9969_v2, %v9966_v1  ;;  %v10027_v5 = vrot.slane %v10025_v47, 4 }
 0x587   : > { %v9980_v35 = vor.u32 %v9979_v42, %v9975_v24  ;;  %v11901_v60 = vcombine.low %v9928_v46, %v9938_v3  ;;  %v9994_v23 = vor.u32 %v9993_v32, %v9990_v62  ;;  %v10005_v53 = vrot.slane %v10004_v12, 4 }
 0x588   : > { %v9947_v17 = vrot.slane %v9946_v10, 4  ;;  %v9985_v10 = vrot.slane %v9983_v50, 5  ;;  %v9971_v56 = vrot.slane %v9970_v40, 4  ;;  %v10018_v55 = vor.u32 %v10017_v30, %v10014_v59  ;;  %v10330_v50 = vld [vmem:[#allocation3 + $0x24] sm:$0xe] }
 0x589   : > { %v9981_v39 = vrot.slane %v9980_v35, 4  ;;  %v10028_v34 = vor.u32 %v10027_v5, %v10023_v21  ;;  %v10031_v61 = vshll.u32 %v17308_v43, 16  ;;  %v9995_v1 = vrot.slane %v9994_v23, 4  ;;  %v18106_v5 = vld [vmem:[#allocation59_spill] sm:$0xff] }
 0x58a   : > { %v9952_v16 = vsel %vm13978_vm13, %v9947_v17, %v17429_v51  ;;  %v10395_v2 = vrot.slane %v17266_v57, 5  ;;  %v9976_v20 = vsel %vm13978_vm13, %v9971_v56, %v9975_v24  ;;  %v10019_v58 = vrot.slane %v10018_v55, 4  ;;  %v10329_v24 = vld [vmem:[#allocation3 + $0x18] sm:$0xe]  ;;  %v18120_v55 = vld [vmem:[#allocation74_spill] sm:$0xff] }
 0x58b   : > { %v11902_v27 = vcombine.low %v9952_v16, %v9962_v15  ;;  %v9986_v51 = vsel %vm13978_vm13, %v9981_v39, %v9985_v10  ;;  %v10029_v37 = vrot.slane %v10028_v34, 4  ;;  %v10033_v28 = vrot.slane %v10031_v61, 5  ;;  %v18109_v16 = vld [vmem:[#allocation65_spill] sm:$0xff]  ;;  %v18117_v10 = vld [vmem:[#allocation72_spill] sm:$0xff]  ;;  %v18121_v34 = vld [vmem:[#allocation79_spill] sm:$0xff] }
 0x58c   : > { %12943 = vmatmul.mubr.msk.bf16.gmra.mrb[0].mxu1 %vm6730_vm9, %v11899_v33  ;;  %v13782_v33 = vld [vmem:[#allocation3 + $0xc8] sm:$0x1]  ;;  %v11903_v47 = vcombine.low %v9976_v20, %v9986_v51  ;;  %v10000_v43 = vsel %vm13978_vm13, %v9995_v1, %v9999_v38  ;;  %v10397_v41 = vrot.slane %v10395_v2, 4  ;;  %v10024_v62 = vsel %vm13978_vm13, %v10019_v58, %v10023_v21  ;;  %v18123_v1 = vld [vmem:[#allocation81_spill] sm:$0xff] }
 0x58d   : > { %12946 = vmatprep.mubr.msk.bf16.mxu1 %vm6730_vm9, %v11900_v13  ;;  %v10007_v13 = vshll.u32 %v13782_v33, 16  ;;  %v10034_v57 = vsel %vm13978_vm13, %v10029_v37, %v10033_v28  ;;  %v10398_v32 = vrot.slane %v17276_v49, 5  ;;  %v10402_v46 = vrot.slane %v17271_v4, 5  ;;  %v18105_v21 = vld [vmem:[#allocation58_spill] sm:$0xff]  ;;  %v18112_v33 = vld [vmem:[#allocation68_spill] sm:$0xff] }
 0x58e   : > { %v11905_v3 = vcombine.low %v10024_v62, %v10034_v57  ;;  %v11922_v35 = vrot.slane %v10329_v24, 9  ;;  %v11923_v49 = vrot.slane %v10330_v50, 9  ;;  %v10895_v30 = vsel %vm1502_vm0, %v17360_v25, 0  ;;  %v18114_v25 = vld [vmem:[#allocation69_spill] sm:$0xff]  ;;  %v13796_v62 = vld [vmem:[%s13936_s10 + $0x68] sm:$0xff]  ;;  %v13797_v24 = vld [vmem:[%s13936_s10 + $0x70] sm:$0xff] }
 0x58f   : > { %v10009_v42 = vrot.slane %v10007_v13, 5  ;;  %v10399_v38 = vsel %vm14396_vm8, %v10397_v41, %v10398_v32  ;;  %v10404_v11 = vrot.slane %v10402_v46, 4  ;;  %v18110_v23 = vcombine.low %v18108_v44, %v18109_v16  ;;  %v13795_v41 = vld [vmem:[%s13936_s10 + $0x60] sm:$0xff]  ;;  %v13798_v32 = vld [vmem:[%s13936_s10 + $0x78] sm:$0xff] }
 0x590   : > { %v10396_v15 = vsel %vm14396_vm8, %v11922_v35, %v10395_v2  ;;  %v10403_v12 = vsel %vm14396_vm8, %v11923_v49, %v10402_v46  ;;  %v18113_v13 = vcombine.low %v18111_v63, %v18112_v33  ;;  %v18122_v61 = vcombine.low %v18120_v55, %v18121_v34  ;;  %v18127_v2 = vld [vmem:[#allocation85_spill] sm:$0xff]  ;;  %v13800_v35 = vld [vmem:[%s13936_s10 + $0x88] sm:$0xff]  ;;  %v13803_v50 = vld [vmem:[%s13936_s10 + $0xa0] sm:$0xff] }
 0x591   : > { %v10010_v45 = vsel %vm13978_vm13, %v10005_v53, %v10009_v42  ;;  %v11939_v40 = vcombine.low %v10396_v15, %v10399_v38  ;;  %v10406_v4 = vsel %vm14396_vm8, %v10404_v11, %v10405_v19  ;;  %v18118_v53 = vld [vmem:[#allocation76_spill] sm:$0xff]  ;;  %v18124_v42 = vld [vmem:[#allocation82_spill] sm:$0xff]  ;;  %v18129_v58 = vcombine.low %v17022_v48, %v17030_v36  ;;  %v13804_v19 = vld [vmem:[%s13936_s10 + $0xa8] sm:$0xff] }
 0x592   : > { %v11904_v17 = vcombine.low %v10000_v43, %v10010_v45  ;;  %v11940_v59 = vcombine.low %v10403_v12, %v10406_v4  ;;  %v18119_v56 = vcombine.low %v18117_v10, %v18118_v53  ;;  %v18125_v51 = vcombine.low %v18123_v1, %v18124_v42  ;;  %v18126_v45 = vld [vmem:[#allocation83_spill] sm:$0xff]  ;;  %v13783_v36 = vld [vmem:[%s13936_s10] sm:$0xff]  ;;  %v13794_v43 = vld [vmem:[%s13936_s10 + $0x58] sm:$0xff] }
 0x593   : > { %v18128_v20 = vcombine.low %v18126_v45, %v18127_v2  ;;  %v18130_v37 = vcombine.low %v17052_v9, %v17056_v54  ;;  %v18131_v48 = vcombine.low %v17086_v29, %v17090_v0  ;;  %v434_v7 = vpack.c.bf16 %v13784_v18, %v13783_v36  ;;  %v13785_v9 = vld [vmem:[%s13936_s10 + $0x10] sm:$0xff]  ;;  %v13790_v0 = vld [vmem:[%s13936_s10 + $0x38] sm:$0xff]  ;;  %v13812_v63 = vld [vmem:[%s13936_s10 + $0xe8] sm:$0xff] }
 0x594   : > { %12947 = vmatmul.mubr.msk.bf16.gmra.mrb[4].mxu1 %vm6730_vm9, %v11901_v60  ;;  %v18107_v60 = vcombine.low %v18105_v21, %v18106_v5  ;;  %v13789_v29 = vld [vmem:[%s13936_s10 + $0x30] sm:$0xff]  ;;  %v440_v57 = vpack.c.bf16 %v13796_v62, %v13795_v41  ;;  %v441_v46 = vpack.c.bf16 %v13798_v32, %v13797_v24  ;;  %v444_v49 = vpack.c.bf16 %v13804_v19, %v13803_v50  ;;  %v13806_v12 = vld [vmem:[%s13936_s10 + $0xb8] sm:$0xff]  ;;  %v13808_v21 = vld [vmem:[%s13936_s10 + $0xc8] sm:$0xff] }
 0x595   : > { %12950 = vmatprep.mubr.msk.bf16.mxu1 %vm6730_vm9, %v11902_v27  ;;  %v18115_v27 = vld [vmem:[#allocation71_spill] sm:$0xff]  ;;  %v437_v52 = vpack.c.bf16 %v13790_v0, %v13789_v29  ;;  %v13801_v15 = vld [vmem:[%s13936_s10 + $0x90] sm:$0xff]  ;;  %v13810_v44 = vld [vmem:[%s13936_s10 + $0xd8] sm:$0xff] }
 0x596   : > { %v18116_v39 = vcombine.low %v18114_v25, %v18115_v27  ;;  %v13805_v4 = vld [vmem:[%s13936_s10 + $0xb0] sm:$0xff]  ;;  %v13814_v25 = vld [vmem:[%s13936_s10 + $0xf8] sm:$0xff]  ;;  %v17614_v34 = vld [vmem:[%s17742_s6] ss:$0 sm:$0xff] }
 0x597   : > { %v18132_v10 = vld [vmem:[#allocation32_spill] sm:$0xff]  ;;  %v18135_v42 = vld [vmem:[#allocation31_spill] sm:$0xff]  ;;  %v18136_v18 = vld [vmem:[#allocation38_spill] sm:$0xff] }
 0x598   : > { %v18138_v0 = vld [vmem:[#allocation40_spill] sm:$0xff] }
 0x59c   : > { %12951 = vmatmul.mubr.msk.bf16.gmra.mrb[8].mxu1 %vm6730_vm9, %v11903_v47  ;;  %v13793_v47 = vld [vmem:[%s13936_s10 + $0x50] sm:$0xff] }
 0x59d   : > { %12954 = vmatprep.mubr.msk.bf16.mxu1 %vm6730_vm9, %v11904_v17  ;;  %v439_v17 = vpack.c.bf16 %v13794_v43, %v13793_v47 }
 0x5a4   : > { %12955 = vmatmul.mubr.msk.bf16.gmra.mrb[12].mxu1 %vm6730_vm9, %v11905_v3  ;;  %v13799_v3 = vld [vmem:[%s13936_s10 + $0x80] sm:$0xff] }
 0x5a5   : > { %12960 = vmatprep.mubr.msk.bf16.mxu1 %vm6730_vm9, %v11939_v40  ;;  %v442_v38 = vpack.c.bf16 %v13800_v35, %v13799_v3  ;;  %v13802_v40 = vld [vmem:[%s13936_s10 + $0x98] sm:$0xff] }
 0x5a6   : > { %v443_v11 = vpack.c.bf16 %v13802_v40, %v13801_v15  ;;  %v18140_v15 = vld [vmem:[#allocation43_spill] sm:$0xff] }
 0x5ac   : > { %12961 = vmatmul.mubr.msk.bf16.vlgmr.msra.gmra.mrb[16].mxu1 %vm6730_vm9, %v11940_v59  ;;  %v445_v59 = vpack.c.bf16 %v13806_v12, %v13805_v4 }
 0x5ad   : > { %12993 = vmatpush3.bf16.msra.mxu1 %v10895_v30  ;;  %12964 = vmatprep.mubr.msk.bf16.mxu1 %vm6730_vm9, %v18107_v60  ;;  %v13807_v30 = vld [vmem:[%s13936_s10 + $0xc0] sm:$0xff]  ;;  %v13809_v60 = vld [vmem:[%s13936_s10 + $0xd0] sm:$0xff] }
 0x5ae   : > { %v446_v5 = vpack.c.bf16 %v13808_v21, %v13807_v30  ;;  %v447_v16 = vpack.c.bf16 %v13810_v44, %v13809_v60  ;;  %v18142_v30 = vld [vmem:[#allocation45_spill] sm:$0xff]  ;;  %v18143_v60 = vld [vmem:[#allocation46_spill] sm:$0xff] }
 0x5b4   : > { %12965 = vmatmul.mubr.msk.bf16.gmra.mrb[20].mxu1 %vm6730_vm9, %v18110_v23  ;;  %v13811_v23 = vld [vmem:[%s13936_s10 + $0xe0] sm:$0xff] }
 0x5b5   : > { %12968 = vmatprep.mubr.msk.bf16.mxu1 %vm6730_vm9, %v18113_v13  ;;  %v448_v33 = vpack.c.bf16 %v13812_v63, %v13811_v23  ;;  %v13813_v13 = vld [vmem:[%s13936_s10 + $0xf0] sm:$0xff] }
 0x5b6   : > { %v449_v27 = vpack.c.bf16 %v13814_v25, %v13813_v13 }
 0x5bc   : > { %12969 = vmatmul.mubr.msk.bf16.gmra.mrb[24].mxu1 %vm6730_vm9, %v18116_v39  ;;  %v17605_v39 = vld [vmem:[%s17740_s4] ss:$0 sm:$0xff] }
 0x5bd   : > { %12972 = vmatprep.mubr.msk.bf16.mxu1 %vm6730_vm9, %v18119_v56  ;;  %v13034_v53 = vadd.f32 %v18132_v10, %v17605_v39  ;;  %v18133_v56 = vld [vmem:[#allocation35_spill] sm:$0xff]  ;;  %v13052_v40 = vadd.f32 %v18140_v15, %v17605_v39  ;;  %v13058_v21 = vadd.f32 %v18142_v30, %v17605_v39  ;;  %v13061_v44 = vadd.f32 %v17605_v39, %v18143_v60 }
 0x5be   : > { %v13037_v55 = vadd.f32 %v17605_v39, %v18133_v56 }
 0x5bf   : > { %v13053_v23 = vadd.f32 %v13052_v40, %v17614_v34  ;;  %v13062_v56 = vadd.f32 %v13061_v44, %v17614_v34 }
 0x5c0   : > { %v13038_v36 = vadd.f32 %v13037_v55, %v17614_v34  ;;  %v18144_v55 = vld [vmem:[#allocation47_spill] sm:$0xff] }
 0x5c4   : > { %12973 = vmatmul.mubr.msk.bf16.gmra.mrb[28].mxu1 %vm6730_vm9, %v18122_v61  ;;  %v18134_v61 = vld [vmem:[#allocation30_spill] sm:$0xff] }
 0x5c5   : > { %12976 = vmatprep.mubr.msk.bf16.mxu1 %vm6730_vm9, %v18125_v51  ;;  %v13028_v1 = vadd.f32 %v18134_v61, %v17605_v39  ;;  %v13031_v51 = vadd.f32 %v17605_v39, %v18135_v42  ;;  %v13064_v61 = vadd.f32 %v18144_v55, %v17605_v39 }
 0x5cc   : > { %12977 = vmatmul.mubr.msk.bf16.gmra.mrb[0].mxu1 %vm6730_vm9, %v18128_v20 }
 0x5cd   : > { %12980 = vmatprep.mubr.msk.bf16.mxu1 %vm6730_vm9, %v18129_v58  ;;  %v13035_v58 = vadd.f32 %v13034_v53, %v17614_v34 }
 0x5d4   : > { %12981 = vmatmul.mubr.msk.bf16.gmra.mrb[4].mxu1 %vm6730_vm9, %v11950_v6  ;;  %v13786_v6 = vld [vmem:[%s13936_s10 + $0x18] sm:$0xff] }
 0x5d5   : > { %12984 = vmatprep.mubr.msk.bf16.mxu1 %vm6730_vm9, %v18130_v37  ;;  %v435_v54 = vpack.c.bf16 %v13786_v6, %v13785_v9 }
 0x5dc   : > { %12985 = vmatmul.mubr.msk.bf16.gmra.mrb[8].mxu1 %vm6730_vm9, %v11952_v26  ;;  %v436_v26 = vpack.c.bf16 %v13788_v8, %v13787_v31  ;;  %v18137_v31 = vld [vmem:[#allocation39_spill] sm:$0xff] }
 0x5dd   : > { %12988 = vmatprep.mubr.msk.bf16.mxu1 %vm6730_vm9, %v18131_v48  ;;  %v13043_v8 = vadd.f32 %v17605_v39, %v18137_v31 }
 0x5e4   : > { %12989 = vmatmul.mubr.msk.bf16.gmra.mrb[12].mxu1 %vm6730_vm9, %v11954_v22  ;;  %v13792_v22 = vld [vmem:[%s13936_s10 + $0x48] sm:$0xff] }
 0x5e5   : > { %12994 = vmatprep.mubr.msk.bf16.mxu1 %vm1453_vm14, %v434_v7  ;;  %v438_v28 = vpack.c.bf16 %v13792_v22, %v13791_v14  ;;  %v13040_v7 = vadd.f32 %v18136_v18, %v17605_v39  ;;  %v18147_v18 = vld [vmem:[#allocation50_spill] sm:$0xff] }
 0x5e7   : > { %v13041_v41 = vadd.f32 %v13040_v7, %v17614_v34  ;;  %v13073_v7 = vadd.f32 %v17605_v39, %v18147_v18 }
 0x5ec   : > { %12995 = vmatmul.mubr.msk.bf16.vlgmr.msra.gmra.mrb[16].mxu1 %vm1453_vm14, %v435_v54 }
 0x5ed   : > { %12998 = vmatprep.mubr.msk.bf16.mxu1 %vm1453_vm14, %v436_v26 }
 0x5f4   : > { %12999 = vmatmul.mubr.msk.bf16.gmra.mrb[20].mxu1 %vm1453_vm14, %v437_v52  ;;  %v13046_v52 = vadd.f32 %v18138_v0, %v17605_v39 }
 0x5f5   : > { %13002 = vmatprep.mubr.msk.bf16.mxu1 %vm1453_vm14, %v438_v28  ;;  %v18139_v28 = vld [vmem:[#allocation41_spill] sm:$0xff] }
 0x5f6   : > { %v13049_v47 = vadd.f32 %v17605_v39, %v18139_v28 }
 0x5fc   : > { %13003 = vmatmul.mubr.msk.bf16.gmra.mrb[24].mxu1 %vm1453_vm14, %v439_v17 }
 0x5fd   : > { %13006 = vmatprep.mubr.msk.bf16.mxu1 %vm1453_vm14, %v440_v57  ;;  %v13044_v57 = vadd.f32 %v13043_v8, %v17614_v34 }
 0x604   : > { %13007 = vmatmul.mubr.msk.bf16.gmra.mrb[28].mxu1 %vm1453_vm14, %v441_v46  ;;  %v13047_v46 = vadd.f32 %v13046_v52, %v17614_v34 }
 0x605   : > { %13010 = vmatprep.mubr.msk.bf16.mxu1 %vm1453_vm14, %v442_v38  ;;  %v13050_v38 = vadd.f32 %v13049_v47, %v17614_v34 }
 0x60c   : > { %13011 = vmatmul.mubr.msk.bf16.gmra.mrb[0].mxu1 %vm1453_vm14, %v443_v11 }
 0x60d   : > { %13014 = vmatprep.mubr.msk.bf16.mxu1 %vm1453_vm14, %v444_v49  ;;  %v18141_v49 = vld [vmem:[#allocation44_spill] sm:$0xff] }
 0x60e   : > { %v13055_v4 = vadd.f32 %v17605_v39, %v18141_v49 }
 0x614   : > { %13015 = vmatmul.mubr.msk.bf16.gmra.mrb[4].mxu1 %vm1453_vm14, %v445_v59 }
 0x615   : > { %13018 = vmatprep.mubr.msk.bf16.mxu1 %vm1453_vm14, %v446_v5 }
 0x61c   : > { %13019 = vmatmul.mubr.msk.bf16.gmra.mrb[8].mxu1 %vm1453_vm14, %v447_v16 }
 0x61d   : > { %13022 = vmatprep.mubr.msk.bf16.mxu1 %vm1453_vm14, %v448_v33  ;;  %v13056_v33 = vadd.f32 %v13055_v4, %v17614_v34 }
 0x624   : > { %13023 = vmatmul.mubr.msk.bf16.gmra.mrb[12].mxu1 %vm1453_vm14, %v449_v27  ;;  %v13059_v27 = vadd.f32 %v13058_v21, %v17614_v34 }
 0x6bf   : > { %v12996_v45 = vpop.f32.mrb[16].mxu1 }
 0x6c0   : > { %v13029_v2 = vadd.f32 %v13028_v1, %v12996_v45  ;;  %v10931_v20 = vpop.f32.mrb[17].mxu1  ;;  %v18145_v45 = vld [vmem:[#allocation48_spill] sm:$0xff] }
 0x6c1   : > { %v13032_v37 = vadd.f32 %v13031_v51, %v10931_v20  ;;  %v12997_v48 = vpop.f32.mrb[18].mxu1 }
 0x6c2   : > { %v13030_v9 = vadd.f32 %v13029_v2, %v17614_v34  ;;  %v13036_v6 = vadd.f32 %v13035_v58, %v12997_v48  ;;  %v10934_v54 = vpop.f32.mrb[19].mxu1  ;;  %v13067_v2 = vadd.f32 %v17605_v39, %v18145_v45 }
 0x6c3   : > { %v13033_v26 = vadd.f32 %v13032_v37, %v17614_v34  ;;  %v13039_v29 = vadd.f32 %v13038_v36, %v10934_v54  ;;  %v18146_v37 = vld [vmem:[#allocation49_spill] sm:$0xff] }
 0x6c4   : > { %v11092_v14 = vmax.f32 %v13030_v9, 0.0  ;;  %v11093_v22 = vmax.f32 %v13036_v6, 0.0  ;;  %v13070_v48 = vadd.f32 %v18146_v37, %v17605_v39  ;;  %v13065_v6 = vadd.f32 %v13064_v61, %v17614_v34 }
 0x6c5   : > { %v11090_v43 = vmax.f32 %v13033_v26, 0.0  ;;  %v11091_v17 = vmax.f32 %v13039_v29, 0.0  ;;  %v13068_v31 = vadd.f32 %v13067_v2, %v17614_v34 }
 0x6c6   : > { %11124 = vst.msk [vmem:[%s17632_s20 + $0x10] sm:$0xff] %vm6730_vm9, %v11092_v14  ;;  %11125 = vst.msk [vmem:[%s17632_s20 + $0x18] sm:$0xff] %vm6730_vm9, %v11093_v22  ;;  %v13071_v29 = vadd.f32 %v13070_v48, %v17614_v34  ;;  %v13074_v14 = vadd.f32 %v13073_v7, %v17614_v34 }
 0x6c7   : > { %11122 = vst.msk [vmem:[%s17632_s20] sm:$0xff] %vm6730_vm9, %v11090_v43  ;;  %11123 = vst.msk [vmem:[%s17632_s20 + $0x8] sm:$0xff] %vm6730_vm9, %v11091_v17  ;;  %v13000_v62 = vpop.f32.mrb[20].mxu1 }
 0x6c8   : > { %v13042_v24 = vadd.f32 %v13041_v41, %v13000_v62  ;;  %v10947_v32 = vpop.f32.mrb[21].mxu1  ;;  %v13078_v62 = vadd.f32 %v17614_v34, %v17605_v39 }
 0x6c9   : > { %v13045_v3 = vadd.f32 %v13044_v57, %v10947_v32  ;;  %v13001_v35 = vpop.f32.mrb[22].mxu1 }
 0x6ca   : > { %v11096_v11 = vmax.f32 %v13042_v24, 0.0  ;;  %v13048_v50 = vadd.f32 %v13047_v46, %v13001_v35  ;;  %v10950_v19 = vpop.f32.mrb[23].mxu1 }
 0x6cb   : > { %v11094_v12 = vmax.f32 %v13045_v3, 0.0  ;;  %v13051_v59 = vadd.f32 %v13050_v38, %v10950_v19 }
 0x6cc   : > { %11128 = vst.msk [vmem:[%s17632_s20 + $0x30] sm:$0xff] %vm6730_vm9, %v11096_v11  ;;  %v11097_v5 = vmax.f32 %v13048_v50, 0.0 }
 0x6cd   : > { %11126 = vst.msk [vmem:[%s17632_s20 + $0x20] sm:$0xff] %vm6730_vm9, %v11094_v12  ;;  %v11095_v16 = vmax.f32 %v13051_v59, 0.0 }
 0x6ce   : > { %11129 = vst.msk [vmem:[%s17632_s20 + $0x38] sm:$0xff] %vm6730_vm9, %v11097_v5 }
 0x6cf   : > { %11127 = vst.msk [vmem:[%s17632_s20 + $0x28] sm:$0xff] %vm6730_vm9, %v11095_v16  ;;  %v13004_v63 = vpop.f32.mrb[24].mxu1 }
 0x6d0   : > { %v13054_v13 = vadd.f32 %v13053_v23, %v13004_v63  ;;  %v10963_v25 = vpop.f32.mrb[25].mxu1 }
 0x6d1   : > { %v13057_v10 = vadd.f32 %v13056_v33, %v10963_v25  ;;  %v13005_v53 = vpop.f32.mrb[26].mxu1 }
 0x6d2   : > { %v11100_v1 = vmax.f32 %v13054_v13, 0.0  ;;  %v13060_v42 = vadd.f32 %v13059_v27, %v13005_v53  ;;  %v10966_v51 = vpop.f32.mrb[27].mxu1 }
 0x6d3   : > { %v11098_v20 = vmax.f32 %v13057_v10, 0.0  ;;  %v13063_v58 = vadd.f32 %v13062_v56, %v10966_v51 }
 0x6d4   : > { %11132 = vst.msk [vmem:[%s17632_s20 + $0x50] sm:$0xff] %vm6730_vm9, %v11100_v1  ;;  %v11101_v36 = vmax.f32 %v13060_v42, 0.0 }
 0x6d5   : > { %11130 = vst.msk [vmem:[%s17632_s20 + $0x40] sm:$0xff] %vm6730_vm9, %v11098_v20  ;;  %v11099_v9 = vmax.f32 %v13063_v58, 0.0 }
 0x6d6   : > { %11133 = vst.msk [vmem:[%s17632_s20 + $0x58] sm:$0xff] %vm6730_vm9, %v11101_v36 }
 0x6d7   : > { %11131 = vst.msk [vmem:[%s17632_s20 + $0x48] sm:$0xff] %vm6730_vm9, %v11099_v9  ;;  %v13008_v54 = vpop.f32.mrb[28].mxu1 }
 0x6d8   : > { %v13066_v8 = vadd.f32 %v13065_v6, %v13008_v54  ;;  %v10979_v26 = vpop.f32.mrb[29].mxu1 }
 0x6d9   : > { %v13069_v0 = vadd.f32 %v13068_v31, %v10979_v26  ;;  %v13009_v52 = vpop.f32.mrb[30].mxu1 }
 0x6da   : > { %v11104_v22 = vmax.f32 %v13066_v8, 0.0  ;;  %v13072_v28 = vadd.f32 %v13071_v29, %v13009_v52  ;;  %v10982_v47 = vpop.f32.mrb[31].mxu1 }
 0x6db   : > { %v11102_v43 = vmax.f32 %v13069_v0, 0.0  ;;  %v13075_v17 = vadd.f32 %v13074_v14, %v10982_v47 }
 0x6dc   : > { %11136 = vst.msk [vmem:[%s17632_s20 + $0x70] sm:$0xff] %vm6730_vm9, %v11104_v22  ;;  %v11105_v41 = vmax.f32 %v13072_v28, 0.0 }
 0x6dd   : > { %11134 = vst.msk [vmem:[%s17632_s20 + $0x60] sm:$0xff] %vm6730_vm9, %v11102_v43  ;;  %v11103_v57 = vmax.f32 %v13075_v17, 0.0 }
 0x6de   : > { %11137 = vst.msk [vmem:[%s17632_s20 + $0x78] sm:$0xff] %vm6730_vm9, %v11105_v41 }
 0x6df   : > { %11135 = vst.msk [vmem:[%s17632_s20 + $0x68] sm:$0xff] %vm6730_vm9, %v11103_v57  ;;  %v13012_v24 = vpop.f32.mrb[0].mxu1 }
 0x6e0   : > { %v13077_v32 = vadd.f32 %v13078_v62, %v13012_v24  ;;  %v10995_v46 = vpop.f32.mrb[1].mxu1 }
 0x6e1   : > { %v13079_v3 = vadd.f32 %v13078_v62, %v10995_v46  ;;  %v13013_v35 = vpop.f32.mrb[2].mxu1 }
 0x6e2   : > { %v11108_v38 = vmax.f32 %v13077_v32, 0.0  ;;  %v13081_v15 = vadd.f32 %v13078_v62, %v13013_v35  ;;  %v10998_v40 = vpop.f32.mrb[3].mxu1 }
 0x6e3   : > { %v11106_v11 = vmax.f32 %v13079_v3, 0.0  ;;  %v13083_v39 = vadd.f32 %v13078_v62, %v10998_v40 }
 0x6e4   : > { %11140 = vst.msk [vmem:[%s17632_s20 + $0x90] sm:$0xff] %vm6730_vm9, %v11108_v38  ;;  %v11109_v34 = vmax.f32 %v13081_v15, 0.0 }
 0x6e5   : > { %11138 = vst.msk [vmem:[%s17632_s20 + $0x80] sm:$0xff] %vm6730_vm9, %v11106_v11  ;;  %v11107_v50 = vmax.f32 %v13083_v39, 0.0 }
 0x6e6   : > { %11141 = vst.msk [vmem:[%s17632_s20 + $0x98] sm:$0xff] %vm6730_vm9, %v11109_v34 }
 0x6e7   : > { %11139 = vst.msk [vmem:[%s17632_s20 + $0x88] sm:$0xff] %vm6730_vm9, %v11107_v50  ;;  %v13016_v19 = vpop.f32.mrb[4].mxu1 }
 0x6e8   : > { %v13085_v49 = vadd.f32 %v13078_v62, %v13016_v19  ;;  %v11011_v4 = vpop.f32.mrb[5].mxu1 }
 0x6e9   : > { %v13087_v12 = vadd.f32 %v13078_v62, %v11011_v4  ;;  %v13017_v59 = vpop.f32.mrb[6].mxu1 }
 0x6ea   : > { %v11112_v30 = vmax.f32 %v13085_v49, 0.0  ;;  %v13089_v21 = vadd.f32 %v13078_v62, %v13017_v59  ;;  %v11014_v5 = vpop.f32.mrb[7].mxu1 }
 0x6eb   : > { %v11110_v60 = vmax.f32 %v13087_v12, 0.0  ;;  %v13091_v44 = vadd.f32 %v13078_v62, %v11014_v5 }
 0x6ec   : > { %11144 = vst.msk [vmem:[%s17632_s20 + $0xb0] sm:$0xff] %vm6730_vm9, %v11112_v30  ;;  %v11113_v16 = vmax.f32 %v13089_v21, 0.0 }
 0x6ed   : > { %11142 = vst.msk [vmem:[%s17632_s20 + $0xa0] sm:$0xff] %vm6730_vm9, %v11110_v60  ;;  %v11111_v23 = vmax.f32 %v13091_v44, 0.0 }
 0x6ee   : > { %11145 = vst.msk [vmem:[%s17632_s20 + $0xb8] sm:$0xff] %vm6730_vm9, %v11113_v16 }
 0x6ef   : > { %11143 = vst.msk [vmem:[%s17632_s20 + $0xa8] sm:$0xff] %vm6730_vm9, %v11111_v23  ;;  %v13020_v63 = vpop.f32.mrb[8].mxu1 }
 0x6f0   : > { %v13093_v33 = vadd.f32 %v13078_v62, %v13020_v63  ;;  %v11027_v13 = vpop.f32.mrb[9].mxu1 }
 0x6f1   : > { %v13095_v25 = vadd.f32 %v13078_v62, %v11027_v13  ;;  %v13021_v27 = vpop.f32.mrb[10].mxu1 }
 0x6f2   : > { %v11116_v10 = vmax.f32 %v13093_v33, 0.0  ;;  %v13097_v53 = vadd.f32 %v13078_v62, %v13021_v27  ;;  %v11030_v56 = vpop.f32.mrb[11].mxu1 }
 0x6f3   : > { %v11114_v55 = vmax.f32 %v13095_v25, 0.0  ;;  %v13099_v61 = vadd.f32 %v13078_v62, %v11030_v56 }
 0x6f4   : > { %11148 = vst.msk [vmem:[%s17632_s20 + $0xd0] sm:$0xff] %vm6730_vm9, %v11116_v10  ;;  %v11117_v1 = vmax.f32 %v13097_v53, 0.0 }
 0x6f5   : > { %11146 = vst.msk [vmem:[%s17632_s20 + $0xc0] sm:$0xff] %vm6730_vm9, %v11114_v55  ;;  %v11115_v42 = vmax.f32 %v13099_v61, 0.0 }
 0x6f6   : > { %11149 = vst.msk [vmem:[%s17632_s20 + $0xd8] sm:$0xff] %vm6730_vm9, %v11117_v1 }
 0x6f7   : > { %11147 = vst.msk [vmem:[%s17632_s20 + $0xc8] sm:$0xff] %vm6730_vm9, %v11115_v42  ;;  %v13024_v51 = vpop.f32.mrb[12].mxu1 }
 0x6f8   : > { %v13101_v45 = vadd.f32 %v13078_v62, %v13024_v51  ;;  %v11043_v2 = vpop.f32.mrb[13].mxu1 }
 0x6f9   : > { %v13103_v20 = vadd.f32 %v13078_v62, %v11043_v2  ;;  %v13025_v58 = vpop.f32.mrb[14].mxu1 }
 0x6fa   : > { %v11120_v37 = vmax.f32 %v13101_v45, 0.0  ;;  %v13105_v48 = vadd.f32 %v13078_v62, %v13025_v58  ;;  %v11046_v36 = vpop.f32.mrb[15].mxu1 }
 0x6fb   : > { %v11118_v18 = vmax.f32 %v13103_v20, 0.0  ;;  %v13107_v7 = vadd.f32 %v13078_v62, %v11046_v36 }
 0x6fc   : > { %11152 = vst.msk [vmem:[%s17632_s20 + $0xf0] sm:$0xff] %vm6730_vm9, %v11120_v37  ;;  %v11121_v9 = vmax.f32 %v13105_v48, 0.0 }
 0x6fd   : > { %11150 = vst.msk [vmem:[%s17632_s20 + $0xe0] sm:$0xff] %vm6730_vm9, %v11118_v18  ;;  %v11119_v6 = vmax.f32 %v13107_v7, 0.0 }
 0x6fe   : > { %11153 = vst.msk [vmem:[%s17632_s20 + $0xf8] sm:$0xff] %vm6730_vm9, %v11121_v9 }
 0x6ff   : > { %11151 = vst.msk [vmem:[%s17632_s20 + $0xe8] sm:$0xff] %vm6730_vm9, %v11119_v6 }
 0x700 PF: > { %s17_s24 = sadd.s32 1, %s13821_s24  }
 0x701   : > { %p14_p4 = scmp.ge.s32.totalorder %s17_s24, 4  }
 0x703   :  { %16 = sbr.rel (!%p14_p4) target bundleno = 1 (0x1), region = 100 }

</bundles_post_ra>
